<compile_context>
chip_gen: v7x
topology: tpu7x:2x2x1
jax: 0.10.0
libtpu: 0.0.40
codegen_flags: <defaults>
</compile_context>

<pallas_src>
import functools

import jax
import jax.numpy as jnp
import numpy as np
from jax import lax
from jax.experimental import pallas as pl
from jax.experimental.pallas import tpu as pltpu

LEAKY_SLOPE = 0.01   # nn.LeakyReLU default
BN_EPS = 1e-5        # nn.BatchNorm2d default

# Per conv layer: pre-upsample input spatial size, conv (= post-upsample)
# spatial size, input channel count (spatial is always square).
_H_IN = (2, 2, 4, 8, 16, 32)
_H_OUT = (2, 4, 8, 16, 32, 56)
_C_IN = (32, 128, 64, 32, 16, 8)
_BN_CHANNELS = (128, 64, 32, 16, 8)


def _round_up(x, m):
    return ((x + m - 1) // m) * m


# ----------------------------------------------------------------------------
# Pallas kernel: the entire decoder for one batch element.
# ----------------------------------------------------------------------------
def _decoder_kernel(vec_ref, wp_ref, bp_ref, g_ref, l_ref, bias_ref, out_ref):
    # vec_ref  : (1, 1, out_dim)      f32
    # wp_ref   : (out_dim, 2*n_pad)   bf16  merged + permuted + padded linear
    # bp_ref   : (1, 2*n_pad)         f32
    # g_ref    : (6, n_pad, 3*n_pad)  bf16  per-layer N-stacked tap matrices
    # l_ref    : (6, 3, 56, 32)       bf16  per-layer row (H) matrices, 0-padded
    # bias_ref : (6, 1, n_pad)        f32
    # out_ref  : (1, C, 56, 56)       f32
    f32 = jnp.float32
    bf16 = jnp.bfloat16
    n_pad = bias_ref.shape[-1]

    # ---- Linear head: one merged matmul -> (2, n_pad) activation, (H, W*C) layout.
    v = vec_ref[0].astype(bf16)                                       # (1, out_dim)
    r = jnp.dot(v, wp_ref[...], preferred_element_type=f32) + bp_ref[...]
    r0, r1 = r[:, :n_pad], r[:, n_pad:]
    row_id = lax.broadcasted_iota(jnp.int32, (2, n_pad), 0)           # one-time, 4 vregs
    act = jnp.where(row_id == 0,
                    jnp.broadcast_to(r0, (2, n_pad)),
                    jnp.broadcast_to(r1, (2, n_pad)))                 # (2, n_pad) f32

    # ---- 6 x [LeakyReLU -> (nearest-upsample + conv3x3 + folded eval-BN)]
    #      out = sum_dy L_dy @ (x @ G_dy) + bias   (reassociated; G N-stacked)
    for i in range(g_ref.shape[0]):
        h_in, h_out = _H_IN[i], _H_OUT[i]
        x = jnp.where(act >= 0.0, act, LEAKY_SLOPE * act)             # LeakyReLU in f32
        t = jnp.dot(x.astype(bf16), g_ref[i],
                    preferred_element_type=f32)                        # (h_in, 3*n_pad)
        tb = t.astype(bf16)
        acc = bias_ref[i]                                              # (1, n_pad) f32
        for dy in range(3):
            l = l_ref[i, dy][:h_out, :h_in]                            # (h_out, h_in) bf16
            acc = acc + jnp.dot(l, tb[:, dy * n_pad:(dy + 1) * n_pad],
                                preferred_element_type=f32)
        act = acc                                                      # (h_out, n_pad) f32

    # ---- Last layer's columns are already channel-major (folded host-side):
    #      NCHW output via plain static slices (56-lane masked stores are cheap).
    for c in range(out_ref.shape[1]):
        out_ref[0, c] = act[:, c * 56:(c + 1) * 56]


# ----------------------------------------------------------------------------
# Host-side parameter preparation (structured matrices, computed once).
# ----------------------------------------------------------------------------
def _nearest_matrix(n_out, n_in):
    """U[r, s] = 1 iff s == floor(r * n_in / n_out)  (PyTorch 'nearest')."""
    u = np.zeros((n_out, n_in), dtype=np.float32)
    src = (np.arange(n_out) * n_in) // n_out
    u[np.arange(n_out), src] = 1.0
    return u


def _chan_nearest_matrix(w_out, w_in, c):
    """Column-side nearest upsampling for the (H, W*C) layout: (Win*C, Wout*C)."""
    r = np.zeros((w_in * c, w_out * c), dtype=np.float32)
    src = (np.arange(w_out) * w_in) // w_out
    eye = np.eye(c, dtype=np.float32)
    for w in range(w_out):
        r[src[w] * c:(src[w] + 1) * c, w * c:(w + 1) * c] = eye
    return r


def _shift_matrix(h, dy):
    """S_dy[o, i] = 1 iff i == o + dy - 1  (vertical taps of a pad=1 conv)."""
    s = np.zeros((h, h), dtype=np.float32)
    for o in range(h):
        i = o + dy - 1
        if 0 <= i < h:
            s[o, i] = 1.0
    return s


def _conv_col_matrix(w_hwio, width, dy):
    """Block-Toeplitz M_dy: (W*Cin, W*Cout) — horizontal taps + zero padding."""
    c_in, c_out = w_hwio.shape[2], w_hwio.shape[3]
    sel = np.zeros((width, width, 3), dtype=np.float32)
    for w in range(width):
        for dx in range(3):
            wi = w + dx - 1
            if 0 <= wi < width:
                sel[wi, w, dx] = 1.0
    m = np.einsum("awd,dio->aiwo", sel, w_hwio[dy])                   # (W,Cin,W,Cout)
    return m.reshape(width * c_in, width * c_out).astype(np.float32)


def fold_bn(gamma, beta, running_mean, running_var):
    scale = gamma / jnp.sqrt(running_var + BN_EPS)
    shift = beta - running_mean * scale
    return scale, shift


def prepare_decoder(params, channel):
    """Fold BN/upsample/conv/NCHW-permutation into 5 packed constant arrays."""
    n_pad = max(256, _round_up(56 * channel, 128))     # per-tap column stride (K too)
    g_pack = np.zeros((6, n_pad, 3 * n_pad), np.float32)
    l_pack = np.zeros((6, 3, 56, 32), np.float32)
    bias_pack = np.zeros((6, 1, n_pad), np.float32)

    for i in range(6):
        w = np.asarray(params["convs"][i][0], np.float32)             # (3,3,Cin,Cout)
        b = np.asarray(params["convs"][i][1], np.float32)             # (Cout,)
        if i < len(_BN_CHANNELS):
            # BN_i follows conv_i (after an upsample it commutes with) -> fold.
            scale = np.asarray(params["bns"][i][0], np.float32)
            shift = np.asarray(params["bns"][i][1], np.float32)
            w = w * scale[None, None, None, :]
            b = b * scale + shift
        h_in, h_out, c_in = _H_IN[i], _H_OUT[i], _C_IN[i]
        c_out = w.shape[3]
        k_real = h_in * c_in
        n_real = h_out * c_out
        u = _nearest_matrix(h_out, h_in)
        r = _chan_nearest_matrix(h_out, h_in, c_in)
        if i == 5:
            # Fold (w,c) -> (c,w) so the kernel's final stores are static slices.
            perm = np.array([wpos * c_out + c
                             for c in range(c_out) for wpos in range(h_out)])
        else:
            perm = None
        for dy in range(3):
            s = _shift_matrix(h_out, dy)
            m = _conv_col_matrix(w, h_out, dy)
            L = s @ u                                                  # (h_out, h_in)
            G = r @ m                                                  # (k_real, n_real)
            if perm is not None:
                G = G[:, perm]
            l_pack[i, dy, :h_out, :h_in] = L
            g_pack[i, :k_real, dy * n_pad:dy * n_pad + n_real] = G
        bias_row = np.tile(b, h_out)
        if perm is not None:
            bias_row = bias_row[perm]
        bias_pack[i, 0, :n_real] = bias_row

    # Linear weights merged (row 0 cols [0,n_pad), row 1 cols [n_pad,2*n_pad))
    # and permuted so row h is already the (W*C)-major row h of the (32,2,2) view.
    lw = np.asarray(params["lin_w"], np.float32)                       # (out_dim, 128)
    lb = np.asarray(params["lin_b"], np.float32)                       # (128,)
    out_dim = lw.shape[0]
    wp = np.zeros((out_dim, 2 * n_pad), np.float32)
    bp = np.zeros((1, 2 * n_pad), np.float32)
    for h in range(2):
        for wpos in range(2):
            for c in range(32):
                src = c * 4 + h * 2 + wpos
                dst = h * n_pad + wpos * 32 + c
                wp[:, dst] = lw[:, src]
                bp[0, dst] = lb[src]

    return {
        "wp": jnp.asarray(wp, jnp.bfloat16),
        "bp": jnp.asarray(bp, jnp.float32),
        "g": jnp.asarray(g_pack, jnp.bfloat16),
        "l": jnp.asarray(l_pack, jnp.bfloat16),
        "bias": jnp.asarray(bias_pack, jnp.float32),
    }


# ----------------------------------------------------------------------------
# Fused forward pass.
# ----------------------------------------------------------------------------
def _const_spec(arr, single_buffer):
    zeros = (0,) * arr.ndim
    idx = lambda b, _z=zeros: _z
    if single_buffer:
        return pl.BlockSpec(arr.shape, idx, pipeline_mode=pl.Buffered(1))
    return pl.BlockSpec(arr.shape, idx)


@functools.partial(jax.jit, static_argnames=("channel", "single_buffer"))
def _forward_impl(vec, prep, channel, single_buffer):
    bsz, out_dim = vec.shape
    vec3 = vec.reshape(bsz, 1, out_dim)
    consts = (prep["wp"], prep["bp"], prep["g"], prep["l"], prep["bias"])
    in_specs = [pl.BlockSpec((1, 1, out_dim), lambda b: (b, 0, 0))]
    in_specs += [_const_spec(a, single_buffer) for a in consts]
    return pl.pallas_call(
        _decoder_kernel,
        out_shape=jax.ShapeDtypeStruct((bsz, channel, 56, 56), jnp.float32),
        grid=(bsz,),
        in_specs=in_specs,
        out_specs=pl.BlockSpec((1, channel, 56, 56), lambda b: (b, 0, 0, 0)),
        compiler_params=pltpu.CompilerParams(
            dimension_semantics=("parallel",)),
    )(vec3, *consts)


def conv_decoder2_forward(vec, prep, channel):
    # Prefer single-buffered constant specs (pl.Buffered(1), constants' block
    # index never changes); fall back automatically if this Pallas build does
    # not support pipeline_mode on BlockSpec.
    try:
        return jax.block_until_ready(
            _forward_impl(vec, prep, channel=channel, single_buffer=True))
    except Exception:
        return jax.block_until_ready(
            _forward_impl(vec, prep, channel=channel, single_buffer=False))


# ----------------------------------------------------------------------------
# Deterministic synthetic parameters (PyTorch-module-shaped).
# ----------------------------------------------------------------------------
def make_params(out_dim, channel, key):
    conv_io = [(32, 128), (128, 64), (64, 32), (32, 16), (16, 8), (8, channel)]
    n_keys = 2 + 2 * len(conv_io) + 4 * len(_BN_CHANNELS)
    keys = jax.random.split(key, n_keys)
    ki = iter(range(n_keys))

    params = {}
    params["lin_w"] = 0.1 * jax.random.normal(
        keys[next(ki)], (out_dim, 32 * 2 * 2), jnp.float32)
    params["lin_b"] = 0.1 * jax.random.normal(
        keys[next(ki)], (32 * 2 * 2,), jnp.float32)

    convs = []
    for (cin, cout) in conv_io:
        w = 0.1 * jax.random.normal(keys[next(ki)], (3, 3, cin, cout), jnp.float32)
        b = 0.1 * jax.random.normal(keys[next(ki)], (cout,), jnp.float32)
        convs.append((w, b))
    params["convs"] = convs

    bns = []
    for c in _BN_CHANNELS:
        gamma = 1.0 + 0.05 * jax.random.normal(keys[next(ki)], (c,), jnp.float32)
        beta = 0.05 * jax.random.normal(keys[next(ki)], (c,), jnp.float32)
        rmean = 0.05 * jax.random.normal(keys[next(ki)], (c,), jnp.float32)
        rvar = jax.random.uniform(keys[next(ki)], (c,), jnp.float32,
                                  minval=0.5, maxval=1.5)
        bns.append(fold_bn(gamma, beta, rmean, rvar))
    params["bns"] = bns
    return params


# ----------------------------------------------------------------------------
# Pure-JAX reference (mirrors the PyTorch Sequential exactly, NCHW, f32).
# ----------------------------------------------------------------------------
def _reference_forward(vec, params, channel):
    bsz = vec.shape[0]
    hi = lax.Precision.HIGHEST

    def conv(x, w, b):
        w_oihw = jnp.transpose(w, (3, 2, 0, 1))
        y = lax.conv_general_dilated(
            x, w_oihw, window_strides=(1, 1), padding=((1, 1), (1, 1)),
            dimension_numbers=("NCHW", "OIHW", "NCHW"), precision=hi)
        return y + b.reshape(1, -1, 1, 1)

    def lrelu(x):
        return jnp.where(x >= 0, x, LEAKY_SLOPE * x)

    def bn(x, sc, sh):
        return x * sc.reshape(1, -1, 1, 1) + sh.reshape(1, -1, 1, 1)

    def up2(x):
        return jnp.repeat(jnp.repeat(x, 2, axis=2), 2, axis=3)

    def up_to(x, size):
        h_in, w_in = x.shape[2], x.shape[3]
        rows = (jnp.arange(size[0]) * h_in) // size[0]
        cols = (jnp.arange(size[1]) * w_in) // size[1]
        return x[:, :, rows][:, :, :, cols]

    lin = jnp.dot(vec, params["lin_w"], precision=hi) + params["lin_b"]
    x = lin.reshape(bsz, 32, 2, 2)
    convs, bns = params["convs"], params["bns"]
    x = lrelu(x); x = conv(x, *convs[0]); x = up2(x); x = bn(x, *bns[0])
    x = lrelu(x); x = conv(x, *convs[1]); x = up2(x); x = bn(x, *bns[1])
    x = lrelu(x); x = conv(x, *convs[2]); x = up2(x); x = bn(x, *bns[2])
    x = lrelu(x); x = conv(x, *convs[3]); x = up2(x); x = bn(x, *bns[3])
    x = lrelu(x); x = conv(x, *convs[4]); x = up_to(x, (56, 56)); x = bn(x, *bns[4])
    x = lrelu(x); x = conv(x, *convs[5])
    return x


# ----------------------------------------------------------------------------
# Main
# ----------------------------------------------------------------------------
if __name__ == "__main__":
    key = jax.random.PRNGKey(0)
    kp, kx = jax.random.split(key)

    B = 2          # even -> both v7x TensorCores get work
    OUT_DIM = 32
    CHANNEL = 4    # the decoder always emits (B, CHANNEL, 56, 56)

    params = make_params(OUT_DIM, CHANNEL, kp)
    prep = prepare_decoder(params, CHANNEL)
    vec = jax.random.normal(kx, (B, OUT_DIM), jnp.float32)

    out = conv_decoder2_forward(vec, prep, CHANNEL)
    out = jax.block_until_ready(out)

    assert out.shape == (B, CHANNEL, 56, 56), out.shape
    assert out.dtype == jnp.float32
    assert bool(jnp.all(jnp.isfinite(out)))

    ref = _reference_forward(vec, params, CHANNEL)
    err = float(jnp.max(jnp.abs(out - ref)))
    ref_max = float(jnp.max(jnp.abs(ref)))
    # bf16 matmul operands (f32 accumulation): tolerance scaled to output magnitude.
    tol = 5e-2 * max(1.0, ref_max)
    assert err < tol, f"kernel vs reference mismatch: max|diff|={err} (tol={tol})"

    print("KERNEL_OK")
</pallas_src>

<mosaic_0001>
module attributes {stable_mosaic.version = 11 : i64} {
  func.func @_decoder_kernel(%arg0: i32, %arg1: memref<1x1x32xf32, #tpu.memory_space<vmem>>, %arg2: memref<32x512xbf16, #tpu.memory_space<vmem>>, %arg3: memref<1x512xf32, #tpu.memory_space<vmem>>, %arg4: memref<6x256x768xbf16, #tpu.memory_space<vmem>>, %arg5: memref<6x3x56x32xbf16, #tpu.memory_space<vmem>>, %arg6: memref<6x1x256xf32, #tpu.memory_space<vmem>>, %arg7: memref<1x4x56x56xf32, #tpu.memory_space<vmem>>) attributes {dimension_semantics = [#tpu.dimension_semantics<parallel>], iteration_bounds = array<i64: 2>, scalar_prefetch = 0 : i64, scratch_operands = 0 : i64, tpu.core_type = #tpu.core_type<tc>, window_params = [{transform_indices = @transform_0, window_bounds = array<i64: 1, 1, 32>}, {pipeline_mode = #tpu.pipeline_mode<synchronous>, transform_indices = @transform_1, window_bounds = array<i64: 32, 512>}, {pipeline_mode = #tpu.pipeline_mode<synchronous>, transform_indices = @transform_2, window_bounds = array<i64: 1, 512>}, {pipeline_mode = #tpu.pipeline_mode<synchronous>, transform_indices = @transform_3, window_bounds = array<i64: 6, 256, 768>}, {pipeline_mode = #tpu.pipeline_mode<synchronous>, transform_indices = @transform_4, window_bounds = array<i64: 6, 3, 56, 32>}, {pipeline_mode = #tpu.pipeline_mode<synchronous>, transform_indices = @transform_5, window_bounds = array<i64: 6, 1, 256>}, {transform_indices = @transform_6, window_bounds = array<i64: 1, 4, 56, 56>}]} {
    %c0 = arith.constant 0 : index
    %c0_0 = arith.constant 0 : index
    %c0_1 = arith.constant 0 : index
    %0 = vector.load %arg1[%c0, %c0_0, %c0_1] : memref<1x1x32xf32, #tpu.memory_space<vmem>>, vector<1x1x32xf32>
    %1 = vector.shape_cast %0 : vector<1x1x32xf32> to vector<1x32xf32>
    %2 = arith.truncf %1 : vector<1x32xf32> to vector<1x32xbf16>
    %c0_2 = arith.constant 0 : index
    %c0_3 = arith.constant 0 : index
    %3 = vector.load %arg2[%c0_2, %c0_3] : memref<32x512xbf16, #tpu.memory_space<vmem>>, vector<32x512xbf16>
    %cst = arith.constant dense<0.000000e+00> : vector<1x512xf32>
    %4 = tpu.matmul %2, %3, %cst {dimension_numbers = #tpu.dot_dimension_numbers<[1], [0], [0], [1], [0, 0, 1, 1], [], []>} : vector<1x32xbf16>, vector<32x512xbf16>, vector<1x512xf32> -> vector<1x512xf32>
    %c0_4 = arith.constant 0 : index
    %c0_5 = arith.constant 0 : index
    %5 = vector.load %arg3[%c0_4, %c0_5] : memref<1x512xf32, #tpu.memory_space<vmem>>, vector<1x512xf32>
    %6 = arith.addf %4, %5 : vector<1x512xf32>
    %7 = vector.extract_strided_slice %6 {offsets = [0, 0], sizes = [1, 256], strides = [1, 1]} : vector<1x512xf32> to vector<1x256xf32>
    %8 = vector.extract_strided_slice %6 {offsets = [0, 256], sizes = [1, 256], strides = [1, 1]} : vector<1x512xf32> to vector<1x256xf32>
    %9 = tpu.iota {dimensions = array<i32: 0>} : vector<2x256xi32>
    %c0_i32 = arith.constant 0 : i32
    %10 = vector.broadcast %c0_i32 : i32 to vector<2x256xi32>
    %11 = arith.cmpi eq, %9, %10 : vector<2x256xi32>
    %12 = vector.shape_cast %7 : vector<1x256xf32> to vector<1x256xf32>
    %13 = vector.broadcast %12 : vector<1x256xf32> to vector<2x256xf32>
    %14 = vector.shape_cast %8 : vector<1x256xf32> to vector<1x256xf32>
    %15 = vector.broadcast %14 : vector<1x256xf32> to vector<2x256xf32>
    %16 = arith.select %11, %13, %15 : vector<2x256xi1>, vector<2x256xf32>
    %cst_6 = arith.constant 0.000000e+00 : f32
    %17 = vector.broadcast %cst_6 : f32 to vector<2x256xf32>
    %18 = arith.cmpf oge, %16, %17 : vector<2x256xf32>
    %cst_7 = arith.constant 0.00999999977 : f32
    %19 = vector.broadcast %cst_7 : f32 to vector<2x256xf32>
    %20 = arith.mulf %19, %16 : vector<2x256xf32>
    %21 = arith.select %18, %16, %20 : vector<2x256xi1>, vector<2x256xf32>
    %22 = arith.truncf %21 : vector<2x256xf32> to vector<2x256xbf16>
    %c0_8 = arith.constant 0 : index
    %c0_9 = arith.constant 0 : index
    %c0_10 = arith.constant 0 : index
    %23 = vector.load %arg4[%c0_8, %c0_9, %c0_10] : memref<6x256x768xbf16, #tpu.memory_space<vmem>>, vector<1x256x768xbf16>
    %24 = vector.shape_cast %23 : vector<1x256x768xbf16> to vector<256x768xbf16>
    %cst_11 = arith.constant dense<0.000000e+00> : vector<2x768xf32>
    %25 = tpu.matmul %22, %24, %cst_11 {dimension_numbers = #tpu.dot_dimension_numbers<[1], [0], [0], [1], [0, 0, 1, 1], [], []>} : vector<2x256xbf16>, vector<256x768xbf16>, vector<2x768xf32> -> vector<2x768xf32>
    %26 = arith.truncf %25 : vector<2x768xf32> to vector<2x768xbf16>
    %c0_12 = arith.constant 0 : index
    %c0_13 = arith.constant 0 : index
    %c0_14 = arith.constant 0 : index
    %27 = vector.load %arg6[%c0_12, %c0_13, %c0_14] : memref<6x1x256xf32, #tpu.memory_space<vmem>>, vector<1x1x256xf32>
    %28 = vector.shape_cast %27 : vector<1x1x256xf32> to vector<1x256xf32>
    %c0_15 = arith.constant 0 : index
    %c0_16 = arith.constant 0 : index
    %c0_17 = arith.constant 0 : index
    %c0_18 = arith.constant 0 : index
    %29 = vector.load %arg5[%c0_15, %c0_16, %c0_17, %c0_18] : memref<6x3x56x32xbf16, #tpu.memory_space<vmem>>, vector<1x1x56x32xbf16>
    %30 = vector.shape_cast %29 : vector<1x1x56x32xbf16> to vector<56x32xbf16>
    %31 = vector.extract_strided_slice %30 {offsets = [0, 0], sizes = [2, 2], strides = [1, 1]} : vector<56x32xbf16> to vector<2x2xbf16>
    %32 = vector.extract_strided_slice %26 {offsets = [0, 0], sizes = [2, 256], strides = [1, 1]} : vector<2x768xbf16> to vector<2x256xbf16>
    %cst_19 = arith.constant dense<0.000000e+00> : vector<2x256xf32>
    %33 = tpu.matmul %31, %32, %cst_19 {dimension_numbers = #tpu.dot_dimension_numbers<[1], [0], [0], [1], [0, 0, 1, 1], [], []>} : vector<2x2xbf16>, vector<2x256xbf16>, vector<2x256xf32> -> vector<2x256xf32>
    %34 = vector.broadcast %28 : vector<1x256xf32> to vector<2x256xf32>
    %35 = arith.addf %34, %33 : vector<2x256xf32>
    %c0_20 = arith.constant 0 : index
    %c1 = arith.constant 1 : index
    %c0_21 = arith.constant 0 : index
    %c0_22 = arith.constant 0 : index
    %36 = vector.load %arg5[%c0_20, %c1, %c0_21, %c0_22] : memref<6x3x56x32xbf16, #tpu.memory_space<vmem>>, vector<1x1x56x32xbf16>
    %37 = vector.shape_cast %36 : vector<1x1x56x32xbf16> to vector<56x32xbf16>
    %38 = vector.extract_strided_slice %37 {offsets = [0, 0], sizes = [2, 2], strides = [1, 1]} : vector<56x32xbf16> to vector<2x2xbf16>
    %39 = vector.extract_strided_slice %26 {offsets = [0, 256], sizes = [2, 256], strides = [1, 1]} : vector<2x768xbf16> to vector<2x256xbf16>
    %cst_23 = arith.constant dense<0.000000e+00> : vector<2x256xf32>
    %40 = tpu.matmul %38, %39, %cst_23 {dimension_numbers = #tpu.dot_dimension_numbers<[1], [0], [0], [1], [0, 0, 1, 1], [], []>} : vector<2x2xbf16>, vector<2x256xbf16>, vector<2x256xf32> -> vector<2x256xf32>
    %41 = arith.addf %35, %40 : vector<2x256xf32>
    %c0_24 = arith.constant 0 : index
    %c2 = arith.constant 2 : index
    %c0_25 = arith.constant 0 : index
    %c0_26 = arith.constant 0 : index
    %42 = vector.load %arg5[%c0_24, %c2, %c0_25, %c0_26] : memref<6x3x56x32xbf16, #tpu.memory_space<vmem>>, vector<1x1x56x32xbf16>
    %43 = vector.shape_cast %42 : vector<1x1x56x32xbf16> to vector<56x32xbf16>
    %44 = vector.extract_strided_slice %43 {offsets = [0, 0], sizes = [2, 2], strides = [1, 1]} : vector<56x32xbf16> to vector<2x2xbf16>
    %45 = vector.extract_strided_slice %26 {offsets = [0, 512], sizes = [2, 256], strides = [1, 1]} : vector<2x768xbf16> to vector<2x256xbf16>
    %cst_27 = arith.constant dense<0.000000e+00> : vector<2x256xf32>
    %46 = tpu.matmul %44, %45, %cst_27 {dimension_numbers = #tpu.dot_dimension_numbers<[1], [0], [0], [1], [0, 0, 1, 1], [], []>} : vector<2x2xbf16>, vector<2x256xbf16>, vector<2x256xf32> -> vector<2x256xf32>
    %47 = arith.addf %41, %46 : vector<2x256xf32>
    %cst_28 = arith.constant 0.000000e+00 : f32
    %48 = vector.broadcast %cst_28 : f32 to vector<2x256xf32>
    %49 = arith.cmpf oge, %47, %48 : vector<2x256xf32>
    %cst_29 = arith.constant 0.00999999977 : f32
    %50 = vector.broadcast %cst_29 : f32 to vector<2x256xf32>
    %51 = arith.mulf %50, %47 : vector<2x256xf32>
    %52 = arith.select %49, %47, %51 : vector<2x256xi1>, vector<2x256xf32>
    %53 = arith.truncf %52 : vector<2x256xf32> to vector<2x256xbf16>
    %c1_30 = arith.constant 1 : index
    %c0_31 = arith.constant 0 : index
    %c0_32 = arith.constant 0 : index
    %54 = vector.load %arg4[%c1_30, %c0_31, %c0_32] : memref<6x256x768xbf16, #tpu.memory_space<vmem>>, vector<1x256x768xbf16>
    %55 = vector.shape_cast %54 : vector<1x256x768xbf16> to vector<256x768xbf16>
    %cst_33 = arith.constant dense<0.000000e+00> : vector<2x768xf32>
    %56 = tpu.matmul %53, %55, %cst_33 {dimension_numbers = #tpu.dot_dimension_numbers<[1], [0], [0], [1], [0, 0, 1, 1], [], []>} : vector<2x256xbf16>, vector<256x768xbf16>, vector<2x768xf32> -> vector<2x768xf32>
    %57 = arith.truncf %56 : vector<2x768xf32> to vector<2x768xbf16>
    %c1_34 = arith.constant 1 : index
    %c0_35 = arith.constant 0 : index
    %c0_36 = arith.constant 0 : index
    %58 = vector.load %arg6[%c1_34, %c0_35, %c0_36] : memref<6x1x256xf32, #tpu.memory_space<vmem>>, vector<1x1x256xf32>
    %59 = vector.shape_cast %58 : vector<1x1x256xf32> to vector<1x256xf32>
    %c1_37 = arith.constant 1 : index
    %c0_38 = arith.constant 0 : index
    %c0_39 = arith.constant 0 : index
    %c0_40 = arith.constant 0 : index
    %60 = vector.load %arg5[%c1_37, %c0_38, %c0_39, %c0_40] : memref<6x3x56x32xbf16, #tpu.memory_space<vmem>>, vector<1x1x56x32xbf16>
    %61 = vector.shape_cast %60 : vector<1x1x56x32xbf16> to vector<56x32xbf16>
    %62 = vector.extract_strided_slice %61 {offsets = [0, 0], sizes = [4, 2], strides = [1, 1]} : vector<56x32xbf16> to vector<4x2xbf16>
    %63 = vector.extract_strided_slice %57 {offsets = [0, 0], sizes = [2, 256], strides = [1, 1]} : vector<2x768xbf16> to vector<2x256xbf16>
    %cst_41 = arith.constant dense<0.000000e+00> : vector<4x256xf32>
    %64 = tpu.matmul %62, %63, %cst_41 {dimension_numbers = #tpu.dot_dimension_numbers<[1], [0], [0], [1], [0, 0, 1, 1], [], []>} : vector<4x2xbf16>, vector<2x256xbf16>, vector<4x256xf32> -> vector<4x256xf32>
    %65 = vector.broadcast %59 : vector<1x256xf32> to vector<4x256xf32>
    %66 = arith.addf %65, %64 : vector<4x256xf32>
    %c1_42 = arith.constant 1 : index
    %c1_43 = arith.constant 1 : index
    %c0_44 = arith.constant 0 : index
    %c0_45 = arith.constant 0 : index
    %67 = vector.load %arg5[%c1_42, %c1_43, %c0_44, %c0_45] : memref<6x3x56x32xbf16, #tpu.memory_space<vmem>>, vector<1x1x56x32xbf16>
    %68 = vector.shape_cast %67 : vector<1x1x56x32xbf16> to vector<56x32xbf16>
    %69 = vector.extract_strided_slice %68 {offsets = [0, 0], sizes = [4, 2], strides = [1, 1]} : vector<56x32xbf16> to vector<4x2xbf16>
    %70 = vector.extract_strided_slice %57 {offsets = [0, 256], sizes = [2, 256], strides = [1, 1]} : vector<2x768xbf16> to vector<2x256xbf16>
    %cst_46 = arith.constant dense<0.000000e+00> : vector<4x256xf32>
    %71 = tpu.matmul %69, %70, %cst_46 {dimension_numbers = #tpu.dot_dimension_numbers<[1], [0], [0], [1], [0, 0, 1, 1], [], []>} : vector<4x2xbf16>, vector<2x256xbf16>, vector<4x256xf32> -> vector<4x256xf32>
    %72 = arith.addf %66, %71 : vector<4x256xf32>
    %c1_47 = arith.constant 1 : index
    %c2_48 = arith.constant 2 : index
    %c0_49 = arith.constant 0 : index
    %c0_50 = arith.constant 0 : index
    %73 = vector.load %arg5[%c1_47, %c2_48, %c0_49, %c0_50] : memref<6x3x56x32xbf16, #tpu.memory_space<vmem>>, vector<1x1x56x32xbf16>
    %74 = vector.shape_cast %73 : vector<1x1x56x32xbf16> to vector<56x32xbf16>
    %75 = vector.extract_strided_slice %74 {offsets = [0, 0], sizes = [4, 2], strides = [1, 1]} : vector<56x32xbf16> to vector<4x2xbf16>
    %76 = vector.extract_strided_slice %57 {offsets = [0, 512], sizes = [2, 256], strides = [1, 1]} : vector<2x768xbf16> to vector<2x256xbf16>
    %cst_51 = arith.constant dense<0.000000e+00> : vector<4x256xf32>
    %77 = tpu.matmul %75, %76, %cst_51 {dimension_numbers = #tpu.dot_dimension_numbers<[1], [0], [0], [1], [0, 0, 1, 1], [], []>} : vector<4x2xbf16>, vector<2x256xbf16>, vector<4x256xf32> -> vector<4x256xf32>
    %78 = arith.addf %72, %77 : vector<4x256xf32>
    %cst_52 = arith.constant 0.000000e+00 : f32
    %79 = vector.broadcast %cst_52 : f32 to vector<4x256xf32>
    %80 = arith.cmpf oge, %78, %79 : vector<4x256xf32>
    %cst_53 = arith.constant 0.00999999977 : f32
    %81 = vector.broadcast %cst_53 : f32 to vector<4x256xf32>
    %82 = arith.mulf %81, %78 : vector<4x256xf32>
    %83 = arith.select %80, %78, %82 : vector<4x256xi1>, vector<4x256xf32>
    %84 = arith.truncf %83 : vector<4x256xf32> to vector<4x256xbf16>
    %c2_54 = arith.constant 2 : index
    %c0_55 = arith.constant 0 : index
    %c0_56 = arith.constant 0 : index
    %85 = vector.load %arg4[%c2_54, %c0_55, %c0_56] : memref<6x256x768xbf16, #tpu.memory_space<vmem>>, vector<1x256x768xbf16>
    %86 = vector.shape_cast %85 : vector<1x256x768xbf16> to vector<256x768xbf16>
    %cst_57 = arith.constant dense<0.000000e+00> : vector<4x768xf32>
    %87 = tpu.matmul %84, %86, %cst_57 {dimension_numbers = #tpu.dot_dimension_numbers<[1], [0], [0], [1], [0, 0, 1, 1], [], []>} : vector<4x256xbf16>, vector<256x768xbf16>, vector<4x768xf32> -> vector<4x768xf32>
    %88 = arith.truncf %87 : vector<4x768xf32> to vector<4x768xbf16>
    %c2_58 = arith.constant 2 : index
    %c0_59 = arith.constant 0 : index
    %c0_60 = arith.constant 0 : index
    %89 = vector.load %arg6[%c2_58, %c0_59, %c0_60] : memref<6x1x256xf32, #tpu.memory_space<vmem>>, vector<1x1x256xf32>
    %90 = vector.shape_cast %89 : vector<1x1x256xf32> to vector<1x256xf32>
    %c2_61 = arith.constant 2 : index
    %c0_62 = arith.constant 0 : index
    %c0_63 = arith.constant 0 : index
    %c0_64 = arith.constant 0 : index
    %91 = vector.load %arg5[%c2_61, %c0_62, %c0_63, %c0_64] : memref<6x3x56x32xbf16, #tpu.memory_space<vmem>>, vector<1x1x56x32xbf16>
    %92 = vector.shape_cast %91 : vector<1x1x56x32xbf16> to vector<56x32xbf16>
    %93 = vector.extract_strided_slice %92 {offsets = [0, 0], sizes = [8, 4], strides = [1, 1]} : vector<56x32xbf16> to vector<8x4xbf16>
    %94 = vector.extract_strided_slice %88 {offsets = [0, 0], sizes = [4, 256], strides = [1, 1]} : vector<4x768xbf16> to vector<4x256xbf16>
    %cst_65 = arith.constant dense<0.000000e+00> : vector<8x256xf32>
    %95 = tpu.matmul %93, %94, %cst_65 {dimension_numbers = #tpu.dot_dimension_numbers<[1], [0], [0], [1], [0, 0, 1, 1], [], []>} : vector<8x4xbf16>, vector<4x256xbf16>, vector<8x256xf32> -> vector<8x256xf32>
    %96 = vector.broadcast %90 : vector<1x256xf32> to vector<8x256xf32>
    %97 = arith.addf %96, %95 : vector<8x256xf32>
    %c2_66 = arith.constant 2 : index
    %c1_67 = arith.constant 1 : index
    %c0_68 = arith.constant 0 : index
    %c0_69 = arith.constant 0 : index
    %98 = vector.load %arg5[%c2_66, %c1_67, %c0_68, %c0_69] : memref<6x3x56x32xbf16, #tpu.memory_space<vmem>>, vector<1x1x56x32xbf16>
    %99 = vector.shape_cast %98 : vector<1x1x56x32xbf16> to vector<56x32xbf16>
    %100 = vector.extract_strided_slice %99 {offsets = [0, 0], sizes = [8, 4], strides = [1, 1]} : vector<56x32xbf16> to vector<8x4xbf16>
    %101 = vector.extract_strided_slice %88 {offsets = [0, 256], sizes = [4, 256], strides = [1, 1]} : vector<4x768xbf16> to vector<4x256xbf16>
    %cst_70 = arith.constant dense<0.000000e+00> : vector<8x256xf32>
    %102 = tpu.matmul %100, %101, %cst_70 {dimension_numbers = #tpu.dot_dimension_numbers<[1], [0], [0], [1], [0, 0, 1, 1], [], []>} : vector<8x4xbf16>, vector<4x256xbf16>, vector<8x256xf32> -> vector<8x256xf32>
    %103 = arith.addf %97, %102 : vector<8x256xf32>
    %c2_71 = arith.constant 2 : index
    %c2_72 = arith.constant 2 : index
    %c0_73 = arith.constant 0 : index
    %c0_74 = arith.constant 0 : index
    %104 = vector.load %arg5[%c2_71, %c2_72, %c0_73, %c0_74] : memref<6x3x56x32xbf16, #tpu.memory_space<vmem>>, vector<1x1x56x32xbf16>
    %105 = vector.shape_cast %104 : vector<1x1x56x32xbf16> to vector<56x32xbf16>
    %106 = vector.extract_strided_slice %105 {offsets = [0, 0], sizes = [8, 4], strides = [1, 1]} : vector<56x32xbf16> to vector<8x4xbf16>
    %107 = vector.extract_strided_slice %88 {offsets = [0, 512], sizes = [4, 256], strides = [1, 1]} : vector<4x768xbf16> to vector<4x256xbf16>
    %cst_75 = arith.constant dense<0.000000e+00> : vector<8x256xf32>
    %108 = tpu.matmul %106, %107, %cst_75 {dimension_numbers = #tpu.dot_dimension_numbers<[1], [0], [0], [1], [0, 0, 1, 1], [], []>} : vector<8x4xbf16>, vector<4x256xbf16>, vector<8x256xf32> -> vector<8x256xf32>
    %109 = arith.addf %103, %108 : vector<8x256xf32>
    %cst_76 = arith.constant 0.000000e+00 : f32
    %110 = vector.broadcast %cst_76 : f32 to vector<8x256xf32>
    %111 = arith.cmpf oge, %109, %110 : vector<8x256xf32>
    %cst_77 = arith.constant 0.00999999977 : f32
    %112 = vector.broadcast %cst_77 : f32 to vector<8x256xf32>
    %113 = arith.mulf %112, %109 : vector<8x256xf32>
    %114 = arith.select %111, %109, %113 : vector<8x256xi1>, vector<8x256xf32>
    %115 = arith.truncf %114 : vector<8x256xf32> to vector<8x256xbf16>
    %c3 = arith.constant 3 : index
    %c0_78 = arith.constant 0 : index
    %c0_79 = arith.constant 0 : index
    %116 = vector.load %arg4[%c3, %c0_78, %c0_79] : memref<6x256x768xbf16, #tpu.memory_space<vmem>>, vector<1x256x768xbf16>
    %117 = vector.shape_cast %116 : vector<1x256x768xbf16> to vector<256x768xbf16>
    %cst_80 = arith.constant dense<0.000000e+00> : vector<8x768xf32>
    %118 = tpu.matmul %115, %117, %cst_80 {dimension_numbers = #tpu.dot_dimension_numbers<[1], [0], [0], [1], [0, 0, 1, 1], [], []>} : vector<8x256xbf16>, vector<256x768xbf16>, vector<8x768xf32> -> vector<8x768xf32>
    %119 = arith.truncf %118 : vector<8x768xf32> to vector<8x768xbf16>
    %c3_81 = arith.constant 3 : index
    %c0_82 = arith.constant 0 : index
    %c0_83 = arith.constant 0 : index
    %120 = vector.load %arg6[%c3_81, %c0_82, %c0_83] : memref<6x1x256xf32, #tpu.memory_space<vmem>>, vector<1x1x256xf32>
    %121 = vector.shape_cast %120 : vector<1x1x256xf32> to vector<1x256xf32>
    %c3_84 = arith.constant 3 : index
    %c0_85 = arith.constant 0 : index
    %c0_86 = arith.constant 0 : index
    %c0_87 = arith.constant 0 : index
    %122 = vector.load %arg5[%c3_84, %c0_85, %c0_86, %c0_87] : memref<6x3x56x32xbf16, #tpu.memory_space<vmem>>, vector<1x1x56x32xbf16>
    %123 = vector.shape_cast %122 : vector<1x1x56x32xbf16> to vector<56x32xbf16>
    %124 = vector.extract_strided_slice %123 {offsets = [0, 0], sizes = [16, 8], strides = [1, 1]} : vector<56x32xbf16> to vector<16x8xbf16>
    %125 = vector.extract_strided_slice %119 {offsets = [0, 0], sizes = [8, 256], strides = [1, 1]} : vector<8x768xbf16> to vector<8x256xbf16>
    %cst_88 = arith.constant dense<0.000000e+00> : vector<16x256xf32>
    %126 = tpu.matmul %124, %125, %cst_88 {dimension_numbers = #tpu.dot_dimension_numbers<[1], [0], [0], [1], [0, 0, 1, 1], [], []>} : vector<16x8xbf16>, vector<8x256xbf16>, vector<16x256xf32> -> vector<16x256xf32>
    %127 = vector.broadcast %121 : vector<1x256xf32> to vector<16x256xf32>
    %128 = arith.addf %127, %126 : vector<16x256xf32>
    %c3_89 = arith.constant 3 : index
    %c1_90 = arith.constant 1 : index
    %c0_91 = arith.constant 0 : index
    %c0_92 = arith.constant 0 : index
    %129 = vector.load %arg5[%c3_89, %c1_90, %c0_91, %c0_92] : memref<6x3x56x32xbf16, #tpu.memory_space<vmem>>, vector<1x1x56x32xbf16>
    %130 = vector.shape_cast %129 : vector<1x1x56x32xbf16> to vector<56x32xbf16>
    %131 = vector.extract_strided_slice %130 {offsets = [0, 0], sizes = [16, 8], strides = [1, 1]} : vector<56x32xbf16> to vector<16x8xbf16>
    %132 = vector.extract_strided_slice %119 {offsets = [0, 256], sizes = [8, 256], strides = [1, 1]} : vector<8x768xbf16> to vector<8x256xbf16>
    %cst_93 = arith.constant dense<0.000000e+00> : vector<16x256xf32>
    %133 = tpu.matmul %131, %132, %cst_93 {dimension_numbers = #tpu.dot_dimension_numbers<[1], [0], [0], [1], [0, 0, 1, 1], [], []>} : vector<16x8xbf16>, vector<8x256xbf16>, vector<16x256xf32> -> vector<16x256xf32>
    %134 = arith.addf %128, %133 : vector<16x256xf32>
    %c3_94 = arith.constant 3 : index
    %c2_95 = arith.constant 2 : index
    %c0_96 = arith.constant 0 : index
    %c0_97 = arith.constant 0 : index
    %135 = vector.load %arg5[%c3_94, %c2_95, %c0_96, %c0_97] : memref<6x3x56x32xbf16, #tpu.memory_space<vmem>>, vector<1x1x56x32xbf16>
    %136 = vector.shape_cast %135 : vector<1x1x56x32xbf16> to vector<56x32xbf16>
    %137 = vector.extract_strided_slice %136 {offsets = [0, 0], sizes = [16, 8], strides = [1, 1]} : vector<56x32xbf16> to vector<16x8xbf16>
    %138 = vector.extract_strided_slice %119 {offsets = [0, 512], sizes = [8, 256], strides = [1, 1]} : vector<8x768xbf16> to vector<8x256xbf16>
    %cst_98 = arith.constant dense<0.000000e+00> : vector<16x256xf32>
    %139 = tpu.matmul %137, %138, %cst_98 {dimension_numbers = #tpu.dot_dimension_numbers<[1], [0], [0], [1], [0, 0, 1, 1], [], []>} : vector<16x8xbf16>, vector<8x256xbf16>, vector<16x256xf32> -> vector<16x256xf32>
    %140 = arith.addf %134, %139 : vector<16x256xf32>
    %cst_99 = arith.constant 0.000000e+00 : f32
    %141 = vector.broadcast %cst_99 : f32 to vector<16x256xf32>
    %142 = arith.cmpf oge, %140, %141 : vector<16x256xf32>
    %cst_100 = arith.constant 0.00999999977 : f32
    %143 = vector.broadcast %cst_100 : f32 to vector<16x256xf32>
    %144 = arith.mulf %143, %140 : vector<16x256xf32>
    %145 = arith.select %142, %140, %144 : vector<16x256xi1>, vector<16x256xf32>
    %146 = arith.truncf %145 : vector<16x256xf32> to vector<16x256xbf16>
    %c4 = arith.constant 4 : index
    %c0_101 = arith.constant 0 : index
    %c0_102 = arith.constant 0 : index
    %147 = vector.load %arg4[%c4, %c0_101, %c0_102] : memref<6x256x768xbf16, #tpu.memory_space<vmem>>, vector<1x256x768xbf16>
    %148 = vector.shape_cast %147 : vector<1x256x768xbf16> to vector<256x768xbf16>
    %cst_103 = arith.constant dense<0.000000e+00> : vector<16x768xf32>
    %149 = tpu.matmul %146, %148, %cst_103 {dimension_numbers = #tpu.dot_dimension_numbers<[1], [0], [0], [1], [0, 0, 1, 1], [], []>} : vector<16x256xbf16>, vector<256x768xbf16>, vector<16x768xf32> -> vector<16x768xf32>
    %150 = arith.truncf %149 : vector<16x768xf32> to vector<16x768xbf16>
    %c4_104 = arith.constant 4 : index
    %c0_105 = arith.constant 0 : index
    %c0_106 = arith.constant 0 : index
    %151 = vector.load %arg6[%c4_104, %c0_105, %c0_106] : memref<6x1x256xf32, #tpu.memory_space<vmem>>, vector<1x1x256xf32>
    %152 = vector.shape_cast %151 : vector<1x1x256xf32> to vector<1x256xf32>
    %c4_107 = arith.constant 4 : index
    %c0_108 = arith.constant 0 : index
    %c0_109 = arith.constant 0 : index
    %c0_110 = arith.constant 0 : index
    %153 = vector.load %arg5[%c4_107, %c0_108, %c0_109, %c0_110] : memref<6x3x56x32xbf16, #tpu.memory_space<vmem>>, vector<1x1x56x32xbf16>
    %154 = vector.shape_cast %153 : vector<1x1x56x32xbf16> to vector<56x32xbf16>
    %155 = vector.extract_strided_slice %154 {offsets = [0, 0], sizes = [32, 16], strides = [1, 1]} : vector<56x32xbf16> to vector<32x16xbf16>
    %156 = vector.extract_strided_slice %150 {offsets = [0, 0], sizes = [16, 256], strides = [1, 1]} : vector<16x768xbf16> to vector<16x256xbf16>
    %cst_111 = arith.constant dense<0.000000e+00> : vector<32x256xf32>
    %157 = tpu.matmul %155, %156, %cst_111 {dimension_numbers = #tpu.dot_dimension_numbers<[1], [0], [0], [1], [0, 0, 1, 1], [], []>} : vector<32x16xbf16>, vector<16x256xbf16>, vector<32x256xf32> -> vector<32x256xf32>
    %158 = vector.broadcast %152 : vector<1x256xf32> to vector<32x256xf32>
    %159 = arith.addf %158, %157 : vector<32x256xf32>
    %c4_112 = arith.constant 4 : index
    %c1_113 = arith.constant 1 : index
    %c0_114 = arith.constant 0 : index
    %c0_115 = arith.constant 0 : index
    %160 = vector.load %arg5[%c4_112, %c1_113, %c0_114, %c0_115] : memref<6x3x56x32xbf16, #tpu.memory_space<vmem>>, vector<1x1x56x32xbf16>
    %161 = vector.shape_cast %160 : vector<1x1x56x32xbf16> to vector<56x32xbf16>
    %162 = vector.extract_strided_slice %161 {offsets = [0, 0], sizes = [32, 16], strides = [1, 1]} : vector<56x32xbf16> to vector<32x16xbf16>
    %163 = vector.extract_strided_slice %150 {offsets = [0, 256], sizes = [16, 256], strides = [1, 1]} : vector<16x768xbf16> to vector<16x256xbf16>
    %cst_116 = arith.constant dense<0.000000e+00> : vector<32x256xf32>
    %164 = tpu.matmul %162, %163, %cst_116 {dimension_numbers = #tpu.dot_dimension_numbers<[1], [0], [0], [1], [0, 0, 1, 1], [], []>} : vector<32x16xbf16>, vector<16x256xbf16>, vector<32x256xf32> -> vector<32x256xf32>
    %165 = arith.addf %159, %164 : vector<32x256xf32>
    %c4_117 = arith.constant 4 : index
    %c2_118 = arith.constant 2 : index
    %c0_119 = arith.constant 0 : index
    %c0_120 = arith.constant 0 : index
    %166 = vector.load %arg5[%c4_117, %c2_118, %c0_119, %c0_120] : memref<6x3x56x32xbf16, #tpu.memory_space<vmem>>, vector<1x1x56x32xbf16>
    %167 = vector.shape_cast %166 : vector<1x1x56x32xbf16> to vector<56x32xbf16>
    %168 = vector.extract_strided_slice %167 {offsets = [0, 0], sizes = [32, 16], strides = [1, 1]} : vector<56x32xbf16> to vector<32x16xbf16>
    %169 = vector.extract_strided_slice %150 {offsets = [0, 512], sizes = [16, 256], strides = [1, 1]} : vector<16x768xbf16> to vector<16x256xbf16>
    %cst_121 = arith.constant dense<0.000000e+00> : vector<32x256xf32>
    %170 = tpu.matmul %168, %169, %cst_121 {dimension_numbers = #tpu.dot_dimension_numbers<[1], [0], [0], [1], [0, 0, 1, 1], [], []>} : vector<32x16xbf16>, vector<16x256xbf16>, vector<32x256xf32> -> vector<32x256xf32>
    %171 = arith.addf %165, %170 : vector<32x256xf32>
    %cst_122 = arith.constant 0.000000e+00 : f32
    %172 = vector.broadcast %cst_122 : f32 to vector<32x256xf32>
    %173 = arith.cmpf oge, %171, %172 : vector<32x256xf32>
    %cst_123 = arith.constant 0.00999999977 : f32
    %174 = vector.broadcast %cst_123 : f32 to vector<32x256xf32>
    %175 = arith.mulf %174, %171 : vector<32x256xf32>
    %176 = arith.select %173, %171, %175 : vector<32x256xi1>, vector<32x256xf32>
    %177 = arith.truncf %176 : vector<32x256xf32> to vector<32x256xbf16>
    %c5 = arith.constant 5 : index
    %c0_124 = arith.constant 0 : index
    %c0_125 = arith.constant 0 : index
    %178 = vector.load %arg4[%c5, %c0_124, %c0_125] : memref<6x256x768xbf16, #tpu.memory_space<vmem>>, vector<1x256x768xbf16>
    %179 = vector.shape_cast %178 : vector<1x256x768xbf16> to vector<256x768xbf16>
    %cst_126 = arith.constant dense<0.000000e+00> : vector<32x768xf32>
    %180 = tpu.matmul %177, %179, %cst_126 {dimension_numbers = #tpu.dot_dimension_numbers<[1], [0], [0], [1], [0, 0, 1, 1], [], []>} : vector<32x256xbf16>, vector<256x768xbf16>, vector<32x768xf32> -> vector<32x768xf32>
    %181 = arith.truncf %180 : vector<32x768xf32> to vector<32x768xbf16>
    %c5_127 = arith.constant 5 : index
    %c0_128 = arith.constant 0 : index
    %c0_129 = arith.constant 0 : index
    %182 = vector.load %arg6[%c5_127, %c0_128, %c0_129] : memref<6x1x256xf32, #tpu.memory_space<vmem>>, vector<1x1x256xf32>
    %183 = vector.shape_cast %182 : vector<1x1x256xf32> to vector<1x256xf32>
    %c5_130 = arith.constant 5 : index
    %c0_131 = arith.constant 0 : index
    %c0_132 = arith.constant 0 : index
    %c0_133 = arith.constant 0 : index
    %184 = vector.load %arg5[%c5_130, %c0_131, %c0_132, %c0_133] : memref<6x3x56x32xbf16, #tpu.memory_space<vmem>>, vector<1x1x56x32xbf16>
    %185 = vector.shape_cast %184 : vector<1x1x56x32xbf16> to vector<56x32xbf16>
    %186 = vector.extract_strided_slice %181 {offsets = [0, 0], sizes = [32, 256], strides = [1, 1]} : vector<32x768xbf16> to vector<32x256xbf16>
    %cst_134 = arith.constant dense<0.000000e+00> : vector<56x256xf32>
    %187 = tpu.matmul %185, %186, %cst_134 {dimension_numbers = #tpu.dot_dimension_numbers<[1], [0], [0], [1], [0, 0, 1, 1], [], []>} : vector<56x32xbf16>, vector<32x256xbf16>, vector<56x256xf32> -> vector<56x256xf32>
    %188 = vector.broadcast %183 : vector<1x256xf32> to vector<56x256xf32>
    %189 = arith.addf %188, %187 : vector<56x256xf32>
    %c5_135 = arith.constant 5 : index
    %c1_136 = arith.constant 1 : index
    %c0_137 = arith.constant 0 : index
    %c0_138 = arith.constant 0 : index
    %190 = vector.load %arg5[%c5_135, %c1_136, %c0_137, %c0_138] : memref<6x3x56x32xbf16, #tpu.memory_space<vmem>>, vector<1x1x56x32xbf16>
    %191 = vector.shape_cast %190 : vector<1x1x56x32xbf16> to vector<56x32xbf16>
    %192 = vector.extract_strided_slice %181 {offsets = [0, 256], sizes = [32, 256], strides = [1, 1]} : vector<32x768xbf16> to vector<32x256xbf16>
    %cst_139 = arith.constant dense<0.000000e+00> : vector<56x256xf32>
    %193 = tpu.matmul %191, %192, %cst_139 {dimension_numbers = #tpu.dot_dimension_numbers<[1], [0], [0], [1], [0, 0, 1, 1], [], []>} : vector<56x32xbf16>, vector<32x256xbf16>, vector<56x256xf32> -> vector<56x256xf32>
    %194 = arith.addf %189, %193 : vector<56x256xf32>
    %c5_140 = arith.constant 5 : index
    %c2_141 = arith.constant 2 : index
    %c0_142 = arith.constant 0 : index
    %c0_143 = arith.constant 0 : index
    %195 = vector.load %arg5[%c5_140, %c2_141, %c0_142, %c0_143] : memref<6x3x56x32xbf16, #tpu.memory_space<vmem>>, vector<1x1x56x32xbf16>
    %196 = vector.shape_cast %195 : vector<1x1x56x32xbf16> to vector<56x32xbf16>
    %197 = vector.extract_strided_slice %181 {offsets = [0, 512], sizes = [32, 256], strides = [1, 1]} : vector<32x768xbf16> to vector<32x256xbf16>
    %cst_144 = arith.constant dense<0.000000e+00> : vector<56x256xf32>
    %198 = tpu.matmul %196, %197, %cst_144 {dimension_numbers = #tpu.dot_dimension_numbers<[1], [0], [0], [1], [0, 0, 1, 1], [], []>} : vector<56x32xbf16>, vector<32x256xbf16>, vector<56x256xf32> -> vector<56x256xf32>
    %199 = arith.addf %194, %198 : vector<56x256xf32>
    %200 = vector.extract_strided_slice %199 {offsets = [0, 0], sizes = [56, 56], strides = [1, 1]} : vector<56x256xf32> to vector<56x56xf32>
    %c0_145 = arith.constant 0 : index
    %c0_146 = arith.constant 0 : index
    %c0_147 = arith.constant 0 : index
    %c0_148 = arith.constant 0 : index
    %201 = vector.load %arg7[%c0_145, %c0_146, %c0_147, %c0_148] : memref<1x4x56x56xf32, #tpu.memory_space<vmem>>, vector<1x1x56x56xf32>
    %202 = vector.shape_cast %201 : vector<1x1x56x56xf32> to vector<56x56xf32>
    %203 = vector.shape_cast %200 : vector<56x56xf32> to vector<1x1x56x56xf32>
    tpu.vector_store %arg7[%c0_145, %c0_146, %c0_147, %c0_148], %203 {strides = array<i32>} : memref<1x4x56x56xf32, #tpu.memory_space<vmem>>, vector<1x1x56x56xf32>,
    %204 = vector.extract_strided_slice %199 {offsets = [0, 56], sizes = [56, 56], strides = [1, 1]} : vector<56x256xf32> to vector<56x56xf32>
    %c0_149 = arith.constant 0 : index
    %c1_150 = arith.constant 1 : index
    %c0_151 = arith.constant 0 : index
    %c0_152 = arith.constant 0 : index
    %205 = vector.load %arg7[%c0_149, %c1_150, %c0_151, %c0_152] : memref<1x4x56x56xf32, #tpu.memory_space<vmem>>, vector<1x1x56x56xf32>
    %206 = vector.shape_cast %205 : vector<1x1x56x56xf32> to vector<56x56xf32>
    %207 = vector.shape_cast %204 : vector<56x56xf32> to vector<1x1x56x56xf32>
    tpu.vector_store %arg7[%c0_149, %c1_150, %c0_151, %c0_152], %207 {strides = array<i32>} : memref<1x4x56x56xf32, #tpu.memory_space<vmem>>, vector<1x1x56x56xf32>,
    %208 = vector.extract_strided_slice %199 {offsets = [0, 112], sizes = [56, 56], strides = [1, 1]} : vector<56x256xf32> to vector<56x56xf32>
    %c0_153 = arith.constant 0 : index
    %c2_154 = arith.constant 2 : index
    %c0_155 = arith.constant 0 : index
    %c0_156 = arith.constant 0 : index
    %209 = vector.load %arg7[%c0_153, %c2_154, %c0_155, %c0_156] : memref<1x4x56x56xf32, #tpu.memory_space<vmem>>, vector<1x1x56x56xf32>
    %210 = vector.shape_cast %209 : vector<1x1x56x56xf32> to vector<56x56xf32>
    %211 = vector.shape_cast %208 : vector<56x56xf32> to vector<1x1x56x56xf32>
    tpu.vector_store %arg7[%c0_153, %c2_154, %c0_155, %c0_156], %211 {strides = array<i32>} : memref<1x4x56x56xf32, #tpu.memory_space<vmem>>, vector<1x1x56x56xf32>,
    %212 = vector.extract_strided_slice %199 {offsets = [0, 168], sizes = [56, 56], strides = [1, 1]} : vector<56x256xf32> to vector<56x56xf32>
    %c0_157 = arith.constant 0 : index
    %c3_158 = arith.constant 3 : index
    %c0_159 = arith.constant 0 : index
    %c0_160 = arith.constant 0 : index
    %213 = vector.load %arg7[%c0_157, %c3_158, %c0_159, %c0_160] : memref<1x4x56x56xf32, #tpu.memory_space<vmem>>, vector<1x1x56x56xf32>
    %214 = vector.shape_cast %213 : vector<1x1x56x56xf32> to vector<56x56xf32>
    %215 = vector.shape_cast %212 : vector<56x56xf32> to vector<1x1x56x56xf32>
    tpu.vector_store %arg7[%c0_157, %c3_158, %c0_159, %c0_160], %215 {strides = array<i32>} : memref<1x4x56x56xf32, #tpu.memory_space<vmem>>, vector<1x1x56x56xf32>,
    return
  }
  func.func @transform_0(%arg0: i32) -> (i32, i32, i32) {
    %c0_i32 = arith.constant 0 : i32
    %c0_i32_0 = arith.constant 0 : i32
    %c0_i32_1 = arith.constant 0 : i32
    return %arg0, %c0_i32, %c0_i32_0 : i32, i32, i32
  }
  func.func @transform_1(%arg0: i32) -> (i32, i32) {
    %c0_i32 = arith.constant 0 : i32
    %c0_i32_0 = arith.constant 0 : i32
    %c0_i32_1 = arith.constant 0 : i32
    return %c0_i32, %c0_i32_0 : i32, i32
  }
  func.func @transform_2(%arg0: i32) -> (i32, i32) {
    %c0_i32 = arith.constant 0 : i32
    %c0_i32_0 = arith.constant 0 : i32
    %c0_i32_1 = arith.constant 0 : i32
    return %c0_i32, %c0_i32_0 : i32, i32
  }
  func.func @transform_3(%arg0: i32) -> (i32, i32, i32) {
    %c0_i32 = arith.constant 0 : i32
    %c0_i32_0 = arith.constant 0 : i32
    %c0_i32_1 = arith.constant 0 : i32
    %c0_i32_2 = arith.constant 0 : i32
    return %c0_i32, %c0_i32_0, %c0_i32_1 : i32, i32, i32
  }
  func.func @transform_4(%arg0: i32) -> (i32, i32, i32, i32) {
    %c0_i32 = arith.constant 0 : i32
    %c0_i32_0 = arith.constant 0 : i32
    %c0_i32_1 = arith.constant 0 : i32
    %c0_i32_2 = arith.constant 0 : i32
    %c0_i32_3 = arith.constant 0 : i32
    return %c0_i32, %c0_i32_0, %c0_i32_1, %c0_i32_2 : i32, i32, i32, i32
  }
  func.func @transform_5(%arg0: i32) -> (i32, i32, i32) {
    %c0_i32 = arith.constant 0 : i32
    %c0_i32_0 = arith.constant 0 : i32
    %c0_i32_1 = arith.constant 0 : i32
    %c0_i32_2 = arith.constant 0 : i32
    return %c0_i32, %c0_i32_0, %c0_i32_1 : i32, i32, i32
  }
  func.func @transform_6(%arg0: i32) -> (i32, i32, i32, i32) {
    %c0_i32 = arith.constant 0 : i32
    %c0_i32_0 = arith.constant 0 : i32
    %c0_i32_1 = arith.constant 0 : i32
    %c0_i32_2 = arith.constant 0 : i32
    return %arg0, %c0_i32, %c0_i32_0, %c0_i32_1 : i32, i32, i32, i32
  }
}

module attributes {stable_mosaic.version = 11 : i64} {
  func.func @_decoder_kernel(%arg0: i32, %arg1: memref<1x1x32xf32, #tpu.memory_space<vmem>>, %arg2: memref<32x512xbf16, #tpu.memory_space<vmem>>, %arg3: memref<1x512xf32, #tpu.memory_space<vmem>>, %arg4: memref<6x256x768xbf16, #tpu.memory_space<vmem>>, %arg5: memref<6x3x56x32xbf16, #tpu.memory_space<vmem>>, %arg6: memref<6x1x256xf32, #tpu.memory_space<vmem>>, %arg7: memref<1x4x56x56xf32, #tpu.memory_space<vmem>>) attributes {dimension_semantics = [#tpu.dimension_semantics<parallel>], iteration_bounds = array<i64: 2>, scalar_prefetch = 0 : i64, scratch_operands = 0 : i64, tpu.core_type = #tpu.core_type<tc>, window_params = [{transform_indices = @transform_0, window_bounds = array<i64: 1, 1, 32>}, {pipeline_mode = #tpu.pipeline_mode<synchronous>, transform_indices = @transform_1, window_bounds = array<i64: 32, 512>}, {pipeline_mode = #tpu.pipeline_mode<synchronous>, transform_indices = @transform_2, window_bounds = array<i64: 1, 512>}, {pipeline_mode = #tpu.pipeline_mode<synchronous>, transform_indices = @transform_3, window_bounds = array<i64: 6, 256, 768>}, {pipeline_mode = #tpu.pipeline_mode<synchronous>, transform_indices = @transform_4, window_bounds = array<i64: 6, 3, 56, 32>}, {pipeline_mode = #tpu.pipeline_mode<synchronous>, transform_indices = @transform_5, window_bounds = array<i64: 6, 1, 256>}, {transform_indices = @transform_6, window_bounds = array<i64: 1, 4, 56, 56>}]} {
    %c0 = arith.constant 0 : index
    %c0_0 = arith.constant 0 : index
    %c0_1 = arith.constant 0 : index
    %0 = vector.load %arg1[%c0, %c0_0, %c0_1] : memref<1x1x32xf32, #tpu.memory_space<vmem>>, vector<1x1x32xf32>
    %1 = vector.shape_cast %0 : vector<1x1x32xf32> to vector<1x32xf32>
    %2 = arith.truncf %1 : vector<1x32xf32> to vector<1x32xbf16>
    %c0_2 = arith.constant 0 : index
    %c0_3 = arith.constant 0 : index
    %3 = vector.load %arg2[%c0_2, %c0_3] : memref<32x512xbf16, #tpu.memory_space<vmem>>, vector<32x512xbf16>
    %cst = arith.constant dense<0.000000e+00> : vector<1x512xf32>
    %4 = tpu.matmul %2, %3, %cst {dimension_numbers = #tpu.dot_dimension_numbers<[1], [0], [0], [1], [0, 0, 1, 1], [], []>} : vector<1x32xbf16>, vector<32x512xbf16>, vector<1x512xf32> -> vector<1x512xf32>
    %c0_4 = arith.constant 0 : index
    %c0_5 = arith.constant 0 : index
    %5 = vector.load %arg3[%c0_4, %c0_5] : memref<1x512xf32, #tpu.memory_space<vmem>>, vector<1x512xf32>
    %6 = arith.addf %4, %5 : vector<1x512xf32>
    %7 = vector.extract_strided_slice %6 {offsets = [0, 0], sizes = [1, 256], strides = [1, 1]} : vector<1x512xf32> to vector<1x256xf32>
    %8 = vector.extract_strided_slice %6 {offsets = [0, 256], sizes = [1, 256], strides = [1, 1]} : vector<1x512xf32> to vector<1x256xf32>
    %9 = tpu.iota {dimensions = array<i32: 0>} : vector<2x256xi32>
    %c0_i32 = arith.constant 0 : i32
    %10 = vector.broadcast %c0_i32 : i32 to vector<2x256xi32>
    %11 = arith.cmpi eq, %9, %10 : vector<2x256xi32>
    %12 = vector.shape_cast %7 : vector<1x256xf32> to vector<1x256xf32>
    %13 = vector.broadcast %12 : vector<1x256xf32> to vector<2x256xf32>
    %14 = vector.shape_cast %8 : vector<1x256xf32> to vector<1x256xf32>
    %15 = vector.broadcast %14 : vector<1x256xf32> to vector<2x256xf32>
    %16 = arith.select %11, %13, %15 : vector<2x256xi1>, vector<2x256xf32>
    %cst_6 = arith.constant 0.000000e+00 : f32
    %17 = vector.broadcast %cst_6 : f32 to vector<2x256xf32>
    %18 = arith.cmpf oge, %16, %17 : vector<2x256xf32>
    %cst_7 = arith.constant 0.00999999977 : f32
    %19 = vector.broadcast %cst_7 : f32 to vector<2x256xf32>
    %20 = arith.mulf %19, %16 : vector<2x256xf32>
    %21 = arith.select %18, %16, %20 : vector<2x256xi1>, vector<2x256xf32>
    %22 = arith.truncf %21 : vector<2x256xf32> to vector<2x256xbf16>
    %c0_8 = arith.constant 0 : index
    %c0_9 = arith.constant 0 : index
    %c0_10 = arith.constant 0 : index
    %23 = vector.load %arg4[%c0_8, %c0_9, %c0_10] : memref<6x256x768xbf16, #tpu.memory_space<vmem>>, vector<1x256x768xbf16>
    %24 = vector.shape_cast %23 : vector<1x256x768xbf16> to vector<256x768xbf16>
    %cst_11 = arith.constant dense<0.000000e+00> : vector<2x768xf32>
    %25 = tpu.matmul %22, %24, %cst_11 {dimension_numbers = #tpu.dot_dimension_numbers<[1], [0], [0], [1], [0, 0, 1, 1], [], []>} : vector<2x256xbf16>, vector<256x768xbf16>, vector<2x768xf32> -> vector<2x768xf32>
    %26 = arith.truncf %25 : vector<2x768xf32> to vector<2x768xbf16>
    %c0_12 = arith.constant 0 : index
    %c0_13 = arith.constant 0 : index
    %c0_14 = arith.constant 0 : index
    %27 = vector.load %arg6[%c0_12, %c0_13, %c0_14] : memref<6x1x256xf32, #tpu.memory_space<vmem>>, vector<1x1x256xf32>
    %28 = vector.shape_cast %27 : vector<1x1x256xf32> to vector<1x256xf32>
    %c0_15 = arith.constant 0 : index
    %c0_16 = arith.constant 0 : index
    %c0_17 = arith.constant 0 : index
    %c0_18 = arith.constant 0 : index
    %29 = vector.load %arg5[%c0_15, %c0_16, %c0_17, %c0_18] : memref<6x3x56x32xbf16, #tpu.memory_space<vmem>>, vector<1x1x56x32xbf16>
    %30 = vector.shape_cast %29 : vector<1x1x56x32xbf16> to vector<56x32xbf16>
    %31 = vector.extract_strided_slice %30 {offsets = [0, 0], sizes = [2, 2], strides = [1, 1]} : vector<56x32xbf16> to vector<2x2xbf16>
    %32 = vector.extract_strided_slice %26 {offsets = [0, 0], sizes = [2, 256], strides = [1, 1]} : vector<2x768xbf16> to vector<2x256xbf16>
    %cst_19 = arith.constant dense<0.000000e+00> : vector<2x256xf32>
    %33 = tpu.matmul %31, %32, %cst_19 {dimension_numbers = #tpu.dot_dimension_numbers<[1], [0], [0], [1], [0, 0, 1, 1], [], []>} : vector<2x2xbf16>, vector<2x256xbf16>, vector<2x256xf32> -> vector<2x256xf32>
    %34 = vector.broadcast %28 : vector<1x256xf32> to vector<2x256xf32>
    %35 = arith.addf %34, %33 : vector<2x256xf32>
    %c0_20 = arith.constant 0 : index
    %c1 = arith.constant 1 : index
    %c0_21 = arith.constant 0 : index
    %c0_22 = arith.constant 0 : index
    %36 = vector.load %arg5[%c0_20, %c1, %c0_21, %c0_22] : memref<6x3x56x32xbf16, #tpu.memory_space<vmem>>, vector<1x1x56x32xbf16>
    %37 = vector.shape_cast %36 : vector<1x1x56x32xbf16> to vector<56x32xbf16>
    %38 = vector.extract_strided_slice %37 {offsets = [0, 0], sizes = [2, 2], strides = [1, 1]} : vector<56x32xbf16> to vector<2x2xbf16>
    %39 = vector.extract_strided_slice %26 {offsets = [0, 256], sizes = [2, 256], strides = [1, 1]} : vector<2x768xbf16> to vector<2x256xbf16>
    %cst_23 = arith.constant dense<0.000000e+00> : vector<2x256xf32>
    %40 = tpu.matmul %38, %39, %cst_23 {dimension_numbers = #tpu.dot_dimension_numbers<[1], [0], [0], [1], [0, 0, 1, 1], [], []>} : vector<2x2xbf16>, vector<2x256xbf16>, vector<2x256xf32> -> vector<2x256xf32>
    %41 = arith.addf %35, %40 : vector<2x256xf32>
    %c0_24 = arith.constant 0 : index
    %c2 = arith.constant 2 : index
    %c0_25 = arith.constant 0 : index
    %c0_26 = arith.constant 0 : index
    %42 = vector.load %arg5[%c0_24, %c2, %c0_25, %c0_26] : memref<6x3x56x32xbf16, #tpu.memory_space<vmem>>, vector<1x1x56x32xbf16>
    %43 = vector.shape_cast %42 : vector<1x1x56x32xbf16> to vector<56x32xbf16>
    %44 = vector.extract_strided_slice %43 {offsets = [0, 0], sizes = [2, 2], strides = [1, 1]} : vector<56x32xbf16> to vector<2x2xbf16>
    %45 = vector.extract_strided_slice %26 {offsets = [0, 512], sizes = [2, 256], strides = [1, 1]} : vector<2x768xbf16> to vector<2x256xbf16>
    %cst_27 = arith.constant dense<0.000000e+00> : vector<2x256xf32>
    %46 = tpu.matmul %44, %45, %cst_27 {dimension_numbers = #tpu.dot_dimension_numbers<[1], [0], [0], [1], [0, 0, 1, 1], [], []>} : vector<2x2xbf16>, vector<2x256xbf16>, vector<2x256xf32> -> vector<2x256xf32>
    %47 = arith.addf %41, %46 : vector<2x256xf32>
    %cst_28 = arith.constant 0.000000e+00 : f32
    %48 = vector.broadcast %cst_28 : f32 to vector<2x256xf32>
    %49 = arith.cmpf oge, %47, %48 : vector<2x256xf32>
    %cst_29 = arith.constant 0.00999999977 : f32
    %50 = vector.broadcast %cst_29 : f32 to vector<2x256xf32>
    %51 = arith.mulf %50, %47 : vector<2x256xf32>
    %52 = arith.select %49, %47, %51 : vector<2x256xi1>, vector<2x256xf32>
    %53 = arith.truncf %52 : vector<2x256xf32> to vector<2x256xbf16>
    %c1_30 = arith.constant 1 : index
    %c0_31 = arith.constant 0 : index
    %c0_32 = arith.constant 0 : index
    %54 = vector.load %arg4[%c1_30, %c0_31, %c0_32] : memref<6x256x768xbf16, #tpu.memory_space<vmem>>, vector<1x256x768xbf16>
    %55 = vector.shape_cast %54 : vector<1x256x768xbf16> to vector<256x768xbf16>
    %cst_33 = arith.constant dense<0.000000e+00> : vector<2x768xf32>
    %56 = tpu.matmul %53, %55, %cst_33 {dimension_numbers = #tpu.dot_dimension_numbers<[1], [0], [0], [1], [0, 0, 1, 1], [], []>} : vector<2x256xbf16>, vector<256x768xbf16>, vector<2x768xf32> -> vector<2x768xf32>
    %57 = arith.truncf %56 : vector<2x768xf32> to vector<2x768xbf16>
    %c1_34 = arith.constant 1 : index
    %c0_35 = arith.constant 0 : index
    %c0_36 = arith.constant 0 : index
    %58 = vector.load %arg6[%c1_34, %c0_35, %c0_36] : memref<6x1x256xf32, #tpu.memory_space<vmem>>, vector<1x1x256xf32>
    %59 = vector.shape_cast %58 : vector<1x1x256xf32> to vector<1x256xf32>
    %c1_37 = arith.constant 1 : index
    %c0_38 = arith.constant 0 : index
    %c0_39 = arith.constant 0 : index
    %c0_40 = arith.constant 0 : index
    %60 = vector.load %arg5[%c1_37, %c0_38, %c0_39, %c0_40] : memref<6x3x56x32xbf16, #tpu.memory_space<vmem>>, vector<1x1x56x32xbf16>
    %61 = vector.shape_cast %60 : vector<1x1x56x32xbf16> to vector<56x32xbf16>
    %62 = vector.extract_strided_slice %61 {offsets = [0, 0], sizes = [4, 2], strides = [1, 1]} : vector<56x32xbf16> to vector<4x2xbf16>
    %63 = vector.extract_strided_slice %57 {offsets = [0, 0], sizes = [2, 256], strides = [1, 1]} : vector<2x768xbf16> to vector<2x256xbf16>
    %cst_41 = arith.constant dense<0.000000e+00> : vector<4x256xf32>
    %64 = tpu.matmul %62, %63, %cst_41 {dimension_numbers = #tpu.dot_dimension_numbers<[1], [0], [0], [1], [0, 0, 1, 1], [], []>} : vector<4x2xbf16>, vector<2x256xbf16>, vector<4x256xf32> -> vector<4x256xf32>
    %65 = vector.broadcast %59 : vector<1x256xf32> to vector<4x256xf32>
    %66 = arith.addf %65, %64 : vector<4x256xf32>
    %c1_42 = arith.constant 1 : index
    %c1_43 = arith.constant 1 : index
    %c0_44 = arith.constant 0 : index
    %c0_45 = arith.constant 0 : index
    %67 = vector.load %arg5[%c1_42, %c1_43, %c0_44, %c0_45] : memref<6x3x56x32xbf16, #tpu.memory_space<vmem>>, vector<1x1x56x32xbf16>
    %68 = vector.shape_cast %67 : vector<1x1x56x32xbf16> to vector<56x32xbf16>
    %69 = vector.extract_strided_slice %68 {offsets = [0, 0], sizes = [4, 2], strides = [1, 1]} : vector<56x32xbf16> to vector<4x2xbf16>
    %70 = vector.extract_strided_slice %57 {offsets = [0, 256], sizes = [2, 256], strides = [1, 1]} : vector<2x768xbf16> to vector<2x256xbf16>
    %cst_46 = arith.constant dense<0.000000e+00> : vector<4x256xf32>
    %71 = tpu.matmul %69, %70, %cst_46 {dimension_numbers = #tpu.dot_dimension_numbers<[1], [0], [0], [1], [0, 0, 1, 1], [], []>} : vector<4x2xbf16>, vector<2x256xbf16>, vector<4x256xf32> -> vector<4x256xf32>
    %72 = arith.addf %66, %71 : vector<4x256xf32>
    %c1_47 = arith.constant 1 : index
    %c2_48 = arith.constant 2 : index
    %c0_49 = arith.constant 0 : index
    %c0_50 = arith.constant 0 : index
    %73 = vector.load %arg5[%c1_47, %c2_48, %c0_49, %c0_50] : memref<6x3x56x32xbf16, #tpu.memory_space<vmem>>, vector<1x1x56x32xbf16>
    %74 = vector.shape_cast %73 : vector<1x1x56x32xbf16> to vector<56x32xbf16>
    %75 = vector.extract_strided_slice %74 {offsets = [0, 0], sizes = [4, 2], strides = [1, 1]} : vector<56x32xbf16> to vector<4x2xbf16>
    %76 = vector.extract_strided_slice %57 {offsets = [0, 512], sizes = [2, 256], strides = [1, 1]} : vector<2x768xbf16> to vector<2x256xbf16>
    %cst_51 = arith.constant dense<0.000000e+00> : vector<4x256xf32>
    %77 = tpu.matmul %75, %76, %cst_51 {dimension_numbers = #tpu.dot_dimension_numbers<[1], [0], [0], [1], [0, 0, 1, 1], [], []>} : vector<4x2xbf16>, vector<2x256xbf16>, vector<4x256xf32> -> vector<4x256xf32>
    %78 = arith.addf %72, %77 : vector<4x256xf32>
    %cst_52 = arith.constant 0.000000e+00 : f32
    %79 = vector.broadcast %cst_52 : f32 to vector<4x256xf32>
    %80 = arith.cmpf oge, %78, %79 : vector<4x256xf32>
    %cst_53 = arith.constant 0.00999999977 : f32
    %81 = vector.broadcast %cst_53 : f32 to vector<4x256xf32>
    %82 = arith.mulf %81, %78 : vector<4x256xf32>
    %83 = arith.select %80, %78, %82 : vector<4x256xi1>, vector<4x256xf32>
    %84 = arith.truncf %83 : vector<4x256xf32> to vector<4x256xbf16>
    %c2_54 = arith.constant 2 : index
    %c0_55 = arith.constant 0 : index
    %c0_56 = arith.constant 0 : index
    %85 = vector.load %arg4[%c2_54, %c0_55, %c0_56] : memref<6x256x768xbf16, #tpu.memory_space<vmem>>, vector<1x256x768xbf16>
    %86 = vector.shape_cast %85 : vector<1x256x768xbf16> to vector<256x768xbf16>
    %cst_57 = arith.constant dense<0.000000e+00> : vector<4x768xf32>
    %87 = tpu.matmul %84, %86, %cst_57 {dimension_numbers = #tpu.dot_dimension_numbers<[1], [0], [0], [1], [0, 0, 1, 1], [], []>} : vector<4x256xbf16>, vector<256x768xbf16>, vector<4x768xf32> -> vector<4x768xf32>
    %88 = arith.truncf %87 : vector<4x768xf32> to vector<4x768xbf16>
    %c2_58 = arith.constant 2 : index
    %c0_59 = arith.constant 0 : index
    %c0_60 = arith.constant 0 : index
    %89 = vector.load %arg6[%c2_58, %c0_59, %c0_60] : memref<6x1x256xf32, #tpu.memory_space<vmem>>, vector<1x1x256xf32>
    %90 = vector.shape_cast %89 : vector<1x1x256xf32> to vector<1x256xf32>
    %c2_61 = arith.constant 2 : index
    %c0_62 = arith.constant 0 : index
    %c0_63 = arith.constant 0 : index
    %c0_64 = arith.constant 0 : index
    %91 = vector.load %arg5[%c2_61, %c0_62, %c0_63, %c0_64] : memref<6x3x56x32xbf16, #tpu.memory_space<vmem>>, vector<1x1x56x32xbf16>
    %92 = vector.shape_cast %91 : vector<1x1x56x32xbf16> to vector<56x32xbf16>
    %93 = vector.extract_strided_slice %92 {offsets = [0, 0], sizes = [8, 4], strides = [1, 1]} : vector<56x32xbf16> to vector<8x4xbf16>
    %94 = vector.extract_strided_slice %88 {offsets = [0, 0], sizes = [4, 256], strides = [1, 1]} : vector<4x768xbf16> to vector<4x256xbf16>
    %cst_65 = arith.constant dense<0.000000e+00> : vector<8x256xf32>
    %95 = tpu.matmul %93, %94, %cst_65 {dimension_numbers = #tpu.dot_dimension_numbers<[1], [0], [0], [1], [0, 0, 1, 1], [], []>} : vector<8x4xbf16>, vector<4x256xbf16>, vector<8x256xf32> -> vector<8x256xf32>
    %96 = vector.broadcast %90 : vector<1x256xf32> to vector<8x256xf32>
    %97 = arith.addf %96, %95 : vector<8x256xf32>
    %c2_66 = arith.constant 2 : index
    %c1_67 = arith.constant 1 : index
    %c0_68 = arith.constant 0 : index
    %c0_69 = arith.constant 0 : index
    %98 = vector.load %arg5[%c2_66, %c1_67, %c0_68, %c0_69] : memref<6x3x56x32xbf16, #tpu.memory_space<vmem>>, vector<1x1x56x32xbf16>
    %99 = vector.shape_cast %98 : vector<1x1x56x32xbf16> to vector<56x32xbf16>
    %100 = vector.extract_strided_slice %99 {offsets = [0, 0], sizes = [8, 4], strides = [1, 1]} : vector<56x32xbf16> to vector<8x4xbf16>
    %101 = vector.extract_strided_slice %88 {offsets = [0, 256], sizes = [4, 256], strides = [1, 1]} : vector<4x768xbf16> to vector<4x256xbf16>
    %cst_70 = arith.constant dense<0.000000e+00> : vector<8x256xf32>
    %102 = tpu.matmul %100, %101, %cst_70 {dimension_numbers = #tpu.dot_dimension_numbers<[1], [0], [0], [1], [0, 0, 1, 1], [], []>} : vector<8x4xbf16>, vector<4x256xbf16>, vector<8x256xf32> -> vector<8x256xf32>
    %103 = arith.addf %97, %102 : vector<8x256xf32>
    %c2_71 = arith.constant 2 : index
    %c2_72 = arith.constant 2 : index
    %c0_73 = arith.constant 0 : index
    %c0_74 = arith.constant 0 : index
    %104 = vector.load %arg5[%c2_71, %c2_72, %c0_73, %c0_74] : memref<6x3x56x32xbf16, #tpu.memory_space<vmem>>, vector<1x1x56x32xbf16>
    %105 = vector.shape_cast %104 : vector<1x1x56x32xbf16> to vector<56x32xbf16>
    %106 = vector.extract_strided_slice %105 {offsets = [0, 0], sizes = [8, 4], strides = [1, 1]} : vector<56x32xbf16> to vector<8x4xbf16>
    %107 = vector.extract_strided_slice %88 {offsets = [0, 512], sizes = [4, 256], strides = [1, 1]} : vector<4x768xbf16> to vector<4x256xbf16>
    %cst_75 = arith.constant dense<0.000000e+00> : vector<8x256xf32>
    %108 = tpu.matmul %106, %107, %cst_75 {dimension_numbers = #tpu.dot_dimension_numbers<[1], [0], [0], [1], [0, 0, 1, 1], [], []>} : vector<8x4xbf16>, vector<4x256xbf16>, vector<8x256xf32> -> vector<8x256xf32>
    %109 = arith.addf %103, %108 : vector<8x256xf32>
    %cst_76 = arith.constant 0.000000e+00 : f32
    %110 = vector.broadcast %cst_76 : f32 to vector<8x256xf32>
    %111 = arith.cmpf oge, %109, %110 : vector<8x256xf32>
    %cst_77 = arith.constant 0.00999999977 : f32
    %112 = vector.broadcast %cst_77 : f32 to vector<8x256xf32>
    %113 = arith.mulf %112, %109 : vector<8x256xf32>
    %114 = arith.select %111, %109, %113 : vector<8x256xi1>, vector<8x256xf32>
    %115 = arith.truncf %114 : vector<8x256xf32> to vector<8x256xbf16>
    %c3 = arith.constant 3 : index
    %c0_78 = arith.constant 0 : index
    %c0_79 = arith.constant 0 : index
    %116 = vector.load %arg4[%c3, %c0_78, %c0_79] : memref<6x256x768xbf16, #tpu.memory_space<vmem>>, vector<1x256x768xbf16>
    %117 = vector.shape_cast %116 : vector<1x256x768xbf16> to vector<256x768xbf16>
    %cst_80 = arith.constant dense<0.000000e+00> : vector<8x768xf32>
    %118 = tpu.matmul %115, %117, %cst_80 {dimension_numbers = #tpu.dot_dimension_numbers<[1], [0], [0], [1], [0, 0, 1, 1], [], []>} : vector<8x256xbf16>, vector<256x768xbf16>, vector<8x768xf32> -> vector<8x768xf32>
    %119 = arith.truncf %118 : vector<8x768xf32> to vector<8x768xbf16>
    %c3_81 = arith.constant 3 : index
    %c0_82 = arith.constant 0 : index
    %c0_83 = arith.constant 0 : index
    %120 = vector.load %arg6[%c3_81, %c0_82, %c0_83] : memref<6x1x256xf32, #tpu.memory_space<vmem>>, vector<1x1x256xf32>
    %121 = vector.shape_cast %120 : vector<1x1x256xf32> to vector<1x256xf32>
    %c3_84 = arith.constant 3 : index
    %c0_85 = arith.constant 0 : index
    %c0_86 = arith.constant 0 : index
    %c0_87 = arith.constant 0 : index
    %122 = vector.load %arg5[%c3_84, %c0_85, %c0_86, %c0_87] : memref<6x3x56x32xbf16, #tpu.memory_space<vmem>>, vector<1x1x56x32xbf16>
    %123 = vector.shape_cast %122 : vector<1x1x56x32xbf16> to vector<56x32xbf16>
    %124 = vector.extract_strided_slice %123 {offsets = [0, 0], sizes = [16, 8], strides = [1, 1]} : vector<56x32xbf16> to vector<16x8xbf16>
    %125 = vector.extract_strided_slice %119 {offsets = [0, 0], sizes = [8, 256], strides = [1, 1]} : vector<8x768xbf16> to vector<8x256xbf16>
    %cst_88 = arith.constant dense<0.000000e+00> : vector<16x256xf32>
    %126 = tpu.matmul %124, %125, %cst_88 {dimension_numbers = #tpu.dot_dimension_numbers<[1], [0], [0], [1], [0, 0, 1, 1], [], []>} : vector<16x8xbf16>, vector<8x256xbf16>, vector<16x256xf32> -> vector<16x256xf32>
    %127 = vector.broadcast %121 : vector<1x256xf32> to vector<16x256xf32>
    %128 = arith.addf %127, %126 : vector<16x256xf32>
    %c3_89 = arith.constant 3 : index
    %c1_90 = arith.constant 1 : index
    %c0_91 = arith.constant 0 : index
    %c0_92 = arith.constant 0 : index
    %129 = vector.load %arg5[%c3_89, %c1_90, %c0_91, %c0_92] : memref<6x3x56x32xbf16, #tpu.memory_space<vmem>>, vector<1x1x56x32xbf16>
    %130 = vector.shape_cast %129 : vector<1x1x56x32xbf16> to vector<56x32xbf16>
    %131 = vector.extract_strided_slice %130 {offsets = [0, 0], sizes = [16, 8], strides = [1, 1]} : vector<56x32xbf16> to vector<16x8xbf16>
    %132 = vector.extract_strided_slice %119 {offsets = [0, 256], sizes = [8, 256], strides = [1, 1]} : vector<8x768xbf16> to vector<8x256xbf16>
    %cst_93 = arith.constant dense<0.000000e+00> : vector<16x256xf32>
    %133 = tpu.matmul %131, %132, %cst_93 {dimension_numbers = #tpu.dot_dimension_numbers<[1], [0], [0], [1], [0, 0, 1, 1], [], []>} : vector<16x8xbf16>, vector<8x256xbf16>, vector<16x256xf32> -> vector<16x256xf32>
    %134 = arith.addf %128, %133 : vector<16x256xf32>
    %c3_94 = arith.constant 3 : index
    %c2_95 = arith.constant 2 : index
    %c0_96 = arith.constant 0 : index
    %c0_97 = arith.constant 0 : index
    %135 = vector.load %arg5[%c3_94, %c2_95, %c0_96, %c0_97] : memref<6x3x56x32xbf16, #tpu.memory_space<vmem>>, vector<1x1x56x32xbf16>
    %136 = vector.shape_cast %135 : vector<1x1x56x32xbf16> to vector<56x32xbf16>
    %137 = vector.extract_strided_slice %136 {offsets = [0, 0], sizes = [16, 8], strides = [1, 1]} : vector<56x32xbf16> to vector<16x8xbf16>
    %138 = vector.extract_strided_slice %119 {offsets = [0, 512], sizes = [8, 256], strides = [1, 1]} : vector<8x768xbf16> to vector<8x256xbf16>
    %cst_98 = arith.constant dense<0.000000e+00> : vector<16x256xf32>
    %139 = tpu.matmul %137, %138, %cst_98 {dimension_numbers = #tpu.dot_dimension_numbers<[1], [0], [0], [1], [0, 0, 1, 1], [], []>} : vector<16x8xbf16>, vector<8x256xbf16>, vector<16x256xf32> -> vector<16x256xf32>
    %140 = arith.addf %134, %139 : vector<16x256xf32>
    %cst_99 = arith.constant 0.000000e+00 : f32
    %141 = vector.broadcast %cst_99 : f32 to vector<16x256xf32>
    %142 = arith.cmpf oge, %140, %141 : vector<16x256xf32>
    %cst_100 = arith.constant 0.00999999977 : f32
    %143 = vector.broadcast %cst_100 : f32 to vector<16x256xf32>
    %144 = arith.mulf %143, %140 : vector<16x256xf32>
    %145 = arith.select %142, %140, %144 : vector<16x256xi1>, vector<16x256xf32>
    %146 = arith.truncf %145 : vector<16x256xf32> to vector<16x256xbf16>
    %c4 = arith.constant 4 : index
    %c0_101 = arith.constant 0 : index
    %c0_102 = arith.constant 0 : index
    %147 = vector.load %arg4[%c4, %c0_101, %c0_102] : memref<6x256x768xbf16, #tpu.memory_space<vmem>>, vector<1x256x768xbf16>
    %148 = vector.shape_cast %147 : vector<1x256x768xbf16> to vector<256x768xbf16>
    %cst_103 = arith.constant dense<0.000000e+00> : vector<16x768xf32>
    %149 = tpu.matmul %146, %148, %cst_103 {dimension_numbers = #tpu.dot_dimension_numbers<[1], [0], [0], [1], [0, 0, 1, 1], [], []>} : vector<16x256xbf16>, vector<256x768xbf16>, vector<16x768xf32> -> vector<16x768xf32>
    %150 = arith.truncf %149 : vector<16x768xf32> to vector<16x768xbf16>
    %c4_104 = arith.constant 4 : index
    %c0_105 = arith.constant 0 : index
    %c0_106 = arith.constant 0 : index
    %151 = vector.load %arg6[%c4_104, %c0_105, %c0_106] : memref<6x1x256xf32, #tpu.memory_space<vmem>>, vector<1x1x256xf32>
    %152 = vector.shape_cast %151 : vector<1x1x256xf32> to vector<1x256xf32>
    %c4_107 = arith.constant 4 : index
    %c0_108 = arith.constant 0 : index
    %c0_109 = arith.constant 0 : index
    %c0_110 = arith.constant 0 : index
    %153 = vector.load %arg5[%c4_107, %c0_108, %c0_109, %c0_110] : memref<6x3x56x32xbf16, #tpu.memory_space<vmem>>, vector<1x1x56x32xbf16>
    %154 = vector.shape_cast %153 : vector<1x1x56x32xbf16> to vector<56x32xbf16>
    %155 = vector.extract_strided_slice %154 {offsets = [0, 0], sizes = [32, 16], strides = [1, 1]} : vector<56x32xbf16> to vector<32x16xbf16>
    %156 = vector.extract_strided_slice %150 {offsets = [0, 0], sizes = [16, 256], strides = [1, 1]} : vector<16x768xbf16> to vector<16x256xbf16>
    %cst_111 = arith.constant dense<0.000000e+00> : vector<32x256xf32>
    %157 = tpu.matmul %155, %156, %cst_111 {dimension_numbers = #tpu.dot_dimension_numbers<[1], [0], [0], [1], [0, 0, 1, 1], [], []>} : vector<32x16xbf16>, vector<16x256xbf16>, vector<32x256xf32> -> vector<32x256xf32>
    %158 = vector.broadcast %152 : vector<1x256xf32> to vector<32x256xf32>
    %159 = arith.addf %158, %157 : vector<32x256xf32>
    %c4_112 = arith.constant 4 : index
    %c1_113 = arith.constant 1 : index
    %c0_114 = arith.constant 0 : index
    %c0_115 = arith.constant 0 : index
    %160 = vector.load %arg5[%c4_112, %c1_113, %c0_114, %c0_115] : memref<6x3x56x32xbf16, #tpu.memory_space<vmem>>, vector<1x1x56x32xbf16>
    %161 = vector.shape_cast %160 : vector<1x1x56x32xbf16> to vector<56x32xbf16>
    %162 = vector.extract_strided_slice %161 {offsets = [0, 0], sizes = [32, 16], strides = [1, 1]} : vector<56x32xbf16> to vector<32x16xbf16>
    %163 = vector.extract_strided_slice %150 {offsets = [0, 256], sizes = [16, 256], strides = [1, 1]} : vector<16x768xbf16> to vector<16x256xbf16>
    %cst_116 = arith.constant dense<0.000000e+00> : vector<32x256xf32>
    %164 = tpu.matmul %162, %163, %cst_116 {dimension_numbers = #tpu.dot_dimension_numbers<[1], [0], [0], [1], [0, 0, 1, 1], [], []>} : vector<32x16xbf16>, vector<16x256xbf16>, vector<32x256xf32> -> vector<32x256xf32>
    %165 = arith.addf %159, %164 : vector<32x256xf32>
    %c4_117 = arith.constant 4 : index
    %c2_118 = arith.constant 2 : index
    %c0_119 = arith.constant 0 : index
    %c0_120 = arith.constant 0 : index
    %166 = vector.load %arg5[%c4_117, %c2_118, %c0_119, %c0_120] : memref<6x3x56x32xbf16, #tpu.memory_space<vmem>>, vector<1x1x56x32xbf16>
    %167 = vector.shape_cast %166 : vector<1x1x56x32xbf16> to vector<56x32xbf16>
    %168 = vector.extract_strided_slice %167 {offsets = [0, 0], sizes = [32, 16], strides = [1, 1]} : vector<56x32xbf16> to vector<32x16xbf16>
    %169 = vector.extract_strided_slice %150 {offsets = [0, 512], sizes = [16, 256], strides = [1, 1]} : vector<16x768xbf16> to vector<16x256xbf16>
    %cst_121 = arith.constant dense<0.000000e+00> : vector<32x256xf32>
    %170 = tpu.matmul %168, %169, %cst_121 {dimension_numbers = #tpu.dot_dimension_numbers<[1], [0], [0], [1], [0, 0, 1, 1], [], []>} : vector<32x16xbf16>, vector<16x256xbf16>, vector<32x256xf32> -> vector<32x256xf32>
    %171 = arith.addf %165, %170 : vector<32x256xf32>
    %cst_122 = arith.constant 0.000000e+00 : f32
    %172 = vector.broadcast %cst_122 : f32 to vector<32x256xf32>
    %173 = arith.cmpf oge, %171, %172 : vector<32x256xf32>
    %cst_123 = arith.constant 0.00999999977 : f32
    %174 = vector.broadcast %cst_123 : f32 to vector<32x256xf32>
    %175 = arith.mulf %174, %171 : vector<32x256xf32>
    %176 = arith.select %173, %171, %175 : vector<32x256xi1>, vector<32x256xf32>
    %177 = arith.truncf %176 : vector<32x256xf32> to vector<32x256xbf16>
    %c5 = arith.constant 5 : index
    %c0_124 = arith.constant 0 : index
    %c0_125 = arith.constant 0 : index
    %178 = vector.load %arg4[%c5, %c0_124, %c0_125] : memref<6x256x768xbf16, #tpu.memory_space<vmem>>, vector<1x256x768xbf16>
    %179 = vector.shape_cast %178 : vector<1x256x768xbf16> to vector<256x768xbf16>
    %cst_126 = arith.constant dense<0.000000e+00> : vector<32x768xf32>
    %180 = tpu.matmul %177, %179, %cst_126 {dimension_numbers = #tpu.dot_dimension_numbers<[1], [0], [0], [1], [0, 0, 1, 1], [], []>} : vector<32x256xbf16>, vector<256x768xbf16>, vector<32x768xf32> -> vector<32x768xf32>
    %181 = arith.truncf %180 : vector<32x768xf32> to vector<32x768xbf16>
    %c5_127 = arith.constant 5 : index
    %c0_128 = arith.constant 0 : index
    %c0_129 = arith.constant 0 : index
    %182 = vector.load %arg6[%c5_127, %c0_128, %c0_129] : memref<6x1x256xf32, #tpu.memory_space<vmem>>, vector<1x1x256xf32>
    %183 = vector.shape_cast %182 : vector<1x1x256xf32> to vector<1x256xf32>
    %c5_130 = arith.constant 5 : index
    %c0_131 = arith.constant 0 : index
    %c0_132 = arith.constant 0 : index
    %c0_133 = arith.constant 0 : index
    %184 = vector.load %arg5[%c5_130, %c0_131, %c0_132, %c0_133] : memref<6x3x56x32xbf16, #tpu.memory_space<vmem>>, vector<1x1x56x32xbf16>
    %185 = vector.shape_cast %184 : vector<1x1x56x32xbf16> to vector<56x32xbf16>
    %186 = vector.extract_strided_slice %181 {offsets = [0, 0], sizes = [32, 256], strides = [1, 1]} : vector<32x768xbf16> to vector<32x256xbf16>
    %cst_134 = arith.constant dense<0.000000e+00> : vector<56x256xf32>
    %187 = tpu.matmul %185, %186, %cst_134 {dimension_numbers = #tpu.dot_dimension_numbers<[1], [0], [0], [1], [0, 0, 1, 1], [], []>} : vector<56x32xbf16>, vector<32x256xbf16>, vector<56x256xf32> -> vector<56x256xf32>
    %188 = vector.broadcast %183 : vector<1x256xf32> to vector<56x256xf32>
    %189 = arith.addf %188, %187 : vector<56x256xf32>
    %c5_135 = arith.constant 5 : index
    %c1_136 = arith.constant 1 : index
    %c0_137 = arith.constant 0 : index
    %c0_138 = arith.constant 0 : index
    %190 = vector.load %arg5[%c5_135, %c1_136, %c0_137, %c0_138] : memref<6x3x56x32xbf16, #tpu.memory_space<vmem>>, vector<1x1x56x32xbf16>
    %191 = vector.shape_cast %190 : vector<1x1x56x32xbf16> to vector<56x32xbf16>
    %192 = vector.extract_strided_slice %181 {offsets = [0, 256], sizes = [32, 256], strides = [1, 1]} : vector<32x768xbf16> to vector<32x256xbf16>
    %cst_139 = arith.constant dense<0.000000e+00> : vector<56x256xf32>
    %193 = tpu.matmul %191, %192, %cst_139 {dimension_numbers = #tpu.dot_dimension_numbers<[1], [0], [0], [1], [0, 0, 1, 1], [], []>} : vector<56x32xbf16>, vector<32x256xbf16>, vector<56x256xf32> -> vector<56x256xf32>
    %194 = arith.addf %189, %193 : vector<56x256xf32>
    %c5_140 = arith.constant 5 : index
    %c2_141 = arith.constant 2 : index
    %c0_142 = arith.constant 0 : index
    %c0_143 = arith.constant 0 : index
    %195 = vector.load %arg5[%c5_140, %c2_141, %c0_142, %c0_143] : memref<6x3x56x32xbf16, #tpu.memory_space<vmem>>, vector<1x1x56x32xbf16>
    %196 = vector.shape_cast %195 : vector<1x1x56x32xbf16> to vector<56x32xbf16>
    %197 = vector.extract_strided_slice %181 {offsets = [0, 512], sizes = [32, 256], strides = [1, 1]} : vector<32x768xbf16> to vector<32x256xbf16>
    %cst_144 = arith.constant dense<0.000000e+00> : vector<56x256xf32>
    %198 = tpu.matmul %196, %197, %cst_144 {dimension_numbers = #tpu.dot_dimension_numbers<[1], [0], [0], [1], [0, 0, 1, 1], [], []>} : vector<56x32xbf16>, vector<32x256xbf16>, vector<56x256xf32> -> vector<56x256xf32>
    %199 = arith.addf %194, %198 : vector<56x256xf32>
    %200 = vector.extract_strided_slice %199 {offsets = [0, 0], sizes = [56, 56], strides = [1, 1]} : vector<56x256xf32> to vector<56x56xf32>
    %c0_145 = arith.constant 0 : index
    %c0_146 = arith.constant 0 : index
    %c0_147 = arith.constant 0 : index
    %c0_148 = arith.constant 0 : index
    %201 = vector.load %arg7[%c0_145, %c0_146, %c0_147, %c0_148] : memref<1x4x56x56xf32, #tpu.memory_space<vmem>>, vector<1x1x56x56xf32>
    %202 = vector.shape_cast %201 : vector<1x1x56x56xf32> to vector<56x56xf32>
    %203 = vector.shape_cast %200 : vector<56x56xf32> to vector<1x1x56x56xf32>
    tpu.vector_store %arg7[%c0_145, %c0_146, %c0_147, %c0_148], %203 {strides = array<i32>} : memref<1x4x56x56xf32, #tpu.memory_space<vmem>>, vector<1x1x56x56xf32>,
    %204 = vector.extract_strided_slice %199 {offsets = [0, 56], sizes = [56, 56], strides = [1, 1]} : vector<56x256xf32> to vector<56x56xf32>
    %c0_149 = arith.constant 0 : index
    %c1_150 = arith.constant 1 : index
    %c0_151 = arith.constant 0 : index
    %c0_152 = arith.constant 0 : index
    %205 = vector.load %arg7[%c0_149, %c1_150, %c0_151, %c0_152] : memref<1x4x56x56xf32, #tpu.memory_space<vmem>>, vector<1x1x56x56xf32>
    %206 = vector.shape_cast %205 : vector<1x1x56x56xf32> to vector<56x56xf32>
    %207 = vector.shape_cast %204 : vector<56x56xf32> to vector<1x1x56x56xf32>
    tpu.vector_store %arg7[%c0_149, %c1_150, %c0_151, %c0_152], %207 {strides = array<i32>} : memref<1x4x56x56xf32, #tpu.memory_space<vmem>>, vector<1x1x56x56xf32>,
    %208 = vector.extract_strided_slice %199 {offsets = [0, 112], sizes = [56, 56], strides = [1, 1]} : vector<56x256xf32> to vector<56x56xf32>
    %c0_153 = arith.constant 0 : index
    %c2_154 = arith.constant 2 : index
    %c0_155 = arith.constant 0 : index
    %c0_156 = arith.constant 0 : index
    %209 = vector.load %arg7[%c0_153, %c2_154, %c0_155, %c0_156] : memref<1x4x56x56xf32, #tpu.memory_space<vmem>>, vector<1x1x56x56xf32>
    %210 = vector.shape_cast %209 : vector<1x1x56x56xf32> to vector<56x56xf32>
    %211 = vector.shape_cast %208 : vector<56x56xf32> to vector<1x1x56x56xf32>
    tpu.vector_store %arg7[%c0_153, %c2_154, %c0_155, %c0_156], %211 {strides = array<i32>} : memref<1x4x56x56xf32, #tpu.memory_space<vmem>>, vector<1x1x56x56xf32>,
    %212 = vector.extract_strided_slice %199 {offsets = [0, 168], sizes = [56, 56], strides = [1, 1]} : vector<56x256xf32> to vector<56x56xf32>
    %c0_157 = arith.constant 0 : index
    %c3_158 = arith.constant 3 : index
    %c0_159 = arith.constant 0 : index
    %c0_160 = arith.constant 0 : index
    %213 = vector.load %arg7[%c0_157, %c3_158, %c0_159, %c0_160] : memref<1x4x56x56xf32, #tpu.memory_space<vmem>>, vector<1x1x56x56xf32>
    %214 = vector.shape_cast %213 : vector<1x1x56x56xf32> to vector<56x56xf32>
    %215 = vector.shape_cast %212 : vector<56x56xf32> to vector<1x1x56x56xf32>
    tpu.vector_store %arg7[%c0_157, %c3_158, %c0_159, %c0_160], %215 {strides = array<i32>} : memref<1x4x56x56xf32, #tpu.memory_space<vmem>>, vector<1x1x56x56xf32>,
    return
  }
  func.func @transform_0(%arg0: i32) -> (i32, i32, i32) {
    %c0_i32 = arith.constant 0 : i32
    %c0_i32_0 = arith.constant 0 : i32
    %c0_i32_1 = arith.constant 0 : i32
    return %arg0, %c0_i32, %c0_i32_0 : i32, i32, i32
  }
  func.func @transform_1(%arg0: i32) -> (i32, i32) {
    %c0_i32 = arith.constant 0 : i32
    %c0_i32_0 = arith.constant 0 : i32
    %c0_i32_1 = arith.constant 0 : i32
    return %c0_i32, %c0_i32_0 : i32, i32
  }
  func.func @transform_2(%arg0: i32) -> (i32, i32) {
    %c0_i32 = arith.constant 0 : i32
    %c0_i32_0 = arith.constant 0 : i32
    %c0_i32_1 = arith.constant 0 : i32
    return %c0_i32, %c0_i32_0 : i32, i32
  }
  func.func @transform_3(%arg0: i32) -> (i32, i32, i32) {
    %c0_i32 = arith.constant 0 : i32
    %c0_i32_0 = arith.constant 0 : i32
    %c0_i32_1 = arith.constant 0 : i32
    %c0_i32_2 = arith.constant 0 : i32
    return %c0_i32, %c0_i32_0, %c0_i32_1 : i32, i32, i32
  }
  func.func @transform_4(%arg0: i32) -> (i32, i32, i32, i32) {
    %c0_i32 = arith.constant 0 : i32
    %c0_i32_0 = arith.constant 0 : i32
    %c0_i32_1 = arith.constant 0 : i32
    %c0_i32_2 = arith.constant 0 : i32
    %c0_i32_3 = arith.constant 0 : i32
    return %c0_i32, %c0_i32_0, %c0_i32_1, %c0_i32_2 : i32, i32, i32, i32
  }
  func.func @transform_5(%arg0: i32) -> (i32, i32, i32) {
    %c0_i32 = arith.constant 0 : i32
    %c0_i32_0 = arith.constant 0 : i32
    %c0_i32_1 = arith.constant 0 : i32
    %c0_i32_2 = arith.constant 0 : i32
    return %c0_i32, %c0_i32_0, %c0_i32_1 : i32, i32, i32
  }
  func.func @transform_6(%arg0: i32) -> (i32, i32, i32, i32) {
    %c0_i32 = arith.constant 0 : i32
    %c0_i32_0 = arith.constant 0 : i32
    %c0_i32_1 = arith.constant 0 : i32
    %c0_i32_2 = arith.constant 0 : i32
    return %arg0, %c0_i32, %c0_i32_0, %c0_i32_1 : i32, i32, i32, i32
  }
}

</mosaic_0001>

<bundles_post_ra>
// kernel: _forward_impl.1
= control target key start
LH: loop header
LB: loop body
LE: loop exit
PB: predicated region body
PF: predicated region fallthrough
CT: control target
= control target key end

     0   :  { %11 = vsyncpa [#allocation3], 0  ;;  %s9211_s0 = inlined_call_operand.hbm [shape: f32[2,1,32], index: 0, kind: input, shape index: {}]   ;;  %s9212_s1 = inlined_call_operand.hbm [shape: bf16[32,512], index: 1, kind: input, shape index: {}]   ;;  %s9213_s2 = inlined_call_operand.hbm [shape: f32[1,512], index: 2, kind: input, shape index: {}]   ;;  %s9214_s3 = inlined_call_operand.hbm [shape: bf16[6,256,768], index: 3, kind: input, shape index: {}]   ;;  %s9215_s4 = inlined_call_operand.vmem [shape: bf16[6,3,56,32], index: 4, kind: input, shape index: {}]   ;;  %s9216_s5 = inlined_call_operand.hbm [shape: f32[6,1,256], index: 5, kind: input, shape index: {}]   ;;  %s9217_s6 = inlined_call_operand.hbm [shape: f32[2,4,56,56], index: 6, kind: output, shape index: {}]  }
   0x1   :  { %13 = vsyncpa [#allocation3 + $0x1], 0 }
   0x2   :  { %14 = vsyncpa [#allocation6], 0 }
   0x3   :  { %15 = vsyncpa [#allocation9], 0 }
   0x4   :  { %16 = vsyncpa [#allocation4], 0 }
   0x5   :  { %18 = vsyncpa [#allocation4 + $0x1], 0  ;;  %s8597_s21 = smov 0   ;;  %s8599_s22 = smov 0  }
   0x6   :  { %s8601_s23 = smov 0   ;;  %s8603_s24 = smov 0  }
   0x7 LB: > { %s8544_s25 = smov [#allocation5]   ;;  %s8618_s27 = sadd.s32 4294967295, %s8542_s24   ;;  %s8542_s24 = sphi %s8603_s24, %s9241_s24   ;;  %s8538_s23 = sphi %s8601_s23, %s9240_s23   ;;  %s8534_s22 = sphi %s8599_s22, %s9239_s22   ;;  %s8530_s21 = sphi %s8597_s21, %s9238_s21  }
   0x8   : > { %s198_s26 = sshll.u32 %s8544_s25, 4  ;;  %p6486_p0 = scmp.ge.s32.totalorder %s8542_s24, 1  ;;  %s8623_s26 = int_to_ptr.vmem [resolvable:$true] %s198_s26 }
   0x9   : > { %p9218_p1 = scmp.eq.s32.totalorder %s8618_s27, 0  ;;  %p186_p2 = scmp.lt.s32.totalorder %s8542_s24, 3 }
   0xa   : > { %s8545_s29 = smov [#allocation8]   ;;  %s8546_s8 = smov [#allocation7]  }
   0xb   : > { %p8625_p3 = pnand %p6486_p0, %p186_p2  ;;  %s222_s30 = sshll.u32 %s8545_s29, 4  ;;  %s8638_s30 = int_to_ptr.vmem [resolvable:$true] %s222_s30 }
   0xc   : > { %s8640_s9 = sshll.u32 %s8546_s8, 4  ;;  %s8326_s12 = scalar_lea.hbm %s9212_s1, 1024  ;;  %s213_s9 = int_to_ptr.vmem [resolvable:$true] %s8640_s9 }
   0xd   : > { %s9221_s28 = scalar_select %p8625_p3, 1, 0 }
   0xe   : > { %p7350_p5 = pneg %p8625_p3  ;;  %p8327_p7 = scmp.ne.s32.totalorder %s9212_s1, %s8326_s12 }
   0xf   : > { %p8333_p11 = scmp.lt.u32.totalorder %s8326_s12, %s9212_s1 }
  0x10   : > { %p8634_p6 = pnand %p7350_p5, %p9218_p1 }
  0x12   : > { %p8650_p8 = pneg %p8634_p6 }
  0x14   : > { %p8329_p9 = pnand %p8650_p8, %p8327_p7 }
  0x16   : > { %p8330_p10 = pneg %p8329_p9 }
  0x18   : > { %p8335_p12 = pnand %p8333_p11, %p8330_p10 }
  0x1a   : > { %8338 = shalt.err (!%p8335_p12)
}
  0x1b   : > { %s8339_s18 = scalar_lea.vmem %s8623_s26, 1024  ;;  %p8347_p5 = scmp.lt.s32.totalorder %s8623_s26, %s8623_s26 }
  0x1c   : > { %p8340_p13 = scmp.ne.s32.totalorder %s8623_s26, %s8339_s18  ;;  %p8348_p4 = scmp.lt.s32.totalorder %s8339_s18, %s8339_s18 }
  0x1e   : > { %p8342_p0 = pnand %p8340_p13, %p8650_p8  ;;  %p8349_p7 = por %p8348_p4, %p8347_p5 }
  0x20   : > { %p8343_p2 = pneg %p8342_p0 }
  0x22   : > { %p8350_p9 = pnand %p8349_p7, %p8343_p2 }
  0x24   : > { %8353 = shalt.err (!%p8350_p9)
}
  0x25   : > { %s8547_s19 = smov 256   ;;  %s8548_s20 = smov 16  }
  0x26   : > { %7353 = dma.hbm_to_vmem [thread:$0]  (!%p8634_p6), %s9212_s1, 1024, %s8623_s26, [#allocation6], %s8547_s19, %s8547_s19, %s8548_s20  }
  0x27   : > { %s8354_s11 = scalar_lea.hbm %s9214_s3, 73728 }
  0x28   : > { %p8355_p4 = scmp.ne.s32.totalorder %s9214_s3, %s8354_s11  ;;  %p8361_p12 = scmp.lt.u32.totalorder %s8354_s11, %s9214_s3 }
  0x2a   : > { %p8357_p10 = pnand %p8355_p4, %p8650_p8 }
  0x2c   : > { %p8358_p11 = pneg %p8357_p10 }
  0x2e   : > { %p8363_p13 = pnand %p8361_p12, %p8358_p11 }
  0x30   : > { %8366 = shalt.err (!%p8363_p13)
}
  0x31   : > { %s8367_s26 = scalar_lea.vmem %s8638_s30, 73728  ;;  %p8375_p7 = scmp.lt.s32.totalorder %s8638_s30, %s8638_s30 }
  0x32   : > { %p8368_p0 = scmp.ne.s32.totalorder %s8638_s30, %s8367_s26  ;;  %p8376_p9 = scmp.lt.s32.totalorder %s8367_s26, %s8367_s26 }
  0x34   : > { %p8370_p2 = pnand %p8368_p0, %p8650_p8  ;;  %p8377_p4 = por %p8376_p9, %p8375_p7 }
  0x36   : > { %p8371_p5 = pneg %p8370_p2 }
  0x38   : > { %p8378_p10 = pnand %p8377_p4, %p8371_p5 }
  0x3a   : > { %8381 = shalt.err (!%p8378_p10)
}
  0x3b   : > { %s8549_s17 = smov 384   ;;  %s8550_s18 = smov 24  }
  0x3c   : > { %7359 = dma.hbm_to_vmem [thread:$0]  (!%p8634_p6), %s9214_s3, 73728, %s8638_s30, [#allocation9], %s8549_s17, %s8549_s17, %s8550_s18  }
  0x3d   : > { %s8382_s8 = scalar_lea.hbm %s9213_s2, 64 }
  0x3e   : > { %p8383_p11 = scmp.ne.s32.totalorder %s9213_s2, %s8382_s8  ;;  %p8389_p0 = scmp.lt.u32.totalorder %s8382_s8, %s9213_s2 }
  0x40   : > { %p8385_p12 = pnand %p8383_p11, %p8650_p8 }
  0x42   : > { %p8386_p13 = pneg %p8385_p12 }
  0x44   : > { %p8391_p2 = pnand %p8389_p0, %p8386_p13 }
  0x46   : > { %8394 = shalt.err (!%p8391_p2)
}
  0x47   : > { %s8395_s14 = scalar_lea.vmem %s213_s9, 64  ;;  %p8403_p4 = scmp.lt.s32.totalorder %s213_s9, %s213_s9 }
  0x48   : > { %p8396_p5 = scmp.ne.s32.totalorder %s213_s9, %s8395_s14  ;;  %p8404_p10 = scmp.lt.s32.totalorder %s8395_s14, %s8395_s14 }
  0x4a   : > { %p8398_p7 = pnand %p8396_p5, %p8650_p8  ;;  %p8405_p1 = por %p8404_p10, %p8403_p4 }
  0x4c   : > { %p8399_p9 = pneg %p8398_p7 }
  0x4e   : > { %p8406_p3 = pnand %p8405_p1, %p8399_p9 }
  0x50   : > { %8409 = shalt.err (!%p8406_p3)
}
  0x51   : > { %7356 = dma.hbm_to_vmem [thread:$0]  (!%p8634_p6), %s9213_s2, 64, %s213_s9, [#allocation6]  }
  0x52   : > { %s8551_s26 = smov [#allocation10]   ;;  %s8410_s20 = scalar_lea.hbm %s9216_s5, 192 }
  0x53   : > { %s238_s17 = sshll.u32 %s8551_s26, 4  ;;  %p8411_p11 = scmp.ne.s32.totalorder %s9216_s5, %s8410_s20  ;;  %s239_s17 = int_to_ptr.vmem [resolvable:$true] %s238_s17 }
  0x54   : > { %p8417_p12 = scmp.lt.u32.totalorder %s8410_s20, %s9216_s5 }
  0x55   : > { %p8413_p1 = pnand %p8411_p11, %p8650_p8 }
  0x57   : > { %p8414_p3 = pneg %p8413_p1 }
  0x59   : > { %p8419_p13 = pnand %p8417_p12, %p8414_p3 }
  0x5b   : > { %8422 = shalt.err (!%p8419_p13)
}
  0x5c   : > { %s8423_s9 = scalar_lea.vmem %s239_s17, 192  ;;  %p8431_p7 = scmp.lt.s32.totalorder %s239_s17, %s239_s17 }
  0x5d   : > { %p8424_p0 = scmp.ne.s32.totalorder %s239_s17, %s8423_s9  ;;  %p8432_p9 = scmp.lt.s32.totalorder %s8423_s9, %s8423_s9 }
  0x5f   : > { %p8426_p2 = pnand %p8424_p0, %p8650_p8  ;;  %p8433_p4 = por %p8432_p9, %p8431_p7 }
  0x61   : > { %p8427_p5 = pneg %p8426_p2 }
  0x63   : > { %p8434_p10 = pnand %p8433_p4, %p8427_p5 }
  0x65   : > { %8437 = shalt.err (!%p8434_p10)
}
  0x66   : > { %s8552_s11 = smov 32   ;;  %s8553_s15 = smov 2  }
  0x67   : > { %7362 = dma.hbm_to_vmem [thread:$0]  (!%p8634_p6), %s9216_s5, 192, %s239_s17, [#allocation9], %s8552_s11, %s8552_s11, %s8553_s15  }
  0x68   : > { %s6485_s14 = sadd.s32 4294967294, %s8542_s24   ;;  %s8733_s30 = sadd.s32 1, %s8542_s24  }
  0x69   : > { %s28_s16 = ssub.s32 %s8542_s24, %s8733_s30  ;;  %s31_s26 = sadd.s32 1, %s8538_s23 }
  0x6a   : > { %p29_p8 = scmp.eq.s32.totalorder %s28_s16, 0  ;;  %p38_p11 = scmp.ne.s32.totalorder %s8538_s23, %s8534_s22 }
  0x6b   : > { %p39_p1 = scmp.eq.s32.totalorder %s8542_s24, 0  ;;  %p44_p3 = scmp.ne.s32.totalorder %s8534_s22, %s8530_s21 }
  0x6c   : > { %s8744_s18 = scalar_select %p29_p8, %s8538_s23, %s31_s26  }
  0x6d   : > { %p8746_p12 = por %p39_p1, %p38_p11  ;;  %p9225_p13 = scmp.eq.s32.totalorder %s8618_s27, 0 }
  0x6e   : > { %p173_p0 = scmp.eq.s32.totalorder %s8618_s27, 1  ;;  %p179_p2 = scmp.eq.s32.totalorder %s6485_s14, 1 }
  0x6f   : > { %p8752_p6 = por %p9225_p13, %p44_p3  ;;  %p7375_p5 = scmp.lt.s32.totalorder %s8542_s24, 2 }
  0x70   : > { %s252_s19 = sand.u32 1, %s8538_s23   ;;  %p8759_p7 = por %p173_p0, %p38_p11 }
  0x71   : > { %p8763_p9 = por %p179_p2, %p44_p3  ;;  %s6492_s29 = sshll.u32 %s8542_s24, 4 }
  0x72   : > { %s9227_s20 = scalar_select %p8759_p7, 1, 0 }
  0x73   : > { %s9228_s25 = scalar_select %p8763_p9, 1, 0 }
  0x74   : > { %s255_s8 = scalar_lea.vmem [#allocation2], %s252_s19  ;;  %s8771_s15 = scalar_lea.hbm %s9211_s0, %s6492_s29 }
  0x75   : > { %s262_s10 = sshll.u32 %s255_s8, 4  ;;  %p8777_p4 = pnand %p7375_p5, %p8746_p12  ;;  %s8773_s10 = int_to_ptr.vmem [resolvable:$true] %s262_s10 }
  0x76   : > { %s253_s13 = scalar_lea.sflag [#allocation3], %s252_s19  ;;  %s8438_s14 = scalar_lea.hbm %s8771_s15, 16 }
  0x77   : > { %p8439_p10 = scmp.ne.s32.totalorder %s8771_s15, %s8438_s14  ;;  %p8440_p8 = pneg %p8777_p4 }
  0x78   : > { %s8443_s29 = scalar_lea.hbm %s9211_s0, 32  ;;  %p8444_p3 = scmp.lt.u32.totalorder %s8771_s15, %s9211_s0 }
  0x79   : > { %p8441_p11 = pnand %p8440_p8, %p8439_p10  ;;  %p8445_p12 = scmp.lt.u32.totalorder %s8443_s29, %s8438_s14 }
  0x7a   : > { %p8447_p0 = scmp.lt.u32.totalorder %s8438_s14, %s8771_s15 }
  0x7b   : > { %p8442_p1 = pneg %p8441_p11  ;;  %p8446_p13 = por %p8445_p12, %p8444_p3 }
  0x7d   : > { %p8448_p2 = por %p8447_p0, %p8446_p13 }
  0x7f   : > { %p8449_p5 = pnand %p8448_p2, %p8442_p1 }
  0x81   : > { %8452 = shalt.err (!%p8449_p5)
}
  0x82   : > { %s8453_s19 = scalar_lea.vmem %s8773_s10, 16  ;;  %s8554_s9 = smov [#allocation2]  }
  0x83   : > { %p8454_p10 = scmp.ne.s32.totalorder %s8773_s10, %s8453_s19  ;;  %s8458_s11 = sshll.u32 %s8554_s9, 4  ;;  %s8459_s11 = int_to_ptr.vmem [resolvable:$false] %s8458_s11 }
  0x84   : > { %s8460_s16 = scalar_lea.vmem %s8459_s11, 32  ;;  %p8461_p7 = scmp.lt.s32.totalorder %s8773_s10, %s8459_s11 }
  0x85   : > { %p8456_p11 = pnand %p8454_p10, %p8440_p8  ;;  %p8462_p3 = scmp.lt.s32.totalorder %s8460_s16, %s8453_s19 }
  0x87   : > { %p8457_p9 = pneg %p8456_p11  ;;  %p8463_p12 = por %p8462_p3, %p8461_p7 }
  0x89   : > { %p8464_p13 = pnand %p8463_p12, %p8457_p9 }
  0x8b   : > { %8467 = shalt.err (!%p8464_p13)
}
  0x8c   : > { %7366 = dma.hbm_to_vmem [thread:$0]  (!%p8777_p4), %s8771_s15, 16, %s8773_s10, %s253_s13  }
  0x8d   : > { %p9230_p1 = scmp.ne.s32.totalorder %s9221_s28, 0 }
  0x8e   : > { %s8809_s14 = sand.u32 (!%p9230_p1), 1, %s8534_s22  }
  0x8f   : > { %271 = sbr.rel (%p9230_p1) target bundleno = 3607 (0xe17), region = 44  ;;  %s274_s26 = scalar_lea.sflag (!%p9230_p1), [#allocation3], %s8809_s14 }
  0x90   : > { %s276_s29 = scalar_lea.vmem (!%p9230_p1), [#allocation2], %s8809_s14 }
  0x96   : > { %8513 = dma.done.wait (%p8752_p6), %s274_s26, 16  }
  0x97   : > { %8515 = vsyncadd (%p8752_p6), %s274_s26, 4294967280  ;;  %p9231_p7 = scmp.eq.s32.totalorder %s8618_s27, 0 }
  0x99   : > { %8517 = dma.done.wait (%p9231_p7), [#allocation6], 1088   ;;  %p9232_p9 = pmov %p9231_p7 }
  0x9a   : > { %p9233_p4 = pmov %p9231_p7 }
  0x9b   : > { %8519 = vsyncadd (%p9232_p9), [#allocation6], 4294966208 }
  0x9c   : > { %8521 = dma.done.wait (%p9233_p4), [#allocation9], 73920   ;;  %p9234_p8 = pmov %p9233_p4 }
  0x9d   : > { %v8555_v0 = vmov 0   ;;  %v7429_v1 = vld [vmem:[#allocation5 + $0x4] ss:$16 sps:$4 sm:$0xff]   ;;  %v7431_v2 = vld [vmem:[#allocation5 + $0xc] ss:$16 sps:$4 sm:$0xff]   ;;  %vm393_vm0 = vcmask 261120  }
  0x9e   : > { %8523 = vsyncadd (%p9234_p8), [#allocation9], 4294893376  ;;  %429 = vmatprep.mubr.bf16.mxu0 %v8555_v0  ;;  %470 = vmatprep.mubr.bf16.mxu1 %v8555_v0  ;;  %v7433_v3 = vld [vmem:[#allocation5] ss:$16 sps:$4 sm:$0xff]   ;;  %v7434_v4 = vld [vmem:[#allocation5 + $0x8] ss:$16 sps:$4 sm:$0xff]  }
  0x9f   : > { %397 = vmatprep.subr.bf16.mxu0 %v7429_v1  ;;  %438 = vmatprep.subr.bf16.mxu1 %v7431_v2  ;;  %v7435_v5 = vld [vmem:[#allocation5 + $0x24] ss:$16 sps:$4 sm:$0xff]   ;;  %v7437_v6 = vld [vmem:[#allocation5 + $0x2c] ss:$16 sps:$4 sm:$0xff]   ;;  %v7439_v7 = vld [vmem:[#allocation5 + $0x20] ss:$16 sps:$4 sm:$0xff]  }
  0xa0   : > { %398 = vmatpush1.bf16.msra.mxu0 %v7433_v3  ;;  %439 = vmatpush1.bf16.msra.mxu1 %v7434_v4  ;;  %v7440_v8 = vld [vmem:[#allocation5 + $0x28] ss:$16 sps:$4 sm:$0xff]   ;;  %v321_v9 = vld [vmem:[%s276_s29] sm:$0x1]  ;;  %v7444_v13 = vld [vmem:[#allocation8 + $0x8] ss:$24 sps:$4 sm:$0xff]  }
  0xa1   : > { %399 = vmatprep.subr.bf16.mxu0 %v7435_v5  ;;  %440 = vmatprep.subr.bf16.mxu1 %v7437_v6  ;;  %v7441_v10 = vld [vmem:[#allocation8] ss:$24 sps:$4 sm:$0xff]   ;;  %v7443_v11 = vld [vmem:[#allocation8 + $0x4] ss:$24 sps:$4 sm:$0xff]   ;;  %v322_v12 = vpack.c.bf16 %v321_v9, %v321_v9  ;;  %v7449_v15 = vld [vmem:[#allocation8 + $0x34] ss:$24 sps:$4 sm:$0xff]  }
  0xa2   : > { %v7446_v14 = vld [vmem:[#allocation8 + $0xc] ss:$24 sps:$4 sm:$0xff]   ;;  %v7452_v16 = vld [vmem:[#allocation8 + $0x3c] ss:$24 sps:$4 sm:$0xff]   ;;  %v7447_v17 = vld [vmem:[#allocation8 + $0x30] ss:$24 sps:$4 sm:$0xff]  }
  0xa3   : > { %v7450_v18 = vld [vmem:[#allocation8 + $0x38] ss:$24 sps:$4 sm:$0xff]   ;;  %v7455_v19 = vld [vmem:[#allocation8 + $0x64] ss:$24 sps:$4 sm:$0xff]   ;;  %v7456_v22 = vld [vmem:[#allocation8 + $0x68] ss:$24 sps:$4 sm:$0xff]  }
  0xa4   : > { %400 = vmatpush1.bf16.msra.mxu0 %v7439_v7  ;;  %441 = vmatpush1.bf16.msra.mxu1 %v7440_v8  ;;  %v7458_v20 = vld [vmem:[#allocation8 + $0x6c] ss:$24 sps:$4 sm:$0xff]   ;;  %v7453_v21 = vld [vmem:[#allocation8 + $0x60] ss:$24 sps:$4 sm:$0xff]   ;;  %v7464_v24 = vld [vmem:[#allocation8 + $0x9c] ss:$24 sps:$4 sm:$0xff]  }
  0xa5   : > { %1084 = vmatprep.subr.bf16.mxu0 %v7443_v11  ;;  %1125 = vmatprep.subr.bf16.mxu1 %v7446_v14  ;;  %v7461_v23 = vld [vmem:[#allocation8 + $0x94] ss:$24 sps:$4 sm:$0xff]   ;;  %v7459_v25 = vld [vmem:[#allocation8 + $0x90] ss:$24 sps:$4 sm:$0xff]   ;;  %v7467_v27 = vld [vmem:[#allocation8 + $0xc4] ss:$24 sps:$4 sm:$0xff]  }
  0xa6   : > { %v7462_v26 = vld [vmem:[#allocation8 + $0x98] ss:$24 sps:$4 sm:$0xff]   ;;  %v7470_v28 = vld [vmem:[#allocation8 + $0xcc] ss:$24 sps:$4 sm:$0xff]   ;;  %v7468_v30 = vld [vmem:[#allocation8 + $0xc8] ss:$24 sps:$4 sm:$0xff]  }
  0xa7   : > { %6506 = vmatmul.mubr.msk.bf16.vlgmr.msra.gmra.mrb[0].mxu0 %vm393_vm0, %v322_v12  ;;  %6507 = vmatmul.mubr.msk.bf16.vlgmr.msra.gmra.mrb[0].mxu1 %vm393_vm0, %v322_v12  ;;  %v7465_v29 = vld [vmem:[#allocation8 + $0xc0] ss:$24 sps:$4 sm:$0xff]   ;;  %v7473_v31 = vld [vmem:[#allocation8 + $0xf4] ss:$24 sps:$4 sm:$0xff]   ;;  %v7471_v33 = vld [vmem:[#allocation8 + $0xf0] ss:$24 sps:$4 sm:$0xff]  }
  0xa8   : > { %1085 = vmatpush1.bf16.msra.mxu0 %v7441_v10  ;;  %1126 = vmatpush1.bf16.msra.mxu1 %v7444_v13  ;;  %v7476_v32 = vld [vmem:[#allocation8 + $0xfc] ss:$24 sps:$4 sm:$0xff]   ;;  %v7474_v34 = vld [vmem:[#allocation8 + $0xf8] ss:$24 sps:$4 sm:$0xff]   ;;  %v7482_v36 = vld [vmem:[#allocation8 + $0x12c] ss:$24 sps:$4 sm:$0xff]   ;;  %v373_v13 = vlaneseq }
  0xa9   : > { %1086 = vmatprep.subr.bf16.mxu0 %v7449_v15  ;;  %1127 = vmatprep.subr.bf16.mxu1 %v7452_v16  ;;  %v7479_v35 = vld [vmem:[#allocation8 + $0x124] ss:$24 sps:$4 sm:$0xff]   ;;  %v7477_v37 = vld [vmem:[#allocation8 + $0x120] ss:$24 sps:$4 sm:$0xff]   ;;  %v7485_v39 = vld [vmem:[#allocation8 + $0x154] ss:$24 sps:$4 sm:$0xff]  }
  0xaa   : > { %v7480_v38 = vld [vmem:[#allocation8 + $0x128] ss:$24 sps:$4 sm:$0xff]   ;;  %v7488_v40 = vld [vmem:[#allocation8 + $0x15c] ss:$24 sps:$4 sm:$0xff]   ;;  %v7486_v42 = vld [vmem:[#allocation8 + $0x158] ss:$24 sps:$4 sm:$0xff]  }
  0xab   : > { %v7483_v41 = vld [vmem:[#allocation8 + $0x150] ss:$24 sps:$4 sm:$0xff]   ;;  %v7491_v43 = vld [vmem:[#allocation8 + $0x184] ss:$24 sps:$4 sm:$0xff]   ;;  %v7489_v45 = vld [vmem:[#allocation8 + $0x180] ss:$24 sps:$4 sm:$0xff]  }
  0xac   : > { %1087 = vmatpush1.bf16.msra.mxu0 %v7447_v17  ;;  %1128 = vmatpush1.bf16.msra.mxu1 %v7450_v18  ;;  %v7494_v44 = vld [vmem:[#allocation8 + $0x18c] ss:$24 sps:$4 sm:$0xff]   ;;  %v7492_v46 = vld [vmem:[#allocation8 + $0x188] ss:$24 sps:$4 sm:$0xff]   ;;  %v7500_v48 = vld [vmem:[#allocation8 + $0x1bc] ss:$24 sps:$4 sm:$0xff]  }
  0xad   : > { %1088 = vmatprep.subr.bf16.mxu0 %v7455_v19  ;;  %1129 = vmatprep.subr.bf16.mxu1 %v7458_v20  ;;  %v7497_v47 = vld [vmem:[#allocation8 + $0x1b4] ss:$24 sps:$4 sm:$0xff]   ;;  %v7495_v49 = vld [vmem:[#allocation8 + $0x1b0] ss:$24 sps:$4 sm:$0xff]   ;;  %v7503_v51 = vld [vmem:[#allocation8 + $0x1e4] ss:$24 sps:$4 sm:$0xff]  }
  0xae   : > { %v7498_v50 = vld [vmem:[#allocation8 + $0x1b8] ss:$24 sps:$4 sm:$0xff]   ;;  %v7506_v52 = vld [vmem:[#allocation8 + $0x1ec] ss:$24 sps:$4 sm:$0xff]   ;;  %v7504_v54 = vld [vmem:[#allocation8 + $0x1e8] ss:$24 sps:$4 sm:$0xff]  }
  0xaf   : > { %v7501_v53 = vld [vmem:[#allocation8 + $0x1e0] ss:$24 sps:$4 sm:$0xff]   ;;  %v7509_v55 = vld [vmem:[#allocation8 + $0x214] ss:$24 sps:$4 sm:$0xff]   ;;  %v7507_v57 = vld [vmem:[#allocation8 + $0x210] ss:$24 sps:$4 sm:$0xff]  }
  0xb0   : > { %1089 = vmatpush1.bf16.msra.mxu0 %v7453_v21  ;;  %1130 = vmatpush1.bf16.msra.mxu1 %v7456_v22  ;;  %v7512_v56 = vld [vmem:[#allocation8 + $0x21c] ss:$24 sps:$4 sm:$0xff]   ;;  %v7510_v58 = vld [vmem:[#allocation8 + $0x218] ss:$24 sps:$4 sm:$0xff]   ;;  %v7518_v60 = vld [vmem:[#allocation8 + $0x24c] ss:$24 sps:$4 sm:$0xff]  }
  0xb1   : > { %1090 = vmatprep.subr.bf16.mxu0 %v7461_v23  ;;  %1131 = vmatprep.subr.bf16.mxu1 %v7464_v24  ;;  %v7515_v59 = vld [vmem:[#allocation8 + $0x244] ss:$24 sps:$4 sm:$0xff]   ;;  %v7513_v61 = vld [vmem:[#allocation8 + $0x240] ss:$24 sps:$4 sm:$0xff]   ;;  %v7521_v63 = vld [vmem:[#allocation8 + $0x274] ss:$24 sps:$4 sm:$0xff]  }
  0xb2   : > { %v7516_v62 = vld [vmem:[#allocation8 + $0x248] ss:$24 sps:$4 sm:$0xff]   ;;  %v7524_v2 = vld [vmem:[#allocation8 + $0x27c] ss:$24 sps:$4 sm:$0xff]   ;;  %v7522_v3 = vld [vmem:[#allocation8 + $0x278] ss:$24 sps:$4 sm:$0xff]  }
  0xb3   : > { %v7519_v1 = vld [vmem:[#allocation8 + $0x270] ss:$24 sps:$4 sm:$0xff]   ;;  %v7527_v4 = vld [vmem:[#allocation8 + $0x2a4] ss:$24 sps:$4 sm:$0xff]   ;;  %v7525_v5 = vld [vmem:[#allocation8 + $0x2a0] ss:$24 sps:$4 sm:$0xff]  }
  0xb4   : > { %1091 = vmatpush1.bf16.msra.mxu0 %v7459_v25  ;;  %1132 = vmatpush1.bf16.msra.mxu1 %v7462_v26  ;;  %v7530_v6 = vld [vmem:[#allocation8 + $0x2ac] ss:$24 sps:$4 sm:$0xff]   ;;  %v7528_v7 = vld [vmem:[#allocation8 + $0x2a8] ss:$24 sps:$4 sm:$0xff]   ;;  %v7534_v10 = vld [vmem:[#allocation8 + $0x2d8] ss:$24 sps:$4 sm:$0xff]  }
  0xb5   : > { %1092 = vmatprep.subr.bf16.mxu0 %v7467_v27  ;;  %1133 = vmatprep.subr.bf16.mxu1 %v7470_v28  ;;  %v7531_v8 = vld [vmem:[#allocation8 + $0x2d0] ss:$24 sps:$4 sm:$0xff]   ;;  %v7533_v9 = vld [vmem:[#allocation8 + $0x2d4] ss:$24 sps:$4 sm:$0xff]   ;;  %v374_v14 = vshrl.u32 %v373_v13, 7  ;;  %vm1219_vm4 = vcmask 1040384  }
  0xb6   : > { %v7536_v11 = vld [vmem:[#allocation8 + $0x2dc] ss:$24 sps:$4 sm:$0xff]   ;;  %v7579_v13 = vld [vmem:[#allocation8 + $0x2b0] ss:$24 sps:$4 sm:$0xff]   ;;  %vm1215_vm5 = vcmask 15360   ;;  %vm2999_vm10 = vcmask 1041408  }
  0xb7   : > { %v7539_v12 = vld [vmem:[#allocation8 + $0x14] ss:$24 sps:$4 sm:$0xff]   ;;  %v331_v15 = vld [vmem:[#allocation7] sm:$0xf]  ;;  %v8829_v16 = vsub.s32 0, %v374_v14  ;;  %v383_v17 = vsub.s32 2, %v374_v14 }
  0xb8   : > { %1093 = vmatpush1.bf16.msra.mxu0 %v7465_v29  ;;  %1134 = vmatpush1.bf16.msra.mxu1 %v7468_v30  ;;  %v8831_v18 = vsub.s32 1, %v374_v14  ;;  %v387_v19 = vsub.s32 3, %v374_v14  ;;  %vm481_vm1 = vcmp.eq.s32.totalorder %v374_v14, 0  ;;  %v7584_v14 = vld [vmem:[#allocation8 + $0x2e4] ss:$24 sps:$4 sm:$0xff]   ;;  %vm2995_vm11 = vcmask 31744  }
  0xb9   : > { %1094 = vmatprep.subr.bf16.mxu0 %v7473_v31  ;;  %1135 = vmatprep.subr.bf16.mxu1 %v7476_v32  ;;  %v376_v20 = vrot.slane %v331_v15, %v8829_v16  ;;  %v384_v21 = vrot.slane %v331_v15, %v383_v17  ;;  %v7588_v17 = vld [vmem:[#allocation8 + $0x308] ss:$24 sps:$4 sm:$0xff]   ;;  %vm3896_vm14 = vcmask 1043456   ;;  %vm3892_vm15 = vcmask 64512   ;;  %s7328_s12 = smul.u32 224, %s8809_s14  ;;  %s8556_s7 = smov 16  }
  0xba   : > { %v380_v22 = vrot.slane %v331_v15, %v8831_v18  ;;  %v388_v23 = vrot.slane %v331_v15, %v387_v19  ;;  %v7582_v15 = vld [vmem:[#allocation8 + $0x2e0] ss:$24 sps:$4 sm:$0xff]   ;;  %v7590_v19 = vld [vmem:[#allocation8 + $0x30c] ss:$24 sps:$4 sm:$0xff]   ;;  %s8557_s8 = smov 88   ;;  %s8558_s19 = smov 72  }
  0xbb   : > { %s9065_s13 = scalar_lea.vmem [#allocation11], %s7328_s12  ;;  %s7329_s9 = smul.u32 3584, %s8618_s27 }
  0xbc   : > { %1095 = vmatpush1.bf16.msra.mxu0 %v7471_v33  ;;  %1136 = vmatpush1.bf16.msra.mxu1 %v7474_v34  ;;  %s6377_s11 = sshll.u32 %s9065_s13, 4  ;;  %s6364_s27 = scalar_lea.sflag [#allocation4], %s8809_s14  ;;  %s9163_s11 = int_to_ptr.vmem [resolvable:$true] %s6377_s11 }
  0xbd   : > { %1096 = vmatprep.subr.bf16.mxu0 %v7479_v35  ;;  %1137 = vmatprep.subr.bf16.mxu1 %v7482_v36  ;;  %s9161_s29 = scalar_lea.hbm %s9217_s6, %s7329_s9  ;;  %s8468_s28 = scalar_lea.vmem %s9163_s11, 3584 }
  0xbe   : > { %p8469_p6 = scmp.ne.s32.totalorder %s9163_s11, %s8468_s28  ;;  %p9235_p0 = scmp.ne.s32.totalorder %s9227_s20, 0 }
  0xbf   : > { %s8559_s17 = smov [#allocation11]  }
  0xc0   : > { %1097 = vmatpush1.bf16.msra.mxu0 %v7477_v37  ;;  %1138 = vmatpush1.bf16.msra.mxu1 %v7480_v38  ;;  %p8470_p2 = pnand %p8469_p6, %p9235_p0  ;;  %s8472_s10 = sshll.u32 %s8559_s17, 4  ;;  %s8473_s10 = int_to_ptr.vmem [resolvable:$false] %s8472_s10 }
  0xc1   : > { %1098 = vmatprep.subr.bf16.mxu0 %v7485_v39  ;;  %1139 = vmatprep.subr.bf16.mxu1 %v7488_v40  ;;  %s8474_s15 = scalar_lea.vmem %s8473_s10, 7168  ;;  %p8475_p10 = scmp.lt.s32.totalorder %s9163_s11, %s8473_s10 }
  0xc2   : > { %p8471_p5 = pneg %p8470_p2  ;;  %p8476_p11 = scmp.lt.s32.totalorder %s8474_s15, %s8468_s28 }
  0xc4   : > { %1099 = vmatpush1.bf16.msra.mxu0 %v7483_v41  ;;  %1140 = vmatpush1.bf16.msra.mxu1 %v7486_v42  ;;  %p8477_p3 = por %p8476_p11, %p8475_p10 }
  0xc5   : > { %1100 = vmatprep.subr.bf16.mxu0 %v7491_v43  ;;  %1141 = vmatprep.subr.bf16.mxu1 %v7494_v44  ;;  %v7537_v44 = vld [vmem:[#allocation8 + $0x10] ss:$24 sps:$4 sm:$0xff]  }
  0xc6   : > { %p8478_p12 = pnand %p8477_p3, %p8471_p5 }
  0xc8   : > { %1101 = vmatpush1.bf16.msra.mxu0 %v7489_v45  ;;  %1142 = vmatpush1.bf16.msra.mxu1 %v7492_v46 }
  0xc9   : > { %1102 = vmatprep.subr.bf16.mxu0 %v7497_v47  ;;  %1143 = vmatprep.subr.bf16.mxu1 %v7500_v48  ;;  %v7542_v47 = vld [vmem:[#allocation8 + $0x44] ss:$24 sps:$4 sm:$0xff]  }
  0xcc   : > { %1103 = vmatpush1.bf16.msra.mxu0 %v7495_v49  ;;  %1144 = vmatpush1.bf16.msra.mxu1 %v7498_v50  ;;  %v7540_v50 = vld [vmem:[#allocation8 + $0x40] ss:$24 sps:$4 sm:$0xff]  }
  0xcd   : > { %1104 = vmatprep.subr.bf16.mxu0 %v7503_v51  ;;  %1145 = vmatprep.subr.bf16.mxu1 %v7506_v52  ;;  %v7545_v51 = vld [vmem:[#allocation8 + $0x74] ss:$24 sps:$4 sm:$0xff]   ;;  %v7543_v52 = vld [vmem:[#allocation8 + $0x70] ss:$24 sps:$4 sm:$0xff]  }
  0xd0   : > { %1105 = vmatpush1.bf16.msra.mxu0 %v7501_v53  ;;  %1146 = vmatpush1.bf16.msra.mxu1 %v7504_v54  ;;  %v7548_v53 = vld [vmem:[#allocation8 + $0xa4] ss:$24 sps:$4 sm:$0xff]   ;;  %v7546_v54 = vld [vmem:[#allocation8 + $0xa0] ss:$24 sps:$4 sm:$0xff]  }
  0xd1   : > { %1106 = vmatprep.subr.bf16.mxu0 %v7509_v55  ;;  %1147 = vmatprep.subr.bf16.mxu1 %v7512_v56  ;;  %v7551_v55 = vld [vmem:[#allocation8 + $0xd4] ss:$24 sps:$4 sm:$0xff]   ;;  %v7549_v56 = vld [vmem:[#allocation8 + $0xd0] ss:$24 sps:$4 sm:$0xff]  }
  0xd4   : > { %1107 = vmatpush1.bf16.msra.mxu0 %v7507_v57  ;;  %1148 = vmatpush1.bf16.msra.mxu1 %v7510_v58  ;;  %v7554_v57 = vld [vmem:[#allocation8 + $0x104] ss:$24 sps:$4 sm:$0xff]   ;;  %v7552_v58 = vld [vmem:[#allocation8 + $0x100] ss:$24 sps:$4 sm:$0xff]  }
  0xd5   : > { %1108 = vmatprep.subr.bf16.mxu0 %v7515_v59  ;;  %1149 = vmatprep.subr.bf16.mxu1 %v7518_v60  ;;  %v7557_v59 = vld [vmem:[#allocation8 + $0x134] ss:$24 sps:$4 sm:$0xff]   ;;  %v7555_v60 = vld [vmem:[#allocation8 + $0x130] ss:$24 sps:$4 sm:$0xff]  }
  0xd8   : > { %1109 = vmatpush1.bf16.msra.mxu0 %v7513_v61  ;;  %1150 = vmatpush1.bf16.msra.mxu1 %v7516_v62  ;;  %v7560_v61 = vld [vmem:[#allocation8 + $0x164] ss:$24 sps:$4 sm:$0xff]   ;;  %v7558_v62 = vld [vmem:[#allocation8 + $0x160] ss:$24 sps:$4 sm:$0xff]  }
  0xd9   : > { %1110 = vmatprep.subr.bf16.mxu0 %v7521_v63  ;;  %1151 = vmatprep.subr.bf16.mxu1 %v7524_v2  ;;  %v7563_v63 = vld [vmem:[#allocation8 + $0x194] ss:$24 sps:$4 sm:$0xff]   ;;  %v7566_v2 = vld [vmem:[#allocation8 + $0x1c4] ss:$24 sps:$4 sm:$0xff]  }
  0xdc   : > { %1111 = vmatpush1.bf16.msra.mxu0 %v7519_v1  ;;  %1152 = vmatpush1.bf16.msra.mxu1 %v7522_v3  ;;  %v7561_v1 = vld [vmem:[#allocation8 + $0x190] ss:$24 sps:$4 sm:$0xff]   ;;  %v7564_v3 = vld [vmem:[#allocation8 + $0x1c0] ss:$24 sps:$4 sm:$0xff]  }
  0xdd   : > { %1112 = vmatprep.subr.bf16.mxu0 %v7527_v4  ;;  %1153 = vmatprep.subr.bf16.mxu1 %v7530_v6  ;;  %v7569_v4 = vld [vmem:[#allocation8 + $0x1f4] ss:$24 sps:$4 sm:$0xff]   ;;  %v7572_v6 = vld [vmem:[#allocation8 + $0x224] ss:$24 sps:$4 sm:$0xff]  }
  0xe0   : > { %1113 = vmatpush1.bf16.msra.mxu0 %v7525_v5  ;;  %1154 = vmatpush1.bf16.msra.mxu1 %v7528_v7  ;;  %v7567_v5 = vld [vmem:[#allocation8 + $0x1f0] ss:$24 sps:$4 sm:$0xff]   ;;  %v7570_v7 = vld [vmem:[#allocation8 + $0x220] ss:$24 sps:$4 sm:$0xff]  }
  0xe1   : > { %1114 = vmatprep.subr.bf16.mxu0 %v7533_v9  ;;  %1155 = vmatprep.subr.bf16.mxu1 %v7536_v11  ;;  %v7573_v9 = vld [vmem:[#allocation8 + $0x250] ss:$24 sps:$4 sm:$0xff]   ;;  %v7576_v11 = vld [vmem:[#allocation8 + $0x280] ss:$24 sps:$4 sm:$0xff]  }
  0xe4   : > { %1115 = vmatpush1.bf16.msra.mxu0 %v7531_v8  ;;  %1156 = vmatpush1.bf16.msra.mxu1 %v7534_v10  ;;  %v7575_v8 = vld [vmem:[#allocation8 + $0x254] ss:$24 sps:$4 sm:$0xff]   ;;  %v7578_v10 = vld [vmem:[#allocation8 + $0x284] ss:$24 sps:$4 sm:$0xff]  }
  0xe5   : > { %1166 = vmatprep.subr.bf16.mxu0 %v7539_v12  ;;  %v7581_v12 = vld [vmem:[#allocation8 + $0x2b4] ss:$24 sps:$4 sm:$0xff]  }
 0x17a   : > { %v431_v24 = vpop.f32.mrb[0].mxu0  ;;  %v472_v25 = vpop.f32.mrb[0].mxu1 }
 0x17b   : > { %v432_v26 = vadd.f32 %v431_v24, %v376_v20  ;;  %v473_v27 = vadd.f32 %v472_v25, %v384_v21  ;;  %v433_v28 = vpop.f32.mrb[1].mxu0  ;;  %v474_v29 = vpop.f32.mrb[1].mxu1  ;;  %v7594_v20 = vld [vmem:[#allocation8 + $0x338] ss:$24 sps:$4 sm:$0xff]   ;;  %v7596_v21 = vld [vmem:[#allocation8 + $0x33c] ss:$24 sps:$4 sm:$0xff]  }
 0x17c   : > { %v434_v30 = vadd.f32 %v433_v28, %v380_v22  ;;  %v475_v31 = vadd.f32 %v474_v29, %v388_v23  ;;  %v435_v32 = vpop.f32.mrb[2].mxu0  ;;  %v476_v33 = vpop.f32.mrb[2].mxu1  ;;  %v7600_v22 = vld [vmem:[#allocation8 + $0x368] ss:$24 sps:$4 sm:$0xff]   ;;  %v7602_v23 = vld [vmem:[#allocation8 + $0x36c] ss:$24 sps:$4 sm:$0xff]  }
 0x17d   : > { %v485_v34 = vrot.slane %v432_v26, %v8829_v16  ;;  %v493_v35 = vrot.slane %v473_v27, %v8829_v16  ;;  %v436_v36 = vpop.f32.mrb[3].mxu0  ;;  %v477_v37 = vpop.f32.mrb[3].mxu1  ;;  %v7606_v24 = vld [vmem:[#allocation8 + $0x398] ss:$24 sps:$4 sm:$0xff]   ;;  %v7608_v25 = vld [vmem:[#allocation8 + $0x39c] ss:$24 sps:$4 sm:$0xff]  }
 0x17e   : > { %v489_v38 = vrot.slane %v434_v30, %v8829_v16  ;;  %v497_v39 = vrot.slane %v475_v31, %v8829_v16  ;;  %v7612_v26 = vld [vmem:[#allocation8 + $0x3c8] ss:$24 sps:$4 sm:$0xff]   ;;  %v7614_v27 = vld [vmem:[#allocation8 + $0x3cc] ss:$24 sps:$4 sm:$0xff]   ;;  %v7618_v28 = vld [vmem:[#allocation8 + $0x3f8] ss:$24 sps:$4 sm:$0xff]  }
 0x17f   : > { %v498_v40 = vsel %vm481_vm1, %v485_v34, %v493_v35  ;;  %v7620_v29 = vld [vmem:[#allocation8 + $0x3fc] ss:$24 sps:$4 sm:$0xff]   ;;  %v7624_v30 = vld [vmem:[#allocation8 + $0x428] ss:$24 sps:$4 sm:$0xff]   ;;  %v7626_v31 = vld [vmem:[#allocation8 + $0x42c] ss:$24 sps:$4 sm:$0xff]  }
 0x180   : > { %vm500_vm2 = vcmp.ge.f32.partialorder %v498_v40, 0.0  ;;  %v502_v41 = vmul.f32 0.01, %v498_v40  ;;  %v499_v42 = vsel %vm481_vm1, %v489_v38, %v497_v39  ;;  %v7630_v32 = vld [vmem:[#allocation8 + $0x458] ss:$24 sps:$4 sm:$0xff]  }
 0x181   : > { %vm501_vm3 = vcmp.ge.f32.partialorder %v499_v42, 0.0  ;;  %v503_v43 = vmul.f32 0.01, %v499_v42  ;;  %v7632_v33 = vld [vmem:[#allocation8 + $0x45c] ss:$24 sps:$4 sm:$0xff]  }
 0x182   : > { %v504_v45 = vsel %vm500_vm2, %v498_v40, %v502_v41  ;;  %v7636_v34 = vld [vmem:[#allocation8 + $0x488] ss:$24 sps:$4 sm:$0xff]   ;;  %v7638_v35 = vld [vmem:[#allocation8 + $0x48c] ss:$24 sps:$4 sm:$0xff]   ;;  %v7642_v36 = vld [vmem:[#allocation8 + $0x4b8] ss:$24 sps:$4 sm:$0xff]  }
 0x183   : > { %v505_v46 = vsel %vm501_vm3, %v499_v42, %v503_v43  ;;  %v8839_v49 = vpack.c.bf16 %v504_v45, %v504_v45  ;;  %v7644_v37 = vld [vmem:[#allocation8 + $0x4bc] ss:$24 sps:$4 sm:$0xff]   ;;  %v7648_v38 = vld [vmem:[#allocation8 + $0x4e8] ss:$24 sps:$4 sm:$0xff]   ;;  %v7650_v39 = vld [vmem:[#allocation8 + $0x4ec] ss:$24 sps:$4 sm:$0xff]  }
 0x184   : > { %v507_v48 = vpack.c.bf16 %v505_v46, %v505_v46  ;;  %v7654_v40 = vld [vmem:[#allocation8 + $0x518] ss:$24 sps:$4 sm:$0xff]   ;;  %v7656_v41 = vld [vmem:[#allocation8 + $0x51c] ss:$24 sps:$4 sm:$0xff]   ;;  %v7660_v42 = vld [vmem:[#allocation8 + $0x548] ss:$24 sps:$4 sm:$0xff]  }
 0x185   : > { %v7662_v43 = vld [vmem:[#allocation8 + $0x54c] ss:$24 sps:$4 sm:$0xff]   ;;  %v7668_v45 = vld [vmem:[#allocation8 + $0x57c] ss:$24 sps:$4 sm:$0xff]  }
 0x186   : > { %1116 = vmatprep.mubr.bf16.mxu0 %v507_v48  ;;  %1157 = vmatprep.mubr.bf16.mxu1 %v507_v48 }
 0x187   : > { %1117 = vmatmul.mubr.bf16.vlgmr.msra.gmra.mrb[4].mxu0 %v8839_v49  ;;  %1158 = vmatmul.mubr.bf16.vlgmr.msra.gmra.mrb[4].mxu1 %v8839_v49 }
 0x188   : > { %1167 = vmatpush1.bf16.msra.mxu0 %v7537_v44  ;;  %1198 = vmatprep.mubr.bf16.mxu0 %v507_v48  ;;  %v7666_v44 = vld [vmem:[#allocation8 + $0x578] ss:$24 sps:$4 sm:$0xff]  }
 0x189   : > { %1168 = vmatprep.subr.bf16.mxu0 %v7542_v47  ;;  %1258 = vmatprep.mubr.bf16.mxu1 %v8555_v0 }
 0x18c   : > { %1169 = vmatpush1.bf16.msra.mxu0 %v7540_v50 }
 0x18d   : > { %1170 = vmatprep.subr.bf16.mxu0 %v7545_v51 }
 0x190   : > { %1171 = vmatpush1.bf16.msra.mxu0 %v7543_v52 }
 0x191   : > { %1172 = vmatprep.subr.bf16.mxu0 %v7548_v53 }
 0x194   : > { %1173 = vmatpush1.bf16.msra.mxu0 %v7546_v54 }
 0x195   : > { %1174 = vmatprep.subr.bf16.mxu0 %v7551_v55 }
 0x198   : > { %1175 = vmatpush1.bf16.msra.mxu0 %v7549_v56 }
 0x199   : > { %1176 = vmatprep.subr.bf16.mxu0 %v7554_v57 }
 0x19c   : > { %1177 = vmatpush1.bf16.msra.mxu0 %v7552_v58 }
 0x19d   : > { %1178 = vmatprep.subr.bf16.mxu0 %v7557_v59  ;;  %v1214_v59 = vld [vmem:[%s9215_s4] sm:$0xf] }
 0x1a0   : > { %1179 = vmatpush1.bf16.msra.mxu0 %v7555_v60 }
 0x1a1   : > { %1180 = vmatprep.subr.bf16.mxu0 %v7560_v61  ;;  %v6606_v61 = vld [vmem:[%s9215_s4 + $0x1c] sm:$0xf] }
 0x1a4   : > { %1181 = vmatpush1.bf16.msra.mxu0 %v7558_v62 }
 0x1a5   : > { %1182 = vmatprep.subr.bf16.mxu0 %v7563_v63 }
 0x1a8   : > { %1183 = vmatpush1.bf16.msra.mxu0 %v7561_v1 }
 0x1a9   : > { %1184 = vmatprep.subr.bf16.mxu0 %v7566_v2 }
 0x1ac   : > { %1185 = vmatpush1.bf16.msra.mxu0 %v7564_v3 }
 0x1ad   : > { %1186 = vmatprep.subr.bf16.mxu0 %v7569_v4  ;;  %v7587_v4 = vld [vmem:[#allocation8 + $0x304] ss:$24 sps:$4 sm:$0xff]  }
 0x1b0   : > { %1187 = vmatpush1.bf16.msra.mxu0 %v7567_v5 }
 0x1b1   : > { %1188 = vmatprep.subr.bf16.mxu0 %v7572_v6 }
 0x1b4   : > { %1189 = vmatpush1.bf16.msra.mxu0 %v7570_v7  ;;  %v6609_v7 = vld [vmem:[%s9215_s4 + $0x38] sm:$0xf] }
 0x1b5   : > { %1190 = vmatprep.subr.bf16.mxu0 %v7575_v8  ;;  %v7585_v8 = vld [vmem:[#allocation8 + $0x300] ss:$24 sps:$4 sm:$0xff]  }
 0x1b8   : > { %1191 = vmatpush1.bf16.msra.mxu0 %v7573_v9  ;;  %v7593_v9 = vld [vmem:[#allocation8 + $0x334] ss:$24 sps:$4 sm:$0xff]  }
 0x1b9   : > { %1192 = vmatprep.subr.bf16.mxu0 %v7578_v10  ;;  %v7591_v10 = vld [vmem:[#allocation8 + $0x330] ss:$24 sps:$4 sm:$0xff]  }
 0x1bc   : > { %1193 = vmatpush1.bf16.msra.mxu0 %v7576_v11  ;;  %v7599_v11 = vld [vmem:[#allocation8 + $0x364] ss:$24 sps:$4 sm:$0xff]  }
 0x1bd   : > { %1194 = vmatprep.subr.bf16.mxu0 %v7581_v12  ;;  %v7597_v12 = vld [vmem:[#allocation8 + $0x360] ss:$24 sps:$4 sm:$0xff]  }
 0x1c0   : > { %1195 = vmatpush1.bf16.msra.mxu0 %v7579_v13  ;;  %v7605_v13 = vld [vmem:[#allocation8 + $0x394] ss:$24 sps:$4 sm:$0xff]  }
 0x1c1   : > { %1196 = vmatprep.subr.bf16.mxu0 %v7584_v14  ;;  %v7603_v14 = vld [vmem:[#allocation8 + $0x390] ss:$24 sps:$4 sm:$0xff]  }
 0x1c4   : > { %1197 = vmatpush1.bf16.msra.mxu0 %v7582_v15  ;;  %v7611_v15 = vld [vmem:[#allocation8 + $0x3c4] ss:$24 sps:$4 sm:$0xff]  }
 0x1c5   : > { %2014 = vmatprep.subr.bf16.mxu0 %v7590_v19  ;;  %v7617_v19 = vld [vmem:[#allocation8 + $0x3f4] ss:$24 sps:$4 sm:$0xff]  }
 0x1c7   : > { %1199 = vmatmul.mubr.bf16.vlgmr.msra.gmra.mrb[8].mxu0 %v8839_v49 }
 0x1c8   : > { %2015 = vmatpush1.bf16.msra.mxu0 %v7588_v17  ;;  %v7609_v17 = vld [vmem:[#allocation8 + $0x3c0] ss:$24 sps:$4 sm:$0xff]  }
 0x1c9   : > { %2016 = vmatprep.subr.bf16.mxu0 %v7596_v21  ;;  %v7623_v21 = vld [vmem:[#allocation8 + $0x424] ss:$24 sps:$4 sm:$0xff]  }
 0x1cc   : > { %2017 = vmatpush1.bf16.msra.mxu0 %v7594_v20  ;;  %v7615_v20 = vld [vmem:[#allocation8 + $0x3f0] ss:$24 sps:$4 sm:$0xff]  }
 0x1cd   : > { %2018 = vmatprep.subr.bf16.mxu0 %v7602_v23  ;;  %v7629_v23 = vld [vmem:[#allocation8 + $0x454] ss:$24 sps:$4 sm:$0xff]  }
 0x1d0   : > { %2019 = vmatpush1.bf16.msra.mxu0 %v7600_v22  ;;  %v7621_v22 = vld [vmem:[#allocation8 + $0x420] ss:$24 sps:$4 sm:$0xff]  }
 0x1d1   : > { %2020 = vmatprep.subr.bf16.mxu0 %v7608_v25  ;;  %v7635_v25 = vld [vmem:[#allocation8 + $0x484] ss:$24 sps:$4 sm:$0xff]  }
 0x1d4   : > { %2021 = vmatpush1.bf16.msra.mxu0 %v7606_v24  ;;  %v7627_v24 = vld [vmem:[#allocation8 + $0x450] ss:$24 sps:$4 sm:$0xff]  }
 0x1d5   : > { %2022 = vmatprep.subr.bf16.mxu0 %v7614_v27  ;;  %v7641_v27 = vld [vmem:[#allocation8 + $0x4b4] ss:$24 sps:$4 sm:$0xff]  }
 0x1d8   : > { %2023 = vmatpush1.bf16.msra.mxu0 %v7612_v26  ;;  %v7633_v26 = vld [vmem:[#allocation8 + $0x480] ss:$24 sps:$4 sm:$0xff]  }
 0x1d9   : > { %2024 = vmatprep.subr.bf16.mxu0 %v7620_v29  ;;  %v7647_v29 = vld [vmem:[#allocation8 + $0x4e4] ss:$24 sps:$4 sm:$0xff]  }
 0x1dc   : > { %2025 = vmatpush1.bf16.msra.mxu0 %v7618_v28  ;;  %v7639_v28 = vld [vmem:[#allocation8 + $0x4b0] ss:$24 sps:$4 sm:$0xff]  }
 0x1dd   : > { %2026 = vmatprep.subr.bf16.mxu0 %v7626_v31  ;;  %v7653_v31 = vld [vmem:[#allocation8 + $0x514] ss:$24 sps:$4 sm:$0xff]  }
 0x1e0   : > { %2027 = vmatpush1.bf16.msra.mxu0 %v7624_v30  ;;  %v7645_v30 = vld [vmem:[#allocation8 + $0x4e0] ss:$24 sps:$4 sm:$0xff]  }
 0x1e1   : > { %2028 = vmatprep.subr.bf16.mxu0 %v7632_v33  ;;  %v7659_v33 = vld [vmem:[#allocation8 + $0x544] ss:$24 sps:$4 sm:$0xff]  }
 0x1e4   : > { %2029 = vmatpush1.bf16.msra.mxu0 %v7630_v32  ;;  %v7651_v32 = vld [vmem:[#allocation8 + $0x510] ss:$24 sps:$4 sm:$0xff]  }
 0x1e5   : > { %2030 = vmatprep.subr.bf16.mxu0 %v7638_v35  ;;  %v7665_v35 = vld [vmem:[#allocation8 + $0x574] ss:$24 sps:$4 sm:$0xff]  }
 0x1e8   : > { %2031 = vmatpush1.bf16.msra.mxu0 %v7636_v34  ;;  %v7657_v34 = vld [vmem:[#allocation8 + $0x540] ss:$24 sps:$4 sm:$0xff]  }
 0x1e9   : > { %2032 = vmatprep.subr.bf16.mxu0 %v7644_v37  ;;  %v7671_v37 = vld [vmem:[#allocation8 + $0x5a4] ss:$24 sps:$4 sm:$0xff]  }
 0x1ec   : > { %2033 = vmatpush1.bf16.msra.mxu0 %v7642_v36  ;;  %v7663_v36 = vld [vmem:[#allocation8 + $0x570] ss:$24 sps:$4 sm:$0xff]  }
 0x1ed   : > { %2034 = vmatprep.subr.bf16.mxu0 %v7650_v39  ;;  %v7674_v39 = vld [vmem:[#allocation8 + $0x5ac] ss:$24 sps:$4 sm:$0xff]  }
 0x1f0   : > { %2035 = vmatpush1.bf16.msra.mxu0 %v7648_v38  ;;  %v7669_v38 = vld [vmem:[#allocation8 + $0x5a0] ss:$24 sps:$4 sm:$0xff]  }
 0x1f1   : > { %2036 = vmatprep.subr.bf16.mxu0 %v7656_v41  ;;  %v7677_v41 = vld [vmem:[#allocation8 + $0x5d4] ss:$24 sps:$4 sm:$0xff]  }
 0x1f4   : > { %2037 = vmatpush1.bf16.msra.mxu0 %v7654_v40  ;;  %v7672_v40 = vld [vmem:[#allocation8 + $0x5a8] ss:$24 sps:$4 sm:$0xff]  }
 0x1f5   : > { %2038 = vmatprep.subr.bf16.mxu0 %v7662_v43  ;;  %v7680_v43 = vld [vmem:[#allocation8 + $0x5dc] ss:$24 sps:$4 sm:$0xff]  }
 0x1f8   : > { %2039 = vmatpush1.bf16.msra.mxu0 %v7660_v42  ;;  %v7675_v42 = vld [vmem:[#allocation8 + $0x5d0] ss:$24 sps:$4 sm:$0xff]  }
 0x1f9   : > { %2040 = vmatprep.subr.bf16.mxu0 %v7668_v45  ;;  %v7683_v45 = vld [vmem:[#allocation8 + $0x314] ss:$24 sps:$4 sm:$0xff]  }
 0x1fc   : > { %2041 = vmatpush1.bf16.msra.mxu0 %v7666_v44  ;;  %v7678_v44 = vld [vmem:[#allocation8 + $0x5d8] ss:$24 sps:$4 sm:$0xff]  }
 0x1fd   : > { %2042 = vmatprep.subr.bf16.mxu0 %v7674_v39  ;;  %v7756_v39 = vld [vmem:[#allocation8 + $0x6c8] ss:$24 sps:$4 sm:$0xff]  }
 0x200   : > { %2043 = vmatpush1.bf16.msra.mxu0 %v7672_v40  ;;  %v7758_v40 = vld [vmem:[#allocation8 + $0x6cc] ss:$24 sps:$4 sm:$0xff]  }
 0x201   : > { %2044 = vmatprep.subr.bf16.mxu0 %v7680_v43  ;;  %v7768_v43 = vld [vmem:[#allocation8 + $0x728] ss:$24 sps:$4 sm:$0xff]  }
 0x204   : > { %2045 = vmatpush1.bf16.msra.mxu0 %v7678_v44  ;;  %v7770_v44 = vld [vmem:[#allocation8 + $0x72c] ss:$24 sps:$4 sm:$0xff]  }
 0x25a   : > { %v1118_v46 = vpop.f32.mrb[4].mxu0  ;;  %v1159_v47 = vpop.f32.mrb[4].mxu1 }
 0x25b   : > { %v1207_v48 = vpack.c.bf16 %v1118_v46, %v1118_v46  ;;  %v1120_v49 = vpop.f32.mrb[5].mxu0  ;;  %v1161_v50 = vpop.f32.mrb[5].mxu1  ;;  %v1209_v57 = vpack.c.bf16 %v1159_v47, %v1159_v47  ;;  %v1213_v46 = vld [vmem:[#allocation10] sm:$0x3] }
 0x25c   : > { %v1208_v51 = vpack.c.bf16 %v1120_v49, %v1120_v49  ;;  %v1122_v52 = vpop.f32.mrb[6].mxu0  ;;  %v1163_v53 = vpop.f32.mrb[6].mxu1  ;;  %v1210_v58 = vpack.c.bf16 %v1161_v50, %v1161_v50  ;;  %v1271_v47 = vrot.slane %v1213_v46, %v8829_v16 }
 0x25d   : > { %v1221_v54 = vsel %vm1219_vm4, %v1207_v48, 0  ;;  %v1123_v55 = vpop.f32.mrb[7].mxu0  ;;  %v1164_v56 = vpop.f32.mrb[7].mxu1  ;;  %v1286_v60 = vsel %vm1219_vm4, %v1209_v57, 0  ;;  %v1275_v48 = vrot.slane %v1213_v46, %v8831_v18  ;;  %v7776_v46 = vld [vmem:[#allocation8 + $0x75c] ss:$24 sps:$4 sm:$0xff]  }
 0x25e   : > { %6604 = vmatprep.subr.msk.bf16.mxu1 %vm1219_vm4, %v1208_v51 }
 0x25f   : > { %1227 = vmatpush1.bf16.msra.mxu1 %v1221_v54 }
 0x260   : > { %6607 = vmatprep.subr.msk.bf16.mxu1 %vm1219_vm4, %v1210_v58 }
 0x262   : > { %6605 = vmatmul.mubr.msk.bf16.vlgmr.msra.gmra.mrb[8].mxu1 %vm1215_vm5, %v1214_v59 }
 0x263   : > { %1292 = vmatpush1.bf16.msra.mxu1 %v1286_v60  ;;  %1323 = vmatprep.mubr.bf16.mxu1 %v8555_v0  ;;  %v7681_v60 = vld [vmem:[#allocation8 + $0x310] ss:$24 sps:$4 sm:$0xff]  }
 0x26e   : > { %6608 = vmatmul.mubr.msk.bf16.vlgmr.msra.gmra.mrb[8].mxu1 %vm1215_vm5, %v6606_v61 }
 0x26f   : > { %1377 = vmatprep.mubr.bf16.mxu1 %v8555_v0 }
 0x29a   : > { %v1200_v62 = vpop.f32.mrb[8].mxu0 }
 0x29b   : > { %v1211_v63 = vpack.c.bf16 %v1200_v62, %v1200_v62  ;;  %v1202_v1 = vpop.f32.mrb[9].mxu0  ;;  %v7686_v62 = vld [vmem:[#allocation8 + $0x344] ss:$24 sps:$4 sm:$0xff]  }
 0x29c   : > { %v1212_v2 = vpack.c.bf16 %v1202_v1, %v1202_v1  ;;  %v1204_v3 = vpop.f32.mrb[10].mxu0  ;;  %v7689_v1 = vld [vmem:[#allocation8 + $0x374] ss:$24 sps:$4 sm:$0xff]  }
 0x29d   : > { %v1340_v5 = vsel %vm1219_vm4, %v1211_v63, 0  ;;  %v1205_v6 = vpop.f32.mrb[11].mxu0  ;;  %v7684_v63 = vld [vmem:[#allocation8 + $0x340] ss:$24 sps:$4 sm:$0xff]   ;;  %v7692_v3 = vld [vmem:[#allocation8 + $0x3a4] ss:$24 sps:$4 sm:$0xff]  }
 0x29e   : > { %6610 = vmatprep.subr.msk.bf16.mxu1 %vm1219_vm4, %v1212_v2  ;;  %v7687_v2 = vld [vmem:[#allocation8 + $0x370] ss:$24 sps:$4 sm:$0xff]  }
 0x29f   : > { %1346 = vmatpush1.bf16.msra.mxu1 %v1340_v5  ;;  %v7695_v5 = vld [vmem:[#allocation8 + $0x3d4] ss:$24 sps:$4 sm:$0xff]   ;;  %v7693_v6 = vld [vmem:[#allocation8 + $0x3d0] ss:$24 sps:$4 sm:$0xff]  }
 0x2a0   : > { %1973 = vmatprep.subr.bf16.mxu1 %v7587_v4  ;;  %v7690_v4 = vld [vmem:[#allocation8 + $0x3a0] ss:$24 sps:$4 sm:$0xff]  }
 0x2a2   : > { %6611 = vmatmul.mubr.msk.bf16.vlgmr.msra.gmra.mrb[8].mxu1 %vm1215_vm5, %v6609_v7  ;;  %v7698_v7 = vld [vmem:[#allocation8 + $0x404] ss:$24 sps:$4 sm:$0xff]  }
 0x2a3   : > { %1974 = vmatpush1.bf16.msra.mxu1 %v7585_v8  ;;  %v7696_v8 = vld [vmem:[#allocation8 + $0x400] ss:$24 sps:$4 sm:$0xff]  }
 0x2a4   : > { %1975 = vmatprep.subr.bf16.mxu1 %v7593_v9  ;;  %v7701_v9 = vld [vmem:[#allocation8 + $0x434] ss:$24 sps:$4 sm:$0xff]  }
 0x2a7   : > { %1976 = vmatpush1.bf16.msra.mxu1 %v7591_v10  ;;  %v7699_v10 = vld [vmem:[#allocation8 + $0x430] ss:$24 sps:$4 sm:$0xff]  }
 0x2a8   : > { %1977 = vmatprep.subr.bf16.mxu1 %v7599_v11  ;;  %v7704_v11 = vld [vmem:[#allocation8 + $0x464] ss:$24 sps:$4 sm:$0xff]  }
 0x2ab   : > { %1978 = vmatpush1.bf16.msra.mxu1 %v7597_v12  ;;  %v7702_v12 = vld [vmem:[#allocation8 + $0x460] ss:$24 sps:$4 sm:$0xff]  }
 0x2ac   : > { %1979 = vmatprep.subr.bf16.mxu1 %v7605_v13  ;;  %v7707_v13 = vld [vmem:[#allocation8 + $0x494] ss:$24 sps:$4 sm:$0xff]  }
 0x2af   : > { %1980 = vmatpush1.bf16.msra.mxu1 %v7603_v14  ;;  %v7705_v14 = vld [vmem:[#allocation8 + $0x490] ss:$24 sps:$4 sm:$0xff]  }
 0x2b0   : > { %1981 = vmatprep.subr.bf16.mxu1 %v7611_v15  ;;  %v7710_v15 = vld [vmem:[#allocation8 + $0x4c4] ss:$24 sps:$4 sm:$0xff]  }
 0x2b3   : > { %1982 = vmatpush1.bf16.msra.mxu1 %v7609_v17  ;;  %v7708_v17 = vld [vmem:[#allocation8 + $0x4c0] ss:$24 sps:$4 sm:$0xff]  }
 0x2b4   : > { %1983 = vmatprep.subr.bf16.mxu1 %v7617_v19  ;;  %v7713_v19 = vld [vmem:[#allocation8 + $0x4f4] ss:$24 sps:$4 sm:$0xff]  }
 0x2b7   : > { %1984 = vmatpush1.bf16.msra.mxu1 %v7615_v20  ;;  %v7711_v20 = vld [vmem:[#allocation8 + $0x4f0] ss:$24 sps:$4 sm:$0xff]  }
 0x2b8   : > { %1985 = vmatprep.subr.bf16.mxu1 %v7623_v21  ;;  %v7716_v21 = vld [vmem:[#allocation8 + $0x524] ss:$24 sps:$4 sm:$0xff]  }
 0x2bb   : > { %1986 = vmatpush1.bf16.msra.mxu1 %v7621_v22  ;;  %v7714_v22 = vld [vmem:[#allocation8 + $0x520] ss:$24 sps:$4 sm:$0xff]  }
 0x2bc   : > { %1987 = vmatprep.subr.bf16.mxu1 %v7629_v23  ;;  %v7719_v23 = vld [vmem:[#allocation8 + $0x554] ss:$24 sps:$4 sm:$0xff]  }
 0x2bf   : > { %1988 = vmatpush1.bf16.msra.mxu1 %v7627_v24  ;;  %v7717_v24 = vld [vmem:[#allocation8 + $0x550] ss:$24 sps:$4 sm:$0xff]  }
 0x2c0   : > { %1989 = vmatprep.subr.bf16.mxu1 %v7635_v25  ;;  %v7722_v25 = vld [vmem:[#allocation8 + $0x584] ss:$24 sps:$4 sm:$0xff]  }
 0x2c3   : > { %1990 = vmatpush1.bf16.msra.mxu1 %v7633_v26  ;;  %v7720_v26 = vld [vmem:[#allocation8 + $0x580] ss:$24 sps:$4 sm:$0xff]  }
 0x2c4   : > { %1991 = vmatprep.subr.bf16.mxu1 %v7641_v27  ;;  %v7725_v27 = vld [vmem:[#allocation8 + $0x5b4] ss:$24 sps:$4 sm:$0xff]  }
 0x2c7   : > { %1992 = vmatpush1.bf16.msra.mxu1 %v7639_v28  ;;  %v7723_v28 = vld [vmem:[#allocation8 + $0x5b0] ss:$24 sps:$4 sm:$0xff]  }
 0x2c8   : > { %1993 = vmatprep.subr.bf16.mxu1 %v7647_v29  ;;  %v7728_v29 = vld [vmem:[#allocation8 + $0x5e4] ss:$24 sps:$4 sm:$0xff]  }
 0x2cb   : > { %1994 = vmatpush1.bf16.msra.mxu1 %v7645_v30  ;;  %v7726_v30 = vld [vmem:[#allocation8 + $0x5e0] ss:$24 sps:$4 sm:$0xff]  }
 0x2cc   : > { %1995 = vmatprep.subr.bf16.mxu1 %v7653_v31  ;;  %v7732_v31 = vld [vmem:[#allocation8 + $0x608] ss:$24 sps:$4 sm:$0xff]  }
 0x2cf   : > { %1996 = vmatpush1.bf16.msra.mxu1 %v7651_v32  ;;  %v7734_v32 = vld [vmem:[#allocation8 + $0x60c] ss:$24 sps:$4 sm:$0xff]  }
 0x2d0   : > { %1997 = vmatprep.subr.bf16.mxu1 %v7659_v33  ;;  %v7738_v33 = vld [vmem:[#allocation8 + $0x638] ss:$24 sps:$4 sm:$0xff]  }
 0x2d3   : > { %1998 = vmatpush1.bf16.msra.mxu1 %v7657_v34  ;;  %v7740_v34 = vld [vmem:[#allocation8 + $0x63c] ss:$24 sps:$4 sm:$0xff]  }
 0x2d4   : > { %1999 = vmatprep.subr.bf16.mxu1 %v7665_v35  ;;  %v7744_v35 = vld [vmem:[#allocation8 + $0x668] ss:$24 sps:$4 sm:$0xff]  }
 0x2d7   : > { %2000 = vmatpush1.bf16.msra.mxu1 %v7663_v36  ;;  %v7746_v36 = vld [vmem:[#allocation8 + $0x66c] ss:$24 sps:$4 sm:$0xff]  }
 0x2d8   : > { %2001 = vmatprep.subr.bf16.mxu1 %v7671_v37  ;;  %v7750_v37 = vld [vmem:[#allocation8 + $0x698] ss:$24 sps:$4 sm:$0xff]  }
 0x2db   : > { %2002 = vmatpush1.bf16.msra.mxu1 %v7669_v38  ;;  %v7752_v38 = vld [vmem:[#allocation8 + $0x69c] ss:$24 sps:$4 sm:$0xff]  }
 0x2dc   : > { %2003 = vmatprep.subr.bf16.mxu1 %v7677_v41  ;;  %v7762_v41 = vld [vmem:[#allocation8 + $0x6f8] ss:$24 sps:$4 sm:$0xff]  }
 0x2df   : > { %2004 = vmatpush1.bf16.msra.mxu1 %v7675_v42  ;;  %v7764_v42 = vld [vmem:[#allocation8 + $0x6fc] ss:$24 sps:$4 sm:$0xff]  }
 0x2e0   : > { %2055 = vmatprep.subr.bf16.mxu1 %v7683_v45  ;;  %v7774_v45 = vld [vmem:[#allocation8 + $0x758] ss:$24 sps:$4 sm:$0xff]  }
 0x375   : > { %v1379_v49 = vpop.f32.mrb[8].mxu1 }
 0x376   : > { %v7218_v50 = vadd.f32 %v1379_v49, %v1271_v47  ;;  %v1381_v51 = vpop.f32.mrb[9].mxu1  ;;  %v7780_v47 = vld [vmem:[#allocation8 + $0x788] ss:$24 sps:$4 sm:$0xff]   ;;  %v7786_v49 = vld [vmem:[#allocation8 + $0x7b8] ss:$24 sps:$4 sm:$0xff]  }
 0x377   : > { %v7219_v52 = vadd.f32 %v1381_v51, %v1275_v48  ;;  %v1383_v53 = vpop.f32.mrb[10].mxu1  ;;  %v7782_v48 = vld [vmem:[#allocation8 + $0x78c] ss:$24 sps:$4 sm:$0xff]   ;;  %v7792_v51 = vld [vmem:[#allocation8 + $0x7e8] ss:$24 sps:$4 sm:$0xff]  }
 0x378   : > { %vm1388_vm6 = vcmp.ge.f32.partialorder %v7218_v50, 0.0  ;;  %v1390_v54 = vmul.f32 0.01, %v7218_v50  ;;  %v1384_v55 = vpop.f32.mrb[11].mxu1  ;;  %v7798_v53 = vld [vmem:[#allocation8 + $0x818] ss:$24 sps:$4 sm:$0xff]  }
 0x379   : > { %vm1389_vm7 = vcmp.ge.f32.partialorder %v7219_v52, 0.0  ;;  %v1391_v56 = vmul.f32 0.01, %v7219_v52  ;;  %v7804_v55 = vld [vmem:[#allocation8 + $0x848] ss:$24 sps:$4 sm:$0xff]  }
 0x37a   : > { %v1392_v57 = vsel %vm1388_vm6, %v7218_v50, %v1390_v54  ;;  %v7788_v50 = vld [vmem:[#allocation8 + $0x7bc] ss:$24 sps:$4 sm:$0xff]  }
 0x37b   : > { %v1393_v58 = vsel %vm1389_vm7, %v7219_v52, %v1391_v56  ;;  %v8867_v61 = vpack.c.bf16 %v1392_v57, %v1392_v57  ;;  %v7794_v52 = vld [vmem:[#allocation8 + $0x7ec] ss:$24 sps:$4 sm:$0xff]   ;;  %v7800_v54 = vld [vmem:[#allocation8 + $0x81c] ss:$24 sps:$4 sm:$0xff]   ;;  %v7810_v57 = vld [vmem:[#allocation8 + $0x878] ss:$24 sps:$4 sm:$0xff]  }
 0x37c   : > { %v1395_v59 = vpack.c.bf16 %v1393_v58, %v1393_v58  ;;  %v7806_v56 = vld [vmem:[#allocation8 + $0x84c] ss:$24 sps:$4 sm:$0xff]   ;;  %v7812_v58 = vld [vmem:[#allocation8 + $0x87c] ss:$24 sps:$4 sm:$0xff]  }
 0x37e   : > { %2005 = vmatprep.mubr.bf16.mxu1 %v1395_v59  ;;  %2046 = vmatprep.mubr.bf16.mxu0 %v1395_v59 }
 0x37f   : > { %2006 = vmatmul.mubr.bf16.vlgmr.msra.gmra.mrb[12].mxu1 %v8867_v61  ;;  %2047 = vmatmul.mubr.bf16.vlgmr.msra.gmra.mrb[12].mxu0 %v8867_v61 }
 0x380   : > { %2056 = vmatpush1.bf16.msra.mxu1 %v7681_v60  ;;  %2087 = vmatprep.mubr.bf16.mxu1 %v1395_v59 }
 0x381   : > { %2057 = vmatprep.subr.bf16.mxu1 %v7686_v62  ;;  %2147 = vmatprep.mubr.bf16.mxu0 %v8555_v0 }
 0x384   : > { %2058 = vmatpush1.bf16.msra.mxu1 %v7684_v63 }
 0x385   : > { %2059 = vmatprep.subr.bf16.mxu1 %v7689_v1 }
 0x388   : > { %2060 = vmatpush1.bf16.msra.mxu1 %v7687_v2 }
 0x389   : > { %2061 = vmatprep.subr.bf16.mxu1 %v7692_v3 }
 0x38c   : > { %2062 = vmatpush1.bf16.msra.mxu1 %v7690_v4 }
 0x38d   : > { %2063 = vmatprep.subr.bf16.mxu1 %v7695_v5 }
 0x390   : > { %2064 = vmatpush1.bf16.msra.mxu1 %v7693_v6 }
 0x391   : > { %2065 = vmatprep.subr.bf16.mxu1 %v7698_v7 }
 0x394   : > { %2066 = vmatpush1.bf16.msra.mxu1 %v7696_v8 }
 0x395   : > { %2067 = vmatprep.subr.bf16.mxu1 %v7701_v9  ;;  %v6708_v9 = vld [vmem:[%s9215_s4 + $0x54] sm:$0xf] }
 0x398   : > { %2068 = vmatpush1.bf16.msra.mxu1 %v7699_v10 }
 0x399   : > { %2069 = vmatprep.subr.bf16.mxu1 %v7704_v11  ;;  %v6711_v11 = vld [vmem:[%s9215_s4 + $0x70] sm:$0xf] }
 0x39c   : > { %2070 = vmatpush1.bf16.msra.mxu1 %v7702_v12 }
 0x39d   : > { %2071 = vmatprep.subr.bf16.mxu1 %v7707_v13 }
 0x3a0   : > { %2072 = vmatpush1.bf16.msra.mxu1 %v7705_v14 }
 0x3a1   : > { %2073 = vmatprep.subr.bf16.mxu1 %v7710_v15 }
 0x3a4   : > { %2074 = vmatpush1.bf16.msra.mxu1 %v7708_v17 }
 0x3a5   : > { %2075 = vmatprep.subr.bf16.mxu1 %v7713_v19  ;;  %v7731_v19 = vld [vmem:[#allocation8 + $0x604] ss:$24 sps:$4 sm:$0xff]  }
 0x3a8   : > { %2076 = vmatpush1.bf16.msra.mxu1 %v7711_v20 }
 0x3a9   : > { %2077 = vmatprep.subr.bf16.mxu1 %v7716_v21 }
 0x3ac   : > { %2078 = vmatpush1.bf16.msra.mxu1 %v7714_v22  ;;  %v6714_v22 = vld [vmem:[%s9215_s4 + $0x8c] sm:$0xf] }
 0x3ad   : > { %2079 = vmatprep.subr.bf16.mxu1 %v7719_v23  ;;  %v7729_v23 = vld [vmem:[#allocation8 + $0x600] ss:$24 sps:$4 sm:$0xff]  }
 0x3b0   : > { %2080 = vmatpush1.bf16.msra.mxu1 %v7717_v24  ;;  %v7737_v24 = vld [vmem:[#allocation8 + $0x634] ss:$24 sps:$4 sm:$0xff]  }
 0x3b1   : > { %2081 = vmatprep.subr.bf16.mxu1 %v7722_v25  ;;  %v7735_v25 = vld [vmem:[#allocation8 + $0x630] ss:$24 sps:$4 sm:$0xff]  }
 0x3b4   : > { %2082 = vmatpush1.bf16.msra.mxu1 %v7720_v26  ;;  %v7743_v26 = vld [vmem:[#allocation8 + $0x664] ss:$24 sps:$4 sm:$0xff]  }
 0x3b5   : > { %2083 = vmatprep.subr.bf16.mxu1 %v7725_v27  ;;  %v7741_v27 = vld [vmem:[#allocation8 + $0x660] ss:$24 sps:$4 sm:$0xff]  }
 0x3b8   : > { %2084 = vmatpush1.bf16.msra.mxu1 %v7723_v28  ;;  %v7749_v28 = vld [vmem:[#allocation8 + $0x694] ss:$24 sps:$4 sm:$0xff]  }
 0x3b9   : > { %2085 = vmatprep.subr.bf16.mxu1 %v7728_v29  ;;  %v7747_v29 = vld [vmem:[#allocation8 + $0x690] ss:$24 sps:$4 sm:$0xff]  }
 0x3bc   : > { %2086 = vmatpush1.bf16.msra.mxu1 %v7726_v30  ;;  %v7755_v30 = vld [vmem:[#allocation8 + $0x6c4] ss:$24 sps:$4 sm:$0xff]  }
 0x3bd   : > { %2903 = vmatprep.subr.bf16.mxu1 %v7734_v32  ;;  %v7761_v32 = vld [vmem:[#allocation8 + $0x6f4] ss:$24 sps:$4 sm:$0xff]  }
 0x3bf   : > { %2088 = vmatmul.mubr.bf16.vlgmr.msra.gmra.mrb[16].mxu1 %v8867_v61 }
 0x3c0   : > { %2904 = vmatpush1.bf16.msra.mxu1 %v7732_v31  ;;  %v7753_v31 = vld [vmem:[#allocation8 + $0x6c0] ss:$24 sps:$4 sm:$0xff]  }
 0x3c1   : > { %2905 = vmatprep.subr.bf16.mxu1 %v7740_v34  ;;  %v7767_v34 = vld [vmem:[#allocation8 + $0x724] ss:$24 sps:$4 sm:$0xff]  }
 0x3c4   : > { %2906 = vmatpush1.bf16.msra.mxu1 %v7738_v33  ;;  %v7759_v33 = vld [vmem:[#allocation8 + $0x6f0] ss:$24 sps:$4 sm:$0xff]  }
 0x3c5   : > { %2907 = vmatprep.subr.bf16.mxu1 %v7746_v36  ;;  %v7773_v36 = vld [vmem:[#allocation8 + $0x754] ss:$24 sps:$4 sm:$0xff]  }
 0x3c8   : > { %2908 = vmatpush1.bf16.msra.mxu1 %v7744_v35  ;;  %v7765_v35 = vld [vmem:[#allocation8 + $0x720] ss:$24 sps:$4 sm:$0xff]  }
 0x3c9   : > { %2909 = vmatprep.subr.bf16.mxu1 %v7752_v38  ;;  %v7779_v38 = vld [vmem:[#allocation8 + $0x784] ss:$24 sps:$4 sm:$0xff]  }
 0x3cc   : > { %2910 = vmatpush1.bf16.msra.mxu1 %v7750_v37  ;;  %v7771_v37 = vld [vmem:[#allocation8 + $0x750] ss:$24 sps:$4 sm:$0xff]  }
 0x3cd   : > { %2911 = vmatprep.subr.bf16.mxu1 %v7758_v40  ;;  %v7785_v40 = vld [vmem:[#allocation8 + $0x7b4] ss:$24 sps:$4 sm:$0xff]  }
 0x3d0   : > { %2912 = vmatpush1.bf16.msra.mxu1 %v7756_v39  ;;  %v7777_v39 = vld [vmem:[#allocation8 + $0x780] ss:$24 sps:$4 sm:$0xff]  }
 0x3d1   : > { %2913 = vmatprep.subr.bf16.mxu1 %v7764_v42  ;;  %v7791_v42 = vld [vmem:[#allocation8 + $0x7e4] ss:$24 sps:$4 sm:$0xff]  }
 0x3d4   : > { %2914 = vmatpush1.bf16.msra.mxu1 %v7762_v41  ;;  %v7783_v41 = vld [vmem:[#allocation8 + $0x7b0] ss:$24 sps:$4 sm:$0xff]  }
 0x3d5   : > { %2915 = vmatprep.subr.bf16.mxu1 %v7770_v44  ;;  %v7797_v44 = vld [vmem:[#allocation8 + $0x814] ss:$24 sps:$4 sm:$0xff]  }
 0x3d8   : > { %2916 = vmatpush1.bf16.msra.mxu1 %v7768_v43  ;;  %v7789_v43 = vld [vmem:[#allocation8 + $0x7e0] ss:$24 sps:$4 sm:$0xff]  }
 0x3d9   : > { %2917 = vmatprep.subr.bf16.mxu1 %v7776_v46  ;;  %v7803_v46 = vld [vmem:[#allocation8 + $0x844] ss:$24 sps:$4 sm:$0xff]  }
 0x3dc   : > { %2918 = vmatpush1.bf16.msra.mxu1 %v7774_v45  ;;  %v7795_v45 = vld [vmem:[#allocation8 + $0x810] ss:$24 sps:$4 sm:$0xff]  }
 0x3dd   : > { %2919 = vmatprep.subr.bf16.mxu1 %v7782_v48  ;;  %v7809_v48 = vld [vmem:[#allocation8 + $0x874] ss:$24 sps:$4 sm:$0xff]  }
 0x3e0   : > { %2920 = vmatpush1.bf16.msra.mxu1 %v7780_v47  ;;  %v7801_v47 = vld [vmem:[#allocation8 + $0x840] ss:$24 sps:$4 sm:$0xff]  }
 0x3e1   : > { %2921 = vmatprep.subr.bf16.mxu1 %v7788_v50  ;;  %v7815_v50 = vld [vmem:[#allocation8 + $0x8a4] ss:$24 sps:$4 sm:$0xff]  }
 0x3e4   : > { %2922 = vmatpush1.bf16.msra.mxu1 %v7786_v49  ;;  %v7807_v49 = vld [vmem:[#allocation8 + $0x870] ss:$24 sps:$4 sm:$0xff]  }
 0x3e5   : > { %2923 = vmatprep.subr.bf16.mxu1 %v7794_v52  ;;  %v7818_v52 = vld [vmem:[#allocation8 + $0x8ac] ss:$24 sps:$4 sm:$0xff]  }
 0x3e8   : > { %2924 = vmatpush1.bf16.msra.mxu1 %v7792_v51  ;;  %v7813_v51 = vld [vmem:[#allocation8 + $0x8a0] ss:$24 sps:$4 sm:$0xff]  }
 0x3e9   : > { %2925 = vmatprep.subr.bf16.mxu1 %v7800_v54  ;;  %v7821_v54 = vld [vmem:[#allocation8 + $0x8d4] ss:$24 sps:$4 sm:$0xff]  }
 0x3ec   : > { %2926 = vmatpush1.bf16.msra.mxu1 %v7798_v53  ;;  %v7816_v53 = vld [vmem:[#allocation8 + $0x8a8] ss:$24 sps:$4 sm:$0xff]  }
 0x3ed   : > { %2927 = vmatprep.subr.bf16.mxu1 %v7806_v56  ;;  %v7824_v56 = vld [vmem:[#allocation8 + $0x8dc] ss:$24 sps:$4 sm:$0xff]  }
 0x3f0   : > { %2928 = vmatpush1.bf16.msra.mxu1 %v7804_v55  ;;  %v7819_v55 = vld [vmem:[#allocation8 + $0x8d0] ss:$24 sps:$4 sm:$0xff]  }
 0x3f1   : > { %2929 = vmatprep.subr.bf16.mxu1 %v7812_v58  ;;  %v7827_v58 = vld [vmem:[#allocation8 + $0x614] ss:$24 sps:$4 sm:$0xff]  }
 0x3f4   : > { %2930 = vmatpush1.bf16.msra.mxu1 %v7810_v57  ;;  %v7822_v57 = vld [vmem:[#allocation8 + $0x8d8] ss:$24 sps:$4 sm:$0xff]  }
 0x3f5   : > { %2931 = vmatprep.subr.bf16.mxu1 %v7818_v52  ;;  %v7900_v52 = vld [vmem:[#allocation8 + $0x9c8] ss:$24 sps:$4 sm:$0xff]  }
 0x3f8   : > { %2932 = vmatpush1.bf16.msra.mxu1 %v7816_v53  ;;  %v7902_v53 = vld [vmem:[#allocation8 + $0x9cc] ss:$24 sps:$4 sm:$0xff]  }
 0x3f9   : > { %2933 = vmatprep.subr.bf16.mxu1 %v7824_v56  ;;  %v7912_v56 = vld [vmem:[#allocation8 + $0xa28] ss:$24 sps:$4 sm:$0xff]  }
 0x3fc   : > { %2934 = vmatpush1.bf16.msra.mxu1 %v7822_v57  ;;  %v7914_v57 = vld [vmem:[#allocation8 + $0xa2c] ss:$24 sps:$4 sm:$0xff]  }
 0x452   : > { %v2007_v59 = vpop.f32.mrb[12].mxu1  ;;  %v2048_v60 = vpop.f32.mrb[12].mxu0 }
 0x453   : > { %v2096_v61 = vpack.c.bf16 %v2007_v59, %v2007_v59  ;;  %v2009_v62 = vpop.f32.mrb[13].mxu1  ;;  %v2050_v63 = vpop.f32.mrb[13].mxu0  ;;  %v2098_v7 = vpack.c.bf16 %v2048_v60, %v2048_v60  ;;  %v2103_v59 = vld [vmem:[#allocation10 + $0x2] sm:$0x3] }
 0x454   : > { %v2097_v1 = vpack.c.bf16 %v2009_v62, %v2009_v62  ;;  %v2011_v2 = vpop.f32.mrb[14].mxu1  ;;  %v2052_v3 = vpop.f32.mrb[14].mxu0  ;;  %v2099_v8 = vpack.c.bf16 %v2050_v63, %v2050_v63  ;;  %v2160_v60 = vrot.slane %v2103_v59, %v8829_v16 }
 0x455   : > { %v2110_v4 = vsel %vm1219_vm4, %v2096_v61, 0  ;;  %v2012_v5 = vpop.f32.mrb[15].mxu1  ;;  %v2053_v6 = vpop.f32.mrb[15].mxu0  ;;  %v2175_v10 = vsel %vm1219_vm4, %v2098_v7, 0  ;;  %v2164_v61 = vrot.slane %v2103_v59, %v8831_v18  ;;  %v7920_v59 = vld [vmem:[#allocation8 + $0xa5c] ss:$24 sps:$4 sm:$0xff]  }
 0x456   : > { %6709 = vmatprep.subr.msk.bf16.mxu0 %vm1219_vm4, %v2097_v1 }
 0x457   : > { %2116 = vmatpush1.bf16.msra.mxu0 %v2110_v4 }
 0x458   : > { %6712 = vmatprep.subr.msk.bf16.mxu0 %vm1219_vm4, %v2099_v8 }
 0x45a   : > { %6710 = vmatmul.mubr.msk.bf16.vlgmr.msra.gmra.mrb[16].mxu0 %vm1215_vm5, %v6708_v9 }
 0x45b   : > { %2181 = vmatpush1.bf16.msra.mxu0 %v2175_v10  ;;  %2212 = vmatprep.mubr.bf16.mxu0 %v8555_v0  ;;  %v7825_v10 = vld [vmem:[#allocation8 + $0x610] ss:$24 sps:$4 sm:$0xff]  }
 0x466   : > { %6713 = vmatmul.mubr.msk.bf16.vlgmr.msra.gmra.mrb[16].mxu0 %vm1215_vm5, %v6711_v11 }
 0x467   : > { %2266 = vmatprep.mubr.bf16.mxu0 %v8555_v0 }
 0x492   : > { %v2089_v12 = vpop.f32.mrb[16].mxu1 }
 0x493   : > { %v2100_v13 = vpack.c.bf16 %v2089_v12, %v2089_v12  ;;  %v2091_v14 = vpop.f32.mrb[17].mxu1  ;;  %v7830_v12 = vld [vmem:[#allocation8 + $0x644] ss:$24 sps:$4 sm:$0xff]  }
 0x494   : > { %v2101_v15 = vpack.c.bf16 %v2091_v14, %v2091_v14  ;;  %v2093_v17 = vpop.f32.mrb[18].mxu1  ;;  %v7833_v14 = vld [vmem:[#allocation8 + $0x674] ss:$24 sps:$4 sm:$0xff]  }
 0x495   : > { %v2229_v20 = vsel %vm1219_vm4, %v2100_v13, 0  ;;  %v2094_v21 = vpop.f32.mrb[19].mxu1  ;;  %v7828_v13 = vld [vmem:[#allocation8 + $0x640] ss:$24 sps:$4 sm:$0xff]   ;;  %v7836_v17 = vld [vmem:[#allocation8 + $0x6a4] ss:$24 sps:$4 sm:$0xff]  }
 0x496   : > { %6715 = vmatprep.subr.msk.bf16.mxu0 %vm1219_vm4, %v2101_v15  ;;  %v7831_v15 = vld [vmem:[#allocation8 + $0x670] ss:$24 sps:$4 sm:$0xff]  }
 0x497   : > { %2235 = vmatpush1.bf16.msra.mxu0 %v2229_v20  ;;  %v7839_v20 = vld [vmem:[#allocation8 + $0x6d4] ss:$24 sps:$4 sm:$0xff]   ;;  %v7837_v21 = vld [vmem:[#allocation8 + $0x6d0] ss:$24 sps:$4 sm:$0xff]  }
 0x498   : > { %2862 = vmatprep.subr.bf16.mxu0 %v7731_v19  ;;  %v7834_v19 = vld [vmem:[#allocation8 + $0x6a0] ss:$24 sps:$4 sm:$0xff]  }
 0x49a   : > { %6716 = vmatmul.mubr.msk.bf16.vlgmr.msra.gmra.mrb[16].mxu0 %vm1215_vm5, %v6714_v22  ;;  %v7842_v22 = vld [vmem:[#allocation8 + $0x704] ss:$24 sps:$4 sm:$0xff]   ;;  %vm4832_vm5 = vcmask 130048  }
 0x49b   : > { %2863 = vmatpush1.bf16.msra.mxu0 %v7729_v23  ;;  %v7840_v23 = vld [vmem:[#allocation8 + $0x700] ss:$24 sps:$4 sm:$0xff]  }
 0x49c   : > { %2864 = vmatprep.subr.bf16.mxu0 %v7737_v24  ;;  %v7845_v24 = vld [vmem:[#allocation8 + $0x734] ss:$24 sps:$4 sm:$0xff]  }
 0x49f   : > { %2865 = vmatpush1.bf16.msra.mxu0 %v7735_v25  ;;  %v7843_v25 = vld [vmem:[#allocation8 + $0x730] ss:$24 sps:$4 sm:$0xff]  }
 0x4a0   : > { %2866 = vmatprep.subr.bf16.mxu0 %v7743_v26  ;;  %v7848_v26 = vld [vmem:[#allocation8 + $0x764] ss:$24 sps:$4 sm:$0xff]  }
 0x4a3   : > { %2867 = vmatpush1.bf16.msra.mxu0 %v7741_v27  ;;  %v7846_v27 = vld [vmem:[#allocation8 + $0x760] ss:$24 sps:$4 sm:$0xff]  }
 0x4a4   : > { %2868 = vmatprep.subr.bf16.mxu0 %v7749_v28  ;;  %v7851_v28 = vld [vmem:[#allocation8 + $0x794] ss:$24 sps:$4 sm:$0xff]  }
 0x4a7   : > { %2869 = vmatpush1.bf16.msra.mxu0 %v7747_v29  ;;  %v7849_v29 = vld [vmem:[#allocation8 + $0x790] ss:$24 sps:$4 sm:$0xff]  }
 0x4a8   : > { %2870 = vmatprep.subr.bf16.mxu0 %v7755_v30  ;;  %v7854_v30 = vld [vmem:[#allocation8 + $0x7c4] ss:$24 sps:$4 sm:$0xff]  }
 0x4ab   : > { %2871 = vmatpush1.bf16.msra.mxu0 %v7753_v31  ;;  %v7852_v31 = vld [vmem:[#allocation8 + $0x7c0] ss:$24 sps:$4 sm:$0xff]  }
 0x4ac   : > { %2872 = vmatprep.subr.bf16.mxu0 %v7761_v32  ;;  %v7857_v32 = vld [vmem:[#allocation8 + $0x7f4] ss:$24 sps:$4 sm:$0xff]  }
 0x4af   : > { %2873 = vmatpush1.bf16.msra.mxu0 %v7759_v33  ;;  %v7855_v33 = vld [vmem:[#allocation8 + $0x7f0] ss:$24 sps:$4 sm:$0xff]  }
 0x4b0   : > { %2874 = vmatprep.subr.bf16.mxu0 %v7767_v34  ;;  %v7860_v34 = vld [vmem:[#allocation8 + $0x824] ss:$24 sps:$4 sm:$0xff]  }
 0x4b3   : > { %2875 = vmatpush1.bf16.msra.mxu0 %v7765_v35  ;;  %v7858_v35 = vld [vmem:[#allocation8 + $0x820] ss:$24 sps:$4 sm:$0xff]  }
 0x4b4   : > { %2876 = vmatprep.subr.bf16.mxu0 %v7773_v36  ;;  %v7863_v36 = vld [vmem:[#allocation8 + $0x854] ss:$24 sps:$4 sm:$0xff]  }
 0x4b7   : > { %2877 = vmatpush1.bf16.msra.mxu0 %v7771_v37  ;;  %v7861_v37 = vld [vmem:[#allocation8 + $0x850] ss:$24 sps:$4 sm:$0xff]  }
 0x4b8   : > { %2878 = vmatprep.subr.bf16.mxu0 %v7779_v38  ;;  %v7866_v38 = vld [vmem:[#allocation8 + $0x884] ss:$24 sps:$4 sm:$0xff]  }
 0x4bb   : > { %2879 = vmatpush1.bf16.msra.mxu0 %v7777_v39  ;;  %v7864_v39 = vld [vmem:[#allocation8 + $0x880] ss:$24 sps:$4 sm:$0xff]  }
 0x4bc   : > { %2880 = vmatprep.subr.bf16.mxu0 %v7785_v40  ;;  %v7869_v40 = vld [vmem:[#allocation8 + $0x8b4] ss:$24 sps:$4 sm:$0xff]  }
 0x4bf   : > { %2881 = vmatpush1.bf16.msra.mxu0 %v7783_v41  ;;  %v7867_v41 = vld [vmem:[#allocation8 + $0x8b0] ss:$24 sps:$4 sm:$0xff]  }
 0x4c0   : > { %2882 = vmatprep.subr.bf16.mxu0 %v7791_v42  ;;  %v7872_v42 = vld [vmem:[#allocation8 + $0x8e4] ss:$24 sps:$4 sm:$0xff]  }
 0x4c3   : > { %2883 = vmatpush1.bf16.msra.mxu0 %v7789_v43  ;;  %v7870_v43 = vld [vmem:[#allocation8 + $0x8e0] ss:$24 sps:$4 sm:$0xff]  }
 0x4c4   : > { %2884 = vmatprep.subr.bf16.mxu0 %v7797_v44  ;;  %v7876_v44 = vld [vmem:[#allocation8 + $0x908] ss:$24 sps:$4 sm:$0xff]  }
 0x4c7   : > { %2885 = vmatpush1.bf16.msra.mxu0 %v7795_v45  ;;  %v7878_v45 = vld [vmem:[#allocation8 + $0x90c] ss:$24 sps:$4 sm:$0xff]  }
 0x4c8   : > { %2886 = vmatprep.subr.bf16.mxu0 %v7803_v46  ;;  %v7882_v46 = vld [vmem:[#allocation8 + $0x938] ss:$24 sps:$4 sm:$0xff]  }
 0x4cb   : > { %2887 = vmatpush1.bf16.msra.mxu0 %v7801_v47  ;;  %v7884_v47 = vld [vmem:[#allocation8 + $0x93c] ss:$24 sps:$4 sm:$0xff]  }
 0x4cc   : > { %2888 = vmatprep.subr.bf16.mxu0 %v7809_v48  ;;  %v7888_v48 = vld [vmem:[#allocation8 + $0x968] ss:$24 sps:$4 sm:$0xff]  }
 0x4cf   : > { %2889 = vmatpush1.bf16.msra.mxu0 %v7807_v49  ;;  %v7890_v49 = vld [vmem:[#allocation8 + $0x96c] ss:$24 sps:$4 sm:$0xff]  }
 0x4d0   : > { %2890 = vmatprep.subr.bf16.mxu0 %v7815_v50  ;;  %v7894_v50 = vld [vmem:[#allocation8 + $0x998] ss:$24 sps:$4 sm:$0xff]  }
 0x4d3   : > { %2891 = vmatpush1.bf16.msra.mxu0 %v7813_v51  ;;  %v7896_v51 = vld [vmem:[#allocation8 + $0x99c] ss:$24 sps:$4 sm:$0xff]  }
 0x4d4   : > { %2892 = vmatprep.subr.bf16.mxu0 %v7821_v54  ;;  %v7906_v54 = vld [vmem:[#allocation8 + $0x9f8] ss:$24 sps:$4 sm:$0xff]  }
 0x4d7   : > { %2893 = vmatpush1.bf16.msra.mxu0 %v7819_v55  ;;  %v7908_v55 = vld [vmem:[#allocation8 + $0x9fc] ss:$24 sps:$4 sm:$0xff]  }
 0x4d8   : > { %2944 = vmatprep.subr.bf16.mxu0 %v7827_v58  ;;  %v7918_v58 = vld [vmem:[#allocation8 + $0xa58] ss:$24 sps:$4 sm:$0xff]  }
 0x56d   : > { %v2268_v62 = vpop.f32.mrb[16].mxu0 }
 0x56e   : > { %v7220_v63 = vadd.f32 %v2268_v62, %v2160_v60  ;;  %v2270_v1 = vpop.f32.mrb[17].mxu0  ;;  %v7924_v60 = vld [vmem:[#allocation8 + $0xa88] ss:$24 sps:$4 sm:$0xff]   ;;  %v7930_v62 = vld [vmem:[#allocation8 + $0xab8] ss:$24 sps:$4 sm:$0xff]  }
 0x56f   : > { %v7221_v2 = vadd.f32 %v2270_v1, %v2164_v61  ;;  %v2272_v3 = vpop.f32.mrb[18].mxu0  ;;  %v7926_v61 = vld [vmem:[#allocation8 + $0xa8c] ss:$24 sps:$4 sm:$0xff]   ;;  %v7936_v1 = vld [vmem:[#allocation8 + $0xae8] ss:$24 sps:$4 sm:$0xff]  }
 0x570   : > { %vm2277_vm8 = vcmp.ge.f32.partialorder %v7220_v63, 0.0  ;;  %v2279_v4 = vmul.f32 0.01, %v7220_v63  ;;  %v2273_v5 = vpop.f32.mrb[19].mxu0  ;;  %v7942_v3 = vld [vmem:[#allocation8 + $0xb18] ss:$24 sps:$4 sm:$0xff]  }
 0x571   : > { %vm2278_vm9 = vcmp.ge.f32.partialorder %v7221_v2, 0.0  ;;  %v2280_v6 = vmul.f32 0.01, %v7221_v2  ;;  %v7948_v5 = vld [vmem:[#allocation8 + $0xb48] ss:$24 sps:$4 sm:$0xff]  }
 0x572   : > { %v2281_v7 = vsel %vm2277_vm8, %v7220_v63, %v2279_v4  ;;  %v7932_v63 = vld [vmem:[#allocation8 + $0xabc] ss:$24 sps:$4 sm:$0xff]  }
 0x573   : > { %v2282_v8 = vsel %vm2278_vm9, %v7221_v2, %v2280_v6  ;;  %v8895_v11 = vpack.c.bf16 %v2281_v7, %v2281_v7  ;;  %v7938_v2 = vld [vmem:[#allocation8 + $0xaec] ss:$24 sps:$4 sm:$0xff]   ;;  %v7944_v4 = vld [vmem:[#allocation8 + $0xb1c] ss:$24 sps:$4 sm:$0xff]   ;;  %v7954_v7 = vld [vmem:[#allocation8 + $0xb78] ss:$24 sps:$4 sm:$0xff]  }
 0x574   : > { %v2284_v9 = vpack.c.bf16 %v2282_v8, %v2282_v8  ;;  %v7950_v6 = vld [vmem:[#allocation8 + $0xb4c] ss:$24 sps:$4 sm:$0xff]   ;;  %v7956_v8 = vld [vmem:[#allocation8 + $0xb7c] ss:$24 sps:$4 sm:$0xff]  }
 0x576   : > { %2894 = vmatprep.mubr.bf16.mxu0 %v2284_v9  ;;  %2935 = vmatprep.mubr.bf16.mxu1 %v2284_v9 }
 0x577   : > { %2895 = vmatmul.mubr.bf16.vlgmr.msra.gmra.mrb[20].mxu0 %v8895_v11  ;;  %2936 = vmatmul.mubr.bf16.vlgmr.msra.gmra.mrb[20].mxu1 %v8895_v11 }
 0x578   : > { %2945 = vmatpush1.bf16.msra.mxu0 %v7825_v10  ;;  %2976 = vmatprep.mubr.bf16.mxu0 %v2284_v9 }
 0x579   : > { %2946 = vmatprep.subr.bf16.mxu0 %v7830_v12  ;;  %3038 = vmatprep.mubr.bf16.mxu1 %v8555_v0 }
 0x57c   : > { %2947 = vmatpush1.bf16.msra.mxu0 %v7828_v13 }
 0x57d   : > { %2948 = vmatprep.subr.bf16.mxu0 %v7833_v14 }
 0x580   : > { %2949 = vmatpush1.bf16.msra.mxu0 %v7831_v15 }
 0x581   : > { %2950 = vmatprep.subr.bf16.mxu0 %v7836_v17 }
 0x584   : > { %2951 = vmatpush1.bf16.msra.mxu0 %v7834_v19 }
 0x585   : > { %2952 = vmatprep.subr.bf16.mxu0 %v7839_v20 }
 0x588   : > { %2953 = vmatpush1.bf16.msra.mxu0 %v7837_v21 }
 0x589   : > { %2954 = vmatprep.subr.bf16.mxu0 %v7842_v22 }
 0x58c   : > { %2955 = vmatpush1.bf16.msra.mxu0 %v7840_v23 }
 0x58d   : > { %2956 = vmatprep.subr.bf16.mxu0 %v7845_v24  ;;  %v6813_v24 = vld [vmem:[%s9215_s4 + $0xa8] sm:$0xf] }
 0x590   : > { %2957 = vmatpush1.bf16.msra.mxu0 %v7843_v25 }
 0x591   : > { %2958 = vmatprep.subr.bf16.mxu0 %v7848_v26  ;;  %v6816_v26 = vld [vmem:[%s9215_s4 + $0xc4] sm:$0xf] }
 0x594   : > { %2959 = vmatpush1.bf16.msra.mxu0 %v7846_v27 }
 0x595   : > { %2960 = vmatprep.subr.bf16.mxu0 %v7851_v28 }
 0x598   : > { %2961 = vmatpush1.bf16.msra.mxu0 %v7849_v29 }
 0x599   : > { %2962 = vmatprep.subr.bf16.mxu0 %v7854_v30 }
 0x59c   : > { %2963 = vmatpush1.bf16.msra.mxu0 %v7852_v31 }
 0x59d   : > { %2964 = vmatprep.subr.bf16.mxu0 %v7857_v32  ;;  %v7875_v32 = vld [vmem:[#allocation8 + $0x904] ss:$24 sps:$4 sm:$0xff]  }
 0x5a0   : > { %2965 = vmatpush1.bf16.msra.mxu0 %v7855_v33 }
 0x5a1   : > { %2966 = vmatprep.subr.bf16.mxu0 %v7860_v34 }
 0x5a4   : > { %2967 = vmatpush1.bf16.msra.mxu0 %v7858_v35  ;;  %v6819_v35 = vld [vmem:[%s9215_s4 + $0xe0] sm:$0xf] }
 0x5a5   : > { %2968 = vmatprep.subr.bf16.mxu0 %v7863_v36  ;;  %v7873_v36 = vld [vmem:[#allocation8 + $0x900] ss:$24 sps:$4 sm:$0xff]  }
 0x5a8   : > { %2969 = vmatpush1.bf16.msra.mxu0 %v7861_v37  ;;  %v7881_v37 = vld [vmem:[#allocation8 + $0x934] ss:$24 sps:$4 sm:$0xff]  }
 0x5a9   : > { %2970 = vmatprep.subr.bf16.mxu0 %v7866_v38  ;;  %v7879_v38 = vld [vmem:[#allocation8 + $0x930] ss:$24 sps:$4 sm:$0xff]  }
 0x5ac   : > { %2971 = vmatpush1.bf16.msra.mxu0 %v7864_v39  ;;  %v7887_v39 = vld [vmem:[#allocation8 + $0x964] ss:$24 sps:$4 sm:$0xff]  }
 0x5ad   : > { %2972 = vmatprep.subr.bf16.mxu0 %v7869_v40  ;;  %v7885_v40 = vld [vmem:[#allocation8 + $0x960] ss:$24 sps:$4 sm:$0xff]  }
 0x5b0   : > { %2973 = vmatpush1.bf16.msra.mxu0 %v7867_v41  ;;  %v7893_v41 = vld [vmem:[#allocation8 + $0x994] ss:$24 sps:$4 sm:$0xff]  }
 0x5b1   : > { %2974 = vmatprep.subr.bf16.mxu0 %v7872_v42  ;;  %v7891_v42 = vld [vmem:[#allocation8 + $0x990] ss:$24 sps:$4 sm:$0xff]  }
 0x5b4   : > { %2975 = vmatpush1.bf16.msra.mxu0 %v7870_v43  ;;  %v7899_v43 = vld [vmem:[#allocation8 + $0x9c4] ss:$24 sps:$4 sm:$0xff]  }
 0x5b5   : > { %3794 = vmatprep.subr.bf16.mxu0 %v7878_v45  ;;  %v7905_v45 = vld [vmem:[#allocation8 + $0x9f4] ss:$24 sps:$4 sm:$0xff]  }
 0x5b7   : > { %2977 = vmatmul.mubr.bf16.vlgmr.msra.gmra.mrb[24].mxu0 %v8895_v11 }
 0x5b8   : > { %3795 = vmatpush1.bf16.msra.mxu0 %v7876_v44  ;;  %v7897_v44 = vld [vmem:[#allocation8 + $0x9c0] ss:$24 sps:$4 sm:$0xff]  }
 0x5b9   : > { %3796 = vmatprep.subr.bf16.mxu0 %v7884_v47  ;;  %v7911_v47 = vld [vmem:[#allocation8 + $0xa24] ss:$24 sps:$4 sm:$0xff]  }
 0x5bc   : > { %3797 = vmatpush1.bf16.msra.mxu0 %v7882_v46  ;;  %v7903_v46 = vld [vmem:[#allocation8 + $0x9f0] ss:$24 sps:$4 sm:$0xff]  }
 0x5bd   : > { %3798 = vmatprep.subr.bf16.mxu0 %v7890_v49  ;;  %v7917_v49 = vld [vmem:[#allocation8 + $0xa54] ss:$24 sps:$4 sm:$0xff]  }
 0x5c0   : > { %3799 = vmatpush1.bf16.msra.mxu0 %v7888_v48  ;;  %v7909_v48 = vld [vmem:[#allocation8 + $0xa20] ss:$24 sps:$4 sm:$0xff]  }
 0x5c1   : > { %3800 = vmatprep.subr.bf16.mxu0 %v7896_v51  ;;  %v7923_v51 = vld [vmem:[#allocation8 + $0xa84] ss:$24 sps:$4 sm:$0xff]  }
 0x5c4   : > { %3801 = vmatpush1.bf16.msra.mxu0 %v7894_v50  ;;  %v7915_v50 = vld [vmem:[#allocation8 + $0xa50] ss:$24 sps:$4 sm:$0xff]  }
 0x5c5   : > { %3802 = vmatprep.subr.bf16.mxu0 %v7902_v53  ;;  %v7929_v53 = vld [vmem:[#allocation8 + $0xab4] ss:$24 sps:$4 sm:$0xff]  }
 0x5c8   : > { %3803 = vmatpush1.bf16.msra.mxu0 %v7900_v52  ;;  %v7921_v52 = vld [vmem:[#allocation8 + $0xa80] ss:$24 sps:$4 sm:$0xff]  }
 0x5c9   : > { %3804 = vmatprep.subr.bf16.mxu0 %v7908_v55  ;;  %v7935_v55 = vld [vmem:[#allocation8 + $0xae4] ss:$24 sps:$4 sm:$0xff]  }
 0x5cc   : > { %3805 = vmatpush1.bf16.msra.mxu0 %v7906_v54  ;;  %v7927_v54 = vld [vmem:[#allocation8 + $0xab0] ss:$24 sps:$4 sm:$0xff]  }
 0x5cd   : > { %3806 = vmatprep.subr.bf16.mxu0 %v7914_v57  ;;  %v7941_v57 = vld [vmem:[#allocation8 + $0xb14] ss:$24 sps:$4 sm:$0xff]  }
 0x5d0   : > { %3807 = vmatpush1.bf16.msra.mxu0 %v7912_v56  ;;  %v7933_v56 = vld [vmem:[#allocation8 + $0xae0] ss:$24 sps:$4 sm:$0xff]  }
 0x5d1   : > { %3808 = vmatprep.subr.bf16.mxu0 %v7920_v59  ;;  %v7947_v59 = vld [vmem:[#allocation8 + $0xb44] ss:$24 sps:$4 sm:$0xff]  }
 0x5d4   : > { %3809 = vmatpush1.bf16.msra.mxu0 %v7918_v58  ;;  %v7939_v58 = vld [vmem:[#allocation8 + $0xb10] ss:$24 sps:$4 sm:$0xff]  }
 0x5d5   : > { %3810 = vmatprep.subr.bf16.mxu0 %v7926_v61  ;;  %v7953_v61 = vld [vmem:[#allocation8 + $0xb74] ss:$24 sps:$4 sm:$0xff]  }
 0x5d8   : > { %3811 = vmatpush1.bf16.msra.mxu0 %v7924_v60  ;;  %v7945_v60 = vld [vmem:[#allocation8 + $0xb40] ss:$24 sps:$4 sm:$0xff]  }
 0x5d9   : > { %3812 = vmatprep.subr.bf16.mxu0 %v7932_v63  ;;  %v7959_v63 = vld [vmem:[#allocation8 + $0xba4] ss:$24 sps:$4 sm:$0xff]  }
 0x5dc   : > { %3813 = vmatpush1.bf16.msra.mxu0 %v7930_v62  ;;  %v7951_v62 = vld [vmem:[#allocation8 + $0xb70] ss:$24 sps:$4 sm:$0xff]  }
 0x5dd   : > { %3814 = vmatprep.subr.bf16.mxu0 %v7938_v2  ;;  %v7962_v2 = vld [vmem:[#allocation8 + $0xbac] ss:$24 sps:$4 sm:$0xff]  }
 0x5e0   : > { %3815 = vmatpush1.bf16.msra.mxu0 %v7936_v1  ;;  %v7957_v1 = vld [vmem:[#allocation8 + $0xba0] ss:$24 sps:$4 sm:$0xff]  }
 0x5e1   : > { %3816 = vmatprep.subr.bf16.mxu0 %v7944_v4  ;;  %v7965_v4 = vld [vmem:[#allocation8 + $0xbd4] ss:$24 sps:$4 sm:$0xff]  }
 0x5e4   : > { %3817 = vmatpush1.bf16.msra.mxu0 %v7942_v3  ;;  %v7960_v3 = vld [vmem:[#allocation8 + $0xba8] ss:$24 sps:$4 sm:$0xff]  }
 0x5e5   : > { %3818 = vmatprep.subr.bf16.mxu0 %v7950_v6  ;;  %v7968_v6 = vld [vmem:[#allocation8 + $0xbdc] ss:$24 sps:$4 sm:$0xff]  }
 0x5e8   : > { %3819 = vmatpush1.bf16.msra.mxu0 %v7948_v5  ;;  %v7963_v5 = vld [vmem:[#allocation8 + $0xbd0] ss:$24 sps:$4 sm:$0xff]  }
 0x5e9   : > { %3820 = vmatprep.subr.bf16.mxu0 %v7956_v8  ;;  %v7971_v8 = vld [vmem:[#allocation8 + $0x914] ss:$24 sps:$4 sm:$0xff]  }
 0x5ec   : > { %3821 = vmatpush1.bf16.msra.mxu0 %v7954_v7  ;;  %v7966_v7 = vld [vmem:[#allocation8 + $0xbd8] ss:$24 sps:$4 sm:$0xff]  }
 0x5ed   : > { %3822 = vmatprep.subr.bf16.mxu0 %v7962_v2  ;;  %v8047_v2 = vld [vmem:[#allocation8 + $0xcc8] ss:$24 sps:$4 sm:$0xff]  }
 0x5f0   : > { %3823 = vmatpush1.bf16.msra.mxu0 %v7960_v3  ;;  %v8049_v3 = vld [vmem:[#allocation8 + $0xccc] ss:$24 sps:$4 sm:$0xff]  }
 0x5f1   : > { %3824 = vmatprep.subr.bf16.mxu0 %v7968_v6  ;;  %v8059_v6 = vld [vmem:[#allocation8 + $0xd28] ss:$24 sps:$4 sm:$0xff]  }
 0x5f4   : > { %3825 = vmatpush1.bf16.msra.mxu0 %v7966_v7  ;;  %v8061_v7 = vld [vmem:[#allocation8 + $0xd2c] ss:$24 sps:$4 sm:$0xff]  }
 0x64a   : > { %v2896_v9 = vpop.f32.mrb[20].mxu0  ;;  %v2937_v10 = vpop.f32.mrb[20].mxu1 }
 0x64b   : > { %v2985_v11 = vpack.c.bf16 %v2896_v9, %v2896_v9  ;;  %v2898_v12 = vpop.f32.mrb[21].mxu0  ;;  %v2939_v13 = vpop.f32.mrb[21].mxu1  ;;  %v2987_v22 = vpack.c.bf16 %v2937_v10, %v2937_v10  ;;  %v2992_v9 = vld [vmem:[#allocation10 + $0x4] sm:$0x3] }
 0x64c   : > { %v2986_v14 = vpack.c.bf16 %v2898_v12, %v2898_v12  ;;  %v2900_v15 = vpop.f32.mrb[22].mxu0  ;;  %v2941_v17 = vpop.f32.mrb[22].mxu1  ;;  %v2988_v23 = vpack.c.bf16 %v2939_v13, %v2939_v13  ;;  %v3051_v10 = vrot.slane %v2992_v9, %v8829_v16 }
 0x64d   : > { %v3001_v19 = vsel %vm2999_vm10, %v2985_v11, 0  ;;  %v2901_v20 = vpop.f32.mrb[23].mxu0  ;;  %v2942_v21 = vpop.f32.mrb[23].mxu1  ;;  %v3066_v25 = vsel %vm2999_vm10, %v2987_v22, 0  ;;  %v3055_v11 = vrot.slane %v2992_v9, %v8831_v18  ;;  %v8067_v9 = vld [vmem:[#allocation8 + $0xd5c] ss:$24 sps:$4 sm:$0xff]  }
 0x64e   : > { %6814 = vmatprep.subr.msk.bf16.mxu1 %vm2999_vm10, %v2986_v14 }
 0x64f   : > { %3007 = vmatpush1.bf16.msra.mxu1 %v3001_v19 }
 0x650   : > { %6817 = vmatprep.subr.msk.bf16.mxu1 %vm2999_vm10, %v2988_v23 }
 0x652   : > { %6815 = vmatmul.mubr.msk.bf16.vlgmr.msra.gmra.mrb[24].mxu1 %vm2995_vm11, %v6813_v24 }
 0x653   : > { %3072 = vmatpush1.bf16.msra.mxu1 %v3066_v25  ;;  %3103 = vmatprep.mubr.bf16.mxu1 %v8555_v0  ;;  %v7969_v25 = vld [vmem:[#allocation8 + $0x910] ss:$24 sps:$4 sm:$0xff]  }
 0x65e   : > { %6818 = vmatmul.mubr.msk.bf16.vlgmr.msra.gmra.mrb[24].mxu1 %vm2995_vm11, %v6816_v26 }
 0x65f   : > { %3157 = vmatprep.mubr.bf16.mxu1 %v8555_v0 }
 0x68a   : > { %v2978_v27 = vpop.f32.mrb[24].mxu0 }
 0x68b   : > { %v2989_v28 = vpack.c.bf16 %v2978_v27, %v2978_v27  ;;  %v2980_v29 = vpop.f32.mrb[25].mxu0  ;;  %v7974_v27 = vld [vmem:[#allocation8 + $0x944] ss:$24 sps:$4 sm:$0xff]  }
 0x68c   : > { %v2990_v30 = vpack.c.bf16 %v2980_v29, %v2980_v29  ;;  %v2982_v31 = vpop.f32.mrb[26].mxu0  ;;  %v7977_v29 = vld [vmem:[#allocation8 + $0x974] ss:$24 sps:$4 sm:$0xff]  }
 0x68d   : > { %v3120_v33 = vsel %vm2999_vm10, %v2989_v28, 0  ;;  %v2983_v34 = vpop.f32.mrb[27].mxu0  ;;  %v7972_v28 = vld [vmem:[#allocation8 + $0x940] ss:$24 sps:$4 sm:$0xff]   ;;  %v7980_v31 = vld [vmem:[#allocation8 + $0x9a4] ss:$24 sps:$4 sm:$0xff]  }
 0x68e   : > { %6820 = vmatprep.subr.msk.bf16.mxu1 %vm2999_vm10, %v2990_v30  ;;  %v7975_v30 = vld [vmem:[#allocation8 + $0x970] ss:$24 sps:$4 sm:$0xff]  }
 0x68f   : > { %3126 = vmatpush1.bf16.msra.mxu1 %v3120_v33  ;;  %v7983_v33 = vld [vmem:[#allocation8 + $0x9d4] ss:$24 sps:$4 sm:$0xff]   ;;  %v7981_v34 = vld [vmem:[#allocation8 + $0x9d0] ss:$24 sps:$4 sm:$0xff]  }
 0x690   : > { %3753 = vmatprep.subr.bf16.mxu1 %v7875_v32  ;;  %v7978_v32 = vld [vmem:[#allocation8 + $0x9a0] ss:$24 sps:$4 sm:$0xff]  }
 0x692   : > { %6821 = vmatmul.mubr.msk.bf16.vlgmr.msra.gmra.mrb[24].mxu1 %vm2995_vm11, %v6819_v35  ;;  %v7986_v35 = vld [vmem:[#allocation8 + $0xa04] ss:$24 sps:$4 sm:$0xff]  }
 0x693   : > { %3754 = vmatpush1.bf16.msra.mxu1 %v7873_v36  ;;  %v7984_v36 = vld [vmem:[#allocation8 + $0xa00] ss:$24 sps:$4 sm:$0xff]  }
 0x694   : > { %3755 = vmatprep.subr.bf16.mxu1 %v7881_v37  ;;  %v7989_v37 = vld [vmem:[#allocation8 + $0xa34] ss:$24 sps:$4 sm:$0xff]  }
 0x697   : > { %3756 = vmatpush1.bf16.msra.mxu1 %v7879_v38  ;;  %v7987_v38 = vld [vmem:[#allocation8 + $0xa30] ss:$24 sps:$4 sm:$0xff]  }
 0x698   : > { %3757 = vmatprep.subr.bf16.mxu1 %v7887_v39  ;;  %v7992_v39 = vld [vmem:[#allocation8 + $0xa64] ss:$24 sps:$4 sm:$0xff]  }
 0x69b   : > { %3758 = vmatpush1.bf16.msra.mxu1 %v7885_v40  ;;  %v7990_v40 = vld [vmem:[#allocation8 + $0xa60] ss:$24 sps:$4 sm:$0xff]  }
 0x69c   : > { %3759 = vmatprep.subr.bf16.mxu1 %v7893_v41  ;;  %v7995_v41 = vld [vmem:[#allocation8 + $0xa94] ss:$24 sps:$4 sm:$0xff]  }
 0x69f   : > { %3760 = vmatpush1.bf16.msra.mxu1 %v7891_v42  ;;  %v7993_v42 = vld [vmem:[#allocation8 + $0xa90] ss:$24 sps:$4 sm:$0xff]  }
 0x6a0   : > { %3761 = vmatprep.subr.bf16.mxu1 %v7899_v43  ;;  %v7998_v43 = vld [vmem:[#allocation8 + $0xac4] ss:$24 sps:$4 sm:$0xff]  }
 0x6a3   : > { %3762 = vmatpush1.bf16.msra.mxu1 %v7897_v44  ;;  %v7996_v44 = vld [vmem:[#allocation8 + $0xac0] ss:$24 sps:$4 sm:$0xff]  }
 0x6a4   : > { %3763 = vmatprep.subr.bf16.mxu1 %v7905_v45  ;;  %v8001_v45 = vld [vmem:[#allocation8 + $0xaf4] ss:$24 sps:$4 sm:$0xff]  }
 0x6a7   : > { %3764 = vmatpush1.bf16.msra.mxu1 %v7903_v46  ;;  %v7999_v46 = vld [vmem:[#allocation8 + $0xaf0] ss:$24 sps:$4 sm:$0xff]  }
 0x6a8   : > { %3765 = vmatprep.subr.bf16.mxu1 %v7911_v47  ;;  %v8004_v47 = vld [vmem:[#allocation8 + $0xb24] ss:$24 sps:$4 sm:$0xff]  }
 0x6ab   : > { %3766 = vmatpush1.bf16.msra.mxu1 %v7909_v48  ;;  %v8002_v48 = vld [vmem:[#allocation8 + $0xb20] ss:$24 sps:$4 sm:$0xff]  }
 0x6ac   : > { %3767 = vmatprep.subr.bf16.mxu1 %v7917_v49  ;;  %v8007_v49 = vld [vmem:[#allocation8 + $0xb54] ss:$24 sps:$4 sm:$0xff]  }
 0x6af   : > { %3768 = vmatpush1.bf16.msra.mxu1 %v7915_v50  ;;  %v8005_v50 = vld [vmem:[#allocation8 + $0xb50] ss:$24 sps:$4 sm:$0xff]  }
 0x6b0   : > { %3769 = vmatprep.subr.bf16.mxu1 %v7923_v51  ;;  %v8010_v51 = vld [vmem:[#allocation8 + $0xb84] ss:$24 sps:$4 sm:$0xff]  }
 0x6b3   : > { %3770 = vmatpush1.bf16.msra.mxu1 %v7921_v52  ;;  %v8008_v52 = vld [vmem:[#allocation8 + $0xb80] ss:$24 sps:$4 sm:$0xff]  }
 0x6b4   : > { %3771 = vmatprep.subr.bf16.mxu1 %v7929_v53  ;;  %v8013_v53 = vld [vmem:[#allocation8 + $0xbb4] ss:$24 sps:$4 sm:$0xff]  }
 0x6b7   : > { %3772 = vmatpush1.bf16.msra.mxu1 %v7927_v54  ;;  %v8011_v54 = vld [vmem:[#allocation8 + $0xbb0] ss:$24 sps:$4 sm:$0xff]  }
 0x6b8   : > { %3773 = vmatprep.subr.bf16.mxu1 %v7935_v55  ;;  %v8016_v55 = vld [vmem:[#allocation8 + $0xbe4] ss:$24 sps:$4 sm:$0xff]  }
 0x6bb   : > { %3774 = vmatpush1.bf16.msra.mxu1 %v7933_v56  ;;  %v8014_v56 = vld [vmem:[#allocation8 + $0xbe0] ss:$24 sps:$4 sm:$0xff]  }
 0x6bc   : > { %3775 = vmatprep.subr.bf16.mxu1 %v7941_v57  ;;  %v8023_v57 = vld [vmem:[#allocation8 + $0xc08] ss:$24 sps:$4 sm:$0xff]  }
 0x6bf   : > { %3776 = vmatpush1.bf16.msra.mxu1 %v7939_v58  ;;  %v8025_v58 = vld [vmem:[#allocation8 + $0xc0c] ss:$24 sps:$4 sm:$0xff]  }
 0x6c0   : > { %3777 = vmatprep.subr.bf16.mxu1 %v7947_v59  ;;  %v8029_v59 = vld [vmem:[#allocation8 + $0xc38] ss:$24 sps:$4 sm:$0xff]  }
 0x6c3   : > { %3778 = vmatpush1.bf16.msra.mxu1 %v7945_v60  ;;  %v8031_v60 = vld [vmem:[#allocation8 + $0xc3c] ss:$24 sps:$4 sm:$0xff]  }
 0x6c4   : > { %3779 = vmatprep.subr.bf16.mxu1 %v7953_v61  ;;  %v8035_v61 = vld [vmem:[#allocation8 + $0xc68] ss:$24 sps:$4 sm:$0xff]  }
 0x6c7   : > { %3780 = vmatpush1.bf16.msra.mxu1 %v7951_v62  ;;  %v8037_v62 = vld [vmem:[#allocation8 + $0xc6c] ss:$24 sps:$4 sm:$0xff]  }
 0x6c8   : > { %3781 = vmatprep.subr.bf16.mxu1 %v7959_v63  ;;  %v8041_v63 = vld [vmem:[#allocation8 + $0xc98] ss:$24 sps:$4 sm:$0xff]  }
 0x6cb   : > { %3782 = vmatpush1.bf16.msra.mxu1 %v7957_v1  ;;  %v8043_v1 = vld [vmem:[#allocation8 + $0xc9c] ss:$24 sps:$4 sm:$0xff]  }
 0x6cc   : > { %3783 = vmatprep.subr.bf16.mxu1 %v7965_v4  ;;  %v8053_v4 = vld [vmem:[#allocation8 + $0xcf8] ss:$24 sps:$4 sm:$0xff]  }
 0x6cf   : > { %3784 = vmatpush1.bf16.msra.mxu1 %v7963_v5  ;;  %v8055_v5 = vld [vmem:[#allocation8 + $0xcfc] ss:$24 sps:$4 sm:$0xff]  }
 0x6d0   : > { %3835 = vmatprep.subr.bf16.mxu1 %v7971_v8  ;;  %v8065_v8 = vld [vmem:[#allocation8 + $0xd58] ss:$24 sps:$4 sm:$0xff]  }
 0x765   : > { %v3159_v12 = vpop.f32.mrb[24].mxu1 }
 0x766   : > { %v7222_v13 = vadd.f32 %v3159_v12, %v3051_v10  ;;  %v3161_v14 = vpop.f32.mrb[25].mxu1  ;;  %v8071_v10 = vld [vmem:[#allocation8 + $0xd88] ss:$24 sps:$4 sm:$0xff]   ;;  %v8077_v12 = vld [vmem:[#allocation8 + $0xdb8] ss:$24 sps:$4 sm:$0xff]  }
 0x767   : > { %v7223_v15 = vadd.f32 %v3161_v14, %v3055_v11  ;;  %v3163_v17 = vpop.f32.mrb[26].mxu1  ;;  %v8073_v11 = vld [vmem:[#allocation8 + $0xd8c] ss:$24 sps:$4 sm:$0xff]   ;;  %v8083_v14 = vld [vmem:[#allocation8 + $0xde8] ss:$24 sps:$4 sm:$0xff]  }
 0x768   : > { %vm3168_vm12 = vcmp.ge.f32.partialorder %v7222_v13, 0.0  ;;  %v3170_v19 = vmul.f32 0.01, %v7222_v13  ;;  %v3164_v20 = vpop.f32.mrb[27].mxu1  ;;  %v8089_v17 = vld [vmem:[#allocation8 + $0xe18] ss:$24 sps:$4 sm:$0xff]  }
 0x769   : > { %vm3169_vm13 = vcmp.ge.f32.partialorder %v7223_v15, 0.0  ;;  %v3171_v21 = vmul.f32 0.01, %v7223_v15  ;;  %v8095_v20 = vld [vmem:[#allocation8 + $0xe48] ss:$24 sps:$4 sm:$0xff]  }
 0x76a   : > { %v3172_v22 = vsel %vm3168_vm12, %v7222_v13, %v3170_v19  ;;  %v8079_v13 = vld [vmem:[#allocation8 + $0xdbc] ss:$24 sps:$4 sm:$0xff]  }
 0x76b   : > { %v3173_v23 = vsel %vm3169_vm13, %v7223_v15, %v3171_v21  ;;  %v8923_v26 = vpack.c.bf16 %v3172_v22, %v3172_v22  ;;  %v8085_v15 = vld [vmem:[#allocation8 + $0xdec] ss:$24 sps:$4 sm:$0xff]   ;;  %v8091_v19 = vld [vmem:[#allocation8 + $0xe1c] ss:$24 sps:$4 sm:$0xff]  }
 0x76c   : > { %v3175_v24 = vpack.c.bf16 %v3173_v23, %v3173_v23  ;;  %v8097_v21 = vld [vmem:[#allocation8 + $0xe4c] ss:$24 sps:$4 sm:$0xff]  }
 0x76e   : > { %3785 = vmatprep.mubr.bf16.mxu1 %v3175_v24  ;;  %3826 = vmatprep.mubr.bf16.mxu0 %v3175_v24 }
 0x76f   : > { %3786 = vmatmul.mubr.bf16.vlgmr.msra.gmra.mrb[28].mxu1 %v8923_v26  ;;  %3827 = vmatmul.mubr.bf16.vlgmr.msra.gmra.mrb[28].mxu0 %v8923_v26 }
 0x770   : > { %3836 = vmatpush1.bf16.msra.mxu1 %v7969_v25  ;;  %3867 = vmatprep.mubr.bf16.mxu1 %v3175_v24 }
 0x771   : > { %3837 = vmatprep.subr.bf16.mxu1 %v7974_v27  ;;  %3935 = vmatprep.mubr.bf16.mxu0 %v8555_v0 }
 0x774   : > { %3838 = vmatpush1.bf16.msra.mxu1 %v7972_v28 }
 0x775   : > { %3839 = vmatprep.subr.bf16.mxu1 %v7977_v29 }
 0x778   : > { %3840 = vmatpush1.bf16.msra.mxu1 %v7975_v30 }
 0x779   : > { %3841 = vmatprep.subr.bf16.mxu1 %v7980_v31 }
 0x77c   : > { %3842 = vmatpush1.bf16.msra.mxu1 %v7978_v32 }
 0x77d   : > { %3843 = vmatprep.subr.bf16.mxu1 %v7983_v33 }
 0x780   : > { %3844 = vmatpush1.bf16.msra.mxu1 %v7981_v34 }
 0x781   : > { %3845 = vmatprep.subr.bf16.mxu1 %v7986_v35  ;;  %v8017_v35 = vld [vmem:[%s9215_s4 + $0xfc] sm:$0xff]  }
 0x784   : > { %3846 = vmatpush1.bf16.msra.mxu1 %v7984_v36 }
 0x785   : > { %3847 = vmatprep.subr.bf16.mxu1 %v7989_v37  ;;  %v8018_v37 = vld [vmem:[%s9215_s4 + $0x118] sm:$0xff]  }
 0x788   : > { %3848 = vmatpush1.bf16.msra.mxu1 %v7987_v38 }
 0x789   : > { %3849 = vmatprep.subr.bf16.mxu1 %v7992_v39 }
 0x78c   : > { %3850 = vmatpush1.bf16.msra.mxu1 %v7990_v40 }
 0x78d   : > { %3851 = vmatprep.subr.bf16.mxu1 %v7995_v41 }
 0x790   : > { %3852 = vmatpush1.bf16.msra.mxu1 %v7993_v42 }
 0x791   : > { %3853 = vmatprep.subr.bf16.mxu1 %v7998_v43  ;;  %v8022_v43 = vld [vmem:[#allocation8 + $0xc04] ss:$24 sps:$4 sm:$0xff]  }
 0x794   : > { %3854 = vmatpush1.bf16.msra.mxu1 %v7996_v44 }
 0x795   : > { %3855 = vmatprep.subr.bf16.mxu1 %v8001_v45 }
 0x798   : > { %3856 = vmatpush1.bf16.msra.mxu1 %v7999_v46  ;;  %v8019_v46 = vld [vmem:[%s9215_s4 + $0x134] sm:$0xff]  }
 0x799   : > { %3857 = vmatprep.subr.bf16.mxu1 %v8004_v47  ;;  %v8020_v47 = vld [vmem:[#allocation8 + $0xc00] ss:$24 sps:$4 sm:$0xff]  }
 0x79c   : > { %3858 = vmatpush1.bf16.msra.mxu1 %v8002_v48  ;;  %v8028_v48 = vld [vmem:[#allocation8 + $0xc34] ss:$24 sps:$4 sm:$0xff]  }
 0x79d   : > { %3859 = vmatprep.subr.bf16.mxu1 %v8007_v49  ;;  %v8026_v49 = vld [vmem:[#allocation8 + $0xc30] ss:$24 sps:$4 sm:$0xff]  }
 0x7a0   : > { %3860 = vmatpush1.bf16.msra.mxu1 %v8005_v50  ;;  %v8034_v50 = vld [vmem:[#allocation8 + $0xc64] ss:$24 sps:$4 sm:$0xff]  }
 0x7a1   : > { %3861 = vmatprep.subr.bf16.mxu1 %v8010_v51  ;;  %v8032_v51 = vld [vmem:[#allocation8 + $0xc60] ss:$24 sps:$4 sm:$0xff]  }
 0x7a4   : > { %3862 = vmatpush1.bf16.msra.mxu1 %v8008_v52  ;;  %v8040_v52 = vld [vmem:[#allocation8 + $0xc94] ss:$24 sps:$4 sm:$0xff]  }
 0x7a5   : > { %3863 = vmatprep.subr.bf16.mxu1 %v8013_v53  ;;  %v8038_v53 = vld [vmem:[#allocation8 + $0xc90] ss:$24 sps:$4 sm:$0xff]  }
 0x7a8   : > { %3864 = vmatpush1.bf16.msra.mxu1 %v8011_v54  ;;  %v8046_v54 = vld [vmem:[#allocation8 + $0xcc4] ss:$24 sps:$4 sm:$0xff]  }
 0x7a9   : > { %3865 = vmatprep.subr.bf16.mxu1 %v8016_v55  ;;  %v8044_v55 = vld [vmem:[#allocation8 + $0xcc0] ss:$24 sps:$4 sm:$0xff]  }
 0x7ac   : > { %3866 = vmatpush1.bf16.msra.mxu1 %v8014_v56  ;;  %v8052_v56 = vld [vmem:[#allocation8 + $0xcf4] ss:$24 sps:$4 sm:$0xff]  }
 0x7ad   : > { %4723 = vmatprep.subr.bf16.mxu1 %v8025_v58  ;;  %v8058_v58 = vld [vmem:[#allocation8 + $0xd24] ss:$24 sps:$4 sm:$0xff]  }
 0x7af   : > { %3868 = vmatmul.mubr.bf16.vlgmr.msra.gmra.mrb[32].mxu1 %v8923_v26 }
 0x7b0   : > { %4724 = vmatpush1.bf16.msra.mxu1 %v8023_v57  ;;  %v8050_v57 = vld [vmem:[#allocation8 + $0xcf0] ss:$24 sps:$4 sm:$0xff]  }
 0x7b1   : > { %4725 = vmatprep.subr.bf16.mxu1 %v8031_v60  ;;  %v8064_v60 = vld [vmem:[#allocation8 + $0xd54] ss:$24 sps:$4 sm:$0xff]  }
 0x7b4   : > { %4726 = vmatpush1.bf16.msra.mxu1 %v8029_v59  ;;  %v8056_v59 = vld [vmem:[#allocation8 + $0xd20] ss:$24 sps:$4 sm:$0xff]  }
 0x7b5   : > { %4727 = vmatprep.subr.bf16.mxu1 %v8037_v62  ;;  %v8070_v62 = vld [vmem:[#allocation8 + $0xd84] ss:$24 sps:$4 sm:$0xff]  }
 0x7b8   : > { %4728 = vmatpush1.bf16.msra.mxu1 %v8035_v61  ;;  %v8062_v61 = vld [vmem:[#allocation8 + $0xd50] ss:$24 sps:$4 sm:$0xff]  }
 0x7b9   : > { %4729 = vmatprep.subr.bf16.mxu1 %v8043_v1  ;;  %v8076_v1 = vld [vmem:[#allocation8 + $0xdb4] ss:$24 sps:$4 sm:$0xff]  }
 0x7bc   : > { %4730 = vmatpush1.bf16.msra.mxu1 %v8041_v63  ;;  %v8068_v63 = vld [vmem:[#allocation8 + $0xd80] ss:$24 sps:$4 sm:$0xff]  }
 0x7bd   : > { %4731 = vmatprep.subr.bf16.mxu1 %v8049_v3  ;;  %v8082_v3 = vld [vmem:[#allocation8 + $0xde4] ss:$24 sps:$4 sm:$0xff]  }
 0x7c0   : > { %4732 = vmatpush1.bf16.msra.mxu1 %v8047_v2  ;;  %v8074_v2 = vld [vmem:[#allocation8 + $0xdb0] ss:$24 sps:$4 sm:$0xff]  }
 0x7c1   : > { %4733 = vmatprep.subr.bf16.mxu1 %v8055_v5  ;;  %v8088_v5 = vld [vmem:[#allocation8 + $0xe14] ss:$24 sps:$4 sm:$0xff]  }
 0x7c4   : > { %4734 = vmatpush1.bf16.msra.mxu1 %v8053_v4  ;;  %v8080_v4 = vld [vmem:[#allocation8 + $0xde0] ss:$24 sps:$4 sm:$0xff]  }
 0x7c5   : > { %4735 = vmatprep.subr.bf16.mxu1 %v8061_v7  ;;  %v8094_v7 = vld [vmem:[#allocation8 + $0xe44] ss:$24 sps:$4 sm:$0xff]  }
 0x7c8   : > { %4736 = vmatpush1.bf16.msra.mxu1 %v8059_v6  ;;  %v8086_v6 = vld [vmem:[#allocation8 + $0xe10] ss:$24 sps:$4 sm:$0xff]  }
 0x7c9   : > { %4737 = vmatprep.subr.bf16.mxu1 %v8067_v9  ;;  %v8100_v9 = vld [vmem:[#allocation8 + $0xe74] ss:$24 sps:$4 sm:$0xff]  }
 0x7cc   : > { %4738 = vmatpush1.bf16.msra.mxu1 %v8065_v8  ;;  %v8092_v8 = vld [vmem:[#allocation8 + $0xe40] ss:$24 sps:$4 sm:$0xff]  }
 0x7cd   : > { %4739 = vmatprep.subr.bf16.mxu1 %v8073_v11  ;;  %v8103_v11 = vld [vmem:[#allocation8 + $0xe7c] ss:$24 sps:$4 sm:$0xff]  }
 0x7d0   : > { %4740 = vmatpush1.bf16.msra.mxu1 %v8071_v10  ;;  %v8098_v10 = vld [vmem:[#allocation8 + $0xe70] ss:$24 sps:$4 sm:$0xff]  }
 0x7d1   : > { %4741 = vmatprep.subr.bf16.mxu1 %v8079_v13  ;;  %v8106_v13 = vld [vmem:[#allocation8 + $0xea4] ss:$24 sps:$4 sm:$0xff]  }
 0x7d4   : > { %4742 = vmatpush1.bf16.msra.mxu1 %v8077_v12  ;;  %v8101_v12 = vld [vmem:[#allocation8 + $0xe78] ss:$24 sps:$4 sm:$0xff]  }
 0x7d5   : > { %4743 = vmatprep.subr.bf16.mxu1 %v8085_v15  ;;  %v8109_v15 = vld [vmem:[#allocation8 + $0xeac] ss:$24 sps:$4 sm:$0xff]  }
 0x7d8   : > { %4744 = vmatpush1.bf16.msra.mxu1 %v8083_v14  ;;  %v8104_v14 = vld [vmem:[#allocation8 + $0xea0] ss:$24 sps:$4 sm:$0xff]  }
 0x7d9   : > { %4745 = vmatprep.subr.bf16.mxu1 %v8091_v19  ;;  %v8112_v19 = vld [vmem:[#allocation8 + $0xed4] ss:$24 sps:$4 sm:$0xff]  }
 0x7dc   : > { %4746 = vmatpush1.bf16.msra.mxu1 %v8089_v17  ;;  %v8107_v17 = vld [vmem:[#allocation8 + $0xea8] ss:$24 sps:$4 sm:$0xff]  }
 0x7dd   : > { %4747 = vmatprep.subr.bf16.mxu1 %v8097_v21  ;;  %v8115_v21 = vld [vmem:[#allocation8 + $0xedc] ss:$24 sps:$4 sm:$0xff]  }
 0x7e0   : > { %4748 = vmatpush1.bf16.msra.mxu1 %v8095_v20  ;;  %v8110_v20 = vld [vmem:[#allocation8 + $0xed0] ss:$24 sps:$4 sm:$0xff]  }
 0x7e1   : > { %4749 = vmatprep.subr.bf16.mxu1 %v8103_v11  ;;  %v8163_v11 = vld [vmem:[#allocation8 + $0xee4] ss:$24 sps:$4 sm:$0xff]  }
 0x7e4   : > { %4750 = vmatpush1.bf16.msra.mxu1 %v8101_v12  ;;  %v8161_v12 = vld [vmem:[#allocation8 + $0xee0] ss:$24 sps:$4 sm:$0xff]  }
 0x7e5   : > { %4751 = vmatprep.subr.bf16.mxu1 %v8109_v15  ;;  %v8181_v15 = vld [vmem:[#allocation8 + $0xf3c] ss:$24 sps:$4 sm:$0xff]  }
 0x7e8   : > { %4752 = vmatpush1.bf16.msra.mxu1 %v8107_v17  ;;  %v8179_v17 = vld [vmem:[#allocation8 + $0xf38] ss:$24 sps:$4 sm:$0xff]  }
 0x7e9   : > { %4753 = vmatprep.subr.bf16.mxu1 %v8115_v21  ;;  %v8193_v21 = vld [vmem:[#allocation8 + $0xf9c] ss:$24 sps:$4 sm:$0xff]  }
 0x842   : > { %v3787_v22 = vpop.f32.mrb[28].mxu1  ;;  %v3828_v23 = vpop.f32.mrb[28].mxu0 }
 0x843   : > { %v3876_v24 = vpack.c.bf16 %v3787_v22, %v3787_v22  ;;  %v3789_v25 = vpop.f32.mrb[29].mxu1  ;;  %v3830_v26 = vpop.f32.mrb[29].mxu0  ;;  %v3878_v33 = vpack.c.bf16 %v3828_v23, %v3828_v23  ;;  %v8113_v22 = vld [vmem:[#allocation8 + $0xed8] ss:$24 sps:$4 sm:$0xff]   ;;  %v8118_v23 = vld [vmem:[#allocation8 + $0xc14] ss:$24 sps:$4 sm:$0xff]  }
 0x844   : > { %v3877_v27 = vpack.c.bf16 %v3789_v25, %v3789_v25  ;;  %v3791_v28 = vpop.f32.mrb[30].mxu1  ;;  %v3832_v29 = vpop.f32.mrb[30].mxu0  ;;  %v3879_v34 = vpack.c.bf16 %v3830_v26, %v3830_v26  ;;  %4754 = vmatpush1.bf16.msra.mxu1 %v8113_v22  ;;  %v8191_v22 = vld [vmem:[#allocation8 + $0xf98] ss:$24 sps:$4 sm:$0xff]  }
 0x845   : > { %v3898_v30 = vsel %vm3896_vm14, %v3876_v24, 0  ;;  %v3792_v31 = vpop.f32.mrb[31].mxu1  ;;  %v3833_v32 = vpop.f32.mrb[31].mxu0  ;;  %v3973_v36 = vsel %vm3896_vm14, %v3878_v33, 0  ;;  %v3883_v24 = vld [vmem:[#allocation10 + $0x6] sm:$0x3] }
 0x846   : > { %6921 = vmatprep.subr.msk.bf16.mxu0 %vm3896_vm14, %v3877_v27  ;;  %v3950_v25 = vrot.slane %v3883_v24, %v8829_v16  ;;  %v3954_v26 = vrot.slane %v3883_v24, %v8831_v18  ;;  %v8197_v24 = vld [vmem:[#allocation8 + $0xfc8] ss:$24 sps:$4 sm:$0xff]  }
 0x847   : > { %3904 = vmatpush1.bf16.msra.mxu0 %v3898_v30 }
 0x848   : > { %6926 = vmatprep.subr.msk.bf16.mxu0 %vm3896_vm14, %v3879_v34 }
 0x84a   : > { %6922 = vmatmul.mubr.msk.bf16.vlgmr.msra.gmra.mrb[32].mxu0 %vm3892_vm15, %v8017_v35 }
 0x84b   : > { %3979 = vmatpush1.bf16.msra.mxu0 %v3973_v36  ;;  %4010 = vmatprep.mubr.bf16.mxu0 %v8555_v0 }
 0x856   : > { %6927 = vmatmul.mubr.msk.bf16.vlgmr.msra.gmra.mrb[32].mxu0 %vm3892_vm15, %v8018_v37 }
 0x857   : > { %4074 = vmatprep.mubr.bf16.mxu0 %v8555_v0 }
 0x882   : > { %v3869_v38 = vpop.f32.mrb[32].mxu1 }
 0x883   : > { %v3880_v39 = vpack.c.bf16 %v3869_v38, %v3869_v38  ;;  %v3871_v40 = vpop.f32.mrb[33].mxu1 }
 0x884   : > { %v3881_v41 = vpack.c.bf16 %v3871_v40, %v3871_v40  ;;  %v3873_v42 = vpop.f32.mrb[34].mxu1 }
 0x885   : > { %v4037_v44 = vsel %vm3896_vm14, %v3880_v39, 0  ;;  %v3874_v45 = vpop.f32.mrb[35].mxu1 }
 0x886   : > { %6931 = vmatprep.subr.msk.bf16.mxu0 %vm3896_vm14, %v3881_v41  ;;  %v8116_v45 = vld [vmem:[#allocation8 + $0xc10] ss:$24 sps:$4 sm:$0xff]  }
 0x887   : > { %4043 = vmatpush1.bf16.msra.mxu0 %v4037_v44 }
 0x888   : > { %4680 = vmatprep.subr.bf16.mxu0 %v8022_v43 }
 0x88a   : > { %6932 = vmatmul.mubr.msk.bf16.vlgmr.msra.gmra.mrb[32].mxu0 %vm3892_vm15, %v8019_v46  ;;  %v8121_v46 = vld [vmem:[#allocation8 + $0xc44] ss:$24 sps:$4 sm:$0xff]  }
 0x88b   : > { %4681 = vmatpush1.bf16.msra.mxu0 %v8020_v47  ;;  %v8119_v47 = vld [vmem:[#allocation8 + $0xc40] ss:$24 sps:$4 sm:$0xff]  }
 0x88c   : > { %4682 = vmatprep.subr.bf16.mxu0 %v8028_v48  ;;  %v8124_v48 = vld [vmem:[#allocation8 + $0xc74] ss:$24 sps:$4 sm:$0xff]  }
 0x88f   : > { %4683 = vmatpush1.bf16.msra.mxu0 %v8026_v49  ;;  %v8122_v49 = vld [vmem:[#allocation8 + $0xc70] ss:$24 sps:$4 sm:$0xff]  }
 0x890   : > { %4684 = vmatprep.subr.bf16.mxu0 %v8034_v50  ;;  %v8127_v50 = vld [vmem:[#allocation8 + $0xca4] ss:$24 sps:$4 sm:$0xff]  }
 0x893   : > { %4685 = vmatpush1.bf16.msra.mxu0 %v8032_v51  ;;  %v8125_v51 = vld [vmem:[#allocation8 + $0xca0] ss:$24 sps:$4 sm:$0xff]  }
 0x894   : > { %4686 = vmatprep.subr.bf16.mxu0 %v8040_v52  ;;  %v8130_v52 = vld [vmem:[#allocation8 + $0xcd4] ss:$24 sps:$4 sm:$0xff]  }
 0x897   : > { %4687 = vmatpush1.bf16.msra.mxu0 %v8038_v53  ;;  %v8128_v53 = vld [vmem:[#allocation8 + $0xcd0] ss:$24 sps:$4 sm:$0xff]  }
 0x898   : > { %4688 = vmatprep.subr.bf16.mxu0 %v8046_v54  ;;  %v8133_v54 = vld [vmem:[#allocation8 + $0xd04] ss:$24 sps:$4 sm:$0xff]  }
 0x89b   : > { %4689 = vmatpush1.bf16.msra.mxu0 %v8044_v55  ;;  %v8131_v55 = vld [vmem:[#allocation8 + $0xd00] ss:$24 sps:$4 sm:$0xff]  }
 0x89c   : > { %4690 = vmatprep.subr.bf16.mxu0 %v8052_v56  ;;  %v8136_v56 = vld [vmem:[#allocation8 + $0xd34] ss:$24 sps:$4 sm:$0xff]  }
 0x89f   : > { %4691 = vmatpush1.bf16.msra.mxu0 %v8050_v57  ;;  %v8134_v57 = vld [vmem:[#allocation8 + $0xd30] ss:$24 sps:$4 sm:$0xff]  }
 0x8a0   : > { %4692 = vmatprep.subr.bf16.mxu0 %v8058_v58  ;;  %v8139_v58 = vld [vmem:[#allocation8 + $0xd64] ss:$24 sps:$4 sm:$0xff]  }
 0x8a3   : > { %4693 = vmatpush1.bf16.msra.mxu0 %v8056_v59  ;;  %v8137_v59 = vld [vmem:[#allocation8 + $0xd60] ss:$24 sps:$4 sm:$0xff]  }
 0x8a4   : > { %4694 = vmatprep.subr.bf16.mxu0 %v8064_v60  ;;  %v8142_v60 = vld [vmem:[#allocation8 + $0xd94] ss:$24 sps:$4 sm:$0xff]  }
 0x8a7   : > { %4695 = vmatpush1.bf16.msra.mxu0 %v8062_v61  ;;  %v8140_v61 = vld [vmem:[#allocation8 + $0xd90] ss:$24 sps:$4 sm:$0xff]  }
 0x8a8   : > { %4696 = vmatprep.subr.bf16.mxu0 %v8070_v62  ;;  %v8145_v62 = vld [vmem:[#allocation8 + $0xdc4] ss:$24 sps:$4 sm:$0xff]  }
 0x8ab   : > { %4697 = vmatpush1.bf16.msra.mxu0 %v8068_v63  ;;  %v8143_v63 = vld [vmem:[#allocation8 + $0xdc0] ss:$24 sps:$4 sm:$0xff]  }
 0x8ac   : > { %4698 = vmatprep.subr.bf16.mxu0 %v8076_v1  ;;  %v8148_v1 = vld [vmem:[#allocation8 + $0xdf4] ss:$24 sps:$4 sm:$0xff]  }
 0x8af   : > { %4699 = vmatpush1.bf16.msra.mxu0 %v8074_v2  ;;  %v8146_v2 = vld [vmem:[#allocation8 + $0xdf0] ss:$24 sps:$4 sm:$0xff]  }
 0x8b0   : > { %4700 = vmatprep.subr.bf16.mxu0 %v8082_v3  ;;  %v8151_v3 = vld [vmem:[#allocation8 + $0xe24] ss:$24 sps:$4 sm:$0xff]  }
 0x8b3   : > { %4701 = vmatpush1.bf16.msra.mxu0 %v8080_v4  ;;  %v8149_v4 = vld [vmem:[#allocation8 + $0xe20] ss:$24 sps:$4 sm:$0xff]  }
 0x8b4   : > { %4702 = vmatprep.subr.bf16.mxu0 %v8088_v5  ;;  %v8154_v5 = vld [vmem:[#allocation8 + $0xe54] ss:$24 sps:$4 sm:$0xff]  }
 0x8b7   : > { %4703 = vmatpush1.bf16.msra.mxu0 %v8086_v6  ;;  %v8152_v6 = vld [vmem:[#allocation8 + $0xe50] ss:$24 sps:$4 sm:$0xff]  }
 0x8b8   : > { %4704 = vmatprep.subr.bf16.mxu0 %v8094_v7  ;;  %v8157_v7 = vld [vmem:[#allocation8 + $0xe84] ss:$24 sps:$4 sm:$0xff]  }
 0x8bb   : > { %4705 = vmatpush1.bf16.msra.mxu0 %v8092_v8  ;;  %v8155_v8 = vld [vmem:[#allocation8 + $0xe80] ss:$24 sps:$4 sm:$0xff]  }
 0x8bc   : > { %4706 = vmatprep.subr.bf16.mxu0 %v8100_v9  ;;  %v8160_v9 = vld [vmem:[#allocation8 + $0xeb4] ss:$24 sps:$4 sm:$0xff]  }
 0x8bf   : > { %4707 = vmatpush1.bf16.msra.mxu0 %v8098_v10  ;;  %v8158_v10 = vld [vmem:[#allocation8 + $0xeb0] ss:$24 sps:$4 sm:$0xff]  }
 0x8c0   : > { %4708 = vmatprep.subr.bf16.mxu0 %v8106_v13  ;;  %v8173_v13 = vld [vmem:[#allocation8 + $0xf08] ss:$24 sps:$4 sm:$0xff]  }
 0x8c3   : > { %4709 = vmatpush1.bf16.msra.mxu0 %v8104_v14  ;;  %v8175_v14 = vld [vmem:[#allocation8 + $0xf0c] ss:$24 sps:$4 sm:$0xff]  }
 0x8c4   : > { %4710 = vmatprep.subr.bf16.mxu0 %v8112_v19  ;;  %v8187_v19 = vld [vmem:[#allocation8 + $0xf6c] ss:$24 sps:$4 sm:$0xff]  }
 0x8c7   : > { %4711 = vmatpush1.bf16.msra.mxu0 %v8110_v20  ;;  %v8185_v20 = vld [vmem:[#allocation8 + $0xf68] ss:$24 sps:$4 sm:$0xff]  }
 0x8c8   : > { %4766 = vmatprep.subr.bf16.mxu0 %v8118_v23  ;;  %v8199_v23 = vld [vmem:[#allocation8 + $0xfcc] ss:$24 sps:$4 sm:$0xff]  }
 0x95d   : > { %v4076_v27 = vpop.f32.mrb[32].mxu0 }
 0x95e   : > { %v7224_v28 = vadd.f32 %v4076_v27, %v3950_v25  ;;  %v4078_v29 = vpop.f32.mrb[33].mxu0  ;;  %v8211_v27 = vld [vmem:[#allocation8 + $0x102c] ss:$24 sps:$4 sm:$0xff]  }
 0x95f   : > { %v7225_v30 = vadd.f32 %v4078_v29, %v3954_v26  ;;  %v4080_v31 = vpop.f32.mrb[34].mxu0  ;;  %v8217_v29 = vld [vmem:[#allocation8 + $0x105c] ss:$24 sps:$4 sm:$0xff]  }
 0x960   : > { %v4093_v32 = vmul.f32 0.01, %v7224_v28  ;;  %v7226_v33 = vadd.f32 %v4080_v31, %v3950_v25  ;;  %v4082_v34 = vpop.f32.mrb[35].mxu0  ;;  %vm4089_vm1 = vcmp.ge.f32.partialorder %v7224_v28, 0.0  ;;  %v8205_v25 = vld [vmem:[#allocation8 + $0xffc] ss:$24 sps:$4 sm:$0xff]  }
 0x961   : > { %v4094_v35 = vmul.f32 0.01, %v7225_v30  ;;  %v7227_v36 = vadd.f32 %v4082_v34, %v3954_v26  ;;  %vm4090_vm2 = vcmp.ge.f32.partialorder %v7225_v30, 0.0  ;;  %v8203_v26 = vld [vmem:[#allocation8 + $0xff8] ss:$24 sps:$4 sm:$0xff]  }
 0x962   : > { %vm4091_vm3 = vcmp.ge.f32.partialorder %v7226_v33, 0.0  ;;  %v4095_v37 = vmul.f32 0.01, %v7226_v33  ;;  %v4097_v39 = vsel %vm4089_vm1, %v7224_v28, %v4093_v32  ;;  %v8209_v28 = vld [vmem:[#allocation8 + $0x1028] ss:$24 sps:$4 sm:$0xff]  }
 0x963   : > { %vm4092_vm4 = vcmp.ge.f32.partialorder %v7227_v36, 0.0  ;;  %v4096_v38 = vmul.f32 0.01, %v7227_v36  ;;  %v4098_v42 = vsel %vm4090_vm2, %v7225_v30, %v4094_v35  ;;  %v8215_v30 = vld [vmem:[#allocation8 + $0x1058] ss:$24 sps:$4 sm:$0xff]  }
 0x964   : > { %v4099_v40 = vsel %vm4091_vm3, %v7226_v33, %v4095_v37  ;;  %v8223_v31 = vld [vmem:[#allocation8 + $0x108c] ss:$24 sps:$4 sm:$0xff]   ;;  %v8221_v32 = vld [vmem:[#allocation8 + $0x1088] ss:$24 sps:$4 sm:$0xff]   ;;  %v8229_v33 = vld [vmem:[#allocation8 + $0x10bc] ss:$24 sps:$4 sm:$0xff]  }
 0x965   : > { %v8951_v41 = vpack.c.bf16 %v4099_v40, %v4097_v39  ;;  %v4100_v43 = vsel %vm4092_vm4, %v7227_v36, %v4096_v38  ;;  %v8227_v34 = vld [vmem:[#allocation8 + $0x10b8] ss:$24 sps:$4 sm:$0xff]   ;;  %v8235_v35 = vld [vmem:[#allocation8 + $0x10ec] ss:$24 sps:$4 sm:$0xff]   ;;  %v8233_v36 = vld [vmem:[#allocation8 + $0x10e8] ss:$24 sps:$4 sm:$0xff]  }
 0x966   : > { %v4102_v44 = vpack.c.bf16 %v4100_v43, %v4098_v42  ;;  %v8241_v37 = vld [vmem:[#allocation8 + $0x111c] ss:$24 sps:$4 sm:$0xff]   ;;  %v8239_v38 = vld [vmem:[#allocation8 + $0x1118] ss:$24 sps:$4 sm:$0xff]   ;;  %v8247_v39 = vld [vmem:[#allocation8 + $0x114c] ss:$24 sps:$4 sm:$0xff]  }
 0x968   : > { %4712 = vmatprep.mubr.bf16.mxu0 %v4102_v44  ;;  %4755 = vmatprep.mubr.bf16.mxu1 %v4102_v44 }
 0x969   : > { %4713 = vmatmul.mubr.bf16.vlgmr.msra.gmra.mrb[36].mxu0 %v8951_v41  ;;  %4756 = vmatmul.mubr.bf16.vlgmr.msra.gmra.mrb[36].mxu1 %v8951_v41 }
 0x96a   : > { %4767 = vmatpush1.bf16.msra.mxu0 %v8116_v45  ;;  %4798 = vmatprep.mubr.bf16.mxu0 %v4102_v44 }
 0x96b   : > { %4768 = vmatprep.subr.bf16.mxu0 %v8121_v46  ;;  %4871 = vmatprep.mubr.bf16.mxu1 %v8555_v0  ;;  %v8245_v46 = vld [vmem:[#allocation8 + $0x1148] ss:$24 sps:$4 sm:$0xff]  }
 0x96e   : > { %4769 = vmatpush1.bf16.msra.mxu0 %v8119_v47 }
 0x96f   : > { %4770 = vmatprep.subr.bf16.mxu0 %v8124_v48 }
 0x972   : > { %4771 = vmatpush1.bf16.msra.mxu0 %v8122_v49 }
 0x973   : > { %4772 = vmatprep.subr.bf16.mxu0 %v8127_v50 }
 0x976   : > { %4773 = vmatpush1.bf16.msra.mxu0 %v8125_v51 }
 0x977   : > { %4774 = vmatprep.subr.bf16.mxu0 %v8130_v52 }
 0x97a   : > { %4775 = vmatpush1.bf16.msra.mxu0 %v8128_v53  ;;  %v8164_v53 = vld [vmem:[%s9215_s4 + $0x150] sm:$0xff]  }
 0x97b   : > { %4776 = vmatprep.subr.bf16.mxu0 %v8133_v54  ;;  %v8165_v54 = vld [vmem:[%s9215_s4 + $0x158] sm:$0xff]  }
 0x97e   : > { %4777 = vmatpush1.bf16.msra.mxu0 %v8131_v55  ;;  %v8166_v55 = vld [vmem:[%s9215_s4 + $0x16c] sm:$0xff]  }
 0x97f   : > { %4778 = vmatprep.subr.bf16.mxu0 %v8136_v56  ;;  %v8167_v56 = vld [vmem:[%s9215_s4 + $0x174] sm:$0xff]  }
 0x982   : > { %4779 = vmatpush1.bf16.msra.mxu0 %v8134_v57 }
 0x983   : > { %4780 = vmatprep.subr.bf16.mxu0 %v8139_v58 }
 0x986   : > { %4781 = vmatpush1.bf16.msra.mxu0 %v8137_v59 }
 0x987   : > { %4782 = vmatprep.subr.bf16.mxu0 %v8142_v60 }
 0x98a   : > { %4783 = vmatpush1.bf16.msra.mxu0 %v8140_v61 }
 0x98b   : > { %4784 = vmatprep.subr.bf16.mxu0 %v8145_v62 }
 0x98e   : > { %4785 = vmatpush1.bf16.msra.mxu0 %v8143_v63  ;;  %v8172_v63 = vld [vmem:[#allocation8 + $0xf04] ss:$24 sps:$4 sm:$0xff]  }
 0x98f   : > { %4786 = vmatprep.subr.bf16.mxu0 %v8148_v1  ;;  %v8168_v1 = vld [vmem:[%s9215_s4 + $0x188] sm:$0xff]  }
 0x992   : > { %4787 = vmatpush1.bf16.msra.mxu0 %v8146_v2  ;;  %v8170_v2 = vld [vmem:[#allocation8 + $0xf00] ss:$24 sps:$4 sm:$0xff]  }
 0x993   : > { %4788 = vmatprep.subr.bf16.mxu0 %v8151_v3  ;;  %v8178_v3 = vld [vmem:[#allocation8 + $0xf34] ss:$24 sps:$4 sm:$0xff]  }
 0x996   : > { %4789 = vmatpush1.bf16.msra.mxu0 %v8149_v4  ;;  %v8176_v4 = vld [vmem:[#allocation8 + $0xf30] ss:$24 sps:$4 sm:$0xff]  }
 0x997   : > { %4790 = vmatprep.subr.bf16.mxu0 %v8154_v5  ;;  %v8184_v5 = vld [vmem:[#allocation8 + $0xf64] ss:$24 sps:$4 sm:$0xff]  }
 0x99a   : > { %4791 = vmatpush1.bf16.msra.mxu0 %v8152_v6  ;;  %v8169_v6 = vld [vmem:[%s9215_s4 + $0x190] sm:$0xff]  }
 0x99b   : > { %4792 = vmatprep.subr.bf16.mxu0 %v8157_v7  ;;  %v8182_v7 = vld [vmem:[#allocation8 + $0xf60] ss:$24 sps:$4 sm:$0xff]  }
 0x99e   : > { %4793 = vmatpush1.bf16.msra.mxu0 %v8155_v8  ;;  %v8190_v8 = vld [vmem:[#allocation8 + $0xf94] ss:$24 sps:$4 sm:$0xff]  }
 0x99f   : > { %4794 = vmatprep.subr.bf16.mxu0 %v8160_v9  ;;  %v8188_v9 = vld [vmem:[#allocation8 + $0xf90] ss:$24 sps:$4 sm:$0xff]  }
 0x9a2   : > { %4795 = vmatpush1.bf16.msra.mxu0 %v8158_v10  ;;  %v8196_v10 = vld [vmem:[#allocation8 + $0xfc4] ss:$24 sps:$4 sm:$0xff]  }
 0x9a3   : > { %4796 = vmatprep.subr.bf16.mxu0 %v8163_v11  ;;  %v8194_v11 = vld [vmem:[#allocation8 + $0xfc0] ss:$24 sps:$4 sm:$0xff]  }
 0x9a6   : > { %4797 = vmatpush1.bf16.msra.mxu0 %v8161_v12  ;;  %v8202_v12 = vld [vmem:[#allocation8 + $0xff4] ss:$24 sps:$4 sm:$0xff]  }
 0x9a7   : > { %5733 = vmatprep.subr.bf16.mxu0 %v8175_v14  ;;  %v8208_v14 = vld [vmem:[#allocation8 + $0x1024] ss:$24 sps:$4 sm:$0xff]  }
 0x9a9   : > { %4799 = vmatmul.mubr.bf16.vlgmr.msra.gmra.mrb[40].mxu0 %v8951_v41 }
 0x9aa   : > { %5734 = vmatpush1.bf16.msra.mxu0 %v8173_v13  ;;  %v8200_v13 = vld [vmem:[#allocation8 + $0xff0] ss:$24 sps:$4 sm:$0xff]  }
 0x9ab   : > { %5735 = vmatprep.subr.bf16.mxu0 %v8181_v15  ;;  %v8206_v15 = vld [vmem:[#allocation8 + $0x1020] ss:$24 sps:$4 sm:$0xff]  }
 0x9ae   : > { %5736 = vmatpush1.bf16.msra.mxu0 %v8179_v17  ;;  %v8214_v17 = vld [vmem:[#allocation8 + $0x1054] ss:$24 sps:$4 sm:$0xff]  }
 0x9af   : > { %5737 = vmatprep.subr.bf16.mxu0 %v8187_v19  ;;  %v8212_v19 = vld [vmem:[#allocation8 + $0x1050] ss:$24 sps:$4 sm:$0xff]  }
 0x9b2   : > { %5738 = vmatpush1.bf16.msra.mxu0 %v8185_v20  ;;  %v8220_v20 = vld [vmem:[#allocation8 + $0x1084] ss:$24 sps:$4 sm:$0xff]  }
 0x9b3   : > { %5739 = vmatprep.subr.bf16.mxu0 %v8193_v21  ;;  %v8218_v21 = vld [vmem:[#allocation8 + $0x1080] ss:$24 sps:$4 sm:$0xff]  }
 0x9b6   : > { %5740 = vmatpush1.bf16.msra.mxu0 %v8191_v22  ;;  %v8226_v22 = vld [vmem:[#allocation8 + $0x10b4] ss:$24 sps:$4 sm:$0xff]  }
 0x9b7   : > { %5741 = vmatprep.subr.bf16.mxu0 %v8199_v23  ;;  %v8224_v23 = vld [vmem:[#allocation8 + $0x10b0] ss:$24 sps:$4 sm:$0xff]  }
 0x9ba   : > { %5742 = vmatpush1.bf16.msra.mxu0 %v8197_v24  ;;  %v8232_v24 = vld [vmem:[#allocation8 + $0x10e4] ss:$24 sps:$4 sm:$0xff]  }
 0x9bb   : > { %5743 = vmatprep.subr.bf16.mxu0 %v8205_v25  ;;  %v8230_v25 = vld [vmem:[#allocation8 + $0x10e0] ss:$24 sps:$4 sm:$0xff]  }
 0x9be   : > { %5744 = vmatpush1.bf16.msra.mxu0 %v8203_v26  ;;  %v8238_v26 = vld [vmem:[#allocation8 + $0x1114] ss:$24 sps:$4 sm:$0xff]  }
 0x9bf   : > { %5745 = vmatprep.subr.bf16.mxu0 %v8211_v27  ;;  %v8236_v27 = vld [vmem:[#allocation8 + $0x1110] ss:$24 sps:$4 sm:$0xff]  }
 0x9c2   : > { %5746 = vmatpush1.bf16.msra.mxu0 %v8209_v28  ;;  %v8244_v28 = vld [vmem:[#allocation8 + $0x1144] ss:$24 sps:$4 sm:$0xff]  }
 0x9c3   : > { %5747 = vmatprep.subr.bf16.mxu0 %v8217_v29  ;;  %v8242_v29 = vld [vmem:[#allocation8 + $0x1140] ss:$24 sps:$4 sm:$0xff]  }
 0x9c6   : > { %5748 = vmatpush1.bf16.msra.mxu0 %v8215_v30  ;;  %v8250_v30 = vld [vmem:[#allocation8 + $0x1174] ss:$24 sps:$4 sm:$0xff]  }
 0x9c7   : > { %5749 = vmatprep.subr.bf16.mxu0 %v8223_v31  ;;  %v8248_v31 = vld [vmem:[#allocation8 + $0x1170] ss:$24 sps:$4 sm:$0xff]  }
 0x9ca   : > { %5750 = vmatpush1.bf16.msra.mxu0 %v8221_v32  ;;  %v8253_v32 = vld [vmem:[#allocation8 + $0x117c] ss:$24 sps:$4 sm:$0xff]  }
 0x9cb   : > { %5751 = vmatprep.subr.bf16.mxu0 %v8229_v33  ;;  %v8251_v33 = vld [vmem:[#allocation8 + $0x1178] ss:$24 sps:$4 sm:$0xff]  }
 0x9ce   : > { %5752 = vmatpush1.bf16.msra.mxu0 %v8227_v34  ;;  %v8256_v34 = vld [vmem:[#allocation8 + $0x11a4] ss:$24 sps:$4 sm:$0xff]  }
 0x9cf   : > { %5753 = vmatprep.subr.bf16.mxu0 %v8235_v35  ;;  %v8254_v35 = vld [vmem:[#allocation8 + $0x11a0] ss:$24 sps:$4 sm:$0xff]  }
 0x9d2   : > { %5754 = vmatpush1.bf16.msra.mxu0 %v8233_v36  ;;  %v8259_v36 = vld [vmem:[#allocation8 + $0x11ac] ss:$24 sps:$4 sm:$0xff]  }
 0x9d3   : > { %5755 = vmatprep.subr.bf16.mxu0 %v8241_v37  ;;  %v8257_v37 = vld [vmem:[#allocation8 + $0x11a8] ss:$24 sps:$4 sm:$0xff]  }
 0x9d6   : > { %5756 = vmatpush1.bf16.msra.mxu0 %v8239_v38  ;;  %v8262_v38 = vld [vmem:[#allocation8 + $0x11d4] ss:$24 sps:$4 sm:$0xff]  }
 0x9d7   : > { %5757 = vmatprep.subr.bf16.mxu0 %v8247_v39  ;;  %v8260_v39 = vld [vmem:[#allocation8 + $0x11d0] ss:$24 sps:$4 sm:$0xff]  }
 0x9da   : > { %5758 = vmatpush1.bf16.msra.mxu0 %v8245_v46 }
 0x9db   : > { %5759 = vmatprep.subr.bf16.mxu0 %v8253_v32  ;;  %v8286_v32 = vld [vmem:[#allocation8 + $0x1034] ss:$24 sps:$4 sm:$0xff]  }
 0x9de   : > { %5760 = vmatpush1.bf16.msra.mxu0 %v8251_v33  ;;  %v8284_v33 = vld [vmem:[#allocation8 + $0x1030] ss:$24 sps:$4 sm:$0xff]  }
 0x9df   : > { %5761 = vmatprep.subr.bf16.mxu0 %v8259_v36  ;;  %v8292_v36 = vld [vmem:[#allocation8 + $0x1094] ss:$24 sps:$4 sm:$0xff]  }
 0x9e2   : > { %5762 = vmatpush1.bf16.msra.mxu0 %v8257_v37  ;;  %v8290_v37 = vld [vmem:[#allocation8 + $0x1090] ss:$24 sps:$4 sm:$0xff]  }
 0xa3c   : > { %v4714_v40 = vpop.f32.mrb[36].mxu0  ;;  %v4757_v41 = vpop.f32.mrb[36].mxu1 }
 0xa3d   : > { %v4716_v42 = vpop.f32.mrb[37].mxu0  ;;  %v4759_v43 = vpop.f32.mrb[37].mxu1 }
 0xa3e   : > { %v4718_v44 = vpop.f32.mrb[38].mxu0  ;;  %v4761_v45 = vpop.f32.mrb[38].mxu1 }
 0xa3f   : > { %v4809_v47 = vpack.c.bf16 %v4718_v44, %v4714_v40  ;;  %v4811_v48 = vpack.c.bf16 %v4761_v45, %v4757_v41  ;;  %v4720_v49 = vpop.f32.mrb[39].mxu0  ;;  %v4763_v50 = vpop.f32.mrb[39].mxu1  ;;  %v8265_v40 = vld [vmem:[#allocation8 + $0x11dc] ss:$24 sps:$4 sm:$0xff]   ;;  %v8263_v41 = vld [vmem:[#allocation8 + $0x11d8] ss:$24 sps:$4 sm:$0xff]  }
 0xa40   : > { %v4810_v51 = vpack.c.bf16 %v4720_v49, %v4716_v42  ;;  %v4812_v52 = vpack.c.bf16 %v4763_v50, %v4759_v43  ;;  %5763 = vmatprep.subr.bf16.mxu0 %v8265_v40  ;;  %v8268_v42 = vld [vmem:[#allocation8 + $0xf14] ss:$24 sps:$4 sm:$0xff]   ;;  %v4816_v43 = vld [vmem:[#allocation10 + $0x8] sm:$0x3] }
 0xa41   : > { %5764 = vmatpush1.bf16.msra.mxu0 %v8263_v41  ;;  %v4896_v44 = vrot.slane %v4816_v43, %v8829_v16  ;;  %v4900_v45 = vrot.slane %v4816_v43, %v8831_v18  ;;  %v8298_v40 = vld [vmem:[#allocation8 + $0x10f4] ss:$24 sps:$4 sm:$0xff]   ;;  %v8296_v41 = vld [vmem:[#allocation8 + $0x10f0] ss:$24 sps:$4 sm:$0xff]   ;;  %v8299_v43 = vld [vmem:[#allocation8 + $0x1120] ss:$24 sps:$4 sm:$0xff]  }
 0xa42   : > { %4839 = vmatprep.subr.bf16.mxu1 %v4810_v51 }
 0xa43   : > { %4840 = vmatpush1.bf16.msra.mxu1 %v4809_v47 }
 0xa44   : > { %4932 = vmatprep.subr.bf16.mxu1 %v4812_v52 }
 0xa46   : > { %7035 = vmatmul.mubr.msk.bf16.vlgmr.msra.gmra.mrb[40].mxu1 %vm4832_vm5, %v8164_v53 }
 0xa47   : > { %4933 = vmatpush1.bf16.msra.mxu1 %v4811_v48  ;;  %4881 = vmatprep.mubr.bf16.mxu1 %v8555_v0 }
 0xa4e   : > { %7036 = vmatmul.mubr.msk.bf16.gmra.mrb[44].mxu1 %vm4832_vm5, %v8165_v54 }
 0xa4f   : > { %4964 = vmatprep.mubr.bf16.mxu1 %v8555_v0 }
 0xa56   : > { %7043 = vmatmul.mubr.msk.bf16.vlgmr.msra.gmra.mrb[40].mxu1 %vm4832_vm5, %v8166_v55 }
 0xa57   : > { %4974 = vmatprep.mubr.bf16.mxu1 %v8555_v0 }
 0xa5e   : > { %7044 = vmatmul.mubr.msk.bf16.gmra.mrb[44].mxu1 %vm4832_vm5, %v8167_v56 }
 0xa5f   : > { %5046 = vmatprep.mubr.bf16.mxu1 %v8555_v0 }
 0xa7c   : > { %v4800_v57 = vpop.f32.mrb[40].mxu0 }
 0xa7d   : > { %v4802_v58 = vpop.f32.mrb[41].mxu0 }
 0xa7e   : > { %v4804_v59 = vpop.f32.mrb[42].mxu0 }
 0xa7f   : > { %v4813_v60 = vpack.c.bf16 %v4804_v59, %v4800_v57  ;;  %v4806_v61 = vpop.f32.mrb[43].mxu0 }
 0xa80   : > { %v4814_v62 = vpack.c.bf16 %v4806_v61, %v4802_v58 }
 0xa82   : > { %5014 = vmatprep.subr.bf16.mxu1 %v4814_v62 }
 0xa83   : > { %5015 = vmatpush1.bf16.msra.mxu1 %v4813_v60 }
 0xa84   : > { %5680 = vmatprep.subr.bf16.mxu1 %v8172_v63 }
 0xa86   : > { %7051 = vmatmul.mubr.msk.bf16.vlgmr.msra.gmra.mrb[40].mxu1 %vm4832_vm5, %v8168_v1 }
 0xa87   : > { %5056 = vmatprep.mubr.bf16.mxu1 %v8555_v0  ;;  %5681 = vmatpush1.bf16.msra.mxu1 %v8170_v2 }
 0xa88   : > { %5682 = vmatprep.subr.bf16.mxu1 %v8178_v3 }
 0xa8b   : > { %5683 = vmatpush1.bf16.msra.mxu1 %v8176_v4  ;;  %v8266_v4 = vld [vmem:[#allocation8 + $0xf10] ss:$24 sps:$4 sm:$0xff]  }
 0xa8c   : > { %5684 = vmatprep.subr.bf16.mxu1 %v8184_v5 }
 0xa8e   : > { %7052 = vmatmul.mubr.msk.bf16.gmra.mrb[44].mxu1 %vm4832_vm5, %v8169_v6 }
 0xa8f   : > { %5685 = vmatpush1.bf16.msra.mxu1 %v8182_v7  ;;  %v8271_v7 = vld [vmem:[#allocation8 + $0xf44] ss:$24 sps:$4 sm:$0xff]  }
 0xa90   : > { %5686 = vmatprep.subr.bf16.mxu1 %v8190_v8 }
 0xa93   : > { %5687 = vmatpush1.bf16.msra.mxu1 %v8188_v9 }
 0xa94   : > { %5688 = vmatprep.subr.bf16.mxu1 %v8196_v10 }
 0xa97   : > { %5689 = vmatpush1.bf16.msra.mxu1 %v8194_v11 }
 0xa98   : > { %5690 = vmatprep.subr.bf16.mxu1 %v8202_v12 }
 0xa9b   : > { %5691 = vmatpush1.bf16.msra.mxu1 %v8200_v13 }
 0xa9c   : > { %5692 = vmatprep.subr.bf16.mxu1 %v8208_v14  ;;  %v8269_v14 = vld [vmem:[#allocation8 + $0xf40] ss:$24 sps:$4 sm:$0xff]  }
 0xa9f   : > { %5693 = vmatpush1.bf16.msra.mxu1 %v8206_v15 }
 0xaa0   : > { %5694 = vmatprep.subr.bf16.mxu1 %v8214_v17  ;;  %v8274_v17 = vld [vmem:[#allocation8 + $0xf74] ss:$24 sps:$4 sm:$0xff]  }
 0xaa3   : > { %5695 = vmatpush1.bf16.msra.mxu1 %v8212_v19 }
 0xaa4   : > { %5696 = vmatprep.subr.bf16.mxu1 %v8220_v20 }
 0xaa7   : > { %5697 = vmatpush1.bf16.msra.mxu1 %v8218_v21 }
 0xaa8   : > { %5698 = vmatprep.subr.bf16.mxu1 %v8226_v22 }
 0xaab   : > { %5699 = vmatpush1.bf16.msra.mxu1 %v8224_v23 }
 0xaac   : > { %5700 = vmatprep.subr.bf16.mxu1 %v8232_v24 }
 0xaaf   : > { %5701 = vmatpush1.bf16.msra.mxu1 %v8230_v25  ;;  %v8272_v25 = vld [vmem:[#allocation8 + $0xf70] ss:$24 sps:$4 sm:$0xff]  }
 0xab0   : > { %5702 = vmatprep.subr.bf16.mxu1 %v8238_v26  ;;  %v8277_v26 = vld [vmem:[#allocation8 + $0xfa4] ss:$24 sps:$4 sm:$0xff]  }
 0xab3   : > { %5703 = vmatpush1.bf16.msra.mxu1 %v8236_v27  ;;  %v8275_v27 = vld [vmem:[#allocation8 + $0xfa0] ss:$24 sps:$4 sm:$0xff]  }
 0xab4   : > { %5704 = vmatprep.subr.bf16.mxu1 %v8244_v28  ;;  %v8280_v28 = vld [vmem:[#allocation8 + $0xfd4] ss:$24 sps:$4 sm:$0xff]  }
 0xab7   : > { %5705 = vmatpush1.bf16.msra.mxu1 %v8242_v29  ;;  %v8278_v29 = vld [vmem:[#allocation8 + $0xfd0] ss:$24 sps:$4 sm:$0xff]  }
 0xab8   : > { %5706 = vmatprep.subr.bf16.mxu1 %v8250_v30  ;;  %v8283_v30 = vld [vmem:[#allocation8 + $0x1004] ss:$24 sps:$4 sm:$0xff]  }
 0xabb   : > { %5707 = vmatpush1.bf16.msra.mxu1 %v8248_v31  ;;  %v8281_v31 = vld [vmem:[#allocation8 + $0x1000] ss:$24 sps:$4 sm:$0xff]  }
 0xabc   : > { %5708 = vmatprep.subr.bf16.mxu1 %v8256_v34  ;;  %v8289_v34 = vld [vmem:[#allocation8 + $0x1064] ss:$24 sps:$4 sm:$0xff]  }
 0xabf   : > { %5709 = vmatpush1.bf16.msra.mxu1 %v8254_v35  ;;  %v8287_v35 = vld [vmem:[#allocation8 + $0x1060] ss:$24 sps:$4 sm:$0xff]  }
 0xac0   : > { %5710 = vmatprep.subr.bf16.mxu1 %v8262_v38  ;;  %v8295_v38 = vld [vmem:[#allocation8 + $0x10c4] ss:$24 sps:$4 sm:$0xff]  }
 0xac3   : > { %5711 = vmatpush1.bf16.msra.mxu1 %v8260_v39  ;;  %v8293_v39 = vld [vmem:[#allocation8 + $0x10c0] ss:$24 sps:$4 sm:$0xff]  }
 0xac4   : > { %5786 = vmatprep.subr.bf16.mxu1 %v8268_v42  ;;  %v8301_v42 = vld [vmem:[#allocation8 + $0x1124] ss:$24 sps:$4 sm:$0xff]  }
 0xb59   : > { %v5048_v46 = vpop.f32.mrb[40].mxu1 }
 0xb5a   : > { %v7228_v47 = vadd.f32 %v5048_v46, %v4896_v44  ;;  %v5050_v48 = vpop.f32.mrb[41].mxu1  ;;  %v8307_v46 = vld [vmem:[#allocation8 + $0x1184] ss:$24 sps:$4 sm:$0xff]  }
 0xb5b   : > { %v7229_v49 = vadd.f32 %v5050_v48, %v4900_v45  ;;  %v5052_v50 = vpop.f32.mrb[42].mxu1  ;;  %v8310_v48 = vld [vmem:[#allocation8 + $0x11b4] ss:$24 sps:$4 sm:$0xff]  }
 0xb5c   : > { %v5083_v51 = vmul.f32 0.01, %v7228_v47  ;;  %v7230_v52 = vadd.f32 %v5052_v50, %v4896_v44  ;;  %v5054_v53 = vpop.f32.mrb[43].mxu1  ;;  %vm5075_vm6 = vcmp.ge.f32.partialorder %v7228_v47, 0.0  ;;  %v8313_v50 = vld [vmem:[#allocation8 + $0x11e4] ss:$24 sps:$4 sm:$0xff]  }
 0xb5d   : > { %v5084_v54 = vmul.f32 0.01, %v7229_v49  ;;  %v7231_v55 = vadd.f32 %v5054_v53, %v4900_v45  ;;  %vm5076_vm7 = vcmp.ge.f32.partialorder %v7229_v49, 0.0 }
 0xb5e   : > { %vm5077_vm8 = vcmp.ge.f32.partialorder %v7230_v52, 0.0  ;;  %v5085_v56 = vmul.f32 0.01, %v7230_v52  ;;  %v5091_v58 = vsel %vm5075_vm6, %v7228_v47, %v5083_v51  ;;  %v8305_v47 = vld [vmem:[#allocation8 + $0x1180] ss:$24 sps:$4 sm:$0xff]  }
 0xb5f   : > { %vm5078_vm9 = vcmp.ge.f32.partialorder %v7231_v55, 0.0  ;;  %v5086_v57 = vmul.f32 0.01, %v7231_v55  ;;  %v5092_v62 = vsel %vm5076_vm7, %v7229_v49, %v5084_v54  ;;  %v8308_v49 = vld [vmem:[#allocation8 + $0x11b0] ss:$24 sps:$4 sm:$0xff]  }
 0xb60   : > { %v5093_v59 = vsel %vm5077_vm8, %v7230_v52, %v5085_v56  ;;  %v8311_v51 = vld [vmem:[#allocation8 + $0x11e0] ss:$24 sps:$4 sm:$0xff]  }
 0xb61   : > { %v8988_v60 = vpack.c.bf16 %v5093_v59, %v5091_v58  ;;  %v5058_v61 = vpop.f32.mrb[44].mxu1  ;;  %v5094_v63 = vsel %vm5078_vm9, %v7231_v55, %v5086_v57 }
 0xb62   : > { %v7232_v1 = vadd.f32 %v5058_v61, %v4896_v44  ;;  %v5060_v2 = vpop.f32.mrb[45].mxu1  ;;  %v5100_v3 = vpack.c.bf16 %v5094_v63, %v5092_v62 }
 0xb63   : > { %v7233_v5 = vadd.f32 %v5060_v2, %v4900_v45  ;;  %v5062_v6 = vpop.f32.mrb[46].mxu1 }
 0xb64   : > { %v5087_v8 = vmul.f32 0.01, %v7232_v1  ;;  %v7234_v9 = vadd.f32 %v5062_v6, %v4896_v44  ;;  %v5064_v10 = vpop.f32.mrb[47].mxu1  ;;  %5712 = vmatprep.mubr.bf16.mxu1 %v5100_v3  ;;  %5765 = vmatprep.mubr.bf16.mxu0 %v5100_v3  ;;  %vm5079_vm10 = vcmp.ge.f32.partialorder %v7232_v1, 0.0  ;;  %v8304_v44 = vld [vmem:[#allocation8 + $0x1154] ss:$24 sps:$4 sm:$0xff]  }
 0xb65   : > { %v5088_v11 = vmul.f32 0.01, %v7233_v5  ;;  %v7235_v12 = vadd.f32 %v5064_v10, %v4900_v45  ;;  %5713 = vmatmul.mubr.bf16.vlgmr.msra.gmra.mrb[48].mxu1 %v8988_v60  ;;  %5766 = vmatmul.mubr.bf16.vlgmr.msra.gmra.mrb[44].mxu0 %v8988_v60  ;;  %vm5080_vm11 = vcmp.ge.f32.partialorder %v7233_v5, 0.0  ;;  %v8302_v45 = vld [vmem:[#allocation8 + $0x1150] ss:$24 sps:$4 sm:$0xff]  }
 0xb66   : > { %vm5081_vm12 = vcmp.ge.f32.partialorder %v7234_v9, 0.0  ;;  %v5089_v13 = vmul.f32 0.01, %v7234_v9  ;;  %5787 = vmatpush1.bf16.msra.mxu1 %v8266_v4  ;;  %v5095_v19 = vsel %vm5079_vm10, %v7232_v1, %v5087_v8 }
 0xb67   : > { %vm5082_vm13 = vcmp.ge.f32.partialorder %v7235_v12, 0.0  ;;  %v5090_v15 = vmul.f32 0.01, %v7235_v12  ;;  %5788 = vmatprep.subr.bf16.mxu1 %v8271_v7  ;;  %v5096_v21 = vsel %vm5080_vm11, %v7233_v5, %v5088_v11 }
 0xb68   : > { %v5097_v20 = vsel %vm5081_vm12, %v7234_v9, %v5089_v13  ;;  %v8314_v13 = vld [vmem:[%s9215_s4 + $0x1c0] sm:$0xff]  }
 0xb69   : > { %v5098_v22 = vsel %vm5082_vm13, %v7235_v12, %v5090_v15  ;;  %v8992_v23 = vpack.c.bf16 %v5097_v20, %v5095_v19  ;;  %v8315_v15 = vld [vmem:[%s9215_s4 + $0x1c8] sm:$0xff]   ;;  %v8316_v19 = vld [vmem:[%s9215_s4 + $0x1d0] sm:$0xff]  }
 0xb6a   : > { %5789 = vmatpush1.bf16.msra.mxu1 %v8269_v14  ;;  %v5102_v24 = vpack.c.bf16 %v5098_v22, %v5096_v21  ;;  %v8318_v14 = vld [vmem:[%s9215_s4 + $0x1a4] sm:$0xff]   ;;  %v8322_v20 = vld [vmem:[%s9215_s4 + $0x1b4] sm:$0xff]   ;;  %v8324_v22 = vld [vmem:[%s9215_s4 + $0x1bc] ss:$0 sps:$4 sm:$0xff]  }
 0xb6b   : > { %5790 = vmatprep.subr.bf16.mxu1 %v8274_v17  ;;  %v8320_v17 = vld [vmem:[%s9215_s4 + $0x1ac] sm:$0xff]   ;;  %v8317_v21 = vld [vmem:[%s9215_s4 + $0x1d8] ss:$0 sps:$4 sm:$0xff]  }
 0xb6c   : > { %5722 = vmatprep.mubr.bf16.mxu1 %v5102_v24  ;;  %5775 = vmatprep.mubr.bf16.mxu0 %v5102_v24 }
 0xb6d   : > { %5723 = vmatmul.mubr.bf16.gmra.mrb[52].mxu1 %v8992_v23  ;;  %5776 = vmatmul.mubr.bf16.gmra.mrb[48].mxu0 %v8992_v23 }
 0xb6e   : > { %5791 = vmatpush1.bf16.msra.mxu1 %v8272_v25  ;;  %5818 = vmatprep.mubr.bf16.mxu1 %v5100_v3 }
 0xb6f   : > { %5792 = vmatprep.subr.bf16.mxu1 %v8277_v26  ;;  %6057 = vmatprep.mubr.bf16.mxu0 %v8555_v0 }
 0xb72   : > { %5793 = vmatpush1.bf16.msra.mxu1 %v8275_v27 }
 0xb73   : > { %5794 = vmatprep.subr.bf16.mxu1 %v8280_v28 }
 0xb76   : > { %5795 = vmatpush1.bf16.msra.mxu1 %v8278_v29 }
 0xb77   : > { %5796 = vmatprep.subr.bf16.mxu1 %v8283_v30 }
 0xb7a   : > { %5797 = vmatpush1.bf16.msra.mxu1 %v8281_v31 }
 0xb7b   : > { %5798 = vmatprep.subr.bf16.mxu1 %v8286_v32 }
 0xb7e   : > { %5799 = vmatpush1.bf16.msra.mxu1 %v8284_v33 }
 0xb7f   : > { %5800 = vmatprep.subr.bf16.mxu1 %v8289_v34 }
 0xb82   : > { %5801 = vmatpush1.bf16.msra.mxu1 %v8287_v35  ;;  %v8319_v35 = vld [vmem:[%s9215_s4 + $0x1dc] sm:$0xff]  }
 0xb83   : > { %5802 = vmatprep.subr.bf16.mxu1 %v8292_v36  ;;  %v8321_v36 = vld [vmem:[%s9215_s4 + $0x1e4] sm:$0xff]  }
 0xb86   : > { %5803 = vmatpush1.bf16.msra.mxu1 %v8290_v37  ;;  %v8323_v37 = vld [vmem:[%s9215_s4 + $0x1ec] sm:$0xff]  }
 0xb87   : > { %5804 = vmatprep.subr.bf16.mxu1 %v8295_v38  ;;  %v8325_v38 = vld [vmem:[%s9215_s4 + $0x1f4] ss:$0 sps:$4 sm:$0xff]  }
 0xb8a   : > { %5805 = vmatpush1.bf16.msra.mxu1 %v8293_v39 }
 0xb8b   : > { %5806 = vmatprep.subr.bf16.mxu1 %v8298_v40 }
 0xb8e   : > { %5807 = vmatpush1.bf16.msra.mxu1 %v8296_v41 }
 0xb8f   : > { %5808 = vmatprep.subr.bf16.mxu1 %v8301_v42 }
 0xb92   : > { %5809 = vmatpush1.bf16.msra.mxu1 %v8299_v43 }
 0xb93   : > { %5810 = vmatprep.subr.bf16.mxu1 %v8304_v44 }
 0xb96   : > { %5811 = vmatpush1.bf16.msra.mxu1 %v8302_v45 }
 0xb97   : > { %5812 = vmatprep.subr.bf16.mxu1 %v8307_v46 }
 0xb9a   : > { %5813 = vmatpush1.bf16.msra.mxu1 %v8305_v47 }
 0xb9b   : > { %5814 = vmatprep.subr.bf16.mxu1 %v8310_v48 }
 0xb9e   : > { %5815 = vmatpush1.bf16.msra.mxu1 %v8308_v49 }
 0xb9f   : > { %5816 = vmatprep.subr.bf16.mxu1 %v8313_v50 }
 0xba2   : > { %5817 = vmatpush1.bf16.msra.mxu1 %v8311_v51 }
 0xba5   : > { %5819 = vmatmul.mubr.bf16.vlgmr.msra.gmra.mrb[56].mxu1 %v8988_v60 }
 0xba6   : > { %5828 = vmatprep.mubr.bf16.mxu1 %v5102_v24 }
 0xbad   : > { %5829 = vmatmul.mubr.bf16.gmra.mrb[60].mxu1 %v8992_v23 }
 0xbae   : > { %5923 = vmatprep.mubr.bf16.mxu1 %v8555_v0 }
 0xc38   : > { %v5714_v52 = vpop.f32.mrb[48].mxu1  ;;  %v5767_v53 = vpop.f32.mrb[44].mxu0 }
 0xc39   : > { %v5716_v54 = vpop.f32.mrb[49].mxu1  ;;  %v5769_v55 = vpop.f32.mrb[45].mxu0 }
 0xc3a   : > { %v5718_v56 = vpop.f32.mrb[50].mxu1  ;;  %v5771_v57 = vpop.f32.mrb[46].mxu0 }
 0xc3b   : > { %v5839_v58 = vpack.c.bf16 %v5718_v56, %v5714_v52  ;;  %v5841_v59 = vpack.c.bf16 %v5771_v57, %v5767_v53  ;;  %v5720_v61 = vpop.f32.mrb[51].mxu1  ;;  %v5773_v62 = vpop.f32.mrb[47].mxu0 }
 0xc3c   : > { %v5840_v63 = vpack.c.bf16 %v5720_v61, %v5716_v54  ;;  %v5842_v1 = vpack.c.bf16 %v5773_v62, %v5769_v55  ;;  %v5852_v54 = vld [vmem:[#allocation10 + $0xa] sm:$0x3] }
 0xc3d   : > { %v5966_v55 = vrot.slane %v5852_v54, %v8829_v16  ;;  %v5970_v56 = vrot.slane %v5852_v54, %v8831_v18 }
 0xc3e   : > { %5891 = vmatprep.subr.bf16.mxu1 %v5840_v63  ;;  %6025 = vmatprep.subr.bf16.mxu0 %v5842_v1 }
 0xc3f   : > { %5892 = vmatpush1.bf16.msra.mxu1 %v5839_v58  ;;  %6026 = vmatpush1.bf16.msra.mxu0 %v5841_v59 }
 0xc40   : > { %v5724_v60 = vpop.f32.mrb[52].mxu1  ;;  %v5777_v2 = vpop.f32.mrb[48].mxu0 }
 0xc41   : > { %v5726_v3 = vpop.f32.mrb[53].mxu1  ;;  %v5779_v4 = vpop.f32.mrb[49].mxu0 }
 0xc42   : > { %v5728_v5 = vpop.f32.mrb[54].mxu1  ;;  %v5781_v6 = vpop.f32.mrb[50].mxu0 }
 0xc43   : > { %v5845_v7 = vpack.c.bf16 %v5728_v5, %v5724_v60  ;;  %v5847_v8 = vpack.c.bf16 %v5781_v6, %v5777_v2  ;;  %v5730_v9 = vpop.f32.mrb[55].mxu1  ;;  %v5783_v10 = vpop.f32.mrb[51].mxu0 }
 0xc44   : > { %v5846_v11 = vpack.c.bf16 %v5730_v9, %v5726_v3  ;;  %v5848_v12 = vpack.c.bf16 %v5783_v10, %v5779_v4 }
 0xc46   : > { %5893 = vmatprep.subr.bf16.mxu1 %v5846_v11  ;;  %6027 = vmatprep.subr.bf16.mxu0 %v5848_v12 }
 0xc47   : > { %5894 = vmatpush1.bf16.msra.mxu1 %v5845_v7  ;;  %6028 = vmatpush1.bf16.msra.mxu0 %v5847_v8 }
 0xc4a   : > { %7175 = vmatmul.mubr.msk.bf16.vlgmr.msra.gmra.mrb[52].mxu0 %vm393_vm0, %v8314_v13  ;;  %7160 = vmatmul.mubr.msk.bf16.vlgmr.msra.gmra.mrb[64].mxu1 %vm393_vm0, %v8318_v14 }
 0xc4b   : > { %6067 = vmatprep.mubr.bf16.mxu0 %v8555_v0  ;;  %5933 = vmatprep.mubr.bf16.mxu1 %v8555_v0 }
 0xc52   : > { %7176 = vmatmul.mubr.msk.bf16.gmra.mrb[56].mxu0 %vm393_vm0, %v8315_v15  ;;  %7161 = vmatmul.mubr.msk.bf16.gmra.mrb[68].mxu1 %vm393_vm0, %v8320_v17 }
 0xc53   : > { %6077 = vmatprep.mubr.bf16.mxu0 %v8555_v0  ;;  %5943 = vmatprep.mubr.bf16.mxu1 %v8555_v0 }
 0xc5a   : > { %7177 = vmatmul.mubr.msk.bf16.gmra.mrb[60].mxu0 %vm393_vm0, %v8316_v19  ;;  %7162 = vmatmul.mubr.msk.bf16.gmra.mrb[72].mxu1 %vm393_vm0, %v8322_v20 }
 0xc5b   : > { %6087 = vmatprep.mubr.bf16.mxu0 %v8555_v0  ;;  %5953 = vmatprep.mubr.bf16.mxu1 %v8555_v0 }
 0xc62   : > { %7178 = vmatmul.mubr.msk.bf16.gmra.mrb[64].mxu0 %vm393_vm0, %v8317_v21  ;;  %7163 = vmatmul.mubr.msk.bf16.gmra.mrb[76].mxu1 %vm393_vm0, %v8324_v22 }
 0xc63   : > { %6180 = vmatprep.mubr.bf16.mxu0 %v8555_v0 }
 0xc78   : > { %v5820_v23 = vpop.f32.mrb[56].mxu1 }
 0xc79   : > { %v5822_v24 = vpop.f32.mrb[57].mxu1 }
 0xc7a   : > { %v5824_v25 = vpop.f32.mrb[58].mxu1 }
 0xc7b   : > { %v5843_v26 = vpack.c.bf16 %v5824_v25, %v5820_v23  ;;  %v5826_v27 = vpop.f32.mrb[59].mxu1 }
 0xc7c   : > { %v5844_v28 = vpack.c.bf16 %v5826_v27, %v5822_v24 }
 0xc7e   : > { %6148 = vmatprep.subr.bf16.mxu0 %v5844_v28 }
 0xc7f   : > { %6149 = vmatpush1.bf16.msra.mxu0 %v5843_v26 }
 0xc80   : > { %v5830_v29 = vpop.f32.mrb[60].mxu1 }
 0xc81   : > { %v5832_v30 = vpop.f32.mrb[61].mxu1 }
 0xc82   : > { %v5834_v31 = vpop.f32.mrb[62].mxu1 }
 0xc83   : > { %v5849_v32 = vpack.c.bf16 %v5834_v31, %v5830_v29  ;;  %v5836_v33 = vpop.f32.mrb[63].mxu1 }
 0xc84   : > { %v5850_v34 = vpack.c.bf16 %v5836_v33, %v5832_v30 }
 0xc86   : > { %6150 = vmatprep.subr.bf16.mxu0 %v5850_v34 }
 0xc87   : > { %6151 = vmatpush1.bf16.msra.mxu0 %v5849_v32 }
 0xc8a   : > { %7190 = vmatmul.mubr.msk.bf16.vlgmr.msra.gmra.mrb[52].mxu0 %vm393_vm0, %v8319_v35 }
 0xc8b   : > { %6190 = vmatprep.mubr.bf16.mxu0 %v8555_v0 }
 0xc92   : > { %7191 = vmatmul.mubr.msk.bf16.gmra.mrb[56].mxu0 %vm393_vm0, %v8321_v36 }
 0xc93   : > { %6200 = vmatprep.mubr.bf16.mxu0 %v8555_v0 }
 0xc9a   : > { %7192 = vmatmul.mubr.msk.bf16.gmra.mrb[60].mxu0 %vm393_vm0, %v8323_v37 }
 0xc9b   : > { %6210 = vmatprep.mubr.bf16.mxu0 %v8555_v0 }
 0xca2   : > { %7193 = vmatmul.mubr.msk.bf16.gmra.mrb[64].mxu0 %vm393_vm0, %v8325_v38  ;;  %vm6233_vm0 = vcmask 457728  }
 0xd1d   : > { %v5925_v39 = vpop.f32.mrb[64].mxu1 }
 0xd1e   : > { %v5927_v40 = vpop.f32.mrb[65].mxu1  ;;  %v5973_v57 = vadd.f32 %v5966_v55, %v5925_v39 }
 0xd1f   : > { %v5929_v41 = vpop.f32.mrb[66].mxu1  ;;  %v5974_v58 = vadd.f32 %v5970_v56, %v5927_v40 }
 0xd20   : > { %v5931_v42 = vpop.f32.mrb[67].mxu1  ;;  %v5975_v61 = vadd.f32 %v5966_v55, %v5929_v41 }
 0xd21   : > { %v5976_v1 = vadd.f32 %v5970_v56, %v5931_v42 }
 0xd25   : > { %v5935_v43 = vpop.f32.mrb[68].mxu1 }
 0xd26   : > { %v5937_v44 = vpop.f32.mrb[69].mxu1  ;;  %v5977_v4 = vadd.f32 %v5966_v55, %v5935_v43 }
 0xd27   : > { %v5939_v45 = vpop.f32.mrb[70].mxu1  ;;  %v5978_v5 = vadd.f32 %v5970_v56, %v5937_v44 }
 0xd28   : > { %v5941_v46 = vpop.f32.mrb[71].mxu1  ;;  %v5979_v6 = vadd.f32 %v5966_v55, %v5939_v45 }
 0xd29   : > { %v5980_v8 = vadd.f32 %v5970_v56, %v5941_v46 }
 0xd2d   : > { %v5945_v47 = vpop.f32.mrb[72].mxu1 }
 0xd2e   : > { %v5947_v48 = vpop.f32.mrb[73].mxu1  ;;  %v5981_v17 = vadd.f32 %v5966_v55, %v5945_v47 }
 0xd2f   : > { %v5949_v49 = vpop.f32.mrb[74].mxu1  ;;  %v5982_v19 = vadd.f32 %v5970_v56, %v5947_v48 }
 0xd30   : > { %v5951_v50 = vpop.f32.mrb[75].mxu1  ;;  %v5983_v20 = vadd.f32 %v5966_v55, %v5949_v49 }
 0xd31   : > { %v5984_v22 = vadd.f32 %v5970_v56, %v5951_v50 }
 0xd35   : > { %v9058_v0 = vpop.f32.mrb[76].mxu1 }
 0xd36   : > { %v9060_v51 = vpop.f32.mrb[77].mxu1  ;;  %v5985_v30 = vadd.f32 %v5966_v55, %v9058_v0 }
 0xd37   : > { %v5959_v52 = vpop.f32.mrb[78].mxu1  ;;  %v5986_v31 = vadd.f32 %v5970_v56, %v9060_v51 }
 0xd38   : > { %v5960_v53 = vpop.f32.mrb[79].mxu1 }
 0xd5d   : > { %v6182_v59 = vpop.f32.mrb[52].mxu0 }
 0xd5e   : > { %v7237_v62 = vadd.f32 %v6182_v59, %v5973_v57  ;;  %v6184_v63 = vpop.f32.mrb[53].mxu0 }
 0xd5f   : > { %v7239_v60 = vadd.f32 %v6184_v63, %v5974_v58  ;;  %v6186_v2 = vpop.f32.mrb[54].mxu0 }
 0xd60   : > { %6234 = vst.msk [vmem:[%s9065_s13] sm:$0xff] %vm6233_vm0, %v7237_v62  ;;  %v7241_v16 = vadd.f32 %v6186_v2, %v5975_v61  ;;  %6284 = vrot.lane.b32.xlu0 %v7237_v62, %s8556_s7  ;;  %v6188_v18 = vpop.f32.mrb[55].mxu0 }
 0xd61   : > { %v7243_v3 = vadd.f32 %v6188_v18, %v5976_v1  ;;  %6334 = vrot.lane.b32.xlu1 %v7239_v60, %s8557_s8 }
 0xd62   : > { %6235 = vst.msk [vmem:[%s9065_s13 + $0x8] sm:$0xff] %vm6233_vm0, %v7241_v16 }
 0xd64   : > { %6248 = vrot.lane.b32.xlu0 %v7237_v62, %s8558_s19 }
 0xd65   : > { %6288 = vrot.lane.b32.xlu1 %v7241_v16, %s8556_s7  ;;  %v6192_v7 = vpop.f32.mrb[56].mxu0 }
 0xd66   : > { %v7245_v9 = vadd.f32 %v6192_v7, %v5977_v4  ;;  %v6194_v10 = vpop.f32.mrb[57].mxu0 }
 0xd67   : > { %v7247_v11 = vadd.f32 %v6194_v10, %v5978_v5  ;;  %v6196_v12 = vpop.f32.mrb[58].mxu0 }
 0xd68   : > { %6236 = vst.msk [vmem:[%s9065_s13 + $0x10] sm:$0xff] %vm6233_vm0, %v7245_v9  ;;  %v7249_v13 = vadd.f32 %v6196_v12, %v5979_v6  ;;  %6286 = vrot.lane.b32.xlu0 %v7239_v60, %s8556_s7  ;;  %v6198_v14 = vpop.f32.mrb[59].mxu0 }
 0xd69   : > { %v7251_v15 = vadd.f32 %v6198_v14, %v5980_v8  ;;  %6250 = vrot.lane.b32.xlu1 %v7241_v16, %s8558_s19 }
 0xd6a   : > { %6237 = vst.msk [vmem:[%s9065_s13 + $0x18] sm:$0xff] %vm6233_vm0, %v7249_v13 }
 0xd6c   : > { %6336 = vrot.lane.b32.xlu0 %v7243_v3, %s8557_s8 }
 0xd6d   : > { %6290 = vrot.lane.b32.xlu1 %v7243_v3, %s8556_s7  ;;  %v6202_v21 = vpop.f32.mrb[60].mxu0 }
 0xd6e   : > { %v7253_v23 = vadd.f32 %v6202_v21, %v5981_v17  ;;  %v6204_v24 = vpop.f32.mrb[61].mxu0 }
 0xd6f   : > { %v7255_v25 = vadd.f32 %v6204_v24, %v5982_v19  ;;  %v6206_v26 = vpop.f32.mrb[62].mxu0 }
 0xd70   : > { %6238 = vst.msk [vmem:[%s9065_s13 + $0x20] sm:$0xff] %vm6233_vm0, %v7253_v23  ;;  %v7257_v27 = vadd.f32 %v6206_v26, %v5983_v20  ;;  %6292 = vrot.lane.b32.xlu0 %v7245_v9, %s8556_s7  ;;  %v6208_v28 = vpop.f32.mrb[63].mxu0 }
 0xd71   : > { %v7259_v29 = vadd.f32 %v6208_v28, %v5984_v22  ;;  %6294 = vrot.lane.b32.xlu1 %v7247_v11, %s8556_s7 }
 0xd72   : > { %6239 = vst.msk [vmem:[%s9065_s13 + $0x28] sm:$0xff] %vm6233_vm0, %v7257_v27 }
 0xd74   : > { %6252 = vrot.lane.b32.xlu0 %v7245_v9, %s8558_s19 }
 0xd75   : > { %6338 = vrot.lane.b32.xlu1 %v7247_v11, %s8557_s8  ;;  %v6212_v32 = vpop.f32.mrb[64].mxu0 }
 0xd76   : > { %v7261_v33 = vadd.f32 %v6212_v32, %v5985_v30  ;;  %v6214_v34 = vpop.f32.mrb[65].mxu0 }
 0xd77   : > { %v7263_v35 = vadd.f32 %v6214_v34, %v5986_v31  ;;  %v6216_v36 = vpop.f32.mrb[66].mxu0 }
 0xd78   : > { %6240 = vst.msk [vmem:[%s9065_s13 + $0x30] sm:$0xff] %vm6233_vm0, %v7261_v33  ;;  %6296 = vrot.lane.b32.xlu0 %v7249_v13, %s8556_s7  ;;  %v6217_v37 = vpop.f32.mrb[67].mxu0 }
 0xd79   : > { %6254 = vrot.lane.b32.xlu1 %v7249_v13, %s8558_s19 }
 0xd7c   : > { %6340 = vrot.lane.b32.xlu0 %v7251_v15, %s8557_s8 }
 0xd7d   : > { %6298 = vrot.lane.b32.xlu1 %v7251_v15, %s8556_s7 }
 0xd80   : > { %6300 = vrot.lane.b32.xlu0 %v7253_v23, %s8556_s7 }
 0xd81   : > { %6302 = vrot.lane.b32.xlu1 %v7255_v25, %s8556_s7 }
 0xd84   : > { %6256 = vrot.lane.b32.xlu0 %v7253_v23, %s8558_s19 }
 0xd85   : > { %6342 = vrot.lane.b32.xlu1 %v7255_v25, %s8557_s8 }
 0xd88   : > { %6304 = vrot.lane.b32.xlu0 %v7257_v27, %s8556_s7 }
 0xd89   : > { %6258 = vrot.lane.b32.xlu1 %v7257_v27, %s8558_s19 }
 0xd8c   : > { %6308 = vrot.lane.b32.xlu0 %v7261_v33, %s8556_s7 }
 0xd8d   : > { %6306 = vrot.lane.b32.xlu1 %v7259_v29, %s8556_s7 }
 0xd90   : > { %6260 = vrot.lane.b32.xlu0 %v7261_v33, %s8558_s19 }
 0xd91   : > { %6310 = vrot.lane.b32.xlu1 %v7263_v35, %s8556_s7 }
 0xd94   : > { %6344 = vrot.lane.b32.xlu0 %v7259_v29, %s8557_s8 }
 0xd95   : > { %6346 = vrot.lane.b32.xlu1 %v7263_v35, %s8557_s8 }
 0xdd2   : > { %v6285_v38 = vpop.permute.xlu0 %6284 }
 0xdd3   : > { %v6335_v39 = vpop.permute.xlu1 %6334 }
 0xdd4   : > { %7208 = vst.msk [vmem:[%s9065_s13 + $0xa8] sm:$0xff] %vm6233_vm0, %v6335_v39 }
 0xdd6   : > { %v6249_v40 = vpop.permute.xlu0 %6248 }
 0xdd7   : > { %7194 = vst.msk [vmem:[%s9065_s13 + $0x38] sm:$0xff] %vm6233_vm0, %v6249_v40  ;;  %v6289_v41 = vpop.permute.xlu1 %6288 }
 0xdda   : > { %v6287_v42 = vpop.permute.xlu0 %6286 }
 0xddb   : > { %v6312_v43 = vsel %vm4832_vm5, %v6285_v38, %v6287_v42  ;;  %v6251_v44 = vpop.permute.xlu1 %6250 }
 0xddc   : > { %7201 = vst.msk [vmem:[%s9065_s13 + $0x70] sm:$0xff] %vm6233_vm0, %v6312_v43  ;;  %7195 = vst.msk [vmem:[%s9065_s13 + $0x40] sm:$0xff] %vm6233_vm0, %v6251_v44 }
 0xdde   : > { %v6337_v45 = vpop.permute.xlu0 %6336 }
 0xddf   : > { %7209 = vst.msk [vmem:[%s9065_s13 + $0xb0] sm:$0xff] %vm6233_vm0, %v6337_v45  ;;  %v6291_v46 = vpop.permute.xlu1 %6290 }
 0xde0   : > { %v6313_v47 = vsel %vm4832_vm5, %v6289_v41, %v6291_v46 }
 0xde1   : > { %7202 = vst.msk [vmem:[%s9065_s13 + $0x78] sm:$0xff] %vm6233_vm0, %v6313_v47 }
 0xde2   : > { %v6293_v48 = vpop.permute.xlu0 %6292 }
 0xde3   : > { %v6295_v49 = vpop.permute.xlu1 %6294 }
 0xde4   : > { %v6314_v50 = vsel %vm4832_vm5, %v6293_v48, %v6295_v49 }
 0xde5   : > { %7203 = vst.msk [vmem:[%s9065_s13 + $0x80] sm:$0xff] %vm6233_vm0, %v6314_v50 }
 0xde6   : > { %v6253_v0 = vpop.permute.xlu0 %6252 }
 0xde7   : > { %7196 = vst.msk [vmem:[%s9065_s13 + $0x48] sm:$0xff] %vm6233_vm0, %v6253_v0  ;;  %v6339_v51 = vpop.permute.xlu1 %6338 }
 0xde8   : > { %7210 = vst.msk [vmem:[%s9065_s13 + $0xb8] sm:$0xff] %vm6233_vm0, %v6339_v51 }
 0xdea   : > { %v6297_v52 = vpop.permute.xlu0 %6296 }
 0xdeb   : > { %v6255_v53 = vpop.permute.xlu1 %6254 }
 0xdec   : > { %7197 = vst.msk [vmem:[%s9065_s13 + $0x50] sm:$0xff] %vm6233_vm0, %v6255_v53 }
 0xdee   : > { %v6341_v54 = vpop.permute.xlu0 %6340 }
 0xdef   : > { %7211 = vst.msk [vmem:[%s9065_s13 + $0xc0] sm:$0xff] %vm6233_vm0, %v6341_v54  ;;  %v6299_v55 = vpop.permute.xlu1 %6298 }
 0xdf0   : > { %v6315_v56 = vsel %vm4832_vm5, %v6297_v52, %v6299_v55 }
 0xdf1   : > { %7204 = vst.msk [vmem:[%s9065_s13 + $0x88] sm:$0xff] %vm6233_vm0, %v6315_v56 }
 0xdf2   : > { %v6301_v57 = vpop.permute.xlu0 %6300 }
 0xdf3   : > { %v6303_v58 = vpop.permute.xlu1 %6302 }
 0xdf4   : > { %v6316_v59 = vsel %vm4832_vm5, %v6301_v57, %v6303_v58 }
 0xdf5   : > { %7205 = vst.msk [vmem:[%s9065_s13 + $0x90] sm:$0xff] %vm6233_vm0, %v6316_v59 }
 0xdf6   : > { %v6257_v61 = vpop.permute.xlu0 %6256 }
 0xdf7   : > { %7198 = vst.msk [vmem:[%s9065_s13 + $0x58] sm:$0xff] %vm6233_vm0, %v6257_v61  ;;  %v6343_v62 = vpop.permute.xlu1 %6342 }
 0xdf8   : > { %7212 = vst.msk [vmem:[%s9065_s13 + $0xc8] sm:$0xff] %vm6233_vm0, %v6343_v62 }
 0xdfa   : > { %v6305_v63 = vpop.permute.xlu0 %6304 }
 0xdfb   : > { %v6259_v1 = vpop.permute.xlu1 %6258 }
 0xdfc   : > { %7199 = vst.msk [vmem:[%s9065_s13 + $0x60] sm:$0xff] %vm6233_vm0, %v6259_v1 }
 0xdfe   : > { %v6309_v60 = vpop.permute.xlu0 %6308 }
 0xdff   : > { %v6307_v2 = vpop.permute.xlu1 %6306 }
 0xe00   : > { %v6317_v16 = vsel %vm4832_vm5, %v6305_v63, %v6307_v2 }
 0xe01   : > { %7206 = vst.msk [vmem:[%s9065_s13 + $0x98] sm:$0xff] %vm6233_vm0, %v6317_v16 }
 0xe02   : > { %v6261_v18 = vpop.permute.xlu0 %6260 }
 0xe03   : > { %7200 = vst.msk [vmem:[%s9065_s13 + $0x68] sm:$0xff] %vm6233_vm0, %v6261_v18  ;;  %v6311_v3 = vpop.permute.xlu1 %6310 }
 0xe04   : > { %v6318_v4 = vsel %vm4832_vm5, %v6309_v60, %v6311_v3 }
 0xe05   : > { %7207 = vst.msk [vmem:[%s9065_s13 + $0xa0] sm:$0xff] %vm6233_vm0, %v6318_v4 }
 0xe06   : > { %v6345_v5 = vpop.permute.xlu0 %6344 }
 0xe07   : > { %7213 = vst.msk [vmem:[%s9065_s13 + $0xd0] sm:$0xff] %vm6233_vm0, %v6345_v5  ;;  %v6347_v6 = vpop.permute.xlu1 %6346 }
 0xe08   : > { %7214 = vst.msk [vmem:[%s9065_s13 + $0xd8] sm:$0xff] %vm6233_vm0, %v6347_v6 }
 0xe09   : > { %8481 = shalt.err (!%p8478_p12)
}
 0xe0a   : > { %s8482_s12 = scalar_lea.hbm %s9161_s29, 3584  ;;  %s8486_s8 = scalar_lea.hbm %s9217_s6, 7168 }
 0xe0b   : > { %p8483_p13 = scmp.ne.s32.totalorder %s9161_s29, %s8482_s12  ;;  %p8487_p9 = scmp.lt.u32.totalorder %s9161_s29, %s9217_s6 }
 0xe0c   : > { %p8488_p4 = scmp.lt.u32.totalorder %s8486_s8, %s8482_s12  ;;  %p8490_p6 = scmp.lt.u32.totalorder %s8482_s12, %s9161_s29 }
 0xe0d   : > { %p8484_p1 = pnand %p8483_p13, %p9235_p0 }
 0xe0e   : > { %p8489_p8 = por %p8488_p4, %p8487_p9 }
 0xe0f   : > { %p8485_p7 = pneg %p8484_p1 }
 0xe10   : > { %p8491_p2 = por %p8490_p6, %p8489_p8 }
 0xe12   : > { %p8492_p5 = pnand %p8491_p2, %p8485_p7 }
 0xe14   : > { %8495 = shalt.err (!%p8492_p5)
}
 0xe15   : > { %s8560_s16 = smov 128   ;;  %s8561_s26 = smov 8  }
 0xe16   : > { %7348 = dma.vmem_to_hbm [thread:$0]  (%p9235_p0), %s9163_s11, 3584, %s9161_s29, %s6364_s27, %s8560_s16, %s8560_s16, %s8561_s26  }
 0xe17 PF: > { %s6392_s28 = sand.u32 1, %s8530_s21   ;;  %p9236_p10 = scmp.ne.s32.totalorder %s9228_s25, 0 }
 0xe18   : > { %p9237_p11 = scmp.ge.s32.totalorder %s8542_s24, 2  ;;  %s6393_s17 = scalar_lea.sflag [#allocation4], %s6392_s28 }
 0xe1a   : > { %p7368_p3 = pnand %p9237_p11, %p9236_p10 }
 0xe1c   : > { %8525 = dma.done.wait (!%p7368_p3), %s6393_s17, 3584  }
 0xe1d   : > { %8527 = vsyncadd (!%p7368_p3), %s6393_s17, 4294963712  ;;  %p21_p12 = scmp.ge.s32.totalorder %s8733_s30, 4   ;;  %s9238_s21 = smov %s8534_s22 }
 0xe1e   : > { %s9239_s22 = smov %s8538_s23  ;;  %s9240_s23 = smov %s8744_s18 }
 0xe1f   : > { %s9241_s24 = smov %s8733_s30  ;;  %23 = sbr.rel (!%p21_p12) target bundleno = 7 (0x7), region = 135 }
 0xe26   :  { %6398 = vsyncpa [#allocation3], 1 }
 0xe27   :  { %6400 = vsyncpa [#allocation3 + $0x1], 1 }
 0xe28   :  { %6401 = vsyncpa [#allocation6], 1 }
 0xe29   :  { %6402 = vsyncpa [#allocation9], 1 }
 0xe2a   :  { %6403 = vsyncpa [#allocation4], 1 }
 0xe2b   :  { %6405 = vsyncpa [#allocation4 + $0x1], 1 }

// kernel: _forward_impl.1
= control target key start
LH: loop header
LB: loop body
LE: loop exit
PB: predicated region body
PF: predicated region fallthrough
CT: control target
= control target key end

     0   :  { %11 = vsyncpa [#allocation3], 0  ;;  %s9211_s0 = inlined_call_operand.hbm [shape: f32[2,1,32], index: 0, kind: input, shape index: {}]   ;;  %s9212_s1 = inlined_call_operand.hbm [shape: bf16[32,512], index: 1, kind: input, shape index: {}]   ;;  %s9213_s2 = inlined_call_operand.hbm [shape: f32[1,512], index: 2, kind: input, shape index: {}]   ;;  %s9214_s3 = inlined_call_operand.hbm [shape: bf16[6,256,768], index: 3, kind: input, shape index: {}]   ;;  %s9215_s4 = inlined_call_operand.vmem [shape: bf16[6,3,56,32], index: 4, kind: input, shape index: {}]   ;;  %s9216_s5 = inlined_call_operand.hbm [shape: f32[6,1,256], index: 5, kind: input, shape index: {}]   ;;  %s9217_s6 = inlined_call_operand.hbm [shape: f32[2,4,56,56], index: 6, kind: output, shape index: {}]  }
   0x1   :  { %13 = vsyncpa [#allocation3 + $0x1], 0 }
   0x2   :  { %14 = vsyncpa [#allocation6], 0 }
   0x3   :  { %15 = vsyncpa [#allocation9], 0 }
   0x4   :  { %16 = vsyncpa [#allocation4], 0 }
   0x5   :  { %18 = vsyncpa [#allocation4 + $0x1], 0  ;;  %s8597_s21 = smov 0   ;;  %s8599_s22 = smov 0  }
   0x6   :  { %s8601_s23 = smov 0   ;;  %s8603_s24 = smov 0  }
   0x7 LB: > { %s8544_s25 = smov [#allocation5]   ;;  %s8618_s27 = sadd.s32 4294967295, %s8542_s24   ;;  %s8542_s24 = sphi %s8603_s24, %s9241_s24   ;;  %s8538_s23 = sphi %s8601_s23, %s9240_s23   ;;  %s8534_s22 = sphi %s8599_s22, %s9239_s22   ;;  %s8530_s21 = sphi %s8597_s21, %s9238_s21  }
   0x8   : > { %s198_s26 = sshll.u32 %s8544_s25, 4  ;;  %p6486_p0 = scmp.ge.s32.totalorder %s8542_s24, 1  ;;  %s8623_s26 = int_to_ptr.vmem [resolvable:$true] %s198_s26 }
   0x9   : > { %p9218_p1 = scmp.eq.s32.totalorder %s8618_s27, 0  ;;  %p186_p2 = scmp.lt.s32.totalorder %s8542_s24, 3 }
   0xa   : > { %s8545_s29 = smov [#allocation8]   ;;  %s8546_s8 = smov [#allocation7]  }
   0xb   : > { %p8625_p3 = pnand %p6486_p0, %p186_p2  ;;  %s222_s30 = sshll.u32 %s8545_s29, 4  ;;  %s8638_s30 = int_to_ptr.vmem [resolvable:$true] %s222_s30 }
   0xc   : > { %s8640_s9 = sshll.u32 %s8546_s8, 4  ;;  %s8326_s12 = scalar_lea.hbm %s9212_s1, 1024  ;;  %s213_s9 = int_to_ptr.vmem [resolvable:$true] %s8640_s9 }
   0xd   : > { %s9221_s28 = scalar_select %p8625_p3, 1, 0 }
   0xe   : > { %p7350_p5 = pneg %p8625_p3  ;;  %p8327_p7 = scmp.ne.s32.totalorder %s9212_s1, %s8326_s12 }
   0xf   : > { %p8333_p11 = scmp.lt.u32.totalorder %s8326_s12, %s9212_s1 }
  0x10   : > { %p8634_p6 = pnand %p7350_p5, %p9218_p1 }
  0x12   : > { %p8650_p8 = pneg %p8634_p6 }
  0x14   : > { %p8329_p9 = pnand %p8650_p8, %p8327_p7 }
  0x16   : > { %p8330_p10 = pneg %p8329_p9 }
  0x18   : > { %p8335_p12 = pnand %p8333_p11, %p8330_p10 }
  0x1a   : > { %8338 = shalt.err (!%p8335_p12)
}
  0x1b   : > { %s8339_s18 = scalar_lea.vmem %s8623_s26, 1024  ;;  %p8347_p5 = scmp.lt.s32.totalorder %s8623_s26, %s8623_s26 }
  0x1c   : > { %p8340_p13 = scmp.ne.s32.totalorder %s8623_s26, %s8339_s18  ;;  %p8348_p4 = scmp.lt.s32.totalorder %s8339_s18, %s8339_s18 }
  0x1e   : > { %p8342_p0 = pnand %p8340_p13, %p8650_p8  ;;  %p8349_p7 = por %p8348_p4, %p8347_p5 }
  0x20   : > { %p8343_p2 = pneg %p8342_p0 }
  0x22   : > { %p8350_p9 = pnand %p8349_p7, %p8343_p2 }
  0x24   : > { %8353 = shalt.err (!%p8350_p9)
}
  0x25   : > { %s8547_s19 = smov 256   ;;  %s8548_s20 = smov 16  }
  0x26   : > { %7353 = dma.hbm_to_vmem [thread:$0]  (!%p8634_p6), %s9212_s1, 1024, %s8623_s26, [#allocation6], %s8547_s19, %s8547_s19, %s8548_s20  }
  0x27   : > { %s8354_s11 = scalar_lea.hbm %s9214_s3, 73728 }
  0x28   : > { %p8355_p4 = scmp.ne.s32.totalorder %s9214_s3, %s8354_s11  ;;  %p8361_p12 = scmp.lt.u32.totalorder %s8354_s11, %s9214_s3 }
  0x2a   : > { %p8357_p10 = pnand %p8355_p4, %p8650_p8 }
  0x2c   : > { %p8358_p11 = pneg %p8357_p10 }
  0x2e   : > { %p8363_p13 = pnand %p8361_p12, %p8358_p11 }
  0x30   : > { %8366 = shalt.err (!%p8363_p13)
}
  0x31   : > { %s8367_s26 = scalar_lea.vmem %s8638_s30, 73728  ;;  %p8375_p7 = scmp.lt.s32.totalorder %s8638_s30, %s8638_s30 }
  0x32   : > { %p8368_p0 = scmp.ne.s32.totalorder %s8638_s30, %s8367_s26  ;;  %p8376_p9 = scmp.lt.s32.totalorder %s8367_s26, %s8367_s26 }
  0x34   : > { %p8370_p2 = pnand %p8368_p0, %p8650_p8  ;;  %p8377_p4 = por %p8376_p9, %p8375_p7 }
  0x36   : > { %p8371_p5 = pneg %p8370_p2 }
  0x38   : > { %p8378_p10 = pnand %p8377_p4, %p8371_p5 }
  0x3a   : > { %8381 = shalt.err (!%p8378_p10)
}
  0x3b   : > { %s8549_s17 = smov 384   ;;  %s8550_s18 = smov 24  }
  0x3c   : > { %7359 = dma.hbm_to_vmem [thread:$0]  (!%p8634_p6), %s9214_s3, 73728, %s8638_s30, [#allocation9], %s8549_s17, %s8549_s17, %s8550_s18  }
  0x3d   : > { %s8382_s8 = scalar_lea.hbm %s9213_s2, 64 }
  0x3e   : > { %p8383_p11 = scmp.ne.s32.totalorder %s9213_s2, %s8382_s8  ;;  %p8389_p0 = scmp.lt.u32.totalorder %s8382_s8, %s9213_s2 }
  0x40   : > { %p8385_p12 = pnand %p8383_p11, %p8650_p8 }
  0x42   : > { %p8386_p13 = pneg %p8385_p12 }
  0x44   : > { %p8391_p2 = pnand %p8389_p0, %p8386_p13 }
  0x46   : > { %8394 = shalt.err (!%p8391_p2)
}
  0x47   : > { %s8395_s14 = scalar_lea.vmem %s213_s9, 64  ;;  %p8403_p4 = scmp.lt.s32.totalorder %s213_s9, %s213_s9 }
  0x48   : > { %p8396_p5 = scmp.ne.s32.totalorder %s213_s9, %s8395_s14  ;;  %p8404_p10 = scmp.lt.s32.totalorder %s8395_s14, %s8395_s14 }
  0x4a   : > { %p8398_p7 = pnand %p8396_p5, %p8650_p8  ;;  %p8405_p1 = por %p8404_p10, %p8403_p4 }
  0x4c   : > { %p8399_p9 = pneg %p8398_p7 }
  0x4e   : > { %p8406_p3 = pnand %p8405_p1, %p8399_p9 }
  0x50   : > { %8409 = shalt.err (!%p8406_p3)
}
  0x51   : > { %7356 = dma.hbm_to_vmem [thread:$0]  (!%p8634_p6), %s9213_s2, 64, %s213_s9, [#allocation6]  }
  0x52   : > { %s8551_s26 = smov [#allocation10]   ;;  %s8410_s20 = scalar_lea.hbm %s9216_s5, 192 }
  0x53   : > { %s238_s17 = sshll.u32 %s8551_s26, 4  ;;  %p8411_p11 = scmp.ne.s32.totalorder %s9216_s5, %s8410_s20  ;;  %s239_s17 = int_to_ptr.vmem [resolvable:$true] %s238_s17 }
  0x54   : > { %p8417_p12 = scmp.lt.u32.totalorder %s8410_s20, %s9216_s5 }
  0x55   : > { %p8413_p1 = pnand %p8411_p11, %p8650_p8 }
  0x57   : > { %p8414_p3 = pneg %p8413_p1 }
  0x59   : > { %p8419_p13 = pnand %p8417_p12, %p8414_p3 }
  0x5b   : > { %8422 = shalt.err (!%p8419_p13)
}
  0x5c   : > { %s8423_s9 = scalar_lea.vmem %s239_s17, 192  ;;  %p8431_p7 = scmp.lt.s32.totalorder %s239_s17, %s239_s17 }
  0x5d   : > { %p8424_p0 = scmp.ne.s32.totalorder %s239_s17, %s8423_s9  ;;  %p8432_p9 = scmp.lt.s32.totalorder %s8423_s9, %s8423_s9 }
  0x5f   : > { %p8426_p2 = pnand %p8424_p0, %p8650_p8  ;;  %p8433_p4 = por %p8432_p9, %p8431_p7 }
  0x61   : > { %p8427_p5 = pneg %p8426_p2 }
  0x63   : > { %p8434_p10 = pnand %p8433_p4, %p8427_p5 }
  0x65   : > { %8437 = shalt.err (!%p8434_p10)
}
  0x66   : > { %s8552_s11 = smov 32   ;;  %s8553_s15 = smov 2  }
  0x67   : > { %7362 = dma.hbm_to_vmem [thread:$0]  (!%p8634_p6), %s9216_s5, 192, %s239_s17, [#allocation9], %s8552_s11, %s8552_s11, %s8553_s15  }
  0x68   : > { %s6485_s14 = sadd.s32 4294967294, %s8542_s24   ;;  %s8733_s30 = sadd.s32 1, %s8542_s24  }
  0x69   : > { %s28_s16 = ssub.s32 %s8542_s24, %s8733_s30  ;;  %s31_s26 = sadd.s32 1, %s8538_s23 }
  0x6a   : > { %p29_p8 = scmp.eq.s32.totalorder %s28_s16, 0  ;;  %p38_p11 = scmp.ne.s32.totalorder %s8538_s23, %s8534_s22 }
  0x6b   : > { %p39_p1 = scmp.eq.s32.totalorder %s8542_s24, 0  ;;  %p44_p3 = scmp.ne.s32.totalorder %s8534_s22, %s8530_s21 }
  0x6c   : > { %s8744_s18 = scalar_select %p29_p8, %s8538_s23, %s31_s26  }
  0x6d   : > { %p8746_p12 = por %p39_p1, %p38_p11  ;;  %p9225_p13 = scmp.eq.s32.totalorder %s8618_s27, 0 }
  0x6e   : > { %p173_p0 = scmp.eq.s32.totalorder %s8618_s27, 1  ;;  %p179_p2 = scmp.eq.s32.totalorder %s6485_s14, 1 }
  0x6f   : > { %p8752_p6 = por %p9225_p13, %p44_p3  ;;  %p7375_p5 = scmp.lt.s32.totalorder %s8542_s24, 2 }
  0x70   : > { %s252_s19 = sand.u32 1, %s8538_s23   ;;  %p8759_p7 = por %p173_p0, %p38_p11 }
  0x71   : > { %p8763_p9 = por %p179_p2, %p44_p3  ;;  %s6492_s29 = sshll.u32 %s8542_s24, 4 }
  0x72   : > { %s9227_s20 = scalar_select %p8759_p7, 1, 0 }
  0x73   : > { %s9228_s25 = scalar_select %p8763_p9, 1, 0 }
  0x74   : > { %s255_s8 = scalar_lea.vmem [#allocation2], %s252_s19  ;;  %s8771_s15 = scalar_lea.hbm %s9211_s0, %s6492_s29 }
  0x75   : > { %s262_s10 = sshll.u32 %s255_s8, 4  ;;  %p8777_p4 = pnand %p7375_p5, %p8746_p12  ;;  %s8773_s10 = int_to_ptr.vmem [resolvable:$true] %s262_s10 }
  0x76   : > { %s253_s13 = scalar_lea.sflag [#allocation3], %s252_s19  ;;  %s8438_s14 = scalar_lea.hbm %s8771_s15, 16 }
  0x77   : > { %p8439_p10 = scmp.ne.s32.totalorder %s8771_s15, %s8438_s14  ;;  %p8440_p8 = pneg %p8777_p4 }
  0x78   : > { %s8443_s29 = scalar_lea.hbm %s9211_s0, 32  ;;  %p8444_p3 = scmp.lt.u32.totalorder %s8771_s15, %s9211_s0 }
  0x79   : > { %p8441_p11 = pnand %p8440_p8, %p8439_p10  ;;  %p8445_p12 = scmp.lt.u32.totalorder %s8443_s29, %s8438_s14 }
  0x7a   : > { %p8447_p0 = scmp.lt.u32.totalorder %s8438_s14, %s8771_s15 }
  0x7b   : > { %p8442_p1 = pneg %p8441_p11  ;;  %p8446_p13 = por %p8445_p12, %p8444_p3 }
  0x7d   : > { %p8448_p2 = por %p8447_p0, %p8446_p13 }
  0x7f   : > { %p8449_p5 = pnand %p8448_p2, %p8442_p1 }
  0x81   : > { %8452 = shalt.err (!%p8449_p5)
}
  0x82   : > { %s8453_s19 = scalar_lea.vmem %s8773_s10, 16  ;;  %s8554_s9 = smov [#allocation2]  }
  0x83   : > { %p8454_p10 = scmp.ne.s32.totalorder %s8773_s10, %s8453_s19  ;;  %s8458_s11 = sshll.u32 %s8554_s9, 4  ;;  %s8459_s11 = int_to_ptr.vmem [resolvable:$false] %s8458_s11 }
  0x84   : > { %s8460_s16 = scalar_lea.vmem %s8459_s11, 32  ;;  %p8461_p7 = scmp.lt.s32.totalorder %s8773_s10, %s8459_s11 }
  0x85   : > { %p8456_p11 = pnand %p8454_p10, %p8440_p8  ;;  %p8462_p3 = scmp.lt.s32.totalorder %s8460_s16, %s8453_s19 }
  0x87   : > { %p8457_p9 = pneg %p8456_p11  ;;  %p8463_p12 = por %p8462_p3, %p8461_p7 }
  0x89   : > { %p8464_p13 = pnand %p8463_p12, %p8457_p9 }
  0x8b   : > { %8467 = shalt.err (!%p8464_p13)
}
  0x8c   : > { %7366 = dma.hbm_to_vmem [thread:$0]  (!%p8777_p4), %s8771_s15, 16, %s8773_s10, %s253_s13  }
  0x8d   : > { %p9230_p1 = scmp.ne.s32.totalorder %s9221_s28, 0 }
  0x8e   : > { %s8809_s14 = sand.u32 (!%p9230_p1), 1, %s8534_s22  }
  0x8f   : > { %271 = sbr.rel (%p9230_p1) target bundleno = 3607 (0xe17), region = 44  ;;  %s274_s26 = scalar_lea.sflag (!%p9230_p1), [#allocation3], %s8809_s14 }
  0x90   : > { %s276_s29 = scalar_lea.vmem (!%p9230_p1), [#allocation2], %s8809_s14 }
  0x96   : > { %8513 = dma.done.wait (%p8752_p6), %s274_s26, 16  }
  0x97   : > { %8515 = vsyncadd (%p8752_p6), %s274_s26, 4294967280  ;;  %p9231_p7 = scmp.eq.s32.totalorder %s8618_s27, 0 }
  0x99   : > { %8517 = dma.done.wait (%p9231_p7), [#allocation6], 1088   ;;  %p9232_p9 = pmov %p9231_p7 }
  0x9a   : > { %p9233_p4 = pmov %p9231_p7 }
  0x9b   : > { %8519 = vsyncadd (%p9232_p9), [#allocation6], 4294966208 }
  0x9c   : > { %8521 = dma.done.wait (%p9233_p4), [#allocation9], 73920   ;;  %p9234_p8 = pmov %p9233_p4 }
  0x9d   : > { %v8555_v0 = vmov 0   ;;  %v7429_v1 = vld [vmem:[#allocation5 + $0x4] ss:$16 sps:$4 sm:$0xff]   ;;  %v7431_v2 = vld [vmem:[#allocation5 + $0xc] ss:$16 sps:$4 sm:$0xff]   ;;  %vm393_vm0 = vcmask 261120  }
  0x9e   : > { %8523 = vsyncadd (%p9234_p8), [#allocation9], 4294893376  ;;  %429 = vmatprep.mubr.bf16.mxu0 %v8555_v0  ;;  %470 = vmatprep.mubr.bf16.mxu1 %v8555_v0  ;;  %v7433_v3 = vld [vmem:[#allocation5] ss:$16 sps:$4 sm:$0xff]   ;;  %v7434_v4 = vld [vmem:[#allocation5 + $0x8] ss:$16 sps:$4 sm:$0xff]  }
  0x9f   : > { %397 = vmatprep.subr.bf16.mxu0 %v7429_v1  ;;  %438 = vmatprep.subr.bf16.mxu1 %v7431_v2  ;;  %v7435_v5 = vld [vmem:[#allocation5 + $0x24] ss:$16 sps:$4 sm:$0xff]   ;;  %v7437_v6 = vld [vmem:[#allocation5 + $0x2c] ss:$16 sps:$4 sm:$0xff]   ;;  %v7439_v7 = vld [vmem:[#allocation5 + $0x20] ss:$16 sps:$4 sm:$0xff]  }
  0xa0   : > { %398 = vmatpush1.bf16.msra.mxu0 %v7433_v3  ;;  %439 = vmatpush1.bf16.msra.mxu1 %v7434_v4  ;;  %v7440_v8 = vld [vmem:[#allocation5 + $0x28] ss:$16 sps:$4 sm:$0xff]   ;;  %v321_v9 = vld [vmem:[%s276_s29] sm:$0x1]  ;;  %v7444_v13 = vld [vmem:[#allocation8 + $0x8] ss:$24 sps:$4 sm:$0xff]  }
  0xa1   : > { %399 = vmatprep.subr.bf16.mxu0 %v7435_v5  ;;  %440 = vmatprep.subr.bf16.mxu1 %v7437_v6  ;;  %v7441_v10 = vld [vmem:[#allocation8] ss:$24 sps:$4 sm:$0xff]   ;;  %v7443_v11 = vld [vmem:[#allocation8 + $0x4] ss:$24 sps:$4 sm:$0xff]   ;;  %v322_v12 = vpack.c.bf16 %v321_v9, %v321_v9  ;;  %v7449_v15 = vld [vmem:[#allocation8 + $0x34] ss:$24 sps:$4 sm:$0xff]  }
  0xa2   : > { %v7446_v14 = vld [vmem:[#allocation8 + $0xc] ss:$24 sps:$4 sm:$0xff]   ;;  %v7452_v16 = vld [vmem:[#allocation8 + $0x3c] ss:$24 sps:$4 sm:$0xff]   ;;  %v7447_v17 = vld [vmem:[#allocation8 + $0x30] ss:$24 sps:$4 sm:$0xff]  }
  0xa3   : > { %v7450_v18 = vld [vmem:[#allocation8 + $0x38] ss:$24 sps:$4 sm:$0xff]   ;;  %v7455_v19 = vld [vmem:[#allocation8 + $0x64] ss:$24 sps:$4 sm:$0xff]   ;;  %v7456_v22 = vld [vmem:[#allocation8 + $0x68] ss:$24 sps:$4 sm:$0xff]  }
  0xa4   : > { %400 = vmatpush1.bf16.msra.mxu0 %v7439_v7  ;;  %441 = vmatpush1.bf16.msra.mxu1 %v7440_v8  ;;  %v7458_v20 = vld [vmem:[#allocation8 + $0x6c] ss:$24 sps:$4 sm:$0xff]   ;;  %v7453_v21 = vld [vmem:[#allocation8 + $0x60] ss:$24 sps:$4 sm:$0xff]   ;;  %v7464_v24 = vld [vmem:[#allocation8 + $0x9c] ss:$24 sps:$4 sm:$0xff]  }
  0xa5   : > { %1084 = vmatprep.subr.bf16.mxu0 %v7443_v11  ;;  %1125 = vmatprep.subr.bf16.mxu1 %v7446_v14  ;;  %v7461_v23 = vld [vmem:[#allocation8 + $0x94] ss:$24 sps:$4 sm:$0xff]   ;;  %v7459_v25 = vld [vmem:[#allocation8 + $0x90] ss:$24 sps:$4 sm:$0xff]   ;;  %v7467_v27 = vld [vmem:[#allocation8 + $0xc4] ss:$24 sps:$4 sm:$0xff]  }
  0xa6   : > { %v7462_v26 = vld [vmem:[#allocation8 + $0x98] ss:$24 sps:$4 sm:$0xff]   ;;  %v7470_v28 = vld [vmem:[#allocation8 + $0xcc] ss:$24 sps:$4 sm:$0xff]   ;;  %v7468_v30 = vld [vmem:[#allocation8 + $0xc8] ss:$24 sps:$4 sm:$0xff]  }
  0xa7   : > { %6506 = vmatmul.mubr.msk.bf16.vlgmr.msra.gmra.mrb[0].mxu0 %vm393_vm0, %v322_v12  ;;  %6507 = vmatmul.mubr.msk.bf16.vlgmr.msra.gmra.mrb[0].mxu1 %vm393_vm0, %v322_v12  ;;  %v7465_v29 = vld [vmem:[#allocation8 + $0xc0] ss:$24 sps:$4 sm:$0xff]   ;;  %v7473_v31 = vld [vmem:[#allocation8 + $0xf4] ss:$24 sps:$4 sm:$0xff]   ;;  %v7471_v33 = vld [vmem:[#allocation8 + $0xf0] ss:$24 sps:$4 sm:$0xff]  }
  0xa8   : > { %1085 = vmatpush1.bf16.msra.mxu0 %v7441_v10  ;;  %1126 = vmatpush1.bf16.msra.mxu1 %v7444_v13  ;;  %v7476_v32 = vld [vmem:[#allocation8 + $0xfc] ss:$24 sps:$4 sm:$0xff]   ;;  %v7474_v34 = vld [vmem:[#allocation8 + $0xf8] ss:$24 sps:$4 sm:$0xff]   ;;  %v7482_v36 = vld [vmem:[#allocation8 + $0x12c] ss:$24 sps:$4 sm:$0xff]   ;;  %v373_v13 = vlaneseq }
  0xa9   : > { %1086 = vmatprep.subr.bf16.mxu0 %v7449_v15  ;;  %1127 = vmatprep.subr.bf16.mxu1 %v7452_v16  ;;  %v7479_v35 = vld [vmem:[#allocation8 + $0x124] ss:$24 sps:$4 sm:$0xff]   ;;  %v7477_v37 = vld [vmem:[#allocation8 + $0x120] ss:$24 sps:$4 sm:$0xff]   ;;  %v7485_v39 = vld [vmem:[#allocation8 + $0x154] ss:$24 sps:$4 sm:$0xff]  }
  0xaa   : > { %v7480_v38 = vld [vmem:[#allocation8 + $0x128] ss:$24 sps:$4 sm:$0xff]   ;;  %v7488_v40 = vld [vmem:[#allocation8 + $0x15c] ss:$24 sps:$4 sm:$0xff]   ;;  %v7486_v42 = vld [vmem:[#allocation8 + $0x158] ss:$24 sps:$4 sm:$0xff]  }
  0xab   : > { %v7483_v41 = vld [vmem:[#allocation8 + $0x150] ss:$24 sps:$4 sm:$0xff]   ;;  %v7491_v43 = vld [vmem:[#allocation8 + $0x184] ss:$24 sps:$4 sm:$0xff]   ;;  %v7489_v45 = vld [vmem:[#allocation8 + $0x180] ss:$24 sps:$4 sm:$0xff]  }
  0xac   : > { %1087 = vmatpush1.bf16.msra.mxu0 %v7447_v17  ;;  %1128 = vmatpush1.bf16.msra.mxu1 %v7450_v18  ;;  %v7494_v44 = vld [vmem:[#allocation8 + $0x18c] ss:$24 sps:$4 sm:$0xff]   ;;  %v7492_v46 = vld [vmem:[#allocation8 + $0x188] ss:$24 sps:$4 sm:$0xff]   ;;  %v7500_v48 = vld [vmem:[#allocation8 + $0x1bc] ss:$24 sps:$4 sm:$0xff]  }
  0xad   : > { %1088 = vmatprep.subr.bf16.mxu0 %v7455_v19  ;;  %1129 = vmatprep.subr.bf16.mxu1 %v7458_v20  ;;  %v7497_v47 = vld [vmem:[#allocation8 + $0x1b4] ss:$24 sps:$4 sm:$0xff]   ;;  %v7495_v49 = vld [vmem:[#allocation8 + $0x1b0] ss:$24 sps:$4 sm:$0xff]   ;;  %v7503_v51 = vld [vmem:[#allocation8 + $0x1e4] ss:$24 sps:$4 sm:$0xff]  }
  0xae   : > { %v7498_v50 = vld [vmem:[#allocation8 + $0x1b8] ss:$24 sps:$4 sm:$0xff]   ;;  %v7506_v52 = vld [vmem:[#allocation8 + $0x1ec] ss:$24 sps:$4 sm:$0xff]   ;;  %v7504_v54 = vld [vmem:[#allocation8 + $0x1e8] ss:$24 sps:$4 sm:$0xff]  }
  0xaf   : > { %v7501_v53 = vld [vmem:[#allocation8 + $0x1e0] ss:$24 sps:$4 sm:$0xff]   ;;  %v7509_v55 = vld [vmem:[#allocation8 + $0x214] ss:$24 sps:$4 sm:$0xff]   ;;  %v7507_v57 = vld [vmem:[#allocation8 + $0x210] ss:$24 sps:$4 sm:$0xff]  }
  0xb0   : > { %1089 = vmatpush1.bf16.msra.mxu0 %v7453_v21  ;;  %1130 = vmatpush1.bf16.msra.mxu1 %v7456_v22  ;;  %v7512_v56 = vld [vmem:[#allocation8 + $0x21c] ss:$24 sps:$4 sm:$0xff]   ;;  %v7510_v58 = vld [vmem:[#allocation8 + $0x218] ss:$24 sps:$4 sm:$0xff]   ;;  %v7518_v60 = vld [vmem:[#allocation8 + $0x24c] ss:$24 sps:$4 sm:$0xff]  }
  0xb1   : > { %1090 = vmatprep.subr.bf16.mxu0 %v7461_v23  ;;  %1131 = vmatprep.subr.bf16.mxu1 %v7464_v24  ;;  %v7515_v59 = vld [vmem:[#allocation8 + $0x244] ss:$24 sps:$4 sm:$0xff]   ;;  %v7513_v61 = vld [vmem:[#allocation8 + $0x240] ss:$24 sps:$4 sm:$0xff]   ;;  %v7521_v63 = vld [vmem:[#allocation8 + $0x274] ss:$24 sps:$4 sm:$0xff]  }
  0xb2   : > { %v7516_v62 = vld [vmem:[#allocation8 + $0x248] ss:$24 sps:$4 sm:$0xff]   ;;  %v7524_v2 = vld [vmem:[#allocation8 + $0x27c] ss:$24 sps:$4 sm:$0xff]   ;;  %v7522_v3 = vld [vmem:[#allocation8 + $0x278] ss:$24 sps:$4 sm:$0xff]  }
  0xb3   : > { %v7519_v1 = vld [vmem:[#allocation8 + $0x270] ss:$24 sps:$4 sm:$0xff]   ;;  %v7527_v4 = vld [vmem:[#allocation8 + $0x2a4] ss:$24 sps:$4 sm:$0xff]   ;;  %v7525_v5 = vld [vmem:[#allocation8 + $0x2a0] ss:$24 sps:$4 sm:$0xff]  }
  0xb4   : > { %1091 = vmatpush1.bf16.msra.mxu0 %v7459_v25  ;;  %1132 = vmatpush1.bf16.msra.mxu1 %v7462_v26  ;;  %v7530_v6 = vld [vmem:[#allocation8 + $0x2ac] ss:$24 sps:$4 sm:$0xff]   ;;  %v7528_v7 = vld [vmem:[#allocation8 + $0x2a8] ss:$24 sps:$4 sm:$0xff]   ;;  %v7534_v10 = vld [vmem:[#allocation8 + $0x2d8] ss:$24 sps:$4 sm:$0xff]  }
  0xb5   : > { %1092 = vmatprep.subr.bf16.mxu0 %v7467_v27  ;;  %1133 = vmatprep.subr.bf16.mxu1 %v7470_v28  ;;  %v7531_v8 = vld [vmem:[#allocation8 + $0x2d0] ss:$24 sps:$4 sm:$0xff]   ;;  %v7533_v9 = vld [vmem:[#allocation8 + $0x2d4] ss:$24 sps:$4 sm:$0xff]   ;;  %v374_v14 = vshrl.u32 %v373_v13, 7  ;;  %vm1219_vm4 = vcmask 1040384  }
  0xb6   : > { %v7536_v11 = vld [vmem:[#allocation8 + $0x2dc] ss:$24 sps:$4 sm:$0xff]   ;;  %v7579_v13 = vld [vmem:[#allocation8 + $0x2b0] ss:$24 sps:$4 sm:$0xff]   ;;  %vm1215_vm5 = vcmask 15360   ;;  %vm2999_vm10 = vcmask 1041408  }
  0xb7   : > { %v7539_v12 = vld [vmem:[#allocation8 + $0x14] ss:$24 sps:$4 sm:$0xff]   ;;  %v331_v15 = vld [vmem:[#allocation7] sm:$0xf]  ;;  %v8829_v16 = vsub.s32 0, %v374_v14  ;;  %v383_v17 = vsub.s32 2, %v374_v14 }
  0xb8   : > { %1093 = vmatpush1.bf16.msra.mxu0 %v7465_v29  ;;  %1134 = vmatpush1.bf16.msra.mxu1 %v7468_v30  ;;  %v8831_v18 = vsub.s32 1, %v374_v14  ;;  %v387_v19 = vsub.s32 3, %v374_v14  ;;  %vm481_vm1 = vcmp.eq.s32.totalorder %v374_v14, 0  ;;  %v7584_v14 = vld [vmem:[#allocation8 + $0x2e4] ss:$24 sps:$4 sm:$0xff]   ;;  %vm2995_vm11 = vcmask 31744  }
  0xb9   : > { %1094 = vmatprep.subr.bf16.mxu0 %v7473_v31  ;;  %1135 = vmatprep.subr.bf16.mxu1 %v7476_v32  ;;  %v376_v20 = vrot.slane %v331_v15, %v8829_v16  ;;  %v384_v21 = vrot.slane %v331_v15, %v383_v17  ;;  %v7588_v17 = vld [vmem:[#allocation8 + $0x308] ss:$24 sps:$4 sm:$0xff]   ;;  %vm3896_vm14 = vcmask 1043456   ;;  %vm3892_vm15 = vcmask 64512   ;;  %s7328_s12 = smul.u32 224, %s8809_s14  ;;  %s8556_s7 = smov 16  }
  0xba   : > { %v380_v22 = vrot.slane %v331_v15, %v8831_v18  ;;  %v388_v23 = vrot.slane %v331_v15, %v387_v19  ;;  %v7582_v15 = vld [vmem:[#allocation8 + $0x2e0] ss:$24 sps:$4 sm:$0xff]   ;;  %v7590_v19 = vld [vmem:[#allocation8 + $0x30c] ss:$24 sps:$4 sm:$0xff]   ;;  %s8557_s8 = smov 88   ;;  %s8558_s19 = smov 72  }
  0xbb   : > { %s9065_s13 = scalar_lea.vmem [#allocation11], %s7328_s12  ;;  %s7329_s9 = smul.u32 3584, %s8618_s27 }
  0xbc   : > { %1095 = vmatpush1.bf16.msra.mxu0 %v7471_v33  ;;  %1136 = vmatpush1.bf16.msra.mxu1 %v7474_v34  ;;  %s6377_s11 = sshll.u32 %s9065_s13, 4  ;;  %s6364_s27 = scalar_lea.sflag [#allocation4], %s8809_s14  ;;  %s9163_s11 = int_to_ptr.vmem [resolvable:$true] %s6377_s11 }
  0xbd   : > { %1096 = vmatprep.subr.bf16.mxu0 %v7479_v35  ;;  %1137 = vmatprep.subr.bf16.mxu1 %v7482_v36  ;;  %s9161_s29 = scalar_lea.hbm %s9217_s6, %s7329_s9  ;;  %s8468_s28 = scalar_lea.vmem %s9163_s11, 3584 }
  0xbe   : > { %p8469_p6 = scmp.ne.s32.totalorder %s9163_s11, %s8468_s28  ;;  %p9235_p0 = scmp.ne.s32.totalorder %s9227_s20, 0 }
  0xbf   : > { %s8559_s17 = smov [#allocation11]  }
  0xc0   : > { %1097 = vmatpush1.bf16.msra.mxu0 %v7477_v37  ;;  %1138 = vmatpush1.bf16.msra.mxu1 %v7480_v38  ;;  %p8470_p2 = pnand %p8469_p6, %p9235_p0  ;;  %s8472_s10 = sshll.u32 %s8559_s17, 4  ;;  %s8473_s10 = int_to_ptr.vmem [resolvable:$false] %s8472_s10 }
  0xc1   : > { %1098 = vmatprep.subr.bf16.mxu0 %v7485_v39  ;;  %1139 = vmatprep.subr.bf16.mxu1 %v7488_v40  ;;  %s8474_s15 = scalar_lea.vmem %s8473_s10, 7168  ;;  %p8475_p10 = scmp.lt.s32.totalorder %s9163_s11, %s8473_s10 }
  0xc2   : > { %p8471_p5 = pneg %p8470_p2  ;;  %p8476_p11 = scmp.lt.s32.totalorder %s8474_s15, %s8468_s28 }
  0xc4   : > { %1099 = vmatpush1.bf16.msra.mxu0 %v7483_v41  ;;  %1140 = vmatpush1.bf16.msra.mxu1 %v7486_v42  ;;  %p8477_p3 = por %p8476_p11, %p8475_p10 }
  0xc5   : > { %1100 = vmatprep.subr.bf16.mxu0 %v7491_v43  ;;  %1141 = vmatprep.subr.bf16.mxu1 %v7494_v44  ;;  %v7537_v44 = vld [vmem:[#allocation8 + $0x10] ss:$24 sps:$4 sm:$0xff]  }
  0xc6   : > { %p8478_p12 = pnand %p8477_p3, %p8471_p5 }
  0xc8   : > { %1101 = vmatpush1.bf16.msra.mxu0 %v7489_v45  ;;  %1142 = vmatpush1.bf16.msra.mxu1 %v7492_v46 }
  0xc9   : > { %1102 = vmatprep.subr.bf16.mxu0 %v7497_v47  ;;  %1143 = vmatprep.subr.bf16.mxu1 %v7500_v48  ;;  %v7542_v47 = vld [vmem:[#allocation8 + $0x44] ss:$24 sps:$4 sm:$0xff]  }
  0xcc   : > { %1103 = vmatpush1.bf16.msra.mxu0 %v7495_v49  ;;  %1144 = vmatpush1.bf16.msra.mxu1 %v7498_v50  ;;  %v7540_v50 = vld [vmem:[#allocation8 + $0x40] ss:$24 sps:$4 sm:$0xff]  }
  0xcd   : > { %1104 = vmatprep.subr.bf16.mxu0 %v7503_v51  ;;  %1145 = vmatprep.subr.bf16.mxu1 %v7506_v52  ;;  %v7545_v51 = vld [vmem:[#allocation8 + $0x74] ss:$24 sps:$4 sm:$0xff]   ;;  %v7543_v52 = vld [vmem:[#allocation8 + $0x70] ss:$24 sps:$4 sm:$0xff]  }
  0xd0   : > { %1105 = vmatpush1.bf16.msra.mxu0 %v7501_v53  ;;  %1146 = vmatpush1.bf16.msra.mxu1 %v7504_v54  ;;  %v7548_v53 = vld [vmem:[#allocation8 + $0xa4] ss:$24 sps:$4 sm:$0xff]   ;;  %v7546_v54 = vld [vmem:[#allocation8 + $0xa0] ss:$24 sps:$4 sm:$0xff]  }
  0xd1   : > { %1106 = vmatprep.subr.bf16.mxu0 %v7509_v55  ;;  %1147 = vmatprep.subr.bf16.mxu1 %v7512_v56  ;;  %v7551_v55 = vld [vmem:[#allocation8 + $0xd4] ss:$24 sps:$4 sm:$0xff]   ;;  %v7549_v56 = vld [vmem:[#allocation8 + $0xd0] ss:$24 sps:$4 sm:$0xff]  }
  0xd4   : > { %1107 = vmatpush1.bf16.msra.mxu0 %v7507_v57  ;;  %1148 = vmatpush1.bf16.msra.mxu1 %v7510_v58  ;;  %v7554_v57 = vld [vmem:[#allocation8 + $0x104] ss:$24 sps:$4 sm:$0xff]   ;;  %v7552_v58 = vld [vmem:[#allocation8 + $0x100] ss:$24 sps:$4 sm:$0xff]  }
  0xd5   : > { %1108 = vmatprep.subr.bf16.mxu0 %v7515_v59  ;;  %1149 = vmatprep.subr.bf16.mxu1 %v7518_v60  ;;  %v7557_v59 = vld [vmem:[#allocation8 + $0x134] ss:$24 sps:$4 sm:$0xff]   ;;  %v7555_v60 = vld [vmem:[#allocation8 + $0x130] ss:$24 sps:$4 sm:$0xff]  }
  0xd8   : > { %1109 = vmatpush1.bf16.msra.mxu0 %v7513_v61  ;;  %1150 = vmatpush1.bf16.msra.mxu1 %v7516_v62  ;;  %v7560_v61 = vld [vmem:[#allocation8 + $0x164] ss:$24 sps:$4 sm:$0xff]   ;;  %v7558_v62 = vld [vmem:[#allocation8 + $0x160] ss:$24 sps:$4 sm:$0xff]  }
  0xd9   : > { %1110 = vmatprep.subr.bf16.mxu0 %v7521_v63  ;;  %1151 = vmatprep.subr.bf16.mxu1 %v7524_v2  ;;  %v7563_v63 = vld [vmem:[#allocation8 + $0x194] ss:$24 sps:$4 sm:$0xff]   ;;  %v7566_v2 = vld [vmem:[#allocation8 + $0x1c4] ss:$24 sps:$4 sm:$0xff]  }
  0xdc   : > { %1111 = vmatpush1.bf16.msra.mxu0 %v7519_v1  ;;  %1152 = vmatpush1.bf16.msra.mxu1 %v7522_v3  ;;  %v7561_v1 = vld [vmem:[#allocation8 + $0x190] ss:$24 sps:$4 sm:$0xff]   ;;  %v7564_v3 = vld [vmem:[#allocation8 + $0x1c0] ss:$24 sps:$4 sm:$0xff]  }
  0xdd   : > { %1112 = vmatprep.subr.bf16.mxu0 %v7527_v4  ;;  %1153 = vmatprep.subr.bf16.mxu1 %v7530_v6  ;;  %v7569_v4 = vld [vmem:[#allocation8 + $0x1f4] ss:$24 sps:$4 sm:$0xff]   ;;  %v7572_v6 = vld [vmem:[#allocation8 + $0x224] ss:$24 sps:$4 sm:$0xff]  }
  0xe0   : > { %1113 = vmatpush1.bf16.msra.mxu0 %v7525_v5  ;;  %1154 = vmatpush1.bf16.msra.mxu1 %v7528_v7  ;;  %v7567_v5 = vld [vmem:[#allocation8 + $0x1f0] ss:$24 sps:$4 sm:$0xff]   ;;  %v7570_v7 = vld [vmem:[#allocation8 + $0x220] ss:$24 sps:$4 sm:$0xff]  }
  0xe1   : > { %1114 = vmatprep.subr.bf16.mxu0 %v7533_v9  ;;  %1155 = vmatprep.subr.bf16.mxu1 %v7536_v11  ;;  %v7573_v9 = vld [vmem:[#allocation8 + $0x250] ss:$24 sps:$4 sm:$0xff]   ;;  %v7576_v11 = vld [vmem:[#allocation8 + $0x280] ss:$24 sps:$4 sm:$0xff]  }
  0xe4   : > { %1115 = vmatpush1.bf16.msra.mxu0 %v7531_v8  ;;  %1156 = vmatpush1.bf16.msra.mxu1 %v7534_v10  ;;  %v7575_v8 = vld [vmem:[#allocation8 + $0x254] ss:$24 sps:$4 sm:$0xff]   ;;  %v7578_v10 = vld [vmem:[#allocation8 + $0x284] ss:$24 sps:$4 sm:$0xff]  }
  0xe5   : > { %1166 = vmatprep.subr.bf16.mxu0 %v7539_v12  ;;  %v7581_v12 = vld [vmem:[#allocation8 + $0x2b4] ss:$24 sps:$4 sm:$0xff]  }
 0x17a   : > { %v431_v24 = vpop.f32.mrb[0].mxu0  ;;  %v472_v25 = vpop.f32.mrb[0].mxu1 }
 0x17b   : > { %v432_v26 = vadd.f32 %v431_v24, %v376_v20  ;;  %v473_v27 = vadd.f32 %v472_v25, %v384_v21  ;;  %v433_v28 = vpop.f32.mrb[1].mxu0  ;;  %v474_v29 = vpop.f32.mrb[1].mxu1  ;;  %v7594_v20 = vld [vmem:[#allocation8 + $0x338] ss:$24 sps:$4 sm:$0xff]   ;;  %v7596_v21 = vld [vmem:[#allocation8 + $0x33c] ss:$24 sps:$4 sm:$0xff]  }
 0x17c   : > { %v434_v30 = vadd.f32 %v433_v28, %v380_v22  ;;  %v475_v31 = vadd.f32 %v474_v29, %v388_v23  ;;  %v435_v32 = vpop.f32.mrb[2].mxu0  ;;  %v476_v33 = vpop.f32.mrb[2].mxu1  ;;  %v7600_v22 = vld [vmem:[#allocation8 + $0x368] ss:$24 sps:$4 sm:$0xff]   ;;  %v7602_v23 = vld [vmem:[#allocation8 + $0x36c] ss:$24 sps:$4 sm:$0xff]  }
 0x17d   : > { %v485_v34 = vrot.slane %v432_v26, %v8829_v16  ;;  %v493_v35 = vrot.slane %v473_v27, %v8829_v16  ;;  %v436_v36 = vpop.f32.mrb[3].mxu0  ;;  %v477_v37 = vpop.f32.mrb[3].mxu1  ;;  %v7606_v24 = vld [vmem:[#allocation8 + $0x398] ss:$24 sps:$4 sm:$0xff]   ;;  %v7608_v25 = vld [vmem:[#allocation8 + $0x39c] ss:$24 sps:$4 sm:$0xff]  }
 0x17e   : > { %v489_v38 = vrot.slane %v434_v30, %v8829_v16  ;;  %v497_v39 = vrot.slane %v475_v31, %v8829_v16  ;;  %v7612_v26 = vld [vmem:[#allocation8 + $0x3c8] ss:$24 sps:$4 sm:$0xff]   ;;  %v7614_v27 = vld [vmem:[#allocation8 + $0x3cc] ss:$24 sps:$4 sm:$0xff]   ;;  %v7618_v28 = vld [vmem:[#allocation8 + $0x3f8] ss:$24 sps:$4 sm:$0xff]  }
 0x17f   : > { %v498_v40 = vsel %vm481_vm1, %v485_v34, %v493_v35  ;;  %v7620_v29 = vld [vmem:[#allocation8 + $0x3fc] ss:$24 sps:$4 sm:$0xff]   ;;  %v7624_v30 = vld [vmem:[#allocation8 + $0x428] ss:$24 sps:$4 sm:$0xff]   ;;  %v7626_v31 = vld [vmem:[#allocation8 + $0x42c] ss:$24 sps:$4 sm:$0xff]  }
 0x180   : > { %vm500_vm2 = vcmp.ge.f32.partialorder %v498_v40, 0.0  ;;  %v502_v41 = vmul.f32 0.01, %v498_v40  ;;  %v499_v42 = vsel %vm481_vm1, %v489_v38, %v497_v39  ;;  %v7630_v32 = vld [vmem:[#allocation8 + $0x458] ss:$24 sps:$4 sm:$0xff]  }
 0x181   : > { %vm501_vm3 = vcmp.ge.f32.partialorder %v499_v42, 0.0  ;;  %v503_v43 = vmul.f32 0.01, %v499_v42  ;;  %v7632_v33 = vld [vmem:[#allocation8 + $0x45c] ss:$24 sps:$4 sm:$0xff]  }
 0x182   : > { %v504_v45 = vsel %vm500_vm2, %v498_v40, %v502_v41  ;;  %v7636_v34 = vld [vmem:[#allocation8 + $0x488] ss:$24 sps:$4 sm:$0xff]   ;;  %v7638_v35 = vld [vmem:[#allocation8 + $0x48c] ss:$24 sps:$4 sm:$0xff]   ;;  %v7642_v36 = vld [vmem:[#allocation8 + $0x4b8] ss:$24 sps:$4 sm:$0xff]  }
 0x183   : > { %v505_v46 = vsel %vm501_vm3, %v499_v42, %v503_v43  ;;  %v8839_v49 = vpack.c.bf16 %v504_v45, %v504_v45  ;;  %v7644_v37 = vld [vmem:[#allocation8 + $0x4bc] ss:$24 sps:$4 sm:$0xff]   ;;  %v7648_v38 = vld [vmem:[#allocation8 + $0x4e8] ss:$24 sps:$4 sm:$0xff]   ;;  %v7650_v39 = vld [vmem:[#allocation8 + $0x4ec] ss:$24 sps:$4 sm:$0xff]  }
 0x184   : > { %v507_v48 = vpack.c.bf16 %v505_v46, %v505_v46  ;;  %v7654_v40 = vld [vmem:[#allocation8 + $0x518] ss:$24 sps:$4 sm:$0xff]   ;;  %v7656_v41 = vld [vmem:[#allocation8 + $0x51c] ss:$24 sps:$4 sm:$0xff]   ;;  %v7660_v42 = vld [vmem:[#allocation8 + $0x548] ss:$24 sps:$4 sm:$0xff]  }
 0x185   : > { %v7662_v43 = vld [vmem:[#allocation8 + $0x54c] ss:$24 sps:$4 sm:$0xff]   ;;  %v7668_v45 = vld [vmem:[#allocation8 + $0x57c] ss:$24 sps:$4 sm:$0xff]  }
 0x186   : > { %1116 = vmatprep.mubr.bf16.mxu0 %v507_v48  ;;  %1157 = vmatprep.mubr.bf16.mxu1 %v507_v48 }
 0x187   : > { %1117 = vmatmul.mubr.bf16.vlgmr.msra.gmra.mrb[4].mxu0 %v8839_v49  ;;  %1158 = vmatmul.mubr.bf16.vlgmr.msra.gmra.mrb[4].mxu1 %v8839_v49 }
 0x188   : > { %1167 = vmatpush1.bf16.msra.mxu0 %v7537_v44  ;;  %1198 = vmatprep.mubr.bf16.mxu0 %v507_v48  ;;  %v7666_v44 = vld [vmem:[#allocation8 + $0x578] ss:$24 sps:$4 sm:$0xff]  }
 0x189   : > { %1168 = vmatprep.subr.bf16.mxu0 %v7542_v47  ;;  %1258 = vmatprep.mubr.bf16.mxu1 %v8555_v0 }
 0x18c   : > { %1169 = vmatpush1.bf16.msra.mxu0 %v7540_v50 }
 0x18d   : > { %1170 = vmatprep.subr.bf16.mxu0 %v7545_v51 }
 0x190   : > { %1171 = vmatpush1.bf16.msra.mxu0 %v7543_v52 }
 0x191   : > { %1172 = vmatprep.subr.bf16.mxu0 %v7548_v53 }
 0x194   : > { %1173 = vmatpush1.bf16.msra.mxu0 %v7546_v54 }
 0x195   : > { %1174 = vmatprep.subr.bf16.mxu0 %v7551_v55 }
 0x198   : > { %1175 = vmatpush1.bf16.msra.mxu0 %v7549_v56 }
 0x199   : > { %1176 = vmatprep.subr.bf16.mxu0 %v7554_v57 }
 0x19c   : > { %1177 = vmatpush1.bf16.msra.mxu0 %v7552_v58 }
 0x19d   : > { %1178 = vmatprep.subr.bf16.mxu0 %v7557_v59  ;;  %v1214_v59 = vld [vmem:[%s9215_s4] sm:$0xf] }
 0x1a0   : > { %1179 = vmatpush1.bf16.msra.mxu0 %v7555_v60 }
 0x1a1   : > { %1180 = vmatprep.subr.bf16.mxu0 %v7560_v61  ;;  %v6606_v61 = vld [vmem:[%s9215_s4 + $0x1c] sm:$0xf] }
 0x1a4   : > { %1181 = vmatpush1.bf16.msra.mxu0 %v7558_v62 }
 0x1a5   : > { %1182 = vmatprep.subr.bf16.mxu0 %v7563_v63 }
 0x1a8   : > { %1183 = vmatpush1.bf16.msra.mxu0 %v7561_v1 }
 0x1a9   : > { %1184 = vmatprep.subr.bf16.mxu0 %v7566_v2 }
 0x1ac   : > { %1185 = vmatpush1.bf16.msra.mxu0 %v7564_v3 }
 0x1ad   : > { %1186 = vmatprep.subr.bf16.mxu0 %v7569_v4  ;;  %v7587_v4 = vld [vmem:[#allocation8 + $0x304] ss:$24 sps:$4 sm:$0xff]  }
 0x1b0   : > { %1187 = vmatpush1.bf16.msra.mxu0 %v7567_v5 }
 0x1b1   : > { %1188 = vmatprep.subr.bf16.mxu0 %v7572_v6 }
 0x1b4   : > { %1189 = vmatpush1.bf16.msra.mxu0 %v7570_v7  ;;  %v6609_v7 = vld [vmem:[%s9215_s4 + $0x38] sm:$0xf] }
 0x1b5   : > { %1190 = vmatprep.subr.bf16.mxu0 %v7575_v8  ;;  %v7585_v8 = vld [vmem:[#allocation8 + $0x300] ss:$24 sps:$4 sm:$0xff]  }
 0x1b8   : > { %1191 = vmatpush1.bf16.msra.mxu0 %v7573_v9  ;;  %v7593_v9 = vld [vmem:[#allocation8 + $0x334] ss:$24 sps:$4 sm:$0xff]  }
 0x1b9   : > { %1192 = vmatprep.subr.bf16.mxu0 %v7578_v10  ;;  %v7591_v10 = vld [vmem:[#allocation8 + $0x330] ss:$24 sps:$4 sm:$0xff]  }
 0x1bc   : > { %1193 = vmatpush1.bf16.msra.mxu0 %v7576_v11  ;;  %v7599_v11 = vld [vmem:[#allocation8 + $0x364] ss:$24 sps:$4 sm:$0xff]  }
 0x1bd   : > { %1194 = vmatprep.subr.bf16.mxu0 %v7581_v12  ;;  %v7597_v12 = vld [vmem:[#allocation8 + $0x360] ss:$24 sps:$4 sm:$0xff]  }
 0x1c0   : > { %1195 = vmatpush1.bf16.msra.mxu0 %v7579_v13  ;;  %v7605_v13 = vld [vmem:[#allocation8 + $0x394] ss:$24 sps:$4 sm:$0xff]  }
 0x1c1   : > { %1196 = vmatprep.subr.bf16.mxu0 %v7584_v14  ;;  %v7603_v14 = vld [vmem:[#allocation8 + $0x390] ss:$24 sps:$4 sm:$0xff]  }
 0x1c4   : > { %1197 = vmatpush1.bf16.msra.mxu0 %v7582_v15  ;;  %v7611_v15 = vld [vmem:[#allocation8 + $0x3c4] ss:$24 sps:$4 sm:$0xff]  }
 0x1c5   : > { %2014 = vmatprep.subr.bf16.mxu0 %v7590_v19  ;;  %v7617_v19 = vld [vmem:[#allocation8 + $0x3f4] ss:$24 sps:$4 sm:$0xff]  }
 0x1c7   : > { %1199 = vmatmul.mubr.bf16.vlgmr.msra.gmra.mrb[8].mxu0 %v8839_v49 }
 0x1c8   : > { %2015 = vmatpush1.bf16.msra.mxu0 %v7588_v17  ;;  %v7609_v17 = vld [vmem:[#allocation8 + $0x3c0] ss:$24 sps:$4 sm:$0xff]  }
 0x1c9   : > { %2016 = vmatprep.subr.bf16.mxu0 %v7596_v21  ;;  %v7623_v21 = vld [vmem:[#allocation8 + $0x424] ss:$24 sps:$4 sm:$0xff]  }
 0x1cc   : > { %2017 = vmatpush1.bf16.msra.mxu0 %v7594_v20  ;;  %v7615_v20 = vld [vmem:[#allocation8 + $0x3f0] ss:$24 sps:$4 sm:$0xff]  }
 0x1cd   : > { %2018 = vmatprep.subr.bf16.mxu0 %v7602_v23  ;;  %v7629_v23 = vld [vmem:[#allocation8 + $0x454] ss:$24 sps:$4 sm:$0xff]  }
 0x1d0   : > { %2019 = vmatpush1.bf16.msra.mxu0 %v7600_v22  ;;  %v7621_v22 = vld [vmem:[#allocation8 + $0x420] ss:$24 sps:$4 sm:$0xff]  }
 0x1d1   : > { %2020 = vmatprep.subr.bf16.mxu0 %v7608_v25  ;;  %v7635_v25 = vld [vmem:[#allocation8 + $0x484] ss:$24 sps:$4 sm:$0xff]  }
 0x1d4   : > { %2021 = vmatpush1.bf16.msra.mxu0 %v7606_v24  ;;  %v7627_v24 = vld [vmem:[#allocation8 + $0x450] ss:$24 sps:$4 sm:$0xff]  }
 0x1d5   : > { %2022 = vmatprep.subr.bf16.mxu0 %v7614_v27  ;;  %v7641_v27 = vld [vmem:[#allocation8 + $0x4b4] ss:$24 sps:$4 sm:$0xff]  }
 0x1d8   : > { %2023 = vmatpush1.bf16.msra.mxu0 %v7612_v26  ;;  %v7633_v26 = vld [vmem:[#allocation8 + $0x480] ss:$24 sps:$4 sm:$0xff]  }
 0x1d9   : > { %2024 = vmatprep.subr.bf16.mxu0 %v7620_v29  ;;  %v7647_v29 = vld [vmem:[#allocation8 + $0x4e4] ss:$24 sps:$4 sm:$0xff]  }
 0x1dc   : > { %2025 = vmatpush1.bf16.msra.mxu0 %v7618_v28  ;;  %v7639_v28 = vld [vmem:[#allocation8 + $0x4b0] ss:$24 sps:$4 sm:$0xff]  }
 0x1dd   : > { %2026 = vmatprep.subr.bf16.mxu0 %v7626_v31  ;;  %v7653_v31 = vld [vmem:[#allocation8 + $0x514] ss:$24 sps:$4 sm:$0xff]  }
 0x1e0   : > { %2027 = vmatpush1.bf16.msra.mxu0 %v7624_v30  ;;  %v7645_v30 = vld [vmem:[#allocation8 + $0x4e0] ss:$24 sps:$4 sm:$0xff]  }
 0x1e1   : > { %2028 = vmatprep.subr.bf16.mxu0 %v7632_v33  ;;  %v7659_v33 = vld [vmem:[#allocation8 + $0x544] ss:$24 sps:$4 sm:$0xff]  }
 0x1e4   : > { %2029 = vmatpush1.bf16.msra.mxu0 %v7630_v32  ;;  %v7651_v32 = vld [vmem:[#allocation8 + $0x510] ss:$24 sps:$4 sm:$0xff]  }
 0x1e5   : > { %2030 = vmatprep.subr.bf16.mxu0 %v7638_v35  ;;  %v7665_v35 = vld [vmem:[#allocation8 + $0x574] ss:$24 sps:$4 sm:$0xff]  }
 0x1e8   : > { %2031 = vmatpush1.bf16.msra.mxu0 %v7636_v34  ;;  %v7657_v34 = vld [vmem:[#allocation8 + $0x540] ss:$24 sps:$4 sm:$0xff]  }
 0x1e9   : > { %2032 = vmatprep.subr.bf16.mxu0 %v7644_v37  ;;  %v7671_v37 = vld [vmem:[#allocation8 + $0x5a4] ss:$24 sps:$4 sm:$0xff]  }
 0x1ec   : > { %2033 = vmatpush1.bf16.msra.mxu0 %v7642_v36  ;;  %v7663_v36 = vld [vmem:[#allocation8 + $0x570] ss:$24 sps:$4 sm:$0xff]  }
 0x1ed   : > { %2034 = vmatprep.subr.bf16.mxu0 %v7650_v39  ;;  %v7674_v39 = vld [vmem:[#allocation8 + $0x5ac] ss:$24 sps:$4 sm:$0xff]  }
 0x1f0   : > { %2035 = vmatpush1.bf16.msra.mxu0 %v7648_v38  ;;  %v7669_v38 = vld [vmem:[#allocation8 + $0x5a0] ss:$24 sps:$4 sm:$0xff]  }
 0x1f1   : > { %2036 = vmatprep.subr.bf16.mxu0 %v7656_v41  ;;  %v7677_v41 = vld [vmem:[#allocation8 + $0x5d4] ss:$24 sps:$4 sm:$0xff]  }
 0x1f4   : > { %2037 = vmatpush1.bf16.msra.mxu0 %v7654_v40  ;;  %v7672_v40 = vld [vmem:[#allocation8 + $0x5a8] ss:$24 sps:$4 sm:$0xff]  }
 0x1f5   : > { %2038 = vmatprep.subr.bf16.mxu0 %v7662_v43  ;;  %v7680_v43 = vld [vmem:[#allocation8 + $0x5dc] ss:$24 sps:$4 sm:$0xff]  }
 0x1f8   : > { %2039 = vmatpush1.bf16.msra.mxu0 %v7660_v42  ;;  %v7675_v42 = vld [vmem:[#allocation8 + $0x5d0] ss:$24 sps:$4 sm:$0xff]  }
 0x1f9   : > { %2040 = vmatprep.subr.bf16.mxu0 %v7668_v45  ;;  %v7683_v45 = vld [vmem:[#allocation8 + $0x314] ss:$24 sps:$4 sm:$0xff]  }
 0x1fc   : > { %2041 = vmatpush1.bf16.msra.mxu0 %v7666_v44  ;;  %v7678_v44 = vld [vmem:[#allocation8 + $0x5d8] ss:$24 sps:$4 sm:$0xff]  }
 0x1fd   : > { %2042 = vmatprep.subr.bf16.mxu0 %v7674_v39  ;;  %v7756_v39 = vld [vmem:[#allocation8 + $0x6c8] ss:$24 sps:$4 sm:$0xff]  }
 0x200   : > { %2043 = vmatpush1.bf16.msra.mxu0 %v7672_v40  ;;  %v7758_v40 = vld [vmem:[#allocation8 + $0x6cc] ss:$24 sps:$4 sm:$0xff]  }
 0x201   : > { %2044 = vmatprep.subr.bf16.mxu0 %v7680_v43  ;;  %v7768_v43 = vld [vmem:[#allocation8 + $0x728] ss:$24 sps:$4 sm:$0xff]  }
 0x204   : > { %2045 = vmatpush1.bf16.msra.mxu0 %v7678_v44  ;;  %v7770_v44 = vld [vmem:[#allocation8 + $0x72c] ss:$24 sps:$4 sm:$0xff]  }
 0x25a   : > { %v1118_v46 = vpop.f32.mrb[4].mxu0  ;;  %v1159_v47 = vpop.f32.mrb[4].mxu1 }
 0x25b   : > { %v1207_v48 = vpack.c.bf16 %v1118_v46, %v1118_v46  ;;  %v1120_v49 = vpop.f32.mrb[5].mxu0  ;;  %v1161_v50 = vpop.f32.mrb[5].mxu1  ;;  %v1209_v57 = vpack.c.bf16 %v1159_v47, %v1159_v47  ;;  %v1213_v46 = vld [vmem:[#allocation10] sm:$0x3] }
 0x25c   : > { %v1208_v51 = vpack.c.bf16 %v1120_v49, %v1120_v49  ;;  %v1122_v52 = vpop.f32.mrb[6].mxu0  ;;  %v1163_v53 = vpop.f32.mrb[6].mxu1  ;;  %v1210_v58 = vpack.c.bf16 %v1161_v50, %v1161_v50  ;;  %v1271_v47 = vrot.slane %v1213_v46, %v8829_v16 }
 0x25d   : > { %v1221_v54 = vsel %vm1219_vm4, %v1207_v48, 0  ;;  %v1123_v55 = vpop.f32.mrb[7].mxu0  ;;  %v1164_v56 = vpop.f32.mrb[7].mxu1  ;;  %v1286_v60 = vsel %vm1219_vm4, %v1209_v57, 0  ;;  %v1275_v48 = vrot.slane %v1213_v46, %v8831_v18  ;;  %v7776_v46 = vld [vmem:[#allocation8 + $0x75c] ss:$24 sps:$4 sm:$0xff]  }
 0x25e   : > { %6604 = vmatprep.subr.msk.bf16.mxu1 %vm1219_vm4, %v1208_v51 }
 0x25f   : > { %1227 = vmatpush1.bf16.msra.mxu1 %v1221_v54 }
 0x260   : > { %6607 = vmatprep.subr.msk.bf16.mxu1 %vm1219_vm4, %v1210_v58 }
 0x262   : > { %6605 = vmatmul.mubr.msk.bf16.vlgmr.msra.gmra.mrb[8].mxu1 %vm1215_vm5, %v1214_v59 }
 0x263   : > { %1292 = vmatpush1.bf16.msra.mxu1 %v1286_v60  ;;  %1323 = vmatprep.mubr.bf16.mxu1 %v8555_v0  ;;  %v7681_v60 = vld [vmem:[#allocation8 + $0x310] ss:$24 sps:$4 sm:$0xff]  }
 0x26e   : > { %6608 = vmatmul.mubr.msk.bf16.vlgmr.msra.gmra.mrb[8].mxu1 %vm1215_vm5, %v6606_v61 }
 0x26f   : > { %1377 = vmatprep.mubr.bf16.mxu1 %v8555_v0 }
 0x29a   : > { %v1200_v62 = vpop.f32.mrb[8].mxu0 }
 0x29b   : > { %v1211_v63 = vpack.c.bf16 %v1200_v62, %v1200_v62  ;;  %v1202_v1 = vpop.f32.mrb[9].mxu0  ;;  %v7686_v62 = vld [vmem:[#allocation8 + $0x344] ss:$24 sps:$4 sm:$0xff]  }
 0x29c   : > { %v1212_v2 = vpack.c.bf16 %v1202_v1, %v1202_v1  ;;  %v1204_v3 = vpop.f32.mrb[10].mxu0  ;;  %v7689_v1 = vld [vmem:[#allocation8 + $0x374] ss:$24 sps:$4 sm:$0xff]  }
 0x29d   : > { %v1340_v5 = vsel %vm1219_vm4, %v1211_v63, 0  ;;  %v1205_v6 = vpop.f32.mrb[11].mxu0  ;;  %v7684_v63 = vld [vmem:[#allocation8 + $0x340] ss:$24 sps:$4 sm:$0xff]   ;;  %v7692_v3 = vld [vmem:[#allocation8 + $0x3a4] ss:$24 sps:$4 sm:$0xff]  }
 0x29e   : > { %6610 = vmatprep.subr.msk.bf16.mxu1 %vm1219_vm4, %v1212_v2  ;;  %v7687_v2 = vld [vmem:[#allocation8 + $0x370] ss:$24 sps:$4 sm:$0xff]  }
 0x29f   : > { %1346 = vmatpush1.bf16.msra.mxu1 %v1340_v5  ;;  %v7695_v5 = vld [vmem:[#allocation8 + $0x3d4] ss:$24 sps:$4 sm:$0xff]   ;;  %v7693_v6 = vld [vmem:[#allocation8 + $0x3d0] ss:$24 sps:$4 sm:$0xff]  }
 0x2a0   : > { %1973 = vmatprep.subr.bf16.mxu1 %v7587_v4  ;;  %v7690_v4 = vld [vmem:[#allocation8 + $0x3a0] ss:$24 sps:$4 sm:$0xff]  }
 0x2a2   : > { %6611 = vmatmul.mubr.msk.bf16.vlgmr.msra.gmra.mrb[8].mxu1 %vm1215_vm5, %v6609_v7  ;;  %v7698_v7 = vld [vmem:[#allocation8 + $0x404] ss:$24 sps:$4 sm:$0xff]  }
 0x2a3   : > { %1974 = vmatpush1.bf16.msra.mxu1 %v7585_v8  ;;  %v7696_v8 = vld [vmem:[#allocation8 + $0x400] ss:$24 sps:$4 sm:$0xff]  }
 0x2a4   : > { %1975 = vmatprep.subr.bf16.mxu1 %v7593_v9  ;;  %v7701_v9 = vld [vmem:[#allocation8 + $0x434] ss:$24 sps:$4 sm:$0xff]  }
 0x2a7   : > { %1976 = vmatpush1.bf16.msra.mxu1 %v7591_v10  ;;  %v7699_v10 = vld [vmem:[#allocation8 + $0x430] ss:$24 sps:$4 sm:$0xff]  }
 0x2a8   : > { %1977 = vmatprep.subr.bf16.mxu1 %v7599_v11  ;;  %v7704_v11 = vld [vmem:[#allocation8 + $0x464] ss:$24 sps:$4 sm:$0xff]  }
 0x2ab   : > { %1978 = vmatpush1.bf16.msra.mxu1 %v7597_v12  ;;  %v7702_v12 = vld [vmem:[#allocation8 + $0x460] ss:$24 sps:$4 sm:$0xff]  }
 0x2ac   : > { %1979 = vmatprep.subr.bf16.mxu1 %v7605_v13  ;;  %v7707_v13 = vld [vmem:[#allocation8 + $0x494] ss:$24 sps:$4 sm:$0xff]  }
 0x2af   : > { %1980 = vmatpush1.bf16.msra.mxu1 %v7603_v14  ;;  %v7705_v14 = vld [vmem:[#allocation8 + $0x490] ss:$24 sps:$4 sm:$0xff]  }
 0x2b0   : > { %1981 = vmatprep.subr.bf16.mxu1 %v7611_v15  ;;  %v7710_v15 = vld [vmem:[#allocation8 + $0x4c4] ss:$24 sps:$4 sm:$0xff]  }
 0x2b3   : > { %1982 = vmatpush1.bf16.msra.mxu1 %v7609_v17  ;;  %v7708_v17 = vld [vmem:[#allocation8 + $0x4c0] ss:$24 sps:$4 sm:$0xff]  }
 0x2b4   : > { %1983 = vmatprep.subr.bf16.mxu1 %v7617_v19  ;;  %v7713_v19 = vld [vmem:[#allocation8 + $0x4f4] ss:$24 sps:$4 sm:$0xff]  }
 0x2b7   : > { %1984 = vmatpush1.bf16.msra.mxu1 %v7615_v20  ;;  %v7711_v20 = vld [vmem:[#allocation8 + $0x4f0] ss:$24 sps:$4 sm:$0xff]  }
 0x2b8   : > { %1985 = vmatprep.subr.bf16.mxu1 %v7623_v21  ;;  %v7716_v21 = vld [vmem:[#allocation8 + $0x524] ss:$24 sps:$4 sm:$0xff]  }
 0x2bb   : > { %1986 = vmatpush1.bf16.msra.mxu1 %v7621_v22  ;;  %v7714_v22 = vld [vmem:[#allocation8 + $0x520] ss:$24 sps:$4 sm:$0xff]  }
 0x2bc   : > { %1987 = vmatprep.subr.bf16.mxu1 %v7629_v23  ;;  %v7719_v23 = vld [vmem:[#allocation8 + $0x554] ss:$24 sps:$4 sm:$0xff]  }
 0x2bf   : > { %1988 = vmatpush1.bf16.msra.mxu1 %v7627_v24  ;;  %v7717_v24 = vld [vmem:[#allocation8 + $0x550] ss:$24 sps:$4 sm:$0xff]  }
 0x2c0   : > { %1989 = vmatprep.subr.bf16.mxu1 %v7635_v25  ;;  %v7722_v25 = vld [vmem:[#allocation8 + $0x584] ss:$24 sps:$4 sm:$0xff]  }
 0x2c3   : > { %1990 = vmatpush1.bf16.msra.mxu1 %v7633_v26  ;;  %v7720_v26 = vld [vmem:[#allocation8 + $0x580] ss:$24 sps:$4 sm:$0xff]  }
 0x2c4   : > { %1991 = vmatprep.subr.bf16.mxu1 %v7641_v27  ;;  %v7725_v27 = vld [vmem:[#allocation8 + $0x5b4] ss:$24 sps:$4 sm:$0xff]  }
 0x2c7   : > { %1992 = vmatpush1.bf16.msra.mxu1 %v7639_v28  ;;  %v7723_v28 = vld [vmem:[#allocation8 + $0x5b0] ss:$24 sps:$4 sm:$0xff]  }
 0x2c8   : > { %1993 = vmatprep.subr.bf16.mxu1 %v7647_v29  ;;  %v7728_v29 = vld [vmem:[#allocation8 + $0x5e4] ss:$24 sps:$4 sm:$0xff]  }
 0x2cb   : > { %1994 = vmatpush1.bf16.msra.mxu1 %v7645_v30  ;;  %v7726_v30 = vld [vmem:[#allocation8 + $0x5e0] ss:$24 sps:$4 sm:$0xff]  }
 0x2cc   : > { %1995 = vmatprep.subr.bf16.mxu1 %v7653_v31  ;;  %v7732_v31 = vld [vmem:[#allocation8 + $0x608] ss:$24 sps:$4 sm:$0xff]  }
 0x2cf   : > { %1996 = vmatpush1.bf16.msra.mxu1 %v7651_v32  ;;  %v7734_v32 = vld [vmem:[#allocation8 + $0x60c] ss:$24 sps:$4 sm:$0xff]  }
 0x2d0   : > { %1997 = vmatprep.subr.bf16.mxu1 %v7659_v33  ;;  %v7738_v33 = vld [vmem:[#allocation8 + $0x638] ss:$24 sps:$4 sm:$0xff]  }
 0x2d3   : > { %1998 = vmatpush1.bf16.msra.mxu1 %v7657_v34  ;;  %v7740_v34 = vld [vmem:[#allocation8 + $0x63c] ss:$24 sps:$4 sm:$0xff]  }
 0x2d4   : > { %1999 = vmatprep.subr.bf16.mxu1 %v7665_v35  ;;  %v7744_v35 = vld [vmem:[#allocation8 + $0x668] ss:$24 sps:$4 sm:$0xff]  }
 0x2d7   : > { %2000 = vmatpush1.bf16.msra.mxu1 %v7663_v36  ;;  %v7746_v36 = vld [vmem:[#allocation8 + $0x66c] ss:$24 sps:$4 sm:$0xff]  }
 0x2d8   : > { %2001 = vmatprep.subr.bf16.mxu1 %v7671_v37  ;;  %v7750_v37 = vld [vmem:[#allocation8 + $0x698] ss:$24 sps:$4 sm:$0xff]  }
 0x2db   : > { %2002 = vmatpush1.bf16.msra.mxu1 %v7669_v38  ;;  %v7752_v38 = vld [vmem:[#allocation8 + $0x69c] ss:$24 sps:$4 sm:$0xff]  }
 0x2dc   : > { %2003 = vmatprep.subr.bf16.mxu1 %v7677_v41  ;;  %v7762_v41 = vld [vmem:[#allocation8 + $0x6f8] ss:$24 sps:$4 sm:$0xff]  }
 0x2df   : > { %2004 = vmatpush1.bf16.msra.mxu1 %v7675_v42  ;;  %v7764_v42 = vld [vmem:[#allocation8 + $0x6fc] ss:$24 sps:$4 sm:$0xff]  }
 0x2e0   : > { %2055 = vmatprep.subr.bf16.mxu1 %v7683_v45  ;;  %v7774_v45 = vld [vmem:[#allocation8 + $0x758] ss:$24 sps:$4 sm:$0xff]  }
 0x375   : > { %v1379_v49 = vpop.f32.mrb[8].mxu1 }
 0x376   : > { %v7218_v50 = vadd.f32 %v1379_v49, %v1271_v47  ;;  %v1381_v51 = vpop.f32.mrb[9].mxu1  ;;  %v7780_v47 = vld [vmem:[#allocation8 + $0x788] ss:$24 sps:$4 sm:$0xff]   ;;  %v7786_v49 = vld [vmem:[#allocation8 + $0x7b8] ss:$24 sps:$4 sm:$0xff]  }
 0x377   : > { %v7219_v52 = vadd.f32 %v1381_v51, %v1275_v48  ;;  %v1383_v53 = vpop.f32.mrb[10].mxu1  ;;  %v7782_v48 = vld [vmem:[#allocation8 + $0x78c] ss:$24 sps:$4 sm:$0xff]   ;;  %v7792_v51 = vld [vmem:[#allocation8 + $0x7e8] ss:$24 sps:$4 sm:$0xff]  }
 0x378   : > { %vm1388_vm6 = vcmp.ge.f32.partialorder %v7218_v50, 0.0  ;;  %v1390_v54 = vmul.f32 0.01, %v7218_v50  ;;  %v1384_v55 = vpop.f32.mrb[11].mxu1  ;;  %v7798_v53 = vld [vmem:[#allocation8 + $0x818] ss:$24 sps:$4 sm:$0xff]  }
 0x379   : > { %vm1389_vm7 = vcmp.ge.f32.partialorder %v7219_v52, 0.0  ;;  %v1391_v56 = vmul.f32 0.01, %v7219_v52  ;;  %v7804_v55 = vld [vmem:[#allocation8 + $0x848] ss:$24 sps:$4 sm:$0xff]  }
 0x37a   : > { %v1392_v57 = vsel %vm1388_vm6, %v7218_v50, %v1390_v54  ;;  %v7788_v50 = vld [vmem:[#allocation8 + $0x7bc] ss:$24 sps:$4 sm:$0xff]  }
 0x37b   : > { %v1393_v58 = vsel %vm1389_vm7, %v7219_v52, %v1391_v56  ;;  %v8867_v61 = vpack.c.bf16 %v1392_v57, %v1392_v57  ;;  %v7794_v52 = vld [vmem:[#allocation8 + $0x7ec] ss:$24 sps:$4 sm:$0xff]   ;;  %v7800_v54 = vld [vmem:[#allocation8 + $0x81c] ss:$24 sps:$4 sm:$0xff]   ;;  %v7810_v57 = vld [vmem:[#allocation8 + $0x878] ss:$24 sps:$4 sm:$0xff]  }
 0x37c   : > { %v1395_v59 = vpack.c.bf16 %v1393_v58, %v1393_v58  ;;  %v7806_v56 = vld [vmem:[#allocation8 + $0x84c] ss:$24 sps:$4 sm:$0xff]   ;;  %v7812_v58 = vld [vmem:[#allocation8 + $0x87c] ss:$24 sps:$4 sm:$0xff]  }
 0x37e   : > { %2005 = vmatprep.mubr.bf16.mxu1 %v1395_v59  ;;  %2046 = vmatprep.mubr.bf16.mxu0 %v1395_v59 }
 0x37f   : > { %2006 = vmatmul.mubr.bf16.vlgmr.msra.gmra.mrb[12].mxu1 %v8867_v61  ;;  %2047 = vmatmul.mubr.bf16.vlgmr.msra.gmra.mrb[12].mxu0 %v8867_v61 }
 0x380   : > { %2056 = vmatpush1.bf16.msra.mxu1 %v7681_v60  ;;  %2087 = vmatprep.mubr.bf16.mxu1 %v1395_v59 }
 0x381   : > { %2057 = vmatprep.subr.bf16.mxu1 %v7686_v62  ;;  %2147 = vmatprep.mubr.bf16.mxu0 %v8555_v0 }
 0x384   : > { %2058 = vmatpush1.bf16.msra.mxu1 %v7684_v63 }
 0x385   : > { %2059 = vmatprep.subr.bf16.mxu1 %v7689_v1 }
 0x388   : > { %2060 = vmatpush1.bf16.msra.mxu1 %v7687_v2 }
 0x389   : > { %2061 = vmatprep.subr.bf16.mxu1 %v7692_v3 }
 0x38c   : > { %2062 = vmatpush1.bf16.msra.mxu1 %v7690_v4 }
 0x38d   : > { %2063 = vmatprep.subr.bf16.mxu1 %v7695_v5 }
 0x390   : > { %2064 = vmatpush1.bf16.msra.mxu1 %v7693_v6 }
 0x391   : > { %2065 = vmatprep.subr.bf16.mxu1 %v7698_v7 }
 0x394   : > { %2066 = vmatpush1.bf16.msra.mxu1 %v7696_v8 }
 0x395   : > { %2067 = vmatprep.subr.bf16.mxu1 %v7701_v9  ;;  %v6708_v9 = vld [vmem:[%s9215_s4 + $0x54] sm:$0xf] }
 0x398   : > { %2068 = vmatpush1.bf16.msra.mxu1 %v7699_v10 }
 0x399   : > { %2069 = vmatprep.subr.bf16.mxu1 %v7704_v11  ;;  %v6711_v11 = vld [vmem:[%s9215_s4 + $0x70] sm:$0xf] }
 0x39c   : > { %2070 = vmatpush1.bf16.msra.mxu1 %v7702_v12 }
 0x39d   : > { %2071 = vmatprep.subr.bf16.mxu1 %v7707_v13 }
 0x3a0   : > { %2072 = vmatpush1.bf16.msra.mxu1 %v7705_v14 }
 0x3a1   : > { %2073 = vmatprep.subr.bf16.mxu1 %v7710_v15 }
 0x3a4   : > { %2074 = vmatpush1.bf16.msra.mxu1 %v7708_v17 }
 0x3a5   : > { %2075 = vmatprep.subr.bf16.mxu1 %v7713_v19  ;;  %v7731_v19 = vld [vmem:[#allocation8 + $0x604] ss:$24 sps:$4 sm:$0xff]  }
 0x3a8   : > { %2076 = vmatpush1.bf16.msra.mxu1 %v7711_v20 }
 0x3a9   : > { %2077 = vmatprep.subr.bf16.mxu1 %v7716_v21 }
 0x3ac   : > { %2078 = vmatpush1.bf16.msra.mxu1 %v7714_v22  ;;  %v6714_v22 = vld [vmem:[%s9215_s4 + $0x8c] sm:$0xf] }
 0x3ad   : > { %2079 = vmatprep.subr.bf16.mxu1 %v7719_v23  ;;  %v7729_v23 = vld [vmem:[#allocation8 + $0x600] ss:$24 sps:$4 sm:$0xff]  }
 0x3b0   : > { %2080 = vmatpush1.bf16.msra.mxu1 %v7717_v24  ;;  %v7737_v24 = vld [vmem:[#allocation8 + $0x634] ss:$24 sps:$4 sm:$0xff]  }
 0x3b1   : > { %2081 = vmatprep.subr.bf16.mxu1 %v7722_v25  ;;  %v7735_v25 = vld [vmem:[#allocation8 + $0x630] ss:$24 sps:$4 sm:$0xff]  }
 0x3b4   : > { %2082 = vmatpush1.bf16.msra.mxu1 %v7720_v26  ;;  %v7743_v26 = vld [vmem:[#allocation8 + $0x664] ss:$24 sps:$4 sm:$0xff]  }
 0x3b5   : > { %2083 = vmatprep.subr.bf16.mxu1 %v7725_v27  ;;  %v7741_v27 = vld [vmem:[#allocation8 + $0x660] ss:$24 sps:$4 sm:$0xff]  }
 0x3b8   : > { %2084 = vmatpush1.bf16.msra.mxu1 %v7723_v28  ;;  %v7749_v28 = vld [vmem:[#allocation8 + $0x694] ss:$24 sps:$4 sm:$0xff]  }
 0x3b9   : > { %2085 = vmatprep.subr.bf16.mxu1 %v7728_v29  ;;  %v7747_v29 = vld [vmem:[#allocation8 + $0x690] ss:$24 sps:$4 sm:$0xff]  }
 0x3bc   : > { %2086 = vmatpush1.bf16.msra.mxu1 %v7726_v30  ;;  %v7755_v30 = vld [vmem:[#allocation8 + $0x6c4] ss:$24 sps:$4 sm:$0xff]  }
 0x3bd   : > { %2903 = vmatprep.subr.bf16.mxu1 %v7734_v32  ;;  %v7761_v32 = vld [vmem:[#allocation8 + $0x6f4] ss:$24 sps:$4 sm:$0xff]  }
 0x3bf   : > { %2088 = vmatmul.mubr.bf16.vlgmr.msra.gmra.mrb[16].mxu1 %v8867_v61 }
 0x3c0   : > { %2904 = vmatpush1.bf16.msra.mxu1 %v7732_v31  ;;  %v7753_v31 = vld [vmem:[#allocation8 + $0x6c0] ss:$24 sps:$4 sm:$0xff]  }
 0x3c1   : > { %2905 = vmatprep.subr.bf16.mxu1 %v7740_v34  ;;  %v7767_v34 = vld [vmem:[#allocation8 + $0x724] ss:$24 sps:$4 sm:$0xff]  }
 0x3c4   : > { %2906 = vmatpush1.bf16.msra.mxu1 %v7738_v33  ;;  %v7759_v33 = vld [vmem:[#allocation8 + $0x6f0] ss:$24 sps:$4 sm:$0xff]  }
 0x3c5   : > { %2907 = vmatprep.subr.bf16.mxu1 %v7746_v36  ;;  %v7773_v36 = vld [vmem:[#allocation8 + $0x754] ss:$24 sps:$4 sm:$0xff]  }
 0x3c8   : > { %2908 = vmatpush1.bf16.msra.mxu1 %v7744_v35  ;;  %v7765_v35 = vld [vmem:[#allocation8 + $0x720] ss:$24 sps:$4 sm:$0xff]  }
 0x3c9   : > { %2909 = vmatprep.subr.bf16.mxu1 %v7752_v38  ;;  %v7779_v38 = vld [vmem:[#allocation8 + $0x784] ss:$24 sps:$4 sm:$0xff]  }
 0x3cc   : > { %2910 = vmatpush1.bf16.msra.mxu1 %v7750_v37  ;;  %v7771_v37 = vld [vmem:[#allocation8 + $0x750] ss:$24 sps:$4 sm:$0xff]  }
 0x3cd   : > { %2911 = vmatprep.subr.bf16.mxu1 %v7758_v40  ;;  %v7785_v40 = vld [vmem:[#allocation8 + $0x7b4] ss:$24 sps:$4 sm:$0xff]  }
 0x3d0   : > { %2912 = vmatpush1.bf16.msra.mxu1 %v7756_v39  ;;  %v7777_v39 = vld [vmem:[#allocation8 + $0x780] ss:$24 sps:$4 sm:$0xff]  }
 0x3d1   : > { %2913 = vmatprep.subr.bf16.mxu1 %v7764_v42  ;;  %v7791_v42 = vld [vmem:[#allocation8 + $0x7e4] ss:$24 sps:$4 sm:$0xff]  }
 0x3d4   : > { %2914 = vmatpush1.bf16.msra.mxu1 %v7762_v41  ;;  %v7783_v41 = vld [vmem:[#allocation8 + $0x7b0] ss:$24 sps:$4 sm:$0xff]  }
 0x3d5   : > { %2915 = vmatprep.subr.bf16.mxu1 %v7770_v44  ;;  %v7797_v44 = vld [vmem:[#allocation8 + $0x814] ss:$24 sps:$4 sm:$0xff]  }
 0x3d8   : > { %2916 = vmatpush1.bf16.msra.mxu1 %v7768_v43  ;;  %v7789_v43 = vld [vmem:[#allocation8 + $0x7e0] ss:$24 sps:$4 sm:$0xff]  }
 0x3d9   : > { %2917 = vmatprep.subr.bf16.mxu1 %v7776_v46  ;;  %v7803_v46 = vld [vmem:[#allocation8 + $0x844] ss:$24 sps:$4 sm:$0xff]  }
 0x3dc   : > { %2918 = vmatpush1.bf16.msra.mxu1 %v7774_v45  ;;  %v7795_v45 = vld [vmem:[#allocation8 + $0x810] ss:$24 sps:$4 sm:$0xff]  }
 0x3dd   : > { %2919 = vmatprep.subr.bf16.mxu1 %v7782_v48  ;;  %v7809_v48 = vld [vmem:[#allocation8 + $0x874] ss:$24 sps:$4 sm:$0xff]  }
 0x3e0   : > { %2920 = vmatpush1.bf16.msra.mxu1 %v7780_v47  ;;  %v7801_v47 = vld [vmem:[#allocation8 + $0x840] ss:$24 sps:$4 sm:$0xff]  }
 0x3e1   : > { %2921 = vmatprep.subr.bf16.mxu1 %v7788_v50  ;;  %v7815_v50 = vld [vmem:[#allocation8 + $0x8a4] ss:$24 sps:$4 sm:$0xff]  }
 0x3e4   : > { %2922 = vmatpush1.bf16.msra.mxu1 %v7786_v49  ;;  %v7807_v49 = vld [vmem:[#allocation8 + $0x870] ss:$24 sps:$4 sm:$0xff]  }
 0x3e5   : > { %2923 = vmatprep.subr.bf16.mxu1 %v7794_v52  ;;  %v7818_v52 = vld [vmem:[#allocation8 + $0x8ac] ss:$24 sps:$4 sm:$0xff]  }
 0x3e8   : > { %2924 = vmatpush1.bf16.msra.mxu1 %v7792_v51  ;;  %v7813_v51 = vld [vmem:[#allocation8 + $0x8a0] ss:$24 sps:$4 sm:$0xff]  }
 0x3e9   : > { %2925 = vmatprep.subr.bf16.mxu1 %v7800_v54  ;;  %v7821_v54 = vld [vmem:[#allocation8 + $0x8d4] ss:$24 sps:$4 sm:$0xff]  }
 0x3ec   : > { %2926 = vmatpush1.bf16.msra.mxu1 %v7798_v53  ;;  %v7816_v53 = vld [vmem:[#allocation8 + $0x8a8] ss:$24 sps:$4 sm:$0xff]  }
 0x3ed   : > { %2927 = vmatprep.subr.bf16.mxu1 %v7806_v56  ;;  %v7824_v56 = vld [vmem:[#allocation8 + $0x8dc] ss:$24 sps:$4 sm:$0xff]  }
 0x3f0   : > { %2928 = vmatpush1.bf16.msra.mxu1 %v7804_v55  ;;  %v7819_v55 = vld [vmem:[#allocation8 + $0x8d0] ss:$24 sps:$4 sm:$0xff]  }
 0x3f1   : > { %2929 = vmatprep.subr.bf16.mxu1 %v7812_v58  ;;  %v7827_v58 = vld [vmem:[#allocation8 + $0x614] ss:$24 sps:$4 sm:$0xff]  }
 0x3f4   : > { %2930 = vmatpush1.bf16.msra.mxu1 %v7810_v57  ;;  %v7822_v57 = vld [vmem:[#allocation8 + $0x8d8] ss:$24 sps:$4 sm:$0xff]  }
 0x3f5   : > { %2931 = vmatprep.subr.bf16.mxu1 %v7818_v52  ;;  %v7900_v52 = vld [vmem:[#allocation8 + $0x9c8] ss:$24 sps:$4 sm:$0xff]  }
 0x3f8   : > { %2932 = vmatpush1.bf16.msra.mxu1 %v7816_v53  ;;  %v7902_v53 = vld [vmem:[#allocation8 + $0x9cc] ss:$24 sps:$4 sm:$0xff]  }
 0x3f9   : > { %2933 = vmatprep.subr.bf16.mxu1 %v7824_v56  ;;  %v7912_v56 = vld [vmem:[#allocation8 + $0xa28] ss:$24 sps:$4 sm:$0xff]  }
 0x3fc   : > { %2934 = vmatpush1.bf16.msra.mxu1 %v7822_v57  ;;  %v7914_v57 = vld [vmem:[#allocation8 + $0xa2c] ss:$24 sps:$4 sm:$0xff]  }
 0x452   : > { %v2007_v59 = vpop.f32.mrb[12].mxu1  ;;  %v2048_v60 = vpop.f32.mrb[12].mxu0 }
 0x453   : > { %v2096_v61 = vpack.c.bf16 %v2007_v59, %v2007_v59  ;;  %v2009_v62 = vpop.f32.mrb[13].mxu1  ;;  %v2050_v63 = vpop.f32.mrb[13].mxu0  ;;  %v2098_v7 = vpack.c.bf16 %v2048_v60, %v2048_v60  ;;  %v2103_v59 = vld [vmem:[#allocation10 + $0x2] sm:$0x3] }
 0x454   : > { %v2097_v1 = vpack.c.bf16 %v2009_v62, %v2009_v62  ;;  %v2011_v2 = vpop.f32.mrb[14].mxu1  ;;  %v2052_v3 = vpop.f32.mrb[14].mxu0  ;;  %v2099_v8 = vpack.c.bf16 %v2050_v63, %v2050_v63  ;;  %v2160_v60 = vrot.slane %v2103_v59, %v8829_v16 }
 0x455   : > { %v2110_v4 = vsel %vm1219_vm4, %v2096_v61, 0  ;;  %v2012_v5 = vpop.f32.mrb[15].mxu1  ;;  %v2053_v6 = vpop.f32.mrb[15].mxu0  ;;  %v2175_v10 = vsel %vm1219_vm4, %v2098_v7, 0  ;;  %v2164_v61 = vrot.slane %v2103_v59, %v8831_v18  ;;  %v7920_v59 = vld [vmem:[#allocation8 + $0xa5c] ss:$24 sps:$4 sm:$0xff]  }
 0x456   : > { %6709 = vmatprep.subr.msk.bf16.mxu0 %vm1219_vm4, %v2097_v1 }
 0x457   : > { %2116 = vmatpush1.bf16.msra.mxu0 %v2110_v4 }
 0x458   : > { %6712 = vmatprep.subr.msk.bf16.mxu0 %vm1219_vm4, %v2099_v8 }
 0x45a   : > { %6710 = vmatmul.mubr.msk.bf16.vlgmr.msra.gmra.mrb[16].mxu0 %vm1215_vm5, %v6708_v9 }
 0x45b   : > { %2181 = vmatpush1.bf16.msra.mxu0 %v2175_v10  ;;  %2212 = vmatprep.mubr.bf16.mxu0 %v8555_v0  ;;  %v7825_v10 = vld [vmem:[#allocation8 + $0x610] ss:$24 sps:$4 sm:$0xff]  }
 0x466   : > { %6713 = vmatmul.mubr.msk.bf16.vlgmr.msra.gmra.mrb[16].mxu0 %vm1215_vm5, %v6711_v11 }
 0x467   : > { %2266 = vmatprep.mubr.bf16.mxu0 %v8555_v0 }
 0x492   : > { %v2089_v12 = vpop.f32.mrb[16].mxu1 }
 0x493   : > { %v2100_v13 = vpack.c.bf16 %v2089_v12, %v2089_v12  ;;  %v2091_v14 = vpop.f32.mrb[17].mxu1  ;;  %v7830_v12 = vld [vmem:[#allocation8 + $0x644] ss:$24 sps:$4 sm:$0xff]  }
 0x494   : > { %v2101_v15 = vpack.c.bf16 %v2091_v14, %v2091_v14  ;;  %v2093_v17 = vpop.f32.mrb[18].mxu1  ;;  %v7833_v14 = vld [vmem:[#allocation8 + $0x674] ss:$24 sps:$4 sm:$0xff]  }
 0x495   : > { %v2229_v20 = vsel %vm1219_vm4, %v2100_v13, 0  ;;  %v2094_v21 = vpop.f32.mrb[19].mxu1  ;;  %v7828_v13 = vld [vmem:[#allocation8 + $0x640] ss:$24 sps:$4 sm:$0xff]   ;;  %v7836_v17 = vld [vmem:[#allocation8 + $0x6a4] ss:$24 sps:$4 sm:$0xff]  }
 0x496   : > { %6715 = vmatprep.subr.msk.bf16.mxu0 %vm1219_vm4, %v2101_v15  ;;  %v7831_v15 = vld [vmem:[#allocation8 + $0x670] ss:$24 sps:$4 sm:$0xff]  }
 0x497   : > { %2235 = vmatpush1.bf16.msra.mxu0 %v2229_v20  ;;  %v7839_v20 = vld [vmem:[#allocation8 + $0x6d4] ss:$24 sps:$4 sm:$0xff]   ;;  %v7837_v21 = vld [vmem:[#allocation8 + $0x6d0] ss:$24 sps:$4 sm:$0xff]  }
 0x498   : > { %2862 = vmatprep.subr.bf16.mxu0 %v7731_v19  ;;  %v7834_v19 = vld [vmem:[#allocation8 + $0x6a0] ss:$24 sps:$4 sm:$0xff]  }
 0x49a   : > { %6716 = vmatmul.mubr.msk.bf16.vlgmr.msra.gmra.mrb[16].mxu0 %vm1215_vm5, %v6714_v22  ;;  %v7842_v22 = vld [vmem:[#allocation8 + $0x704] ss:$24 sps:$4 sm:$0xff]   ;;  %vm4832_vm5 = vcmask 130048  }
 0x49b   : > { %2863 = vmatpush1.bf16.msra.mxu0 %v7729_v23  ;;  %v7840_v23 = vld [vmem:[#allocation8 + $0x700] ss:$24 sps:$4 sm:$0xff]  }
 0x49c   : > { %2864 = vmatprep.subr.bf16.mxu0 %v7737_v24  ;;  %v7845_v24 = vld [vmem:[#allocation8 + $0x734] ss:$24 sps:$4 sm:$0xff]  }
 0x49f   : > { %2865 = vmatpush1.bf16.msra.mxu0 %v7735_v25  ;;  %v7843_v25 = vld [vmem:[#allocation8 + $0x730] ss:$24 sps:$4 sm:$0xff]  }
 0x4a0   : > { %2866 = vmatprep.subr.bf16.mxu0 %v7743_v26  ;;  %v7848_v26 = vld [vmem:[#allocation8 + $0x764] ss:$24 sps:$4 sm:$0xff]  }
 0x4a3   : > { %2867 = vmatpush1.bf16.msra.mxu0 %v7741_v27  ;;  %v7846_v27 = vld [vmem:[#allocation8 + $0x760] ss:$24 sps:$4 sm:$0xff]  }
 0x4a4   : > { %2868 = vmatprep.subr.bf16.mxu0 %v7749_v28  ;;  %v7851_v28 = vld [vmem:[#allocation8 + $0x794] ss:$24 sps:$4 sm:$0xff]  }
 0x4a7   : > { %2869 = vmatpush1.bf16.msra.mxu0 %v7747_v29  ;;  %v7849_v29 = vld [vmem:[#allocation8 + $0x790] ss:$24 sps:$4 sm:$0xff]  }
 0x4a8   : > { %2870 = vmatprep.subr.bf16.mxu0 %v7755_v30  ;;  %v7854_v30 = vld [vmem:[#allocation8 + $0x7c4] ss:$24 sps:$4 sm:$0xff]  }
 0x4ab   : > { %2871 = vmatpush1.bf16.msra.mxu0 %v7753_v31  ;;  %v7852_v31 = vld [vmem:[#allocation8 + $0x7c0] ss:$24 sps:$4 sm:$0xff]  }
 0x4ac   : > { %2872 = vmatprep.subr.bf16.mxu0 %v7761_v32  ;;  %v7857_v32 = vld [vmem:[#allocation8 + $0x7f4] ss:$24 sps:$4 sm:$0xff]  }
 0x4af   : > { %2873 = vmatpush1.bf16.msra.mxu0 %v7759_v33  ;;  %v7855_v33 = vld [vmem:[#allocation8 + $0x7f0] ss:$24 sps:$4 sm:$0xff]  }
 0x4b0   : > { %2874 = vmatprep.subr.bf16.mxu0 %v7767_v34  ;;  %v7860_v34 = vld [vmem:[#allocation8 + $0x824] ss:$24 sps:$4 sm:$0xff]  }
 0x4b3   : > { %2875 = vmatpush1.bf16.msra.mxu0 %v7765_v35  ;;  %v7858_v35 = vld [vmem:[#allocation8 + $0x820] ss:$24 sps:$4 sm:$0xff]  }
 0x4b4   : > { %2876 = vmatprep.subr.bf16.mxu0 %v7773_v36  ;;  %v7863_v36 = vld [vmem:[#allocation8 + $0x854] ss:$24 sps:$4 sm:$0xff]  }
 0x4b7   : > { %2877 = vmatpush1.bf16.msra.mxu0 %v7771_v37  ;;  %v7861_v37 = vld [vmem:[#allocation8 + $0x850] ss:$24 sps:$4 sm:$0xff]  }
 0x4b8   : > { %2878 = vmatprep.subr.bf16.mxu0 %v7779_v38  ;;  %v7866_v38 = vld [vmem:[#allocation8 + $0x884] ss:$24 sps:$4 sm:$0xff]  }
 0x4bb   : > { %2879 = vmatpush1.bf16.msra.mxu0 %v7777_v39  ;;  %v7864_v39 = vld [vmem:[#allocation8 + $0x880] ss:$24 sps:$4 sm:$0xff]  }
 0x4bc   : > { %2880 = vmatprep.subr.bf16.mxu0 %v7785_v40  ;;  %v7869_v40 = vld [vmem:[#allocation8 + $0x8b4] ss:$24 sps:$4 sm:$0xff]  }
 0x4bf   : > { %2881 = vmatpush1.bf16.msra.mxu0 %v7783_v41  ;;  %v7867_v41 = vld [vmem:[#allocation8 + $0x8b0] ss:$24 sps:$4 sm:$0xff]  }
 0x4c0   : > { %2882 = vmatprep.subr.bf16.mxu0 %v7791_v42  ;;  %v7872_v42 = vld [vmem:[#allocation8 + $0x8e4] ss:$24 sps:$4 sm:$0xff]  }
 0x4c3   : > { %2883 = vmatpush1.bf16.msra.mxu0 %v7789_v43  ;;  %v7870_v43 = vld [vmem:[#allocation8 + $0x8e0] ss:$24 sps:$4 sm:$0xff]  }
 0x4c4   : > { %2884 = vmatprep.subr.bf16.mxu0 %v7797_v44  ;;  %v7876_v44 = vld [vmem:[#allocation8 + $0x908] ss:$24 sps:$4 sm:$0xff]  }
 0x4c7   : > { %2885 = vmatpush1.bf16.msra.mxu0 %v7795_v45  ;;  %v7878_v45 = vld [vmem:[#allocation8 + $0x90c] ss:$24 sps:$4 sm:$0xff]  }
 0x4c8   : > { %2886 = vmatprep.subr.bf16.mxu0 %v7803_v46  ;;  %v7882_v46 = vld [vmem:[#allocation8 + $0x938] ss:$24 sps:$4 sm:$0xff]  }
 0x4cb   : > { %2887 = vmatpush1.bf16.msra.mxu0 %v7801_v47  ;;  %v7884_v47 = vld [vmem:[#allocation8 + $0x93c] ss:$24 sps:$4 sm:$0xff]  }
 0x4cc   : > { %2888 = vmatprep.subr.bf16.mxu0 %v7809_v48  ;;  %v7888_v48 = vld [vmem:[#allocation8 + $0x968] ss:$24 sps:$4 sm:$0xff]  }
 0x4cf   : > { %2889 = vmatpush1.bf16.msra.mxu0 %v7807_v49  ;;  %v7890_v49 = vld [vmem:[#allocation8 + $0x96c] ss:$24 sps:$4 sm:$0xff]  }
 0x4d0   : > { %2890 = vmatprep.subr.bf16.mxu0 %v7815_v50  ;;  %v7894_v50 = vld [vmem:[#allocation8 + $0x998] ss:$24 sps:$4 sm:$0xff]  }
 0x4d3   : > { %2891 = vmatpush1.bf16.msra.mxu0 %v7813_v51  ;;  %v7896_v51 = vld [vmem:[#allocation8 + $0x99c] ss:$24 sps:$4 sm:$0xff]  }
 0x4d4   : > { %2892 = vmatprep.subr.bf16.mxu0 %v7821_v54  ;;  %v7906_v54 = vld [vmem:[#allocation8 + $0x9f8] ss:$24 sps:$4 sm:$0xff]  }
 0x4d7   : > { %2893 = vmatpush1.bf16.msra.mxu0 %v7819_v55  ;;  %v7908_v55 = vld [vmem:[#allocation8 + $0x9fc] ss:$24 sps:$4 sm:$0xff]  }
 0x4d8   : > { %2944 = vmatprep.subr.bf16.mxu0 %v7827_v58  ;;  %v7918_v58 = vld [vmem:[#allocation8 + $0xa58] ss:$24 sps:$4 sm:$0xff]  }
 0x56d   : > { %v2268_v62 = vpop.f32.mrb[16].mxu0 }
 0x56e   : > { %v7220_v63 = vadd.f32 %v2268_v62, %v2160_v60  ;;  %v2270_v1 = vpop.f32.mrb[17].mxu0  ;;  %v7924_v60 = vld [vmem:[#allocation8 + $0xa88] ss:$24 sps:$4 sm:$0xff]   ;;  %v7930_v62 = vld [vmem:[#allocation8 + $0xab8] ss:$24 sps:$4 sm:$0xff]  }
 0x56f   : > { %v7221_v2 = vadd.f32 %v2270_v1, %v2164_v61  ;;  %v2272_v3 = vpop.f32.mrb[18].mxu0  ;;  %v7926_v61 = vld [vmem:[#allocation8 + $0xa8c] ss:$24 sps:$4 sm:$0xff]   ;;  %v7936_v1 = vld [vmem:[#allocation8 + $0xae8] ss:$24 sps:$4 sm:$0xff]  }
 0x570   : > { %vm2277_vm8 = vcmp.ge.f32.partialorder %v7220_v63, 0.0  ;;  %v2279_v4 = vmul.f32 0.01, %v7220_v63  ;;  %v2273_v5 = vpop.f32.mrb[19].mxu0  ;;  %v7942_v3 = vld [vmem:[#allocation8 + $0xb18] ss:$24 sps:$4 sm:$0xff]  }
 0x571   : > { %vm2278_vm9 = vcmp.ge.f32.partialorder %v7221_v2, 0.0  ;;  %v2280_v6 = vmul.f32 0.01, %v7221_v2  ;;  %v7948_v5 = vld [vmem:[#allocation8 + $0xb48] ss:$24 sps:$4 sm:$0xff]  }
 0x572   : > { %v2281_v7 = vsel %vm2277_vm8, %v7220_v63, %v2279_v4  ;;  %v7932_v63 = vld [vmem:[#allocation8 + $0xabc] ss:$24 sps:$4 sm:$0xff]  }
 0x573   : > { %v2282_v8 = vsel %vm2278_vm9, %v7221_v2, %v2280_v6  ;;  %v8895_v11 = vpack.c.bf16 %v2281_v7, %v2281_v7  ;;  %v7938_v2 = vld [vmem:[#allocation8 + $0xaec] ss:$24 sps:$4 sm:$0xff]   ;;  %v7944_v4 = vld [vmem:[#allocation8 + $0xb1c] ss:$24 sps:$4 sm:$0xff]   ;;  %v7954_v7 = vld [vmem:[#allocation8 + $0xb78] ss:$24 sps:$4 sm:$0xff]  }
 0x574   : > { %v2284_v9 = vpack.c.bf16 %v2282_v8, %v2282_v8  ;;  %v7950_v6 = vld [vmem:[#allocation8 + $0xb4c] ss:$24 sps:$4 sm:$0xff]   ;;  %v7956_v8 = vld [vmem:[#allocation8 + $0xb7c] ss:$24 sps:$4 sm:$0xff]  }
 0x576   : > { %2894 = vmatprep.mubr.bf16.mxu0 %v2284_v9  ;;  %2935 = vmatprep.mubr.bf16.mxu1 %v2284_v9 }
 0x577   : > { %2895 = vmatmul.mubr.bf16.vlgmr.msra.gmra.mrb[20].mxu0 %v8895_v11  ;;  %2936 = vmatmul.mubr.bf16.vlgmr.msra.gmra.mrb[20].mxu1 %v8895_v11 }
 0x578   : > { %2945 = vmatpush1.bf16.msra.mxu0 %v7825_v10  ;;  %2976 = vmatprep.mubr.bf16.mxu0 %v2284_v9 }
 0x579   : > { %2946 = vmatprep.subr.bf16.mxu0 %v7830_v12  ;;  %3038 = vmatprep.mubr.bf16.mxu1 %v8555_v0 }
 0x57c   : > { %2947 = vmatpush1.bf16.msra.mxu0 %v7828_v13 }
 0x57d   : > { %2948 = vmatprep.subr.bf16.mxu0 %v7833_v14 }
 0x580   : > { %2949 = vmatpush1.bf16.msra.mxu0 %v7831_v15 }
 0x581   : > { %2950 = vmatprep.subr.bf16.mxu0 %v7836_v17 }
 0x584   : > { %2951 = vmatpush1.bf16.msra.mxu0 %v7834_v19 }
 0x585   : > { %2952 = vmatprep.subr.bf16.mxu0 %v7839_v20 }
 0x588   : > { %2953 = vmatpush1.bf16.msra.mxu0 %v7837_v21 }
 0x589   : > { %2954 = vmatprep.subr.bf16.mxu0 %v7842_v22 }
 0x58c   : > { %2955 = vmatpush1.bf16.msra.mxu0 %v7840_v23 }
 0x58d   : > { %2956 = vmatprep.subr.bf16.mxu0 %v7845_v24  ;;  %v6813_v24 = vld [vmem:[%s9215_s4 + $0xa8] sm:$0xf] }
 0x590   : > { %2957 = vmatpush1.bf16.msra.mxu0 %v7843_v25 }
 0x591   : > { %2958 = vmatprep.subr.bf16.mxu0 %v7848_v26  ;;  %v6816_v26 = vld [vmem:[%s9215_s4 + $0xc4] sm:$0xf] }
 0x594   : > { %2959 = vmatpush1.bf16.msra.mxu0 %v7846_v27 }
 0x595   : > { %2960 = vmatprep.subr.bf16.mxu0 %v7851_v28 }
 0x598   : > { %2961 = vmatpush1.bf16.msra.mxu0 %v7849_v29 }
 0x599   : > { %2962 = vmatprep.subr.bf16.mxu0 %v7854_v30 }
 0x59c   : > { %2963 = vmatpush1.bf16.msra.mxu0 %v7852_v31 }
 0x59d   : > { %2964 = vmatprep.subr.bf16.mxu0 %v7857_v32  ;;  %v7875_v32 = vld [vmem:[#allocation8 + $0x904] ss:$24 sps:$4 sm:$0xff]  }
 0x5a0   : > { %2965 = vmatpush1.bf16.msra.mxu0 %v7855_v33 }
 0x5a1   : > { %2966 = vmatprep.subr.bf16.mxu0 %v7860_v34 }
 0x5a4   : > { %2967 = vmatpush1.bf16.msra.mxu0 %v7858_v35  ;;  %v6819_v35 = vld [vmem:[%s9215_s4 + $0xe0] sm:$0xf] }
 0x5a5   : > { %2968 = vmatprep.subr.bf16.mxu0 %v7863_v36  ;;  %v7873_v36 = vld [vmem:[#allocation8 + $0x900] ss:$24 sps:$4 sm:$0xff]  }
 0x5a8   : > { %2969 = vmatpush1.bf16.msra.mxu0 %v7861_v37  ;;  %v7881_v37 = vld [vmem:[#allocation8 + $0x934] ss:$24 sps:$4 sm:$0xff]  }
 0x5a9   : > { %2970 = vmatprep.subr.bf16.mxu0 %v7866_v38  ;;  %v7879_v38 = vld [vmem:[#allocation8 + $0x930] ss:$24 sps:$4 sm:$0xff]  }
 0x5ac   : > { %2971 = vmatpush1.bf16.msra.mxu0 %v7864_v39  ;;  %v7887_v39 = vld [vmem:[#allocation8 + $0x964] ss:$24 sps:$4 sm:$0xff]  }
 0x5ad   : > { %2972 = vmatprep.subr.bf16.mxu0 %v7869_v40  ;;  %v7885_v40 = vld [vmem:[#allocation8 + $0x960] ss:$24 sps:$4 sm:$0xff]  }
 0x5b0   : > { %2973 = vmatpush1.bf16.msra.mxu0 %v7867_v41  ;;  %v7893_v41 = vld [vmem:[#allocation8 + $0x994] ss:$24 sps:$4 sm:$0xff]  }
 0x5b1   : > { %2974 = vmatprep.subr.bf16.mxu0 %v7872_v42  ;;  %v7891_v42 = vld [vmem:[#allocation8 + $0x990] ss:$24 sps:$4 sm:$0xff]  }
 0x5b4   : > { %2975 = vmatpush1.bf16.msra.mxu0 %v7870_v43  ;;  %v7899_v43 = vld [vmem:[#allocation8 + $0x9c4] ss:$24 sps:$4 sm:$0xff]  }
 0x5b5   : > { %3794 = vmatprep.subr.bf16.mxu0 %v7878_v45  ;;  %v7905_v45 = vld [vmem:[#allocation8 + $0x9f4] ss:$24 sps:$4 sm:$0xff]  }
 0x5b7   : > { %2977 = vmatmul.mubr.bf16.vlgmr.msra.gmra.mrb[24].mxu0 %v8895_v11 }
 0x5b8   : > { %3795 = vmatpush1.bf16.msra.mxu0 %v7876_v44  ;;  %v7897_v44 = vld [vmem:[#allocation8 + $0x9c0] ss:$24 sps:$4 sm:$0xff]  }
 0x5b9   : > { %3796 = vmatprep.subr.bf16.mxu0 %v7884_v47  ;;  %v7911_v47 = vld [vmem:[#allocation8 + $0xa24] ss:$24 sps:$4 sm:$0xff]  }
 0x5bc   : > { %3797 = vmatpush1.bf16.msra.mxu0 %v7882_v46  ;;  %v7903_v46 = vld [vmem:[#allocation8 + $0x9f0] ss:$24 sps:$4 sm:$0xff]  }
 0x5bd   : > { %3798 = vmatprep.subr.bf16.mxu0 %v7890_v49  ;;  %v7917_v49 = vld [vmem:[#allocation8 + $0xa54] ss:$24 sps:$4 sm:$0xff]  }
 0x5c0   : > { %3799 = vmatpush1.bf16.msra.mxu0 %v7888_v48  ;;  %v7909_v48 = vld [vmem:[#allocation8 + $0xa20] ss:$24 sps:$4 sm:$0xff]  }
 0x5c1   : > { %3800 = vmatprep.subr.bf16.mxu0 %v7896_v51  ;;  %v7923_v51 = vld [vmem:[#allocation8 + $0xa84] ss:$24 sps:$4 sm:$0xff]  }
 0x5c4   : > { %3801 = vmatpush1.bf16.msra.mxu0 %v7894_v50  ;;  %v7915_v50 = vld [vmem:[#allocation8 + $0xa50] ss:$24 sps:$4 sm:$0xff]  }
 0x5c5   : > { %3802 = vmatprep.subr.bf16.mxu0 %v7902_v53  ;;  %v7929_v53 = vld [vmem:[#allocation8 + $0xab4] ss:$24 sps:$4 sm:$0xff]  }
 0x5c8   : > { %3803 = vmatpush1.bf16.msra.mxu0 %v7900_v52  ;;  %v7921_v52 = vld [vmem:[#allocation8 + $0xa80] ss:$24 sps:$4 sm:$0xff]  }
 0x5c9   : > { %3804 = vmatprep.subr.bf16.mxu0 %v7908_v55  ;;  %v7935_v55 = vld [vmem:[#allocation8 + $0xae4] ss:$24 sps:$4 sm:$0xff]  }
 0x5cc   : > { %3805 = vmatpush1.bf16.msra.mxu0 %v7906_v54  ;;  %v7927_v54 = vld [vmem:[#allocation8 + $0xab0] ss:$24 sps:$4 sm:$0xff]  }
 0x5cd   : > { %3806 = vmatprep.subr.bf16.mxu0 %v7914_v57  ;;  %v7941_v57 = vld [vmem:[#allocation8 + $0xb14] ss:$24 sps:$4 sm:$0xff]  }
 0x5d0   : > { %3807 = vmatpush1.bf16.msra.mxu0 %v7912_v56  ;;  %v7933_v56 = vld [vmem:[#allocation8 + $0xae0] ss:$24 sps:$4 sm:$0xff]  }
 0x5d1   : > { %3808 = vmatprep.subr.bf16.mxu0 %v7920_v59  ;;  %v7947_v59 = vld [vmem:[#allocation8 + $0xb44] ss:$24 sps:$4 sm:$0xff]  }
 0x5d4   : > { %3809 = vmatpush1.bf16.msra.mxu0 %v7918_v58  ;;  %v7939_v58 = vld [vmem:[#allocation8 + $0xb10] ss:$24 sps:$4 sm:$0xff]  }
 0x5d5   : > { %3810 = vmatprep.subr.bf16.mxu0 %v7926_v61  ;;  %v7953_v61 = vld [vmem:[#allocation8 + $0xb74] ss:$24 sps:$4 sm:$0xff]  }
 0x5d8   : > { %3811 = vmatpush1.bf16.msra.mxu0 %v7924_v60  ;;  %v7945_v60 = vld [vmem:[#allocation8 + $0xb40] ss:$24 sps:$4 sm:$0xff]  }
 0x5d9   : > { %3812 = vmatprep.subr.bf16.mxu0 %v7932_v63  ;;  %v7959_v63 = vld [vmem:[#allocation8 + $0xba4] ss:$24 sps:$4 sm:$0xff]  }
 0x5dc   : > { %3813 = vmatpush1.bf16.msra.mxu0 %v7930_v62  ;;  %v7951_v62 = vld [vmem:[#allocation8 + $0xb70] ss:$24 sps:$4 sm:$0xff]  }
 0x5dd   : > { %3814 = vmatprep.subr.bf16.mxu0 %v7938_v2  ;;  %v7962_v2 = vld [vmem:[#allocation8 + $0xbac] ss:$24 sps:$4 sm:$0xff]  }
 0x5e0   : > { %3815 = vmatpush1.bf16.msra.mxu0 %v7936_v1  ;;  %v7957_v1 = vld [vmem:[#allocation8 + $0xba0] ss:$24 sps:$4 sm:$0xff]  }
 0x5e1   : > { %3816 = vmatprep.subr.bf16.mxu0 %v7944_v4  ;;  %v7965_v4 = vld [vmem:[#allocation8 + $0xbd4] ss:$24 sps:$4 sm:$0xff]  }
 0x5e4   : > { %3817 = vmatpush1.bf16.msra.mxu0 %v7942_v3  ;;  %v7960_v3 = vld [vmem:[#allocation8 + $0xba8] ss:$24 sps:$4 sm:$0xff]  }
 0x5e5   : > { %3818 = vmatprep.subr.bf16.mxu0 %v7950_v6  ;;  %v7968_v6 = vld [vmem:[#allocation8 + $0xbdc] ss:$24 sps:$4 sm:$0xff]  }
 0x5e8   : > { %3819 = vmatpush1.bf16.msra.mxu0 %v7948_v5  ;;  %v7963_v5 = vld [vmem:[#allocation8 + $0xbd0] ss:$24 sps:$4 sm:$0xff]  }
 0x5e9   : > { %3820 = vmatprep.subr.bf16.mxu0 %v7956_v8  ;;  %v7971_v8 = vld [vmem:[#allocation8 + $0x914] ss:$24 sps:$4 sm:$0xff]  }
 0x5ec   : > { %3821 = vmatpush1.bf16.msra.mxu0 %v7954_v7  ;;  %v7966_v7 = vld [vmem:[#allocation8 + $0xbd8] ss:$24 sps:$4 sm:$0xff]  }
 0x5ed   : > { %3822 = vmatprep.subr.bf16.mxu0 %v7962_v2  ;;  %v8047_v2 = vld [vmem:[#allocation8 + $0xcc8] ss:$24 sps:$4 sm:$0xff]  }
 0x5f0   : > { %3823 = vmatpush1.bf16.msra.mxu0 %v7960_v3  ;;  %v8049_v3 = vld [vmem:[#allocation8 + $0xccc] ss:$24 sps:$4 sm:$0xff]  }
 0x5f1   : > { %3824 = vmatprep.subr.bf16.mxu0 %v7968_v6  ;;  %v8059_v6 = vld [vmem:[#allocation8 + $0xd28] ss:$24 sps:$4 sm:$0xff]  }
 0x5f4   : > { %3825 = vmatpush1.bf16.msra.mxu0 %v7966_v7  ;;  %v8061_v7 = vld [vmem:[#allocation8 + $0xd2c] ss:$24 sps:$4 sm:$0xff]  }
 0x64a   : > { %v2896_v9 = vpop.f32.mrb[20].mxu0  ;;  %v2937_v10 = vpop.f32.mrb[20].mxu1 }
 0x64b   : > { %v2985_v11 = vpack.c.bf16 %v2896_v9, %v2896_v9  ;;  %v2898_v12 = vpop.f32.mrb[21].mxu0  ;;  %v2939_v13 = vpop.f32.mrb[21].mxu1  ;;  %v2987_v22 = vpack.c.bf16 %v2937_v10, %v2937_v10  ;;  %v2992_v9 = vld [vmem:[#allocation10 + $0x4] sm:$0x3] }
 0x64c   : > { %v2986_v14 = vpack.c.bf16 %v2898_v12, %v2898_v12  ;;  %v2900_v15 = vpop.f32.mrb[22].mxu0  ;;  %v2941_v17 = vpop.f32.mrb[22].mxu1  ;;  %v2988_v23 = vpack.c.bf16 %v2939_v13, %v2939_v13  ;;  %v3051_v10 = vrot.slane %v2992_v9, %v8829_v16 }
 0x64d   : > { %v3001_v19 = vsel %vm2999_vm10, %v2985_v11, 0  ;;  %v2901_v20 = vpop.f32.mrb[23].mxu0  ;;  %v2942_v21 = vpop.f32.mrb[23].mxu1  ;;  %v3066_v25 = vsel %vm2999_vm10, %v2987_v22, 0  ;;  %v3055_v11 = vrot.slane %v2992_v9, %v8831_v18  ;;  %v8067_v9 = vld [vmem:[#allocation8 + $0xd5c] ss:$24 sps:$4 sm:$0xff]  }
 0x64e   : > { %6814 = vmatprep.subr.msk.bf16.mxu1 %vm2999_vm10, %v2986_v14 }
 0x64f   : > { %3007 = vmatpush1.bf16.msra.mxu1 %v3001_v19 }
 0x650   : > { %6817 = vmatprep.subr.msk.bf16.mxu1 %vm2999_vm10, %v2988_v23 }
 0x652   : > { %6815 = vmatmul.mubr.msk.bf16.vlgmr.msra.gmra.mrb[24].mxu1 %vm2995_vm11, %v6813_v24 }
 0x653   : > { %3072 = vmatpush1.bf16.msra.mxu1 %v3066_v25  ;;  %3103 = vmatprep.mubr.bf16.mxu1 %v8555_v0  ;;  %v7969_v25 = vld [vmem:[#allocation8 + $0x910] ss:$24 sps:$4 sm:$0xff]  }
 0x65e   : > { %6818 = vmatmul.mubr.msk.bf16.vlgmr.msra.gmra.mrb[24].mxu1 %vm2995_vm11, %v6816_v26 }
 0x65f   : > { %3157 = vmatprep.mubr.bf16.mxu1 %v8555_v0 }
 0x68a   : > { %v2978_v27 = vpop.f32.mrb[24].mxu0 }
 0x68b   : > { %v2989_v28 = vpack.c.bf16 %v2978_v27, %v2978_v27  ;;  %v2980_v29 = vpop.f32.mrb[25].mxu0  ;;  %v7974_v27 = vld [vmem:[#allocation8 + $0x944] ss:$24 sps:$4 sm:$0xff]  }
 0x68c   : > { %v2990_v30 = vpack.c.bf16 %v2980_v29, %v2980_v29  ;;  %v2982_v31 = vpop.f32.mrb[26].mxu0  ;;  %v7977_v29 = vld [vmem:[#allocation8 + $0x974] ss:$24 sps:$4 sm:$0xff]  }
 0x68d   : > { %v3120_v33 = vsel %vm2999_vm10, %v2989_v28, 0  ;;  %v2983_v34 = vpop.f32.mrb[27].mxu0  ;;  %v7972_v28 = vld [vmem:[#allocation8 + $0x940] ss:$24 sps:$4 sm:$0xff]   ;;  %v7980_v31 = vld [vmem:[#allocation8 + $0x9a4] ss:$24 sps:$4 sm:$0xff]  }
 0x68e   : > { %6820 = vmatprep.subr.msk.bf16.mxu1 %vm2999_vm10, %v2990_v30  ;;  %v7975_v30 = vld [vmem:[#allocation8 + $0x970] ss:$24 sps:$4 sm:$0xff]  }
 0x68f   : > { %3126 = vmatpush1.bf16.msra.mxu1 %v3120_v33  ;;  %v7983_v33 = vld [vmem:[#allocation8 + $0x9d4] ss:$24 sps:$4 sm:$0xff]   ;;  %v7981_v34 = vld [vmem:[#allocation8 + $0x9d0] ss:$24 sps:$4 sm:$0xff]  }
 0x690   : > { %3753 = vmatprep.subr.bf16.mxu1 %v7875_v32  ;;  %v7978_v32 = vld [vmem:[#allocation8 + $0x9a0] ss:$24 sps:$4 sm:$0xff]  }
 0x692   : > { %6821 = vmatmul.mubr.msk.bf16.vlgmr.msra.gmra.mrb[24].mxu1 %vm2995_vm11, %v6819_v35  ;;  %v7986_v35 = vld [vmem:[#allocation8 + $0xa04] ss:$24 sps:$4 sm:$0xff]  }
 0x693   : > { %3754 = vmatpush1.bf16.msra.mxu1 %v7873_v36  ;;  %v7984_v36 = vld [vmem:[#allocation8 + $0xa00] ss:$24 sps:$4 sm:$0xff]  }
 0x694   : > { %3755 = vmatprep.subr.bf16.mxu1 %v7881_v37  ;;  %v7989_v37 = vld [vmem:[#allocation8 + $0xa34] ss:$24 sps:$4 sm:$0xff]  }
 0x697   : > { %3756 = vmatpush1.bf16.msra.mxu1 %v7879_v38  ;;  %v7987_v38 = vld [vmem:[#allocation8 + $0xa30] ss:$24 sps:$4 sm:$0xff]  }
 0x698   : > { %3757 = vmatprep.subr.bf16.mxu1 %v7887_v39  ;;  %v7992_v39 = vld [vmem:[#allocation8 + $0xa64] ss:$24 sps:$4 sm:$0xff]  }
 0x69b   : > { %3758 = vmatpush1.bf16.msra.mxu1 %v7885_v40  ;;  %v7990_v40 = vld [vmem:[#allocation8 + $0xa60] ss:$24 sps:$4 sm:$0xff]  }
 0x69c   : > { %3759 = vmatprep.subr.bf16.mxu1 %v7893_v41  ;;  %v7995_v41 = vld [vmem:[#allocation8 + $0xa94] ss:$24 sps:$4 sm:$0xff]  }
 0x69f   : > { %3760 = vmatpush1.bf16.msra.mxu1 %v7891_v42  ;;  %v7993_v42 = vld [vmem:[#allocation8 + $0xa90] ss:$24 sps:$4 sm:$0xff]  }
 0x6a0   : > { %3761 = vmatprep.subr.bf16.mxu1 %v7899_v43  ;;  %v7998_v43 = vld [vmem:[#allocation8 + $0xac4] ss:$24 sps:$4 sm:$0xff]  }
 0x6a3   : > { %3762 = vmatpush1.bf16.msra.mxu1 %v7897_v44  ;;  %v7996_v44 = vld [vmem:[#allocation8 + $0xac0] ss:$24 sps:$4 sm:$0xff]  }
 0x6a4   : > { %3763 = vmatprep.subr.bf16.mxu1 %v7905_v45  ;;  %v8001_v45 = vld [vmem:[#allocation8 + $0xaf4] ss:$24 sps:$4 sm:$0xff]  }
 0x6a7   : > { %3764 = vmatpush1.bf16.msra.mxu1 %v7903_v46  ;;  %v7999_v46 = vld [vmem:[#allocation8 + $0xaf0] ss:$24 sps:$4 sm:$0xff]  }
 0x6a8   : > { %3765 = vmatprep.subr.bf16.mxu1 %v7911_v47  ;;  %v8004_v47 = vld [vmem:[#allocation8 + $0xb24] ss:$24 sps:$4 sm:$0xff]  }
 0x6ab   : > { %3766 = vmatpush1.bf16.msra.mxu1 %v7909_v48  ;;  %v8002_v48 = vld [vmem:[#allocation8 + $0xb20] ss:$24 sps:$4 sm:$0xff]  }
 0x6ac   : > { %3767 = vmatprep.subr.bf16.mxu1 %v7917_v49  ;;  %v8007_v49 = vld [vmem:[#allocation8 + $0xb54] ss:$24 sps:$4 sm:$0xff]  }
 0x6af   : > { %3768 = vmatpush1.bf16.msra.mxu1 %v7915_v50  ;;  %v8005_v50 = vld [vmem:[#allocation8 + $0xb50] ss:$24 sps:$4 sm:$0xff]  }
 0x6b0   : > { %3769 = vmatprep.subr.bf16.mxu1 %v7923_v51  ;;  %v8010_v51 = vld [vmem:[#allocation8 + $0xb84] ss:$24 sps:$4 sm:$0xff]  }
 0x6b3   : > { %3770 = vmatpush1.bf16.msra.mxu1 %v7921_v52  ;;  %v8008_v52 = vld [vmem:[#allocation8 + $0xb80] ss:$24 sps:$4 sm:$0xff]  }
 0x6b4   : > { %3771 = vmatprep.subr.bf16.mxu1 %v7929_v53  ;;  %v8013_v53 = vld [vmem:[#allocation8 + $0xbb4] ss:$24 sps:$4 sm:$0xff]  }
 0x6b7   : > { %3772 = vmatpush1.bf16.msra.mxu1 %v7927_v54  ;;  %v8011_v54 = vld [vmem:[#allocation8 + $0xbb0] ss:$24 sps:$4 sm:$0xff]  }
 0x6b8   : > { %3773 = vmatprep.subr.bf16.mxu1 %v7935_v55  ;;  %v8016_v55 = vld [vmem:[#allocation8 + $0xbe4] ss:$24 sps:$4 sm:$0xff]  }
 0x6bb   : > { %3774 = vmatpush1.bf16.msra.mxu1 %v7933_v56  ;;  %v8014_v56 = vld [vmem:[#allocation8 + $0xbe0] ss:$24 sps:$4 sm:$0xff]  }
 0x6bc   : > { %3775 = vmatprep.subr.bf16.mxu1 %v7941_v57  ;;  %v8023_v57 = vld [vmem:[#allocation8 + $0xc08] ss:$24 sps:$4 sm:$0xff]  }
 0x6bf   : > { %3776 = vmatpush1.bf16.msra.mxu1 %v7939_v58  ;;  %v8025_v58 = vld [vmem:[#allocation8 + $0xc0c] ss:$24 sps:$4 sm:$0xff]  }
 0x6c0   : > { %3777 = vmatprep.subr.bf16.mxu1 %v7947_v59  ;;  %v8029_v59 = vld [vmem:[#allocation8 + $0xc38] ss:$24 sps:$4 sm:$0xff]  }
 0x6c3   : > { %3778 = vmatpush1.bf16.msra.mxu1 %v7945_v60  ;;  %v8031_v60 = vld [vmem:[#allocation8 + $0xc3c] ss:$24 sps:$4 sm:$0xff]  }
 0x6c4   : > { %3779 = vmatprep.subr.bf16.mxu1 %v7953_v61  ;;  %v8035_v61 = vld [vmem:[#allocation8 + $0xc68] ss:$24 sps:$4 sm:$0xff]  }
 0x6c7   : > { %3780 = vmatpush1.bf16.msra.mxu1 %v7951_v62  ;;  %v8037_v62 = vld [vmem:[#allocation8 + $0xc6c] ss:$24 sps:$4 sm:$0xff]  }
 0x6c8   : > { %3781 = vmatprep.subr.bf16.mxu1 %v7959_v63  ;;  %v8041_v63 = vld [vmem:[#allocation8 + $0xc98] ss:$24 sps:$4 sm:$0xff]  }
 0x6cb   : > { %3782 = vmatpush1.bf16.msra.mxu1 %v7957_v1  ;;  %v8043_v1 = vld [vmem:[#allocation8 + $0xc9c] ss:$24 sps:$4 sm:$0xff]  }
 0x6cc   : > { %3783 = vmatprep.subr.bf16.mxu1 %v7965_v4  ;;  %v8053_v4 = vld [vmem:[#allocation8 + $0xcf8] ss:$24 sps:$4 sm:$0xff]  }
 0x6cf   : > { %3784 = vmatpush1.bf16.msra.mxu1 %v7963_v5  ;;  %v8055_v5 = vld [vmem:[#allocation8 + $0xcfc] ss:$24 sps:$4 sm:$0xff]  }
 0x6d0   : > { %3835 = vmatprep.subr.bf16.mxu1 %v7971_v8  ;;  %v8065_v8 = vld [vmem:[#allocation8 + $0xd58] ss:$24 sps:$4 sm:$0xff]  }
 0x765   : > { %v3159_v12 = vpop.f32.mrb[24].mxu1 }
 0x766   : > { %v7222_v13 = vadd.f32 %v3159_v12, %v3051_v10  ;;  %v3161_v14 = vpop.f32.mrb[25].mxu1  ;;  %v8071_v10 = vld [vmem:[#allocation8 + $0xd88] ss:$24 sps:$4 sm:$0xff]   ;;  %v8077_v12 = vld [vmem:[#allocation8 + $0xdb8] ss:$24 sps:$4 sm:$0xff]  }
 0x767   : > { %v7223_v15 = vadd.f32 %v3161_v14, %v3055_v11  ;;  %v3163_v17 = vpop.f32.mrb[26].mxu1  ;;  %v8073_v11 = vld [vmem:[#allocation8 + $0xd8c] ss:$24 sps:$4 sm:$0xff]   ;;  %v8083_v14 = vld [vmem:[#allocation8 + $0xde8] ss:$24 sps:$4 sm:$0xff]  }
 0x768   : > { %vm3168_vm12 = vcmp.ge.f32.partialorder %v7222_v13, 0.0  ;;  %v3170_v19 = vmul.f32 0.01, %v7222_v13  ;;  %v3164_v20 = vpop.f32.mrb[27].mxu1  ;;  %v8089_v17 = vld [vmem:[#allocation8 + $0xe18] ss:$24 sps:$4 sm:$0xff]  }
 0x769   : > { %vm3169_vm13 = vcmp.ge.f32.partialorder %v7223_v15, 0.0  ;;  %v3171_v21 = vmul.f32 0.01, %v7223_v15  ;;  %v8095_v20 = vld [vmem:[#allocation8 + $0xe48] ss:$24 sps:$4 sm:$0xff]  }
 0x76a   : > { %v3172_v22 = vsel %vm3168_vm12, %v7222_v13, %v3170_v19  ;;  %v8079_v13 = vld [vmem:[#allocation8 + $0xdbc] ss:$24 sps:$4 sm:$0xff]  }
 0x76b   : > { %v3173_v23 = vsel %vm3169_vm13, %v7223_v15, %v3171_v21  ;;  %v8923_v26 = vpack.c.bf16 %v3172_v22, %v3172_v22  ;;  %v8085_v15 = vld [vmem:[#allocation8 + $0xdec] ss:$24 sps:$4 sm:$0xff]   ;;  %v8091_v19 = vld [vmem:[#allocation8 + $0xe1c] ss:$24 sps:$4 sm:$0xff]  }
 0x76c   : > { %v3175_v24 = vpack.c.bf16 %v3173_v23, %v3173_v23  ;;  %v8097_v21 = vld [vmem:[#allocation8 + $0xe4c] ss:$24 sps:$4 sm:$0xff]  }
 0x76e   : > { %3785 = vmatprep.mubr.bf16.mxu1 %v3175_v24  ;;  %3826 = vmatprep.mubr.bf16.mxu0 %v3175_v24 }
 0x76f   : > { %3786 = vmatmul.mubr.bf16.vlgmr.msra.gmra.mrb[28].mxu1 %v8923_v26  ;;  %3827 = vmatmul.mubr.bf16.vlgmr.msra.gmra.mrb[28].mxu0 %v8923_v26 }
 0x770   : > { %3836 = vmatpush1.bf16.msra.mxu1 %v7969_v25  ;;  %3867 = vmatprep.mubr.bf16.mxu1 %v3175_v24 }
 0x771   : > { %3837 = vmatprep.subr.bf16.mxu1 %v7974_v27  ;;  %3935 = vmatprep.mubr.bf16.mxu0 %v8555_v0 }
 0x774   : > { %3838 = vmatpush1.bf16.msra.mxu1 %v7972_v28 }
 0x775   : > { %3839 = vmatprep.subr.bf16.mxu1 %v7977_v29 }
 0x778   : > { %3840 = vmatpush1.bf16.msra.mxu1 %v7975_v30 }
 0x779   : > { %3841 = vmatprep.subr.bf16.mxu1 %v7980_v31 }
 0x77c   : > { %3842 = vmatpush1.bf16.msra.mxu1 %v7978_v32 }
 0x77d   : > { %3843 = vmatprep.subr.bf16.mxu1 %v7983_v33 }
 0x780   : > { %3844 = vmatpush1.bf16.msra.mxu1 %v7981_v34 }
 0x781   : > { %3845 = vmatprep.subr.bf16.mxu1 %v7986_v35  ;;  %v8017_v35 = vld [vmem:[%s9215_s4 + $0xfc] sm:$0xff]  }
 0x784   : > { %3846 = vmatpush1.bf16.msra.mxu1 %v7984_v36 }
 0x785   : > { %3847 = vmatprep.subr.bf16.mxu1 %v7989_v37  ;;  %v8018_v37 = vld [vmem:[%s9215_s4 + $0x118] sm:$0xff]  }
 0x788   : > { %3848 = vmatpush1.bf16.msra.mxu1 %v7987_v38 }
 0x789   : > { %3849 = vmatprep.subr.bf16.mxu1 %v7992_v39 }
 0x78c   : > { %3850 = vmatpush1.bf16.msra.mxu1 %v7990_v40 }
 0x78d   : > { %3851 = vmatprep.subr.bf16.mxu1 %v7995_v41 }
 0x790   : > { %3852 = vmatpush1.bf16.msra.mxu1 %v7993_v42 }
 0x791   : > { %3853 = vmatprep.subr.bf16.mxu1 %v7998_v43  ;;  %v8022_v43 = vld [vmem:[#allocation8 + $0xc04] ss:$24 sps:$4 sm:$0xff]  }
 0x794   : > { %3854 = vmatpush1.bf16.msra.mxu1 %v7996_v44 }
 0x795   : > { %3855 = vmatprep.subr.bf16.mxu1 %v8001_v45 }
 0x798   : > { %3856 = vmatpush1.bf16.msra.mxu1 %v7999_v46  ;;  %v8019_v46 = vld [vmem:[%s9215_s4 + $0x134] sm:$0xff]  }
 0x799   : > { %3857 = vmatprep.subr.bf16.mxu1 %v8004_v47  ;;  %v8020_v47 = vld [vmem:[#allocation8 + $0xc00] ss:$24 sps:$4 sm:$0xff]  }
 0x79c   : > { %3858 = vmatpush1.bf16.msra.mxu1 %v8002_v48  ;;  %v8028_v48 = vld [vmem:[#allocation8 + $0xc34] ss:$24 sps:$4 sm:$0xff]  }
 0x79d   : > { %3859 = vmatprep.subr.bf16.mxu1 %v8007_v49  ;;  %v8026_v49 = vld [vmem:[#allocation8 + $0xc30] ss:$24 sps:$4 sm:$0xff]  }
 0x7a0   : > { %3860 = vmatpush1.bf16.msra.mxu1 %v8005_v50  ;;  %v8034_v50 = vld [vmem:[#allocation8 + $0xc64] ss:$24 sps:$4 sm:$0xff]  }
 0x7a1   : > { %3861 = vmatprep.subr.bf16.mxu1 %v8010_v51  ;;  %v8032_v51 = vld [vmem:[#allocation8 + $0xc60] ss:$24 sps:$4 sm:$0xff]  }
 0x7a4   : > { %3862 = vmatpush1.bf16.msra.mxu1 %v8008_v52  ;;  %v8040_v52 = vld [vmem:[#allocation8 + $0xc94] ss:$24 sps:$4 sm:$0xff]  }
 0x7a5   : > { %3863 = vmatprep.subr.bf16.mxu1 %v8013_v53  ;;  %v8038_v53 = vld [vmem:[#allocation8 + $0xc90] ss:$24 sps:$4 sm:$0xff]  }
 0x7a8   : > { %3864 = vmatpush1.bf16.msra.mxu1 %v8011_v54  ;;  %v8046_v54 = vld [vmem:[#allocation8 + $0xcc4] ss:$24 sps:$4 sm:$0xff]  }
 0x7a9   : > { %3865 = vmatprep.subr.bf16.mxu1 %v8016_v55  ;;  %v8044_v55 = vld [vmem:[#allocation8 + $0xcc0] ss:$24 sps:$4 sm:$0xff]  }
 0x7ac   : > { %3866 = vmatpush1.bf16.msra.mxu1 %v8014_v56  ;;  %v8052_v56 = vld [vmem:[#allocation8 + $0xcf4] ss:$24 sps:$4 sm:$0xff]  }
 0x7ad   : > { %4723 = vmatprep.subr.bf16.mxu1 %v8025_v58  ;;  %v8058_v58 = vld [vmem:[#allocation8 + $0xd24] ss:$24 sps:$4 sm:$0xff]  }
 0x7af   : > { %3868 = vmatmul.mubr.bf16.vlgmr.msra.gmra.mrb[32].mxu1 %v8923_v26 }
 0x7b0   : > { %4724 = vmatpush1.bf16.msra.mxu1 %v8023_v57  ;;  %v8050_v57 = vld [vmem:[#allocation8 + $0xcf0] ss:$24 sps:$4 sm:$0xff]  }
 0x7b1   : > { %4725 = vmatprep.subr.bf16.mxu1 %v8031_v60  ;;  %v8064_v60 = vld [vmem:[#allocation8 + $0xd54] ss:$24 sps:$4 sm:$0xff]  }
 0x7b4   : > { %4726 = vmatpush1.bf16.msra.mxu1 %v8029_v59  ;;  %v8056_v59 = vld [vmem:[#allocation8 + $0xd20] ss:$24 sps:$4 sm:$0xff]  }
 0x7b5   : > { %4727 = vmatprep.subr.bf16.mxu1 %v8037_v62  ;;  %v8070_v62 = vld [vmem:[#allocation8 + $0xd84] ss:$24 sps:$4 sm:$0xff]  }
 0x7b8   : > { %4728 = vmatpush1.bf16.msra.mxu1 %v8035_v61  ;;  %v8062_v61 = vld [vmem:[#allocation8 + $0xd50] ss:$24 sps:$4 sm:$0xff]  }
 0x7b9   : > { %4729 = vmatprep.subr.bf16.mxu1 %v8043_v1  ;;  %v8076_v1 = vld [vmem:[#allocation8 + $0xdb4] ss:$24 sps:$4 sm:$0xff]  }
 0x7bc   : > { %4730 = vmatpush1.bf16.msra.mxu1 %v8041_v63  ;;  %v8068_v63 = vld [vmem:[#allocation8 + $0xd80] ss:$24 sps:$4 sm:$0xff]  }
 0x7bd   : > { %4731 = vmatprep.subr.bf16.mxu1 %v8049_v3  ;;  %v8082_v3 = vld [vmem:[#allocation8 + $0xde4] ss:$24 sps:$4 sm:$0xff]  }
 0x7c0   : > { %4732 = vmatpush1.bf16.msra.mxu1 %v8047_v2  ;;  %v8074_v2 = vld [vmem:[#allocation8 + $0xdb0] ss:$24 sps:$4 sm:$0xff]  }
 0x7c1   : > { %4733 = vmatprep.subr.bf16.mxu1 %v8055_v5  ;;  %v8088_v5 = vld [vmem:[#allocation8 + $0xe14] ss:$24 sps:$4 sm:$0xff]  }
 0x7c4   : > { %4734 = vmatpush1.bf16.msra.mxu1 %v8053_v4  ;;  %v8080_v4 = vld [vmem:[#allocation8 + $0xde0] ss:$24 sps:$4 sm:$0xff]  }
 0x7c5   : > { %4735 = vmatprep.subr.bf16.mxu1 %v8061_v7  ;;  %v8094_v7 = vld [vmem:[#allocation8 + $0xe44] ss:$24 sps:$4 sm:$0xff]  }
 0x7c8   : > { %4736 = vmatpush1.bf16.msra.mxu1 %v8059_v6  ;;  %v8086_v6 = vld [vmem:[#allocation8 + $0xe10] ss:$24 sps:$4 sm:$0xff]  }
 0x7c9   : > { %4737 = vmatprep.subr.bf16.mxu1 %v8067_v9  ;;  %v8100_v9 = vld [vmem:[#allocation8 + $0xe74] ss:$24 sps:$4 sm:$0xff]  }
 0x7cc   : > { %4738 = vmatpush1.bf16.msra.mxu1 %v8065_v8  ;;  %v8092_v8 = vld [vmem:[#allocation8 + $0xe40] ss:$24 sps:$4 sm:$0xff]  }
 0x7cd   : > { %4739 = vmatprep.subr.bf16.mxu1 %v8073_v11  ;;  %v8103_v11 = vld [vmem:[#allocation8 + $0xe7c] ss:$24 sps:$4 sm:$0xff]  }
 0x7d0   : > { %4740 = vmatpush1.bf16.msra.mxu1 %v8071_v10  ;;  %v8098_v10 = vld [vmem:[#allocation8 + $0xe70] ss:$24 sps:$4 sm:$0xff]  }
 0x7d1   : > { %4741 = vmatprep.subr.bf16.mxu1 %v8079_v13  ;;  %v8106_v13 = vld [vmem:[#allocation8 + $0xea4] ss:$24 sps:$4 sm:$0xff]  }
 0x7d4   : > { %4742 = vmatpush1.bf16.msra.mxu1 %v8077_v12  ;;  %v8101_v12 = vld [vmem:[#allocation8 + $0xe78] ss:$24 sps:$4 sm:$0xff]  }
 0x7d5   : > { %4743 = vmatprep.subr.bf16.mxu1 %v8085_v15  ;;  %v8109_v15 = vld [vmem:[#allocation8 + $0xeac] ss:$24 sps:$4 sm:$0xff]  }
 0x7d8   : > { %4744 = vmatpush1.bf16.msra.mxu1 %v8083_v14  ;;  %v8104_v14 = vld [vmem:[#allocation8 + $0xea0] ss:$24 sps:$4 sm:$0xff]  }
 0x7d9   : > { %4745 = vmatprep.subr.bf16.mxu1 %v8091_v19  ;;  %v8112_v19 = vld [vmem:[#allocation8 + $0xed4] ss:$24 sps:$4 sm:$0xff]  }
 0x7dc   : > { %4746 = vmatpush1.bf16.msra.mxu1 %v8089_v17  ;;  %v8107_v17 = vld [vmem:[#allocation8 + $0xea8] ss:$24 sps:$4 sm:$0xff]  }
 0x7dd   : > { %4747 = vmatprep.subr.bf16.mxu1 %v8097_v21  ;;  %v8115_v21 = vld [vmem:[#allocation8 + $0xedc] ss:$24 sps:$4 sm:$0xff]  }
 0x7e0   : > { %4748 = vmatpush1.bf16.msra.mxu1 %v8095_v20  ;;  %v8110_v20 = vld [vmem:[#allocation8 + $0xed0] ss:$24 sps:$4 sm:$0xff]  }
 0x7e1   : > { %4749 = vmatprep.subr.bf16.mxu1 %v8103_v11  ;;  %v8163_v11 = vld [vmem:[#allocation8 + $0xee4] ss:$24 sps:$4 sm:$0xff]  }
 0x7e4   : > { %4750 = vmatpush1.bf16.msra.mxu1 %v8101_v12  ;;  %v8161_v12 = vld [vmem:[#allocation8 + $0xee0] ss:$24 sps:$4 sm:$0xff]  }
 0x7e5   : > { %4751 = vmatprep.subr.bf16.mxu1 %v8109_v15  ;;  %v8181_v15 = vld [vmem:[#allocation8 + $0xf3c] ss:$24 sps:$4 sm:$0xff]  }
 0x7e8   : > { %4752 = vmatpush1.bf16.msra.mxu1 %v8107_v17  ;;  %v8179_v17 = vld [vmem:[#allocation8 + $0xf38] ss:$24 sps:$4 sm:$0xff]  }
 0x7e9   : > { %4753 = vmatprep.subr.bf16.mxu1 %v8115_v21  ;;  %v8193_v21 = vld [vmem:[#allocation8 + $0xf9c] ss:$24 sps:$4 sm:$0xff]  }
 0x842   : > { %v3787_v22 = vpop.f32.mrb[28].mxu1  ;;  %v3828_v23 = vpop.f32.mrb[28].mxu0 }
 0x843   : > { %v3876_v24 = vpack.c.bf16 %v3787_v22, %v3787_v22  ;;  %v3789_v25 = vpop.f32.mrb[29].mxu1  ;;  %v3830_v26 = vpop.f32.mrb[29].mxu0  ;;  %v3878_v33 = vpack.c.bf16 %v3828_v23, %v3828_v23  ;;  %v8113_v22 = vld [vmem:[#allocation8 + $0xed8] ss:$24 sps:$4 sm:$0xff]   ;;  %v8118_v23 = vld [vmem:[#allocation8 + $0xc14] ss:$24 sps:$4 sm:$0xff]  }
 0x844   : > { %v3877_v27 = vpack.c.bf16 %v3789_v25, %v3789_v25  ;;  %v3791_v28 = vpop.f32.mrb[30].mxu1  ;;  %v3832_v29 = vpop.f32.mrb[30].mxu0  ;;  %v3879_v34 = vpack.c.bf16 %v3830_v26, %v3830_v26  ;;  %4754 = vmatpush1.bf16.msra.mxu1 %v8113_v22  ;;  %v8191_v22 = vld [vmem:[#allocation8 + $0xf98] ss:$24 sps:$4 sm:$0xff]  }
 0x845   : > { %v3898_v30 = vsel %vm3896_vm14, %v3876_v24, 0  ;;  %v3792_v31 = vpop.f32.mrb[31].mxu1  ;;  %v3833_v32 = vpop.f32.mrb[31].mxu0  ;;  %v3973_v36 = vsel %vm3896_vm14, %v3878_v33, 0  ;;  %v3883_v24 = vld [vmem:[#allocation10 + $0x6] sm:$0x3] }
 0x846   : > { %6921 = vmatprep.subr.msk.bf16.mxu0 %vm3896_vm14, %v3877_v27  ;;  %v3950_v25 = vrot.slane %v3883_v24, %v8829_v16  ;;  %v3954_v26 = vrot.slane %v3883_v24, %v8831_v18  ;;  %v8197_v24 = vld [vmem:[#allocation8 + $0xfc8] ss:$24 sps:$4 sm:$0xff]  }
 0x847   : > { %3904 = vmatpush1.bf16.msra.mxu0 %v3898_v30 }
 0x848   : > { %6926 = vmatprep.subr.msk.bf16.mxu0 %vm3896_vm14, %v3879_v34 }
 0x84a   : > { %6922 = vmatmul.mubr.msk.bf16.vlgmr.msra.gmra.mrb[32].mxu0 %vm3892_vm15, %v8017_v35 }
 0x84b   : > { %3979 = vmatpush1.bf16.msra.mxu0 %v3973_v36  ;;  %4010 = vmatprep.mubr.bf16.mxu0 %v8555_v0 }
 0x856   : > { %6927 = vmatmul.mubr.msk.bf16.vlgmr.msra.gmra.mrb[32].mxu0 %vm3892_vm15, %v8018_v37 }
 0x857   : > { %4074 = vmatprep.mubr.bf16.mxu0 %v8555_v0 }
 0x882   : > { %v3869_v38 = vpop.f32.mrb[32].mxu1 }
 0x883   : > { %v3880_v39 = vpack.c.bf16 %v3869_v38, %v3869_v38  ;;  %v3871_v40 = vpop.f32.mrb[33].mxu1 }
 0x884   : > { %v3881_v41 = vpack.c.bf16 %v3871_v40, %v3871_v40  ;;  %v3873_v42 = vpop.f32.mrb[34].mxu1 }
 0x885   : > { %v4037_v44 = vsel %vm3896_vm14, %v3880_v39, 0  ;;  %v3874_v45 = vpop.f32.mrb[35].mxu1 }
 0x886   : > { %6931 = vmatprep.subr.msk.bf16.mxu0 %vm3896_vm14, %v3881_v41  ;;  %v8116_v45 = vld [vmem:[#allocation8 + $0xc10] ss:$24 sps:$4 sm:$0xff]  }
 0x887   : > { %4043 = vmatpush1.bf16.msra.mxu0 %v4037_v44 }
 0x888   : > { %4680 = vmatprep.subr.bf16.mxu0 %v8022_v43 }
 0x88a   : > { %6932 = vmatmul.mubr.msk.bf16.vlgmr.msra.gmra.mrb[32].mxu0 %vm3892_vm15, %v8019_v46  ;;  %v8121_v46 = vld [vmem:[#allocation8 + $0xc44] ss:$24 sps:$4 sm:$0xff]  }
 0x88b   : > { %4681 = vmatpush1.bf16.msra.mxu0 %v8020_v47  ;;  %v8119_v47 = vld [vmem:[#allocation8 + $0xc40] ss:$24 sps:$4 sm:$0xff]  }
 0x88c   : > { %4682 = vmatprep.subr.bf16.mxu0 %v8028_v48  ;;  %v8124_v48 = vld [vmem:[#allocation8 + $0xc74] ss:$24 sps:$4 sm:$0xff]  }
 0x88f   : > { %4683 = vmatpush1.bf16.msra.mxu0 %v8026_v49  ;;  %v8122_v49 = vld [vmem:[#allocation8 + $0xc70] ss:$24 sps:$4 sm:$0xff]  }
 0x890   : > { %4684 = vmatprep.subr.bf16.mxu0 %v8034_v50  ;;  %v8127_v50 = vld [vmem:[#allocation8 + $0xca4] ss:$24 sps:$4 sm:$0xff]  }
 0x893   : > { %4685 = vmatpush1.bf16.msra.mxu0 %v8032_v51  ;;  %v8125_v51 = vld [vmem:[#allocation8 + $0xca0] ss:$24 sps:$4 sm:$0xff]  }
 0x894   : > { %4686 = vmatprep.subr.bf16.mxu0 %v8040_v52  ;;  %v8130_v52 = vld [vmem:[#allocation8 + $0xcd4] ss:$24 sps:$4 sm:$0xff]  }
 0x897   : > { %4687 = vmatpush1.bf16.msra.mxu0 %v8038_v53  ;;  %v8128_v53 = vld [vmem:[#allocation8 + $0xcd0] ss:$24 sps:$4 sm:$0xff]  }
 0x898   : > { %4688 = vmatprep.subr.bf16.mxu0 %v8046_v54  ;;  %v8133_v54 = vld [vmem:[#allocation8 + $0xd04] ss:$24 sps:$4 sm:$0xff]  }
 0x89b   : > { %4689 = vmatpush1.bf16.msra.mxu0 %v8044_v55  ;;  %v8131_v55 = vld [vmem:[#allocation8 + $0xd00] ss:$24 sps:$4 sm:$0xff]  }
 0x89c   : > { %4690 = vmatprep.subr.bf16.mxu0 %v8052_v56  ;;  %v8136_v56 = vld [vmem:[#allocation8 + $0xd34] ss:$24 sps:$4 sm:$0xff]  }
 0x89f   : > { %4691 = vmatpush1.bf16.msra.mxu0 %v8050_v57  ;;  %v8134_v57 = vld [vmem:[#allocation8 + $0xd30] ss:$24 sps:$4 sm:$0xff]  }
 0x8a0   : > { %4692 = vmatprep.subr.bf16.mxu0 %v8058_v58  ;;  %v8139_v58 = vld [vmem:[#allocation8 + $0xd64] ss:$24 sps:$4 sm:$0xff]  }
 0x8a3   : > { %4693 = vmatpush1.bf16.msra.mxu0 %v8056_v59  ;;  %v8137_v59 = vld [vmem:[#allocation8 + $0xd60] ss:$24 sps:$4 sm:$0xff]  }
 0x8a4   : > { %4694 = vmatprep.subr.bf16.mxu0 %v8064_v60  ;;  %v8142_v60 = vld [vmem:[#allocation8 + $0xd94] ss:$24 sps:$4 sm:$0xff]  }
 0x8a7   : > { %4695 = vmatpush1.bf16.msra.mxu0 %v8062_v61  ;;  %v8140_v61 = vld [vmem:[#allocation8 + $0xd90] ss:$24 sps:$4 sm:$0xff]  }
 0x8a8   : > { %4696 = vmatprep.subr.bf16.mxu0 %v8070_v62  ;;  %v8145_v62 = vld [vmem:[#allocation8 + $0xdc4] ss:$24 sps:$4 sm:$0xff]  }
 0x8ab   : > { %4697 = vmatpush1.bf16.msra.mxu0 %v8068_v63  ;;  %v8143_v63 = vld [vmem:[#allocation8 + $0xdc0] ss:$24 sps:$4 sm:$0xff]  }
 0x8ac   : > { %4698 = vmatprep.subr.bf16.mxu0 %v8076_v1  ;;  %v8148_v1 = vld [vmem:[#allocation8 + $0xdf4] ss:$24 sps:$4 sm:$0xff]  }
 0x8af   : > { %4699 = vmatpush1.bf16.msra.mxu0 %v8074_v2  ;;  %v8146_v2 = vld [vmem:[#allocation8 + $0xdf0] ss:$24 sps:$4 sm:$0xff]  }
 0x8b0   : > { %4700 = vmatprep.subr.bf16.mxu0 %v8082_v3  ;;  %v8151_v3 = vld [vmem:[#allocation8 + $0xe24] ss:$24 sps:$4 sm:$0xff]  }
 0x8b3   : > { %4701 = vmatpush1.bf16.msra.mxu0 %v8080_v4  ;;  %v8149_v4 = vld [vmem:[#allocation8 + $0xe20] ss:$24 sps:$4 sm:$0xff]  }
 0x8b4   : > { %4702 = vmatprep.subr.bf16.mxu0 %v8088_v5  ;;  %v8154_v5 = vld [vmem:[#allocation8 + $0xe54] ss:$24 sps:$4 sm:$0xff]  }
 0x8b7   : > { %4703 = vmatpush1.bf16.msra.mxu0 %v8086_v6  ;;  %v8152_v6 = vld [vmem:[#allocation8 + $0xe50] ss:$24 sps:$4 sm:$0xff]  }
 0x8b8   : > { %4704 = vmatprep.subr.bf16.mxu0 %v8094_v7  ;;  %v8157_v7 = vld [vmem:[#allocation8 + $0xe84] ss:$24 sps:$4 sm:$0xff]  }
 0x8bb   : > { %4705 = vmatpush1.bf16.msra.mxu0 %v8092_v8  ;;  %v8155_v8 = vld [vmem:[#allocation8 + $0xe80] ss:$24 sps:$4 sm:$0xff]  }
 0x8bc   : > { %4706 = vmatprep.subr.bf16.mxu0 %v8100_v9  ;;  %v8160_v9 = vld [vmem:[#allocation8 + $0xeb4] ss:$24 sps:$4 sm:$0xff]  }
 0x8bf   : > { %4707 = vmatpush1.bf16.msra.mxu0 %v8098_v10  ;;  %v8158_v10 = vld [vmem:[#allocation8 + $0xeb0] ss:$24 sps:$4 sm:$0xff]  }
 0x8c0   : > { %4708 = vmatprep.subr.bf16.mxu0 %v8106_v13  ;;  %v8173_v13 = vld [vmem:[#allocation8 + $0xf08] ss:$24 sps:$4 sm:$0xff]  }
 0x8c3   : > { %4709 = vmatpush1.bf16.msra.mxu0 %v8104_v14  ;;  %v8175_v14 = vld [vmem:[#allocation8 + $0xf0c] ss:$24 sps:$4 sm:$0xff]  }
 0x8c4   : > { %4710 = vmatprep.subr.bf16.mxu0 %v8112_v19  ;;  %v8187_v19 = vld [vmem:[#allocation8 + $0xf6c] ss:$24 sps:$4 sm:$0xff]  }
 0x8c7   : > { %4711 = vmatpush1.bf16.msra.mxu0 %v8110_v20  ;;  %v8185_v20 = vld [vmem:[#allocation8 + $0xf68] ss:$24 sps:$4 sm:$0xff]  }
 0x8c8   : > { %4766 = vmatprep.subr.bf16.mxu0 %v8118_v23  ;;  %v8199_v23 = vld [vmem:[#allocation8 + $0xfcc] ss:$24 sps:$4 sm:$0xff]  }
 0x95d   : > { %v4076_v27 = vpop.f32.mrb[32].mxu0 }
 0x95e   : > { %v7224_v28 = vadd.f32 %v4076_v27, %v3950_v25  ;;  %v4078_v29 = vpop.f32.mrb[33].mxu0  ;;  %v8211_v27 = vld [vmem:[#allocation8 + $0x102c] ss:$24 sps:$4 sm:$0xff]  }
 0x95f   : > { %v7225_v30 = vadd.f32 %v4078_v29, %v3954_v26  ;;  %v4080_v31 = vpop.f32.mrb[34].mxu0  ;;  %v8217_v29 = vld [vmem:[#allocation8 + $0x105c] ss:$24 sps:$4 sm:$0xff]  }
 0x960   : > { %v4093_v32 = vmul.f32 0.01, %v7224_v28  ;;  %v7226_v33 = vadd.f32 %v4080_v31, %v3950_v25  ;;  %v4082_v34 = vpop.f32.mrb[35].mxu0  ;;  %vm4089_vm1 = vcmp.ge.f32.partialorder %v7224_v28, 0.0  ;;  %v8205_v25 = vld [vmem:[#allocation8 + $0xffc] ss:$24 sps:$4 sm:$0xff]  }
 0x961   : > { %v4094_v35 = vmul.f32 0.01, %v7225_v30  ;;  %v7227_v36 = vadd.f32 %v4082_v34, %v3954_v26  ;;  %vm4090_vm2 = vcmp.ge.f32.partialorder %v7225_v30, 0.0  ;;  %v8203_v26 = vld [vmem:[#allocation8 + $0xff8] ss:$24 sps:$4 sm:$0xff]  }
 0x962   : > { %vm4091_vm3 = vcmp.ge.f32.partialorder %v7226_v33, 0.0  ;;  %v4095_v37 = vmul.f32 0.01, %v7226_v33  ;;  %v4097_v39 = vsel %vm4089_vm1, %v7224_v28, %v4093_v32  ;;  %v8209_v28 = vld [vmem:[#allocation8 + $0x1028] ss:$24 sps:$4 sm:$0xff]  }
 0x963   : > { %vm4092_vm4 = vcmp.ge.f32.partialorder %v7227_v36, 0.0  ;;  %v4096_v38 = vmul.f32 0.01, %v7227_v36  ;;  %v4098_v42 = vsel %vm4090_vm2, %v7225_v30, %v4094_v35  ;;  %v8215_v30 = vld [vmem:[#allocation8 + $0x1058] ss:$24 sps:$4 sm:$0xff]  }
 0x964   : > { %v4099_v40 = vsel %vm4091_vm3, %v7226_v33, %v4095_v37  ;;  %v8223_v31 = vld [vmem:[#allocation8 + $0x108c] ss:$24 sps:$4 sm:$0xff]   ;;  %v8221_v32 = vld [vmem:[#allocation8 + $0x1088] ss:$24 sps:$4 sm:$0xff]   ;;  %v8229_v33 = vld [vmem:[#allocation8 + $0x10bc] ss:$24 sps:$4 sm:$0xff]  }
 0x965   : > { %v8951_v41 = vpack.c.bf16 %v4099_v40, %v4097_v39  ;;  %v4100_v43 = vsel %vm4092_vm4, %v7227_v36, %v4096_v38  ;;  %v8227_v34 = vld [vmem:[#allocation8 + $0x10b8] ss:$24 sps:$4 sm:$0xff]   ;;  %v8235_v35 = vld [vmem:[#allocation8 + $0x10ec] ss:$24 sps:$4 sm:$0xff]   ;;  %v8233_v36 = vld [vmem:[#allocation8 + $0x10e8] ss:$24 sps:$4 sm:$0xff]  }
 0x966   : > { %v4102_v44 = vpack.c.bf16 %v4100_v43, %v4098_v42  ;;  %v8241_v37 = vld [vmem:[#allocation8 + $0x111c] ss:$24 sps:$4 sm:$0xff]   ;;  %v8239_v38 = vld [vmem:[#allocation8 + $0x1118] ss:$24 sps:$4 sm:$0xff]   ;;  %v8247_v39 = vld [vmem:[#allocation8 + $0x114c] ss:$24 sps:$4 sm:$0xff]  }
 0x968   : > { %4712 = vmatprep.mubr.bf16.mxu0 %v4102_v44  ;;  %4755 = vmatprep.mubr.bf16.mxu1 %v4102_v44 }
 0x969   : > { %4713 = vmatmul.mubr.bf16.vlgmr.msra.gmra.mrb[36].mxu0 %v8951_v41  ;;  %4756 = vmatmul.mubr.bf16.vlgmr.msra.gmra.mrb[36].mxu1 %v8951_v41 }
 0x96a   : > { %4767 = vmatpush1.bf16.msra.mxu0 %v8116_v45  ;;  %4798 = vmatprep.mubr.bf16.mxu0 %v4102_v44 }
 0x96b   : > { %4768 = vmatprep.subr.bf16.mxu0 %v8121_v46  ;;  %4871 = vmatprep.mubr.bf16.mxu1 %v8555_v0  ;;  %v8245_v46 = vld [vmem:[#allocation8 + $0x1148] ss:$24 sps:$4 sm:$0xff]  }
 0x96e   : > { %4769 = vmatpush1.bf16.msra.mxu0 %v8119_v47 }
 0x96f   : > { %4770 = vmatprep.subr.bf16.mxu0 %v8124_v48 }
 0x972   : > { %4771 = vmatpush1.bf16.msra.mxu0 %v8122_v49 }
 0x973   : > { %4772 = vmatprep.subr.bf16.mxu0 %v8127_v50 }
 0x976   : > { %4773 = vmatpush1.bf16.msra.mxu0 %v8125_v51 }
 0x977   : > { %4774 = vmatprep.subr.bf16.mxu0 %v8130_v52 }
 0x97a   : > { %4775 = vmatpush1.bf16.msra.mxu0 %v8128_v53  ;;  %v8164_v53 = vld [vmem:[%s9215_s4 + $0x150] sm:$0xff]  }
 0x97b   : > { %4776 = vmatprep.subr.bf16.mxu0 %v8133_v54  ;;  %v8165_v54 = vld [vmem:[%s9215_s4 + $0x158] sm:$0xff]  }
 0x97e   : > { %4777 = vmatpush1.bf16.msra.mxu0 %v8131_v55  ;;  %v8166_v55 = vld [vmem:[%s9215_s4 + $0x16c] sm:$0xff]  }
 0x97f   : > { %4778 = vmatprep.subr.bf16.mxu0 %v8136_v56  ;;  %v8167_v56 = vld [vmem:[%s9215_s4 + $0x174] sm:$0xff]  }
 0x982   : > { %4779 = vmatpush1.bf16.msra.mxu0 %v8134_v57 }
 0x983   : > { %4780 = vmatprep.subr.bf16.mxu0 %v8139_v58 }
 0x986   : > { %4781 = vmatpush1.bf16.msra.mxu0 %v8137_v59 }
 0x987   : > { %4782 = vmatprep.subr.bf16.mxu0 %v8142_v60 }
 0x98a   : > { %4783 = vmatpush1.bf16.msra.mxu0 %v8140_v61 }
 0x98b   : > { %4784 = vmatprep.subr.bf16.mxu0 %v8145_v62 }
 0x98e   : > { %4785 = vmatpush1.bf16.msra.mxu0 %v8143_v63  ;;  %v8172_v63 = vld [vmem:[#allocation8 + $0xf04] ss:$24 sps:$4 sm:$0xff]  }
 0x98f   : > { %4786 = vmatprep.subr.bf16.mxu0 %v8148_v1  ;;  %v8168_v1 = vld [vmem:[%s9215_s4 + $0x188] sm:$0xff]  }
 0x992   : > { %4787 = vmatpush1.bf16.msra.mxu0 %v8146_v2  ;;  %v8170_v2 = vld [vmem:[#allocation8 + $0xf00] ss:$24 sps:$4 sm:$0xff]  }
 0x993   : > { %4788 = vmatprep.subr.bf16.mxu0 %v8151_v3  ;;  %v8178_v3 = vld [vmem:[#allocation8 + $0xf34] ss:$24 sps:$4 sm:$0xff]  }
 0x996   : > { %4789 = vmatpush1.bf16.msra.mxu0 %v8149_v4  ;;  %v8176_v4 = vld [vmem:[#allocation8 + $0xf30] ss:$24 sps:$4 sm:$0xff]  }
 0x997   : > { %4790 = vmatprep.subr.bf16.mxu0 %v8154_v5  ;;  %v8184_v5 = vld [vmem:[#allocation8 + $0xf64] ss:$24 sps:$4 sm:$0xff]  }
 0x99a   : > { %4791 = vmatpush1.bf16.msra.mxu0 %v8152_v6  ;;  %v8169_v6 = vld [vmem:[%s9215_s4 + $0x190] sm:$0xff]  }
 0x99b   : > { %4792 = vmatprep.subr.bf16.mxu0 %v8157_v7  ;;  %v8182_v7 = vld [vmem:[#allocation8 + $0xf60] ss:$24 sps:$4 sm:$0xff]  }
 0x99e   : > { %4793 = vmatpush1.bf16.msra.mxu0 %v8155_v8  ;;  %v8190_v8 = vld [vmem:[#allocation8 + $0xf94] ss:$24 sps:$4 sm:$0xff]  }
 0x99f   : > { %4794 = vmatprep.subr.bf16.mxu0 %v8160_v9  ;;  %v8188_v9 = vld [vmem:[#allocation8 + $0xf90] ss:$24 sps:$4 sm:$0xff]  }
 0x9a2   : > { %4795 = vmatpush1.bf16.msra.mxu0 %v8158_v10  ;;  %v8196_v10 = vld [vmem:[#allocation8 + $0xfc4] ss:$24 sps:$4 sm:$0xff]  }
 0x9a3   : > { %4796 = vmatprep.subr.bf16.mxu0 %v8163_v11  ;;  %v8194_v11 = vld [vmem:[#allocation8 + $0xfc0] ss:$24 sps:$4 sm:$0xff]  }
 0x9a6   : > { %4797 = vmatpush1.bf16.msra.mxu0 %v8161_v12  ;;  %v8202_v12 = vld [vmem:[#allocation8 + $0xff4] ss:$24 sps:$4 sm:$0xff]  }
 0x9a7   : > { %5733 = vmatprep.subr.bf16.mxu0 %v8175_v14  ;;  %v8208_v14 = vld [vmem:[#allocation8 + $0x1024] ss:$24 sps:$4 sm:$0xff]  }
 0x9a9   : > { %4799 = vmatmul.mubr.bf16.vlgmr.msra.gmra.mrb[40].mxu0 %v8951_v41 }
 0x9aa   : > { %5734 = vmatpush1.bf16.msra.mxu0 %v8173_v13  ;;  %v8200_v13 = vld [vmem:[#allocation8 + $0xff0] ss:$24 sps:$4 sm:$0xff]  }
 0x9ab   : > { %5735 = vmatprep.subr.bf16.mxu0 %v8181_v15  ;;  %v8206_v15 = vld [vmem:[#allocation8 + $0x1020] ss:$24 sps:$4 sm:$0xff]  }
 0x9ae   : > { %5736 = vmatpush1.bf16.msra.mxu0 %v8179_v17  ;;  %v8214_v17 = vld [vmem:[#allocation8 + $0x1054] ss:$24 sps:$4 sm:$0xff]  }
 0x9af   : > { %5737 = vmatprep.subr.bf16.mxu0 %v8187_v19  ;;  %v8212_v19 = vld [vmem:[#allocation8 + $0x1050] ss:$24 sps:$4 sm:$0xff]  }
 0x9b2   : > { %5738 = vmatpush1.bf16.msra.mxu0 %v8185_v20  ;;  %v8220_v20 = vld [vmem:[#allocation8 + $0x1084] ss:$24 sps:$4 sm:$0xff]  }
 0x9b3   : > { %5739 = vmatprep.subr.bf16.mxu0 %v8193_v21  ;;  %v8218_v21 = vld [vmem:[#allocation8 + $0x1080] ss:$24 sps:$4 sm:$0xff]  }
 0x9b6   : > { %5740 = vmatpush1.bf16.msra.mxu0 %v8191_v22  ;;  %v8226_v22 = vld [vmem:[#allocation8 + $0x10b4] ss:$24 sps:$4 sm:$0xff]  }
 0x9b7   : > { %5741 = vmatprep.subr.bf16.mxu0 %v8199_v23  ;;  %v8224_v23 = vld [vmem:[#allocation8 + $0x10b0] ss:$24 sps:$4 sm:$0xff]  }
 0x9ba   : > { %5742 = vmatpush1.bf16.msra.mxu0 %v8197_v24  ;;  %v8232_v24 = vld [vmem:[#allocation8 + $0x10e4] ss:$24 sps:$4 sm:$0xff]  }
 0x9bb   : > { %5743 = vmatprep.subr.bf16.mxu0 %v8205_v25  ;;  %v8230_v25 = vld [vmem:[#allocation8 + $0x10e0] ss:$24 sps:$4 sm:$0xff]  }
 0x9be   : > { %5744 = vmatpush1.bf16.msra.mxu0 %v8203_v26  ;;  %v8238_v26 = vld [vmem:[#allocation8 + $0x1114] ss:$24 sps:$4 sm:$0xff]  }
 0x9bf   : > { %5745 = vmatprep.subr.bf16.mxu0 %v8211_v27  ;;  %v8236_v27 = vld [vmem:[#allocation8 + $0x1110] ss:$24 sps:$4 sm:$0xff]  }
 0x9c2   : > { %5746 = vmatpush1.bf16.msra.mxu0 %v8209_v28  ;;  %v8244_v28 = vld [vmem:[#allocation8 + $0x1144] ss:$24 sps:$4 sm:$0xff]  }
 0x9c3   : > { %5747 = vmatprep.subr.bf16.mxu0 %v8217_v29  ;;  %v8242_v29 = vld [vmem:[#allocation8 + $0x1140] ss:$24 sps:$4 sm:$0xff]  }
 0x9c6   : > { %5748 = vmatpush1.bf16.msra.mxu0 %v8215_v30  ;;  %v8250_v30 = vld [vmem:[#allocation8 + $0x1174] ss:$24 sps:$4 sm:$0xff]  }
 0x9c7   : > { %5749 = vmatprep.subr.bf16.mxu0 %v8223_v31  ;;  %v8248_v31 = vld [vmem:[#allocation8 + $0x1170] ss:$24 sps:$4 sm:$0xff]  }
 0x9ca   : > { %5750 = vmatpush1.bf16.msra.mxu0 %v8221_v32  ;;  %v8253_v32 = vld [vmem:[#allocation8 + $0x117c] ss:$24 sps:$4 sm:$0xff]  }
 0x9cb   : > { %5751 = vmatprep.subr.bf16.mxu0 %v8229_v33  ;;  %v8251_v33 = vld [vmem:[#allocation8 + $0x1178] ss:$24 sps:$4 sm:$0xff]  }
 0x9ce   : > { %5752 = vmatpush1.bf16.msra.mxu0 %v8227_v34  ;;  %v8256_v34 = vld [vmem:[#allocation8 + $0x11a4] ss:$24 sps:$4 sm:$0xff]  }
 0x9cf   : > { %5753 = vmatprep.subr.bf16.mxu0 %v8235_v35  ;;  %v8254_v35 = vld [vmem:[#allocation8 + $0x11a0] ss:$24 sps:$4 sm:$0xff]  }
 0x9d2   : > { %5754 = vmatpush1.bf16.msra.mxu0 %v8233_v36  ;;  %v8259_v36 = vld [vmem:[#allocation8 + $0x11ac] ss:$24 sps:$4 sm:$0xff]  }
 0x9d3   : > { %5755 = vmatprep.subr.bf16.mxu0 %v8241_v37  ;;  %v8257_v37 = vld [vmem:[#allocation8 + $0x11a8] ss:$24 sps:$4 sm:$0xff]  }
 0x9d6   : > { %5756 = vmatpush1.bf16.msra.mxu0 %v8239_v38  ;;  %v8262_v38 = vld [vmem:[#allocation8 + $0x11d4] ss:$24 sps:$4 sm:$0xff]  }
 0x9d7   : > { %5757 = vmatprep.subr.bf16.mxu0 %v8247_v39  ;;  %v8260_v39 = vld [vmem:[#allocation8 + $0x11d0] ss:$24 sps:$4 sm:$0xff]  }
 0x9da   : > { %5758 = vmatpush1.bf16.msra.mxu0 %v8245_v46 }
 0x9db   : > { %5759 = vmatprep.subr.bf16.mxu0 %v8253_v32  ;;  %v8286_v32 = vld [vmem:[#allocation8 + $0x1034] ss:$24 sps:$4 sm:$0xff]  }
 0x9de   : > { %5760 = vmatpush1.bf16.msra.mxu0 %v8251_v33  ;;  %v8284_v33 = vld [vmem:[#allocation8 + $0x1030] ss:$24 sps:$4 sm:$0xff]  }
 0x9df   : > { %5761 = vmatprep.subr.bf16.mxu0 %v8259_v36  ;;  %v8292_v36 = vld [vmem:[#allocation8 + $0x1094] ss:$24 sps:$4 sm:$0xff]  }
 0x9e2   : > { %5762 = vmatpush1.bf16.msra.mxu0 %v8257_v37  ;;  %v8290_v37 = vld [vmem:[#allocation8 + $0x1090] ss:$24 sps:$4 sm:$0xff]  }
 0xa3c   : > { %v4714_v40 = vpop.f32.mrb[36].mxu0  ;;  %v4757_v41 = vpop.f32.mrb[36].mxu1 }
 0xa3d   : > { %v4716_v42 = vpop.f32.mrb[37].mxu0  ;;  %v4759_v43 = vpop.f32.mrb[37].mxu1 }
 0xa3e   : > { %v4718_v44 = vpop.f32.mrb[38].mxu0  ;;  %v4761_v45 = vpop.f32.mrb[38].mxu1 }
 0xa3f   : > { %v4809_v47 = vpack.c.bf16 %v4718_v44, %v4714_v40  ;;  %v4811_v48 = vpack.c.bf16 %v4761_v45, %v4757_v41  ;;  %v4720_v49 = vpop.f32.mrb[39].mxu0  ;;  %v4763_v50 = vpop.f32.mrb[39].mxu1  ;;  %v8265_v40 = vld [vmem:[#allocation8 + $0x11dc] ss:$24 sps:$4 sm:$0xff]   ;;  %v8263_v41 = vld [vmem:[#allocation8 + $0x11d8] ss:$24 sps:$4 sm:$0xff]  }
 0xa40   : > { %v4810_v51 = vpack.c.bf16 %v4720_v49, %v4716_v42  ;;  %v4812_v52 = vpack.c.bf16 %v4763_v50, %v4759_v43  ;;  %5763 = vmatprep.subr.bf16.mxu0 %v8265_v40  ;;  %v8268_v42 = vld [vmem:[#allocation8 + $0xf14] ss:$24 sps:$4 sm:$0xff]   ;;  %v4816_v43 = vld [vmem:[#allocation10 + $0x8] sm:$0x3] }
 0xa41   : > { %5764 = vmatpush1.bf16.msra.mxu0 %v8263_v41  ;;  %v4896_v44 = vrot.slane %v4816_v43, %v8829_v16  ;;  %v4900_v45 = vrot.slane %v4816_v43, %v8831_v18  ;;  %v8298_v40 = vld [vmem:[#allocation8 + $0x10f4] ss:$24 sps:$4 sm:$0xff]   ;;  %v8296_v41 = vld [vmem:[#allocation8 + $0x10f0] ss:$24 sps:$4 sm:$0xff]   ;;  %v8299_v43 = vld [vmem:[#allocation8 + $0x1120] ss:$24 sps:$4 sm:$0xff]  }
 0xa42   : > { %4839 = vmatprep.subr.bf16.mxu1 %v4810_v51 }
 0xa43   : > { %4840 = vmatpush1.bf16.msra.mxu1 %v4809_v47 }
 0xa44   : > { %4932 = vmatprep.subr.bf16.mxu1 %v4812_v52 }
 0xa46   : > { %7035 = vmatmul.mubr.msk.bf16.vlgmr.msra.gmra.mrb[40].mxu1 %vm4832_vm5, %v8164_v53 }
 0xa47   : > { %4933 = vmatpush1.bf16.msra.mxu1 %v4811_v48  ;;  %4881 = vmatprep.mubr.bf16.mxu1 %v8555_v0 }
 0xa4e   : > { %7036 = vmatmul.mubr.msk.bf16.gmra.mrb[44].mxu1 %vm4832_vm5, %v8165_v54 }
 0xa4f   : > { %4964 = vmatprep.mubr.bf16.mxu1 %v8555_v0 }
 0xa56   : > { %7043 = vmatmul.mubr.msk.bf16.vlgmr.msra.gmra.mrb[40].mxu1 %vm4832_vm5, %v8166_v55 }
 0xa57   : > { %4974 = vmatprep.mubr.bf16.mxu1 %v8555_v0 }
 0xa5e   : > { %7044 = vmatmul.mubr.msk.bf16.gmra.mrb[44].mxu1 %vm4832_vm5, %v8167_v56 }
 0xa5f   : > { %5046 = vmatprep.mubr.bf16.mxu1 %v8555_v0 }
 0xa7c   : > { %v4800_v57 = vpop.f32.mrb[40].mxu0 }
 0xa7d   : > { %v4802_v58 = vpop.f32.mrb[41].mxu0 }
 0xa7e   : > { %v4804_v59 = vpop.f32.mrb[42].mxu0 }
 0xa7f   : > { %v4813_v60 = vpack.c.bf16 %v4804_v59, %v4800_v57  ;;  %v4806_v61 = vpop.f32.mrb[43].mxu0 }
 0xa80   : > { %v4814_v62 = vpack.c.bf16 %v4806_v61, %v4802_v58 }
 0xa82   : > { %5014 = vmatprep.subr.bf16.mxu1 %v4814_v62 }
 0xa83   : > { %5015 = vmatpush1.bf16.msra.mxu1 %v4813_v60 }
 0xa84   : > { %5680 = vmatprep.subr.bf16.mxu1 %v8172_v63 }
 0xa86   : > { %7051 = vmatmul.mubr.msk.bf16.vlgmr.msra.gmra.mrb[40].mxu1 %vm4832_vm5, %v8168_v1 }
 0xa87   : > { %5056 = vmatprep.mubr.bf16.mxu1 %v8555_v0  ;;  %5681 = vmatpush1.bf16.msra.mxu1 %v8170_v2 }
 0xa88   : > { %5682 = vmatprep.subr.bf16.mxu1 %v8178_v3 }
 0xa8b   : > { %5683 = vmatpush1.bf16.msra.mxu1 %v8176_v4  ;;  %v8266_v4 = vld [vmem:[#allocation8 + $0xf10] ss:$24 sps:$4 sm:$0xff]  }
 0xa8c   : > { %5684 = vmatprep.subr.bf16.mxu1 %v8184_v5 }
 0xa8e   : > { %7052 = vmatmul.mubr.msk.bf16.gmra.mrb[44].mxu1 %vm4832_vm5, %v8169_v6 }
 0xa8f   : > { %5685 = vmatpush1.bf16.msra.mxu1 %v8182_v7  ;;  %v8271_v7 = vld [vmem:[#allocation8 + $0xf44] ss:$24 sps:$4 sm:$0xff]  }
 0xa90   : > { %5686 = vmatprep.subr.bf16.mxu1 %v8190_v8 }
 0xa93   : > { %5687 = vmatpush1.bf16.msra.mxu1 %v8188_v9 }
 0xa94   : > { %5688 = vmatprep.subr.bf16.mxu1 %v8196_v10 }
 0xa97   : > { %5689 = vmatpush1.bf16.msra.mxu1 %v8194_v11 }
 0xa98   : > { %5690 = vmatprep.subr.bf16.mxu1 %v8202_v12 }
 0xa9b   : > { %5691 = vmatpush1.bf16.msra.mxu1 %v8200_v13 }
 0xa9c   : > { %5692 = vmatprep.subr.bf16.mxu1 %v8208_v14  ;;  %v8269_v14 = vld [vmem:[#allocation8 + $0xf40] ss:$24 sps:$4 sm:$0xff]  }
 0xa9f   : > { %5693 = vmatpush1.bf16.msra.mxu1 %v8206_v15 }
 0xaa0   : > { %5694 = vmatprep.subr.bf16.mxu1 %v8214_v17  ;;  %v8274_v17 = vld [vmem:[#allocation8 + $0xf74] ss:$24 sps:$4 sm:$0xff]  }
 0xaa3   : > { %5695 = vmatpush1.bf16.msra.mxu1 %v8212_v19 }
 0xaa4   : > { %5696 = vmatprep.subr.bf16.mxu1 %v8220_v20 }
 0xaa7   : > { %5697 = vmatpush1.bf16.msra.mxu1 %v8218_v21 }
 0xaa8   : > { %5698 = vmatprep.subr.bf16.mxu1 %v8226_v22 }
 0xaab   : > { %5699 = vmatpush1.bf16.msra.mxu1 %v8224_v23 }
 0xaac   : > { %5700 = vmatprep.subr.bf16.mxu1 %v8232_v24 }
 0xaaf   : > { %5701 = vmatpush1.bf16.msra.mxu1 %v8230_v25  ;;  %v8272_v25 = vld [vmem:[#allocation8 + $0xf70] ss:$24 sps:$4 sm:$0xff]  }
 0xab0   : > { %5702 = vmatprep.subr.bf16.mxu1 %v8238_v26  ;;  %v8277_v26 = vld [vmem:[#allocation8 + $0xfa4] ss:$24 sps:$4 sm:$0xff]  }
 0xab3   : > { %5703 = vmatpush1.bf16.msra.mxu1 %v8236_v27  ;;  %v8275_v27 = vld [vmem:[#allocation8 + $0xfa0] ss:$24 sps:$4 sm:$0xff]  }
 0xab4   : > { %5704 = vmatprep.subr.bf16.mxu1 %v8244_v28  ;;  %v8280_v28 = vld [vmem:[#allocation8 + $0xfd4] ss:$24 sps:$4 sm:$0xff]  }
 0xab7   : > { %5705 = vmatpush1.bf16.msra.mxu1 %v8242_v29  ;;  %v8278_v29 = vld [vmem:[#allocation8 + $0xfd0] ss:$24 sps:$4 sm:$0xff]  }
 0xab8   : > { %5706 = vmatprep.subr.bf16.mxu1 %v8250_v30  ;;  %v8283_v30 = vld [vmem:[#allocation8 + $0x1004] ss:$24 sps:$4 sm:$0xff]  }
 0xabb   : > { %5707 = vmatpush1.bf16.msra.mxu1 %v8248_v31  ;;  %v8281_v31 = vld [vmem:[#allocation8 + $0x1000] ss:$24 sps:$4 sm:$0xff]  }
 0xabc   : > { %5708 = vmatprep.subr.bf16.mxu1 %v8256_v34  ;;  %v8289_v34 = vld [vmem:[#allocation8 + $0x1064] ss:$24 sps:$4 sm:$0xff]  }
 0xabf   : > { %5709 = vmatpush1.bf16.msra.mxu1 %v8254_v35  ;;  %v8287_v35 = vld [vmem:[#allocation8 + $0x1060] ss:$24 sps:$4 sm:$0xff]  }
 0xac0   : > { %5710 = vmatprep.subr.bf16.mxu1 %v8262_v38  ;;  %v8295_v38 = vld [vmem:[#allocation8 + $0x10c4] ss:$24 sps:$4 sm:$0xff]  }
 0xac3   : > { %5711 = vmatpush1.bf16.msra.mxu1 %v8260_v39  ;;  %v8293_v39 = vld [vmem:[#allocation8 + $0x10c0] ss:$24 sps:$4 sm:$0xff]  }
 0xac4   : > { %5786 = vmatprep.subr.bf16.mxu1 %v8268_v42  ;;  %v8301_v42 = vld [vmem:[#allocation8 + $0x1124] ss:$24 sps:$4 sm:$0xff]  }
 0xb59   : > { %v5048_v46 = vpop.f32.mrb[40].mxu1 }
 0xb5a   : > { %v7228_v47 = vadd.f32 %v5048_v46, %v4896_v44  ;;  %v5050_v48 = vpop.f32.mrb[41].mxu1  ;;  %v8307_v46 = vld [vmem:[#allocation8 + $0x1184] ss:$24 sps:$4 sm:$0xff]  }
 0xb5b   : > { %v7229_v49 = vadd.f32 %v5050_v48, %v4900_v45  ;;  %v5052_v50 = vpop.f32.mrb[42].mxu1  ;;  %v8310_v48 = vld [vmem:[#allocation8 + $0x11b4] ss:$24 sps:$4 sm:$0xff]  }
 0xb5c   : > { %v5083_v51 = vmul.f32 0.01, %v7228_v47  ;;  %v7230_v52 = vadd.f32 %v5052_v50, %v4896_v44  ;;  %v5054_v53 = vpop.f32.mrb[43].mxu1  ;;  %vm5075_vm6 = vcmp.ge.f32.partialorder %v7228_v47, 0.0  ;;  %v8313_v50 = vld [vmem:[#allocation8 + $0x11e4] ss:$24 sps:$4 sm:$0xff]  }
 0xb5d   : > { %v5084_v54 = vmul.f32 0.01, %v7229_v49  ;;  %v7231_v55 = vadd.f32 %v5054_v53, %v4900_v45  ;;  %vm5076_vm7 = vcmp.ge.f32.partialorder %v7229_v49, 0.0 }
 0xb5e   : > { %vm5077_vm8 = vcmp.ge.f32.partialorder %v7230_v52, 0.0  ;;  %v5085_v56 = vmul.f32 0.01, %v7230_v52  ;;  %v5091_v58 = vsel %vm5075_vm6, %v7228_v47, %v5083_v51  ;;  %v8305_v47 = vld [vmem:[#allocation8 + $0x1180] ss:$24 sps:$4 sm:$0xff]  }
 0xb5f   : > { %vm5078_vm9 = vcmp.ge.f32.partialorder %v7231_v55, 0.0  ;;  %v5086_v57 = vmul.f32 0.01, %v7231_v55  ;;  %v5092_v62 = vsel %vm5076_vm7, %v7229_v49, %v5084_v54  ;;  %v8308_v49 = vld [vmem:[#allocation8 + $0x11b0] ss:$24 sps:$4 sm:$0xff]  }
 0xb60   : > { %v5093_v59 = vsel %vm5077_vm8, %v7230_v52, %v5085_v56  ;;  %v8311_v51 = vld [vmem:[#allocation8 + $0x11e0] ss:$24 sps:$4 sm:$0xff]  }
 0xb61   : > { %v8988_v60 = vpack.c.bf16 %v5093_v59, %v5091_v58  ;;  %v5058_v61 = vpop.f32.mrb[44].mxu1  ;;  %v5094_v63 = vsel %vm5078_vm9, %v7231_v55, %v5086_v57 }
 0xb62   : > { %v7232_v1 = vadd.f32 %v5058_v61, %v4896_v44  ;;  %v5060_v2 = vpop.f32.mrb[45].mxu1  ;;  %v5100_v3 = vpack.c.bf16 %v5094_v63, %v5092_v62 }
 0xb63   : > { %v7233_v5 = vadd.f32 %v5060_v2, %v4900_v45  ;;  %v5062_v6 = vpop.f32.mrb[46].mxu1 }
 0xb64   : > { %v5087_v8 = vmul.f32 0.01, %v7232_v1  ;;  %v7234_v9 = vadd.f32 %v5062_v6, %v4896_v44  ;;  %v5064_v10 = vpop.f32.mrb[47].mxu1  ;;  %5712 = vmatprep.mubr.bf16.mxu1 %v5100_v3  ;;  %5765 = vmatprep.mubr.bf16.mxu0 %v5100_v3  ;;  %vm5079_vm10 = vcmp.ge.f32.partialorder %v7232_v1, 0.0  ;;  %v8304_v44 = vld [vmem:[#allocation8 + $0x1154] ss:$24 sps:$4 sm:$0xff]  }
 0xb65   : > { %v5088_v11 = vmul.f32 0.01, %v7233_v5  ;;  %v7235_v12 = vadd.f32 %v5064_v10, %v4900_v45  ;;  %5713 = vmatmul.mubr.bf16.vlgmr.msra.gmra.mrb[48].mxu1 %v8988_v60  ;;  %5766 = vmatmul.mubr.bf16.vlgmr.msra.gmra.mrb[44].mxu0 %v8988_v60  ;;  %vm5080_vm11 = vcmp.ge.f32.partialorder %v7233_v5, 0.0  ;;  %v8302_v45 = vld [vmem:[#allocation8 + $0x1150] ss:$24 sps:$4 sm:$0xff]  }
 0xb66   : > { %vm5081_vm12 = vcmp.ge.f32.partialorder %v7234_v9, 0.0  ;;  %v5089_v13 = vmul.f32 0.01, %v7234_v9  ;;  %5787 = vmatpush1.bf16.msra.mxu1 %v8266_v4  ;;  %v5095_v19 = vsel %vm5079_vm10, %v7232_v1, %v5087_v8 }
 0xb67   : > { %vm5082_vm13 = vcmp.ge.f32.partialorder %v7235_v12, 0.0  ;;  %v5090_v15 = vmul.f32 0.01, %v7235_v12  ;;  %5788 = vmatprep.subr.bf16.mxu1 %v8271_v7  ;;  %v5096_v21 = vsel %vm5080_vm11, %v7233_v5, %v5088_v11 }
 0xb68   : > { %v5097_v20 = vsel %vm5081_vm12, %v7234_v9, %v5089_v13  ;;  %v8314_v13 = vld [vmem:[%s9215_s4 + $0x1c0] sm:$0xff]  }
 0xb69   : > { %v5098_v22 = vsel %vm5082_vm13, %v7235_v12, %v5090_v15  ;;  %v8992_v23 = vpack.c.bf16 %v5097_v20, %v5095_v19  ;;  %v8315_v15 = vld [vmem:[%s9215_s4 + $0x1c8] sm:$0xff]   ;;  %v8316_v19 = vld [vmem:[%s9215_s4 + $0x1d0] sm:$0xff]  }
 0xb6a   : > { %5789 = vmatpush1.bf16.msra.mxu1 %v8269_v14  ;;  %v5102_v24 = vpack.c.bf16 %v5098_v22, %v5096_v21  ;;  %v8318_v14 = vld [vmem:[%s9215_s4 + $0x1a4] sm:$0xff]   ;;  %v8322_v20 = vld [vmem:[%s9215_s4 + $0x1b4] sm:$0xff]   ;;  %v8324_v22 = vld [vmem:[%s9215_s4 + $0x1bc] ss:$0 sps:$4 sm:$0xff]  }
 0xb6b   : > { %5790 = vmatprep.subr.bf16.mxu1 %v8274_v17  ;;  %v8320_v17 = vld [vmem:[%s9215_s4 + $0x1ac] sm:$0xff]   ;;  %v8317_v21 = vld [vmem:[%s9215_s4 + $0x1d8] ss:$0 sps:$4 sm:$0xff]  }
 0xb6c   : > { %5722 = vmatprep.mubr.bf16.mxu1 %v5102_v24  ;;  %5775 = vmatprep.mubr.bf16.mxu0 %v5102_v24 }
 0xb6d   : > { %5723 = vmatmul.mubr.bf16.gmra.mrb[52].mxu1 %v8992_v23  ;;  %5776 = vmatmul.mubr.bf16.gmra.mrb[48].mxu0 %v8992_v23 }
 0xb6e   : > { %5791 = vmatpush1.bf16.msra.mxu1 %v8272_v25  ;;  %5818 = vmatprep.mubr.bf16.mxu1 %v5100_v3 }
 0xb6f   : > { %5792 = vmatprep.subr.bf16.mxu1 %v8277_v26  ;;  %6057 = vmatprep.mubr.bf16.mxu0 %v8555_v0 }
 0xb72   : > { %5793 = vmatpush1.bf16.msra.mxu1 %v8275_v27 }
 0xb73   : > { %5794 = vmatprep.subr.bf16.mxu1 %v8280_v28 }
 0xb76   : > { %5795 = vmatpush1.bf16.msra.mxu1 %v8278_v29 }
 0xb77   : > { %5796 = vmatprep.subr.bf16.mxu1 %v8283_v30 }
 0xb7a   : > { %5797 = vmatpush1.bf16.msra.mxu1 %v8281_v31 }
 0xb7b   : > { %5798 = vmatprep.subr.bf16.mxu1 %v8286_v32 }
 0xb7e   : > { %5799 = vmatpush1.bf16.msra.mxu1 %v8284_v33 }
 0xb7f   : > { %5800 = vmatprep.subr.bf16.mxu1 %v8289_v34 }
 0xb82   : > { %5801 = vmatpush1.bf16.msra.mxu1 %v8287_v35  ;;  %v8319_v35 = vld [vmem:[%s9215_s4 + $0x1dc] sm:$0xff]  }
 0xb83   : > { %5802 = vmatprep.subr.bf16.mxu1 %v8292_v36  ;;  %v8321_v36 = vld [vmem:[%s9215_s4 + $0x1e4] sm:$0xff]  }
 0xb86   : > { %5803 = vmatpush1.bf16.msra.mxu1 %v8290_v37  ;;  %v8323_v37 = vld [vmem:[%s9215_s4 + $0x1ec] sm:$0xff]  }
 0xb87   : > { %5804 = vmatprep.subr.bf16.mxu1 %v8295_v38  ;;  %v8325_v38 = vld [vmem:[%s9215_s4 + $0x1f4] ss:$0 sps:$4 sm:$0xff]  }
 0xb8a   : > { %5805 = vmatpush1.bf16.msra.mxu1 %v8293_v39 }
 0xb8b   : > { %5806 = vmatprep.subr.bf16.mxu1 %v8298_v40 }
 0xb8e   : > { %5807 = vmatpush1.bf16.msra.mxu1 %v8296_v41 }
 0xb8f   : > { %5808 = vmatprep.subr.bf16.mxu1 %v8301_v42 }
 0xb92   : > { %5809 = vmatpush1.bf16.msra.mxu1 %v8299_v43 }
 0xb93   : > { %5810 = vmatprep.subr.bf16.mxu1 %v8304_v44 }
 0xb96   : > { %5811 = vmatpush1.bf16.msra.mxu1 %v8302_v45 }
 0xb97   : > { %5812 = vmatprep.subr.bf16.mxu1 %v8307_v46 }
 0xb9a   : > { %5813 = vmatpush1.bf16.msra.mxu1 %v8305_v47 }
 0xb9b   : > { %5814 = vmatprep.subr.bf16.mxu1 %v8310_v48 }
 0xb9e   : > { %5815 = vmatpush1.bf16.msra.mxu1 %v8308_v49 }
 0xb9f   : > { %5816 = vmatprep.subr.bf16.mxu1 %v8313_v50 }
 0xba2   : > { %5817 = vmatpush1.bf16.msra.mxu1 %v8311_v51 }
 0xba5   : > { %5819 = vmatmul.mubr.bf16.vlgmr.msra.gmra.mrb[56].mxu1 %v8988_v60 }
 0xba6   : > { %5828 = vmatprep.mubr.bf16.mxu1 %v5102_v24 }
 0xbad   : > { %5829 = vmatmul.mubr.bf16.gmra.mrb[60].mxu1 %v8992_v23 }
 0xbae   : > { %5923 = vmatprep.mubr.bf16.mxu1 %v8555_v0 }
 0xc38   : > { %v5714_v52 = vpop.f32.mrb[48].mxu1  ;;  %v5767_v53 = vpop.f32.mrb[44].mxu0 }
 0xc39   : > { %v5716_v54 = vpop.f32.mrb[49].mxu1  ;;  %v5769_v55 = vpop.f32.mrb[45].mxu0 }
 0xc3a   : > { %v5718_v56 = vpop.f32.mrb[50].mxu1  ;;  %v5771_v57 = vpop.f32.mrb[46].mxu0 }
 0xc3b   : > { %v5839_v58 = vpack.c.bf16 %v5718_v56, %v5714_v52  ;;  %v5841_v59 = vpack.c.bf16 %v5771_v57, %v5767_v53  ;;  %v5720_v61 = vpop.f32.mrb[51].mxu1  ;;  %v5773_v62 = vpop.f32.mrb[47].mxu0 }
 0xc3c   : > { %v5840_v63 = vpack.c.bf16 %v5720_v61, %v5716_v54  ;;  %v5842_v1 = vpack.c.bf16 %v5773_v62, %v5769_v55  ;;  %v5852_v54 = vld [vmem:[#allocation10 + $0xa] sm:$0x3] }
 0xc3d   : > { %v5966_v55 = vrot.slane %v5852_v54, %v8829_v16  ;;  %v5970_v56 = vrot.slane %v5852_v54, %v8831_v18 }
 0xc3e   : > { %5891 = vmatprep.subr.bf16.mxu1 %v5840_v63  ;;  %6025 = vmatprep.subr.bf16.mxu0 %v5842_v1 }
 0xc3f   : > { %5892 = vmatpush1.bf16.msra.mxu1 %v5839_v58  ;;  %6026 = vmatpush1.bf16.msra.mxu0 %v5841_v59 }
 0xc40   : > { %v5724_v60 = vpop.f32.mrb[52].mxu1  ;;  %v5777_v2 = vpop.f32.mrb[48].mxu0 }
 0xc41   : > { %v5726_v3 = vpop.f32.mrb[53].mxu1  ;;  %v5779_v4 = vpop.f32.mrb[49].mxu0 }
 0xc42   : > { %v5728_v5 = vpop.f32.mrb[54].mxu1  ;;  %v5781_v6 = vpop.f32.mrb[50].mxu0 }
 0xc43   : > { %v5845_v7 = vpack.c.bf16 %v5728_v5, %v5724_v60  ;;  %v5847_v8 = vpack.c.bf16 %v5781_v6, %v5777_v2  ;;  %v5730_v9 = vpop.f32.mrb[55].mxu1  ;;  %v5783_v10 = vpop.f32.mrb[51].mxu0 }
 0xc44   : > { %v5846_v11 = vpack.c.bf16 %v5730_v9, %v5726_v3  ;;  %v5848_v12 = vpack.c.bf16 %v5783_v10, %v5779_v4 }
 0xc46   : > { %5893 = vmatprep.subr.bf16.mxu1 %v5846_v11  ;;  %6027 = vmatprep.subr.bf16.mxu0 %v5848_v12 }
 0xc47   : > { %5894 = vmatpush1.bf16.msra.mxu1 %v5845_v7  ;;  %6028 = vmatpush1.bf16.msra.mxu0 %v5847_v8 }
 0xc4a   : > { %7175 = vmatmul.mubr.msk.bf16.vlgmr.msra.gmra.mrb[52].mxu0 %vm393_vm0, %v8314_v13  ;;  %7160 = vmatmul.mubr.msk.bf16.vlgmr.msra.gmra.mrb[64].mxu1 %vm393_vm0, %v8318_v14 }
 0xc4b   : > { %6067 = vmatprep.mubr.bf16.mxu0 %v8555_v0  ;;  %5933 = vmatprep.mubr.bf16.mxu1 %v8555_v0 }
 0xc52   : > { %7176 = vmatmul.mubr.msk.bf16.gmra.mrb[56].mxu0 %vm393_vm0, %v8315_v15  ;;  %7161 = vmatmul.mubr.msk.bf16.gmra.mrb[68].mxu1 %vm393_vm0, %v8320_v17 }
 0xc53   : > { %6077 = vmatprep.mubr.bf16.mxu0 %v8555_v0  ;;  %5943 = vmatprep.mubr.bf16.mxu1 %v8555_v0 }
 0xc5a   : > { %7177 = vmatmul.mubr.msk.bf16.gmra.mrb[60].mxu0 %vm393_vm0, %v8316_v19  ;;  %7162 = vmatmul.mubr.msk.bf16.gmra.mrb[72].mxu1 %vm393_vm0, %v8322_v20 }
 0xc5b   : > { %6087 = vmatprep.mubr.bf16.mxu0 %v8555_v0  ;;  %5953 = vmatprep.mubr.bf16.mxu1 %v8555_v0 }
 0xc62   : > { %7178 = vmatmul.mubr.msk.bf16.gmra.mrb[64].mxu0 %vm393_vm0, %v8317_v21  ;;  %7163 = vmatmul.mubr.msk.bf16.gmra.mrb[76].mxu1 %vm393_vm0, %v8324_v22 }
 0xc63   : > { %6180 = vmatprep.mubr.bf16.mxu0 %v8555_v0 }
 0xc78   : > { %v5820_v23 = vpop.f32.mrb[56].mxu1 }
 0xc79   : > { %v5822_v24 = vpop.f32.mrb[57].mxu1 }
 0xc7a   : > { %v5824_v25 = vpop.f32.mrb[58].mxu1 }
 0xc7b   : > { %v5843_v26 = vpack.c.bf16 %v5824_v25, %v5820_v23  ;;  %v5826_v27 = vpop.f32.mrb[59].mxu1 }
 0xc7c   : > { %v5844_v28 = vpack.c.bf16 %v5826_v27, %v5822_v24 }
 0xc7e   : > { %6148 = vmatprep.subr.bf16.mxu0 %v5844_v28 }
 0xc7f   : > { %6149 = vmatpush1.bf16.msra.mxu0 %v5843_v26 }
 0xc80   : > { %v5830_v29 = vpop.f32.mrb[60].mxu1 }
 0xc81   : > { %v5832_v30 = vpop.f32.mrb[61].mxu1 }
 0xc82   : > { %v5834_v31 = vpop.f32.mrb[62].mxu1 }
 0xc83   : > { %v5849_v32 = vpack.c.bf16 %v5834_v31, %v5830_v29  ;;  %v5836_v33 = vpop.f32.mrb[63].mxu1 }
 0xc84   : > { %v5850_v34 = vpack.c.bf16 %v5836_v33, %v5832_v30 }
 0xc86   : > { %6150 = vmatprep.subr.bf16.mxu0 %v5850_v34 }
 0xc87   : > { %6151 = vmatpush1.bf16.msra.mxu0 %v5849_v32 }
 0xc8a   : > { %7190 = vmatmul.mubr.msk.bf16.vlgmr.msra.gmra.mrb[52].mxu0 %vm393_vm0, %v8319_v35 }
 0xc8b   : > { %6190 = vmatprep.mubr.bf16.mxu0 %v8555_v0 }
 0xc92   : > { %7191 = vmatmul.mubr.msk.bf16.gmra.mrb[56].mxu0 %vm393_vm0, %v8321_v36 }
 0xc93   : > { %6200 = vmatprep.mubr.bf16.mxu0 %v8555_v0 }
 0xc9a   : > { %7192 = vmatmul.mubr.msk.bf16.gmra.mrb[60].mxu0 %vm393_vm0, %v8323_v37 }
 0xc9b   : > { %6210 = vmatprep.mubr.bf16.mxu0 %v8555_v0 }
 0xca2   : > { %7193 = vmatmul.mubr.msk.bf16.gmra.mrb[64].mxu0 %vm393_vm0, %v8325_v38  ;;  %vm6233_vm0 = vcmask 457728  }
 0xd1d   : > { %v5925_v39 = vpop.f32.mrb[64].mxu1 }
 0xd1e   : > { %v5927_v40 = vpop.f32.mrb[65].mxu1  ;;  %v5973_v57 = vadd.f32 %v5966_v55, %v5925_v39 }
 0xd1f   : > { %v5929_v41 = vpop.f32.mrb[66].mxu1  ;;  %v5974_v58 = vadd.f32 %v5970_v56, %v5927_v40 }
 0xd20   : > { %v5931_v42 = vpop.f32.mrb[67].mxu1  ;;  %v5975_v61 = vadd.f32 %v5966_v55, %v5929_v41 }
 0xd21   : > { %v5976_v1 = vadd.f32 %v5970_v56, %v5931_v42 }
 0xd25   : > { %v5935_v43 = vpop.f32.mrb[68].mxu1 }
 0xd26   : > { %v5937_v44 = vpop.f32.mrb[69].mxu1  ;;  %v5977_v4 = vadd.f32 %v5966_v55, %v5935_v43 }
 0xd27   : > { %v5939_v45 = vpop.f32.mrb[70].mxu1  ;;  %v5978_v5 = vadd.f32 %v5970_v56, %v5937_v44 }
 0xd28   : > { %v5941_v46 = vpop.f32.mrb[71].mxu1  ;;  %v5979_v6 = vadd.f32 %v5966_v55, %v5939_v45 }
 0xd29   : > { %v5980_v8 = vadd.f32 %v5970_v56, %v5941_v46 }
 0xd2d   : > { %v5945_v47 = vpop.f32.mrb[72].mxu1 }
 0xd2e   : > { %v5947_v48 = vpop.f32.mrb[73].mxu1  ;;  %v5981_v17 = vadd.f32 %v5966_v55, %v5945_v47 }
 0xd2f   : > { %v5949_v49 = vpop.f32.mrb[74].mxu1  ;;  %v5982_v19 = vadd.f32 %v5970_v56, %v5947_v48 }
 0xd30   : > { %v5951_v50 = vpop.f32.mrb[75].mxu1  ;;  %v5983_v20 = vadd.f32 %v5966_v55, %v5949_v49 }
 0xd31   : > { %v5984_v22 = vadd.f32 %v5970_v56, %v5951_v50 }
 0xd35   : > { %v9058_v0 = vpop.f32.mrb[76].mxu1 }
 0xd36   : > { %v9060_v51 = vpop.f32.mrb[77].mxu1  ;;  %v5985_v30 = vadd.f32 %v5966_v55, %v9058_v0 }
 0xd37   : > { %v5959_v52 = vpop.f32.mrb[78].mxu1  ;;  %v5986_v31 = vadd.f32 %v5970_v56, %v9060_v51 }
 0xd38   : > { %v5960_v53 = vpop.f32.mrb[79].mxu1 }
 0xd5d   : > { %v6182_v59 = vpop.f32.mrb[52].mxu0 }
 0xd5e   : > { %v7237_v62 = vadd.f32 %v6182_v59, %v5973_v57  ;;  %v6184_v63 = vpop.f32.mrb[53].mxu0 }
 0xd5f   : > { %v7239_v60 = vadd.f32 %v6184_v63, %v5974_v58  ;;  %v6186_v2 = vpop.f32.mrb[54].mxu0 }
 0xd60   : > { %6234 = vst.msk [vmem:[%s9065_s13] sm:$0xff] %vm6233_vm0, %v7237_v62  ;;  %v7241_v16 = vadd.f32 %v6186_v2, %v5975_v61  ;;  %6284 = vrot.lane.b32.xlu0 %v7237_v62, %s8556_s7  ;;  %v6188_v18 = vpop.f32.mrb[55].mxu0 }
 0xd61   : > { %v7243_v3 = vadd.f32 %v6188_v18, %v5976_v1  ;;  %6334 = vrot.lane.b32.xlu1 %v7239_v60, %s8557_s8 }
 0xd62   : > { %6235 = vst.msk [vmem:[%s9065_s13 + $0x8] sm:$0xff] %vm6233_vm0, %v7241_v16 }
 0xd64   : > { %6248 = vrot.lane.b32.xlu0 %v7237_v62, %s8558_s19 }
 0xd65   : > { %6288 = vrot.lane.b32.xlu1 %v7241_v16, %s8556_s7  ;;  %v6192_v7 = vpop.f32.mrb[56].mxu0 }
 0xd66   : > { %v7245_v9 = vadd.f32 %v6192_v7, %v5977_v4  ;;  %v6194_v10 = vpop.f32.mrb[57].mxu0 }
 0xd67   : > { %v7247_v11 = vadd.f32 %v6194_v10, %v5978_v5  ;;  %v6196_v12 = vpop.f32.mrb[58].mxu0 }
 0xd68   : > { %6236 = vst.msk [vmem:[%s9065_s13 + $0x10] sm:$0xff] %vm6233_vm0, %v7245_v9  ;;  %v7249_v13 = vadd.f32 %v6196_v12, %v5979_v6  ;;  %6286 = vrot.lane.b32.xlu0 %v7239_v60, %s8556_s7  ;;  %v6198_v14 = vpop.f32.mrb[59].mxu0 }
 0xd69   : > { %v7251_v15 = vadd.f32 %v6198_v14, %v5980_v8  ;;  %6250 = vrot.lane.b32.xlu1 %v7241_v16, %s8558_s19 }
 0xd6a   : > { %6237 = vst.msk [vmem:[%s9065_s13 + $0x18] sm:$0xff] %vm6233_vm0, %v7249_v13 }
 0xd6c   : > { %6336 = vrot.lane.b32.xlu0 %v7243_v3, %s8557_s8 }
 0xd6d   : > { %6290 = vrot.lane.b32.xlu1 %v7243_v3, %s8556_s7  ;;  %v6202_v21 = vpop.f32.mrb[60].mxu0 }
 0xd6e   : > { %v7253_v23 = vadd.f32 %v6202_v21, %v5981_v17  ;;  %v6204_v24 = vpop.f32.mrb[61].mxu0 }
 0xd6f   : > { %v7255_v25 = vadd.f32 %v6204_v24, %v5982_v19  ;;  %v6206_v26 = vpop.f32.mrb[62].mxu0 }
 0xd70   : > { %6238 = vst.msk [vmem:[%s9065_s13 + $0x20] sm:$0xff] %vm6233_vm0, %v7253_v23  ;;  %v7257_v27 = vadd.f32 %v6206_v26, %v5983_v20  ;;  %6292 = vrot.lane.b32.xlu0 %v7245_v9, %s8556_s7  ;;  %v6208_v28 = vpop.f32.mrb[63].mxu0 }
 0xd71   : > { %v7259_v29 = vadd.f32 %v6208_v28, %v5984_v22  ;;  %6294 = vrot.lane.b32.xlu1 %v7247_v11, %s8556_s7 }
 0xd72   : > { %6239 = vst.msk [vmem:[%s9065_s13 + $0x28] sm:$0xff] %vm6233_vm0, %v7257_v27 }
 0xd74   : > { %6252 = vrot.lane.b32.xlu0 %v7245_v9, %s8558_s19 }
 0xd75   : > { %6338 = vrot.lane.b32.xlu1 %v7247_v11, %s8557_s8  ;;  %v6212_v32 = vpop.f32.mrb[64].mxu0 }
 0xd76   : > { %v7261_v33 = vadd.f32 %v6212_v32, %v5985_v30  ;;  %v6214_v34 = vpop.f32.mrb[65].mxu0 }
 0xd77   : > { %v7263_v35 = vadd.f32 %v6214_v34, %v5986_v31  ;;  %v6216_v36 = vpop.f32.mrb[66].mxu0 }
 0xd78   : > { %6240 = vst.msk [vmem:[%s9065_s13 + $0x30] sm:$0xff] %vm6233_vm0, %v7261_v33  ;;  %6296 = vrot.lane.b32.xlu0 %v7249_v13, %s8556_s7  ;;  %v6217_v37 = vpop.f32.mrb[67].mxu0 }
 0xd79   : > { %6254 = vrot.lane.b32.xlu1 %v7249_v13, %s8558_s19 }
 0xd7c   : > { %6340 = vrot.lane.b32.xlu0 %v7251_v15, %s8557_s8 }
 0xd7d   : > { %6298 = vrot.lane.b32.xlu1 %v7251_v15, %s8556_s7 }
 0xd80   : > { %6300 = vrot.lane.b32.xlu0 %v7253_v23, %s8556_s7 }
 0xd81   : > { %6302 = vrot.lane.b32.xlu1 %v7255_v25, %s8556_s7 }
 0xd84   : > { %6256 = vrot.lane.b32.xlu0 %v7253_v23, %s8558_s19 }
 0xd85   : > { %6342 = vrot.lane.b32.xlu1 %v7255_v25, %s8557_s8 }
 0xd88   : > { %6304 = vrot.lane.b32.xlu0 %v7257_v27, %s8556_s7 }
 0xd89   : > { %6258 = vrot.lane.b32.xlu1 %v7257_v27, %s8558_s19 }
 0xd8c   : > { %6308 = vrot.lane.b32.xlu0 %v7261_v33, %s8556_s7 }
 0xd8d   : > { %6306 = vrot.lane.b32.xlu1 %v7259_v29, %s8556_s7 }
 0xd90   : > { %6260 = vrot.lane.b32.xlu0 %v7261_v33, %s8558_s19 }
 0xd91   : > { %6310 = vrot.lane.b32.xlu1 %v7263_v35, %s8556_s7 }
 0xd94   : > { %6344 = vrot.lane.b32.xlu0 %v7259_v29, %s8557_s8 }
 0xd95   : > { %6346 = vrot.lane.b32.xlu1 %v7263_v35, %s8557_s8 }
 0xdd2   : > { %v6285_v38 = vpop.permute.xlu0 %6284 }
 0xdd3   : > { %v6335_v39 = vpop.permute.xlu1 %6334 }
 0xdd4   : > { %7208 = vst.msk [vmem:[%s9065_s13 + $0xa8] sm:$0xff] %vm6233_vm0, %v6335_v39 }
 0xdd6   : > { %v6249_v40 = vpop.permute.xlu0 %6248 }
 0xdd7   : > { %7194 = vst.msk [vmem:[%s9065_s13 + $0x38] sm:$0xff] %vm6233_vm0, %v6249_v40  ;;  %v6289_v41 = vpop.permute.xlu1 %6288 }
 0xdda   : > { %v6287_v42 = vpop.permute.xlu0 %6286 }
 0xddb   : > { %v6312_v43 = vsel %vm4832_vm5, %v6285_v38, %v6287_v42  ;;  %v6251_v44 = vpop.permute.xlu1 %6250 }
 0xddc   : > { %7201 = vst.msk [vmem:[%s9065_s13 + $0x70] sm:$0xff] %vm6233_vm0, %v6312_v43  ;;  %7195 = vst.msk [vmem:[%s9065_s13 + $0x40] sm:$0xff] %vm6233_vm0, %v6251_v44 }
 0xdde   : > { %v6337_v45 = vpop.permute.xlu0 %6336 }
 0xddf   : > { %7209 = vst.msk [vmem:[%s9065_s13 + $0xb0] sm:$0xff] %vm6233_vm0, %v6337_v45  ;;  %v6291_v46 = vpop.permute.xlu1 %6290 }
 0xde0   : > { %v6313_v47 = vsel %vm4832_vm5, %v6289_v41, %v6291_v46 }
 0xde1   : > { %7202 = vst.msk [vmem:[%s9065_s13 + $0x78] sm:$0xff] %vm6233_vm0, %v6313_v47 }
 0xde2   : > { %v6293_v48 = vpop.permute.xlu0 %6292 }
 0xde3   : > { %v6295_v49 = vpop.permute.xlu1 %6294 }
 0xde4   : > { %v6314_v50 = vsel %vm4832_vm5, %v6293_v48, %v6295_v49 }
 0xde5   : > { %7203 = vst.msk [vmem:[%s9065_s13 + $0x80] sm:$0xff] %vm6233_vm0, %v6314_v50 }
 0xde6   : > { %v6253_v0 = vpop.permute.xlu0 %6252 }
 0xde7   : > { %7196 = vst.msk [vmem:[%s9065_s13 + $0x48] sm:$0xff] %vm6233_vm0, %v6253_v0  ;;  %v6339_v51 = vpop.permute.xlu1 %6338 }
 0xde8   : > { %7210 = vst.msk [vmem:[%s9065_s13 + $0xb8] sm:$0xff] %vm6233_vm0, %v6339_v51 }
 0xdea   : > { %v6297_v52 = vpop.permute.xlu0 %6296 }
 0xdeb   : > { %v6255_v53 = vpop.permute.xlu1 %6254 }
 0xdec   : > { %7197 = vst.msk [vmem:[%s9065_s13 + $0x50] sm:$0xff] %vm6233_vm0, %v6255_v53 }
 0xdee   : > { %v6341_v54 = vpop.permute.xlu0 %6340 }
 0xdef   : > { %7211 = vst.msk [vmem:[%s9065_s13 + $0xc0] sm:$0xff] %vm6233_vm0, %v6341_v54  ;;  %v6299_v55 = vpop.permute.xlu1 %6298 }
 0xdf0   : > { %v6315_v56 = vsel %vm4832_vm5, %v6297_v52, %v6299_v55 }
 0xdf1   : > { %7204 = vst.msk [vmem:[%s9065_s13 + $0x88] sm:$0xff] %vm6233_vm0, %v6315_v56 }
 0xdf2   : > { %v6301_v57 = vpop.permute.xlu0 %6300 }
 0xdf3   : > { %v6303_v58 = vpop.permute.xlu1 %6302 }
 0xdf4   : > { %v6316_v59 = vsel %vm4832_vm5, %v6301_v57, %v6303_v58 }
 0xdf5   : > { %7205 = vst.msk [vmem:[%s9065_s13 + $0x90] sm:$0xff] %vm6233_vm0, %v6316_v59 }
 0xdf6   : > { %v6257_v61 = vpop.permute.xlu0 %6256 }
 0xdf7   : > { %7198 = vst.msk [vmem:[%s9065_s13 + $0x58] sm:$0xff] %vm6233_vm0, %v6257_v61  ;;  %v6343_v62 = vpop.permute.xlu1 %6342 }
 0xdf8   : > { %7212 = vst.msk [vmem:[%s9065_s13 + $0xc8] sm:$0xff] %vm6233_vm0, %v6343_v62 }
 0xdfa   : > { %v6305_v63 = vpop.permute.xlu0 %6304 }
 0xdfb   : > { %v6259_v1 = vpop.permute.xlu1 %6258 }
 0xdfc   : > { %7199 = vst.msk [vmem:[%s9065_s13 + $0x60] sm:$0xff] %vm6233_vm0, %v6259_v1 }
 0xdfe   : > { %v6309_v60 = vpop.permute.xlu0 %6308 }
 0xdff   : > { %v6307_v2 = vpop.permute.xlu1 %6306 }
 0xe00   : > { %v6317_v16 = vsel %vm4832_vm5, %v6305_v63, %v6307_v2 }
 0xe01   : > { %7206 = vst.msk [vmem:[%s9065_s13 + $0x98] sm:$0xff] %vm6233_vm0, %v6317_v16 }
 0xe02   : > { %v6261_v18 = vpop.permute.xlu0 %6260 }
 0xe03   : > { %7200 = vst.msk [vmem:[%s9065_s13 + $0x68] sm:$0xff] %vm6233_vm0, %v6261_v18  ;;  %v6311_v3 = vpop.permute.xlu1 %6310 }
 0xe04   : > { %v6318_v4 = vsel %vm4832_vm5, %v6309_v60, %v6311_v3 }
 0xe05   : > { %7207 = vst.msk [vmem:[%s9065_s13 + $0xa0] sm:$0xff] %vm6233_vm0, %v6318_v4 }
 0xe06   : > { %v6345_v5 = vpop.permute.xlu0 %6344 }
 0xe07   : > { %7213 = vst.msk [vmem:[%s9065_s13 + $0xd0] sm:$0xff] %vm6233_vm0, %v6345_v5  ;;  %v6347_v6 = vpop.permute.xlu1 %6346 }
 0xe08   : > { %7214 = vst.msk [vmem:[%s9065_s13 + $0xd8] sm:$0xff] %vm6233_vm0, %v6347_v6 }
 0xe09   : > { %8481 = shalt.err (!%p8478_p12)
}
 0xe0a   : > { %s8482_s12 = scalar_lea.hbm %s9161_s29, 3584  ;;  %s8486_s8 = scalar_lea.hbm %s9217_s6, 7168 }
 0xe0b   : > { %p8483_p13 = scmp.ne.s32.totalorder %s9161_s29, %s8482_s12  ;;  %p8487_p9 = scmp.lt.u32.totalorder %s9161_s29, %s9217_s6 }
 0xe0c   : > { %p8488_p4 = scmp.lt.u32.totalorder %s8486_s8, %s8482_s12  ;;  %p8490_p6 = scmp.lt.u32.totalorder %s8482_s12, %s9161_s29 }
 0xe0d   : > { %p8484_p1 = pnand %p8483_p13, %p9235_p0 }
 0xe0e   : > { %p8489_p8 = por %p8488_p4, %p8487_p9 }
 0xe0f   : > { %p8485_p7 = pneg %p8484_p1 }
 0xe10   : > { %p8491_p2 = por %p8490_p6, %p8489_p8 }
 0xe12   : > { %p8492_p5 = pnand %p8491_p2, %p8485_p7 }
 0xe14   : > { %8495 = shalt.err (!%p8492_p5)
}
 0xe15   : > { %s8560_s16 = smov 128   ;;  %s8561_s26 = smov 8  }
 0xe16   : > { %7348 = dma.vmem_to_hbm [thread:$0]  (%p9235_p0), %s9163_s11, 3584, %s9161_s29, %s6364_s27, %s8560_s16, %s8560_s16, %s8561_s26  }
 0xe17 PF: > { %s6392_s28 = sand.u32 1, %s8530_s21   ;;  %p9236_p10 = scmp.ne.s32.totalorder %s9228_s25, 0 }
 0xe18   : > { %p9237_p11 = scmp.ge.s32.totalorder %s8542_s24, 2  ;;  %s6393_s17 = scalar_lea.sflag [#allocation4], %s6392_s28 }
 0xe1a   : > { %p7368_p3 = pnand %p9237_p11, %p9236_p10 }
 0xe1c   : > { %8525 = dma.done.wait (!%p7368_p3), %s6393_s17, 3584  }
 0xe1d   : > { %8527 = vsyncadd (!%p7368_p3), %s6393_s17, 4294963712  ;;  %p21_p12 = scmp.ge.s32.totalorder %s8733_s30, 4   ;;  %s9238_s21 = smov %s8534_s22 }
 0xe1e   : > { %s9239_s22 = smov %s8538_s23  ;;  %s9240_s23 = smov %s8744_s18 }
 0xe1f   : > { %s9241_s24 = smov %s8733_s30  ;;  %23 = sbr.rel (!%p21_p12) target bundleno = 7 (0x7), region = 135 }
 0xe26   :  { %6398 = vsyncpa [#allocation3], 1 }
 0xe27   :  { %6400 = vsyncpa [#allocation3 + $0x1], 1 }
 0xe28   :  { %6401 = vsyncpa [#allocation6], 1 }
 0xe29   :  { %6402 = vsyncpa [#allocation9], 1 }
 0xe2a   :  { %6403 = vsyncpa [#allocation4], 1 }
 0xe2b   :  { %6405 = vsyncpa [#allocation4 + $0x1], 1 }

</bundles_post_ra>
